<compile_context>
chip_gen: v7x
topology: tpu7x:2x2x1
jax: 0.10.0
libtpu: 0.0.40
codegen_flags: <defaults>
</compile_context>

<pallas_src>
import jax
import jax.numpy as jnp
from jax.experimental import pallas as pl
from jax.experimental.pallas import tpu as pltpu


def _round_up(x, m):
    return ((x + m - 1) // m) * m


# ----------------------------------------------------------------------------
# Kernel 1: full 2-layer LSTM recurrence over the sequence, one invocation.
# ----------------------------------------------------------------------------
def _lstm_seq_kernel(emb_ref, w0_ref, b0_ref, w1_ref, b1_ref,
                     h1_all_ref, hn_ref, cn_ref):
    S = emb_ref.shape[0]
    Bp = emb_ref.shape[1]
    Hp = h1_all_ref.shape[2]

    def gate_update(gates, c):
        # Each gate occupies a full, 128-aligned lane block of width Hp.
        i = jax.nn.sigmoid(gates[:, 0 * Hp:1 * Hp])
        f = jax.nn.sigmoid(gates[:, 1 * Hp:2 * Hp])
        g = jnp.tanh(gates[:, 2 * Hp:3 * Hp])
        o = jax.nn.sigmoid(gates[:, 3 * Hp:4 * Hp])
        c_new = f * c + i * g
        h_new = o * jnp.tanh(c_new)
        return h_new, c_new

    def body(t, carry):
        h0, c0, h1, c1 = carry
        x_t = emb_ref[t]                                        # (Bp, Ep)
        # Layer 0: fused [x | h0] @ [Wih0; Whh0]^T gate GEMM.
        g0 = jnp.dot(jnp.concatenate([x_t, h0], axis=-1), w0_ref[...],
                     preferred_element_type=jnp.float32) + b0_ref[...]
        h0, c0 = gate_update(g0, c0)
        # Layer 1: fused [h0 | h1] @ [Wih1; Whh1]^T gate GEMM.
        g1 = jnp.dot(jnp.concatenate([h0, h1], axis=-1), w1_ref[...],
                     preferred_element_type=jnp.float32) + b1_ref[...]
        h1, c1 = gate_update(g1, c1)
        # Stage layer-1 hidden state; fc1 happens in a separate kernel.
        h1_all_ref[t] = h1
        return (h0, c0, h1, c1)

    zeros = jnp.zeros((Bp, Hp), jnp.float32)
    h0, c0, h1, c1 = jax.lax.fori_loop(
        0, S, body, (zeros, zeros, zeros, zeros), unroll=True)

    hn_ref[0] = h0
    hn_ref[1] = h1
    cn_ref[0] = c0
    cn_ref[1] = c1


# ----------------------------------------------------------------------------
# Kernel 2: hoisted fc1 projection, one lane-dense GEMM over all timesteps.
# ----------------------------------------------------------------------------
def _fc_kernel(x_ref, w_ref, b_ref, o_ref):
    o_ref[...] = (
        jnp.dot(x_ref[...], w_ref[...], preferred_element_type=jnp.float32)
        + b_ref[...]
    )


# ----------------------------------------------------------------------------
# Parameter padding helpers (gate blocks spread to 128-aligned lane blocks).
# ----------------------------------------------------------------------------
def _pad_gate_mat(w_t, k_pad, h_pad):
    """(K, 4H) gate matrix (cols = [i|f|g|o]) -> (k_pad, 4*h_pad)."""
    k, four_h = w_t.shape
    h = four_h // 4
    out = jnp.zeros((k_pad, 4 * h_pad), w_t.dtype)
    for g in range(4):
        out = out.at[:k, g * h_pad:g * h_pad + h].set(w_t[:, g * h:(g + 1) * h])
    return out


def _pad_gate_bias(b, h_pad):
    four_h = b.shape[0]
    h = four_h // 4
    out = jnp.zeros((4 * h_pad,), b.dtype)
    for g in range(4):
        out = out.at[g * h_pad:g * h_pad + h].set(b[g * h:(g + 1) * h])
    return out.reshape(1, 4 * h_pad)


# ----------------------------------------------------------------------------
# Forward pass wrapper.
# ----------------------------------------------------------------------------
@jax.jit
def poetry_model_forward(x_tokens, params):
    """x_tokens: (seq_len, batch) int32. Returns (logits (S*B, V), (h_n, c_n))."""
    embedding = params["embedding"]           # (V, E)
    S, B = x_tokens.shape
    V, E = embedding.shape
    H = params["whh0"].shape[1]               # (4H, H) -> H

    # Lane dims padded to multiples of 128; batch (sublane) padded to mult of 8.
    Ep = _round_up(E, 128)
    Hp = _round_up(H, 128)
    Vp = _round_up(V, 128)
    Bp = _round_up(B, 8)
    f32 = jnp.float32

    # Embedding gather (glue) + zero padding.
    emb_tbl = jnp.zeros((V, Ep), f32).at[:, :E].set(embedding.astype(f32))
    embedds = emb_tbl[x_tokens]                                   # (S, B, Ep)
    embedds = jnp.zeros((S, Bp, Ep), f32).at[:, :B, :].set(embedds)

    # Fused, padded gate weights: one stacked [Wih; Whh]^T matrix per layer.
    w0 = jnp.concatenate([
        _pad_gate_mat(params["wih0"].T.astype(f32), Ep, Hp),
        _pad_gate_mat(params["whh0"].T.astype(f32), Hp, Hp),
    ], axis=0)                                                    # (Ep+Hp, 4Hp)
    b0 = _pad_gate_bias((params["bih0"] + params["bhh0"]).astype(f32), Hp)
    w1 = jnp.concatenate([
        _pad_gate_mat(params["wih1"].T.astype(f32), Hp, Hp),
        _pad_gate_mat(params["whh1"].T.astype(f32), Hp, Hp),
    ], axis=0)                                                    # (2Hp, 4Hp)
    b1 = _pad_gate_bias((params["bih1"] + params["bhh1"]).astype(f32), Hp)

    wfc = jnp.zeros((Hp, Vp), f32).at[:H, :V].set(params["wfc"].T.astype(f32))
    bfc = jnp.zeros((1, Vp), f32).at[0, :V].set(params["bfc"].astype(f32))

    vmem = lambda: pl.BlockSpec(memory_space=pltpu.MemorySpace.VMEM)

    # Recurrent kernel: whole sequence in one invocation, weights / inputs
    # fully VMEM-resident (loaded once, no per-step double-buffering).
    h1_all, h_n, c_n = pl.pallas_call(
        _lstm_seq_kernel,
        out_shape=(
            jax.ShapeDtypeStruct((S, Bp, Hp), f32),   # per-step layer-1 hidden
            jax.ShapeDtypeStruct((2, Bp, Hp), f32),   # h_n
            jax.ShapeDtypeStruct((2, Bp, Hp), f32),   # c_n
        ),
        in_specs=[vmem() for _ in range(5)],
        out_specs=(vmem(), vmem(), vmem()),
    )(embedds, w0, b0, w1, b1)

    # Hoisted fc1: single (S*Bp, Hp) x (Hp, Vp) GEMM, lane-dense output.
    logits_p = pl.pallas_call(
        _fc_kernel,
        out_shape=jax.ShapeDtypeStruct((S * Bp, Vp), f32),
        in_specs=[vmem(), vmem(), vmem()],
        out_specs=vmem(),
    )(h1_all.reshape(S * Bp, Hp), wfc, bfc)

    # Strip padding; flatten like output.view(seq_len * batch_size, -1).
    logits = logits_p.reshape(S, Bp, Vp)[:, :B, :V].reshape(S * B, V)
    h_n = h_n[:, :B, :H]
    c_n = c_n[:, :B, :H]
    return logits, (h_n, c_n)


# ----------------------------------------------------------------------------
# Pure-JAX reference (mirrors PyTorch semantics) for correctness check.
# ----------------------------------------------------------------------------
def _lstm_cell_ref(x, h, c, wih_t, whh_t, b):
    H = h.shape[-1]
    gates = x @ wih_t + h @ whh_t + b
    i = jax.nn.sigmoid(gates[:, 0 * H:1 * H])
    f = jax.nn.sigmoid(gates[:, 1 * H:2 * H])
    g = jnp.tanh(gates[:, 2 * H:3 * H])
    o = jax.nn.sigmoid(gates[:, 3 * H:4 * H])
    c_new = f * c + i * g
    h_new = o * jnp.tanh(c_new)
    return h_new, c_new


def _reference_forward(x_tokens, params):
    S, B = x_tokens.shape
    H = params["whh0"].shape[1]
    embedds = params["embedding"][x_tokens]
    b0 = params["bih0"] + params["bhh0"]
    b1 = params["bih1"] + params["bhh1"]

    def step(carry, x_t):
        h0, c0, h1, c1 = carry
        h0, c0 = _lstm_cell_ref(x_t, h0, c0, params["wih0"].T, params["whh0"].T, b0)
        h1, c1 = _lstm_cell_ref(h0, h1, c1, params["wih1"].T, params["whh1"].T, b1)
        return (h0, c0, h1, c1), h1

    zeros = jnp.zeros((B, H), jnp.float32)
    (h0, c0, h1, c1), outs = jax.lax.scan(step, (zeros, zeros, zeros, zeros), embedds)
    logits = outs.reshape(S * B, H) @ params["wfc"].T + params["bfc"]
    return logits, (jnp.stack([h0, h1]), jnp.stack([c0, c1]))


def init_params(key, vocab_size, embedding_dim, hidden_dim):
    ks = jax.random.split(key, 12)
    bound = 1.0 / jnp.sqrt(hidden_dim)
    u = lambda k, shape: jax.random.uniform(
        k, shape, jnp.float32, minval=-bound, maxval=bound)
    return {
        "embedding": jax.random.normal(ks[0], (vocab_size, embedding_dim), jnp.float32),
        "wih0": u(ks[1], (4 * hidden_dim, embedding_dim)),
        "whh0": u(ks[2], (4 * hidden_dim, hidden_dim)),
        "bih0": u(ks[3], (4 * hidden_dim,)),
        "bhh0": u(ks[4], (4 * hidden_dim,)),
        "wih1": u(ks[5], (4 * hidden_dim, hidden_dim)),
        "whh1": u(ks[6], (4 * hidden_dim, hidden_dim)),
        "bih1": u(ks[7], (4 * hidden_dim,)),
        "bhh1": u(ks[8], (4 * hidden_dim,)),
        "wfc": u(ks[9], (vocab_size, hidden_dim)),
        "bfc": u(ks[10], (vocab_size,)),
    }


if __name__ == "__main__":
    VOCAB, EMB, HID = 32, 16, 32
    SEQ, BATCH = 8, 2

    key = jax.random.PRNGKey(0)
    k_tok, k_par = jax.random.split(key)
    x = jax.random.randint(k_tok, (SEQ, BATCH), 0, VOCAB, dtype=jnp.int32)
    params = init_params(k_par, VOCAB, EMB, HID)

    logits, (h_n, c_n) = poetry_model_forward(x, params)
    jax.block_until_ready((logits, h_n, c_n))

    ref_logits, (ref_h, ref_c) = _reference_forward(x, params)
    assert logits.shape == (SEQ * BATCH, VOCAB)
    assert h_n.shape == (2, BATCH, HID) and c_n.shape == (2, BATCH, HID)
    assert jnp.allclose(logits, ref_logits, atol=1e-4, rtol=1e-4)
    assert jnp.allclose(h_n, ref_h, atol=1e-4, rtol=1e-4)
    assert jnp.allclose(c_n, ref_c, atol=1e-4, rtol=1e-4)

    print("KERNEL_OK")
</pallas_src>

<mosaic_0001>
module attributes {stable_mosaic.version = 11 : i64} {
  func.func @_fc_kernel(%arg0: memref<64x128xf32, #tpu.memory_space<vmem>>, %arg1: memref<128x128xf32, #tpu.memory_space<vmem>>, %arg2: memref<1x128xf32, #tpu.memory_space<vmem>>, %arg3: memref<64x128xf32, #tpu.memory_space<vmem>>) attributes {dimension_semantics = [], scalar_prefetch = 0 : i64, scratch_operands = 0 : i64, tpu.core_type = #tpu.core_type<tc>} {
    %c0 = arith.constant 0 : index
    %c0_0 = arith.constant 0 : index
    %0 = vector.load %arg0[%c0, %c0_0] : memref<64x128xf32, #tpu.memory_space<vmem>>, vector<64x128xf32>
    %c0_1 = arith.constant 0 : index
    %c0_2 = arith.constant 0 : index
    %1 = vector.load %arg1[%c0_1, %c0_2] : memref<128x128xf32, #tpu.memory_space<vmem>>, vector<128x128xf32>
    %cst = arith.constant dense<0.000000e+00> : vector<64x128xf32>
    %2 = tpu.matmul %0, %1, %cst {dimension_numbers = #tpu.dot_dimension_numbers<[1], [0], [0], [1], [0, 0, 1, 1], [], []>} : vector<64x128xf32>, vector<128x128xf32>, vector<64x128xf32> -> vector<64x128xf32>
    %c0_3 = arith.constant 0 : index
    %c0_4 = arith.constant 0 : index
    %3 = vector.load %arg2[%c0_3, %c0_4] : memref<1x128xf32, #tpu.memory_space<vmem>>, vector<1x128xf32>
    %4 = vector.broadcast %3 : vector<1x128xf32> to vector<64x128xf32>
    %5 = arith.addf %2, %4 : vector<64x128xf32>
    %c0_5 = arith.constant 0 : index
    %c0_6 = arith.constant 0 : index
    %6 = vector.load %arg3[%c0_5, %c0_6] : memref<64x128xf32, #tpu.memory_space<vmem>>, vector<64x128xf32>
    tpu.vector_store %arg3[%c0_5, %c0_6], %5 {strides = array<i32>} : memref<64x128xf32, #tpu.memory_space<vmem>>, vector<64x128xf32>,
    return
  }
}

module attributes {stable_mosaic.version = 11 : i64} {
  func.func @_lstm_seq_kernel(%arg0: memref<8x8x128xf32, #tpu.memory_space<vmem>>, %arg1: memref<256x512xf32, #tpu.memory_space<vmem>>, %arg2: memref<1x512xf32, #tpu.memory_space<vmem>>, %arg3: memref<256x512xf32, #tpu.memory_space<vmem>>, %arg4: memref<1x512xf32, #tpu.memory_space<vmem>>, %arg5: memref<8x8x128xf32, #tpu.memory_space<vmem>>, %arg6: memref<2x8x128xf32, #tpu.memory_space<vmem>>, %arg7: memref<2x8x128xf32, #tpu.memory_space<vmem>>) attributes {dimension_semantics = [], scalar_prefetch = 0 : i64, scratch_operands = 0 : i64, tpu.core_type = #tpu.core_type<tc>} {
    %cst = arith.constant 0.000000e+00 : f32
    %0 = vector.broadcast %cst : f32 to vector<8x128xf32>
    %c0_i32 = arith.constant 0 : i32
    %1 = arith.index_cast %c0_i32 : i32 to index
    %c0 = arith.constant 0 : index
    %c0_0 = arith.constant 0 : index
    %2 = vector.load %arg0[%1, %c0, %c0_0] : memref<8x8x128xf32, #tpu.memory_space<vmem>>, vector<1x8x128xf32>
    %3 = vector.shape_cast %2 : vector<1x8x128xf32> to vector<8x128xf32>
    %4 = tpu.concatenate %3, %0 in 1 : vector<8x128xf32>, vector<8x128xf32> -> vector<8x256xf32>
    %c0_1 = arith.constant 0 : index
    %c0_2 = arith.constant 0 : index
    %5 = vector.load %arg1[%c0_1, %c0_2] : memref<256x512xf32, #tpu.memory_space<vmem>>, vector<256x512xf32>
    %cst_3 = arith.constant dense<0.000000e+00> : vector<8x512xf32>
    %6 = tpu.matmul %4, %5, %cst_3 {dimension_numbers = #tpu.dot_dimension_numbers<[1], [0], [0], [1], [0, 0, 1, 1], [], []>} : vector<8x256xf32>, vector<256x512xf32>, vector<8x512xf32> -> vector<8x512xf32>
    %c0_4 = arith.constant 0 : index
    %c0_5 = arith.constant 0 : index
    %7 = vector.load %arg2[%c0_4, %c0_5] : memref<1x512xf32, #tpu.memory_space<vmem>>, vector<1x512xf32>
    %8 = vector.broadcast %7 : vector<1x512xf32> to vector<8x512xf32>
    %9 = arith.addf %6, %8 : vector<8x512xf32>
    %10 = vector.extract_strided_slice %9 {offsets = [0, 0], sizes = [8, 128], strides = [1, 1]} : vector<8x512xf32> to vector<8x128xf32>
    %11 = arith.negf %10 : vector<8x128xf32>
    %12 = math.exp %11 : vector<8x128xf32>
    %cst_6 = arith.constant 1.000000e+00 : f32
    %13 = vector.broadcast %cst_6 : f32 to vector<8x128xf32>
    %14 = arith.addf %13, %12 : vector<8x128xf32>
    %15 = arith.divf %13, %14 : vector<8x128xf32>
    %16 = vector.extract_strided_slice %9 {offsets = [0, 128], sizes = [8, 128], strides = [1, 1]} : vector<8x512xf32> to vector<8x128xf32>
    %17 = arith.negf %16 : vector<8x128xf32>
    %18 = math.exp %17 : vector<8x128xf32>
    %cst_7 = arith.constant 1.000000e+00 : f32
    %19 = vector.broadcast %cst_7 : f32 to vector<8x128xf32>
    %20 = arith.addf %19, %18 : vector<8x128xf32>
    %21 = arith.divf %19, %20 : vector<8x128xf32>
    %22 = vector.extract_strided_slice %9 {offsets = [0, 256], sizes = [8, 128], strides = [1, 1]} : vector<8x512xf32> to vector<8x128xf32>
    %23 = math.tanh %22 : vector<8x128xf32>
    %24 = vector.extract_strided_slice %9 {offsets = [0, 384], sizes = [8, 128], strides = [1, 1]} : vector<8x512xf32> to vector<8x128xf32>
    %25 = arith.negf %24 : vector<8x128xf32>
    %26 = math.exp %25 : vector<8x128xf32>
    %cst_8 = arith.constant 1.000000e+00 : f32
    %27 = vector.broadcast %cst_8 : f32 to vector<8x128xf32>
    %28 = arith.addf %27, %26 : vector<8x128xf32>
    %29 = arith.divf %27, %28 : vector<8x128xf32>
    %30 = arith.mulf %21, %0 : vector<8x128xf32>
    %31 = arith.mulf %15, %23 : vector<8x128xf32>
    %32 = arith.addf %30, %31 : vector<8x128xf32>
    %33 = math.tanh %32 : vector<8x128xf32>
    %34 = arith.mulf %29, %33 : vector<8x128xf32>
    %35 = tpu.concatenate %34, %0 in 1 : vector<8x128xf32>, vector<8x128xf32> -> vector<8x256xf32>
    %c0_9 = arith.constant 0 : index
    %c0_10 = arith.constant 0 : index
    %36 = vector.load %arg3[%c0_9, %c0_10] : memref<256x512xf32, #tpu.memory_space<vmem>>, vector<256x512xf32>
    %cst_11 = arith.constant dense<0.000000e+00> : vector<8x512xf32>
    %37 = tpu.matmul %35, %36, %cst_11 {dimension_numbers = #tpu.dot_dimension_numbers<[1], [0], [0], [1], [0, 0, 1, 1], [], []>} : vector<8x256xf32>, vector<256x512xf32>, vector<8x512xf32> -> vector<8x512xf32>
    %c0_12 = arith.constant 0 : index
    %c0_13 = arith.constant 0 : index
    %38 = vector.load %arg4[%c0_12, %c0_13] : memref<1x512xf32, #tpu.memory_space<vmem>>, vector<1x512xf32>
    %39 = vector.broadcast %38 : vector<1x512xf32> to vector<8x512xf32>
    %40 = arith.addf %37, %39 : vector<8x512xf32>
    %41 = vector.extract_strided_slice %40 {offsets = [0, 0], sizes = [8, 128], strides = [1, 1]} : vector<8x512xf32> to vector<8x128xf32>
    %42 = arith.negf %41 : vector<8x128xf32>
    %43 = math.exp %42 : vector<8x128xf32>
    %cst_14 = arith.constant 1.000000e+00 : f32
    %44 = vector.broadcast %cst_14 : f32 to vector<8x128xf32>
    %45 = arith.addf %44, %43 : vector<8x128xf32>
    %46 = arith.divf %44, %45 : vector<8x128xf32>
    %47 = vector.extract_strided_slice %40 {offsets = [0, 128], sizes = [8, 128], strides = [1, 1]} : vector<8x512xf32> to vector<8x128xf32>
    %48 = arith.negf %47 : vector<8x128xf32>
    %49 = math.exp %48 : vector<8x128xf32>
    %cst_15 = arith.constant 1.000000e+00 : f32
    %50 = vector.broadcast %cst_15 : f32 to vector<8x128xf32>
    %51 = arith.addf %50, %49 : vector<8x128xf32>
    %52 = arith.divf %50, %51 : vector<8x128xf32>
    %53 = vector.extract_strided_slice %40 {offsets = [0, 256], sizes = [8, 128], strides = [1, 1]} : vector<8x512xf32> to vector<8x128xf32>
    %54 = math.tanh %53 : vector<8x128xf32>
    %55 = vector.extract_strided_slice %40 {offsets = [0, 384], sizes = [8, 128], strides = [1, 1]} : vector<8x512xf32> to vector<8x128xf32>
    %56 = arith.negf %55 : vector<8x128xf32>
    %57 = math.exp %56 : vector<8x128xf32>
    %cst_16 = arith.constant 1.000000e+00 : f32
    %58 = vector.broadcast %cst_16 : f32 to vector<8x128xf32>
    %59 = arith.addf %58, %57 : vector<8x128xf32>
    %60 = arith.divf %58, %59 : vector<8x128xf32>
    %61 = arith.mulf %52, %0 : vector<8x128xf32>
    %62 = arith.mulf %46, %54 : vector<8x128xf32>
    %63 = arith.addf %61, %62 : vector<8x128xf32>
    %64 = math.tanh %63 : vector<8x128xf32>
    %65 = arith.mulf %60, %64 : vector<8x128xf32>
    %66 = arith.index_cast %c0_i32 : i32 to index
    %c0_17 = arith.constant 0 : index
    %c0_18 = arith.constant 0 : index
    %67 = vector.load %arg5[%66, %c0_17, %c0_18] : memref<8x8x128xf32, #tpu.memory_space<vmem>>, vector<1x8x128xf32>
    %68 = vector.shape_cast %67 : vector<1x8x128xf32> to vector<8x128xf32>
    %69 = vector.shape_cast %65 : vector<8x128xf32> to vector<1x8x128xf32>
    tpu.vector_store %arg5[%66, %c0_17, %c0_18], %69 {strides = array<i32>} : memref<8x8x128xf32, #tpu.memory_space<vmem>>, vector<1x8x128xf32>,
    %c1_i32 = arith.constant 1 : i32
    %70 = arith.index_cast %c1_i32 : i32 to index
    %c0_19 = arith.constant 0 : index
    %c0_20 = arith.constant 0 : index
    %71 = vector.load %arg0[%70, %c0_19, %c0_20] : memref<8x8x128xf32, #tpu.memory_space<vmem>>, vector<1x8x128xf32>
    %72 = vector.shape_cast %71 : vector<1x8x128xf32> to vector<8x128xf32>
    %73 = tpu.concatenate %72, %34 in 1 : vector<8x128xf32>, vector<8x128xf32> -> vector<8x256xf32>
    %c0_21 = arith.constant 0 : index
    %c0_22 = arith.constant 0 : index
    %74 = vector.load %arg1[%c0_21, %c0_22] : memref<256x512xf32, #tpu.memory_space<vmem>>, vector<256x512xf32>
    %cst_23 = arith.constant dense<0.000000e+00> : vector<8x512xf32>
    %75 = tpu.matmul %73, %74, %cst_23 {dimension_numbers = #tpu.dot_dimension_numbers<[1], [0], [0], [1], [0, 0, 1, 1], [], []>} : vector<8x256xf32>, vector<256x512xf32>, vector<8x512xf32> -> vector<8x512xf32>
    %c0_24 = arith.constant 0 : index
    %c0_25 = arith.constant 0 : index
    %76 = vector.load %arg2[%c0_24, %c0_25] : memref<1x512xf32, #tpu.memory_space<vmem>>, vector<1x512xf32>
    %77 = vector.broadcast %76 : vector<1x512xf32> to vector<8x512xf32>
    %78 = arith.addf %75, %77 : vector<8x512xf32>
    %79 = vector.extract_strided_slice %78 {offsets = [0, 0], sizes = [8, 128], strides = [1, 1]} : vector<8x512xf32> to vector<8x128xf32>
    %80 = arith.negf %79 : vector<8x128xf32>
    %81 = math.exp %80 : vector<8x128xf32>
    %cst_26 = arith.constant 1.000000e+00 : f32
    %82 = vector.broadcast %cst_26 : f32 to vector<8x128xf32>
    %83 = arith.addf %82, %81 : vector<8x128xf32>
    %84 = arith.divf %82, %83 : vector<8x128xf32>
    %85 = vector.extract_strided_slice %78 {offsets = [0, 128], sizes = [8, 128], strides = [1, 1]} : vector<8x512xf32> to vector<8x128xf32>
    %86 = arith.negf %85 : vector<8x128xf32>
    %87 = math.exp %86 : vector<8x128xf32>
    %cst_27 = arith.constant 1.000000e+00 : f32
    %88 = vector.broadcast %cst_27 : f32 to vector<8x128xf32>
    %89 = arith.addf %88, %87 : vector<8x128xf32>
    %90 = arith.divf %88, %89 : vector<8x128xf32>
    %91 = vector.extract_strided_slice %78 {offsets = [0, 256], sizes = [8, 128], strides = [1, 1]} : vector<8x512xf32> to vector<8x128xf32>
    %92 = math.tanh %91 : vector<8x128xf32>
    %93 = vector.extract_strided_slice %78 {offsets = [0, 384], sizes = [8, 128], strides = [1, 1]} : vector<8x512xf32> to vector<8x128xf32>
    %94 = arith.negf %93 : vector<8x128xf32>
    %95 = math.exp %94 : vector<8x128xf32>
    %cst_28 = arith.constant 1.000000e+00 : f32
    %96 = vector.broadcast %cst_28 : f32 to vector<8x128xf32>
    %97 = arith.addf %96, %95 : vector<8x128xf32>
    %98 = arith.divf %96, %97 : vector<8x128xf32>
    %99 = arith.mulf %90, %32 : vector<8x128xf32>
    %100 = arith.mulf %84, %92 : vector<8x128xf32>
    %101 = arith.addf %99, %100 : vector<8x128xf32>
    %102 = math.tanh %101 : vector<8x128xf32>
    %103 = arith.mulf %98, %102 : vector<8x128xf32>
    %104 = tpu.concatenate %103, %65 in 1 : vector<8x128xf32>, vector<8x128xf32> -> vector<8x256xf32>
    %c0_29 = arith.constant 0 : index
    %c0_30 = arith.constant 0 : index
    %105 = vector.load %arg3[%c0_29, %c0_30] : memref<256x512xf32, #tpu.memory_space<vmem>>, vector<256x512xf32>
    %cst_31 = arith.constant dense<0.000000e+00> : vector<8x512xf32>
    %106 = tpu.matmul %104, %105, %cst_31 {dimension_numbers = #tpu.dot_dimension_numbers<[1], [0], [0], [1], [0, 0, 1, 1], [], []>} : vector<8x256xf32>, vector<256x512xf32>, vector<8x512xf32> -> vector<8x512xf32>
    %c0_32 = arith.constant 0 : index
    %c0_33 = arith.constant 0 : index
    %107 = vector.load %arg4[%c0_32, %c0_33] : memref<1x512xf32, #tpu.memory_space<vmem>>, vector<1x512xf32>
    %108 = vector.broadcast %107 : vector<1x512xf32> to vector<8x512xf32>
    %109 = arith.addf %106, %108 : vector<8x512xf32>
    %110 = vector.extract_strided_slice %109 {offsets = [0, 0], sizes = [8, 128], strides = [1, 1]} : vector<8x512xf32> to vector<8x128xf32>
    %111 = arith.negf %110 : vector<8x128xf32>
    %112 = math.exp %111 : vector<8x128xf32>
    %cst_34 = arith.constant 1.000000e+00 : f32
    %113 = vector.broadcast %cst_34 : f32 to vector<8x128xf32>
    %114 = arith.addf %113, %112 : vector<8x128xf32>
    %115 = arith.divf %113, %114 : vector<8x128xf32>
    %116 = vector.extract_strided_slice %109 {offsets = [0, 128], sizes = [8, 128], strides = [1, 1]} : vector<8x512xf32> to vector<8x128xf32>
    %117 = arith.negf %116 : vector<8x128xf32>
    %118 = math.exp %117 : vector<8x128xf32>
    %cst_35 = arith.constant 1.000000e+00 : f32
    %119 = vector.broadcast %cst_35 : f32 to vector<8x128xf32>
    %120 = arith.addf %119, %118 : vector<8x128xf32>
    %121 = arith.divf %119, %120 : vector<8x128xf32>
    %122 = vector.extract_strided_slice %109 {offsets = [0, 256], sizes = [8, 128], strides = [1, 1]} : vector<8x512xf32> to vector<8x128xf32>
    %123 = math.tanh %122 : vector<8x128xf32>
    %124 = vector.extract_strided_slice %109 {offsets = [0, 384], sizes = [8, 128], strides = [1, 1]} : vector<8x512xf32> to vector<8x128xf32>
    %125 = arith.negf %124 : vector<8x128xf32>
    %126 = math.exp %125 : vector<8x128xf32>
    %cst_36 = arith.constant 1.000000e+00 : f32
    %127 = vector.broadcast %cst_36 : f32 to vector<8x128xf32>
    %128 = arith.addf %127, %126 : vector<8x128xf32>
    %129 = arith.divf %127, %128 : vector<8x128xf32>
    %130 = arith.mulf %121, %63 : vector<8x128xf32>
    %131 = arith.mulf %115, %123 : vector<8x128xf32>
    %132 = arith.addf %130, %131 : vector<8x128xf32>
    %133 = math.tanh %132 : vector<8x128xf32>
    %134 = arith.mulf %129, %133 : vector<8x128xf32>
    %135 = arith.index_cast %c1_i32 : i32 to index
    %c0_37 = arith.constant 0 : index
    %c0_38 = arith.constant 0 : index
    %136 = vector.load %arg5[%135, %c0_37, %c0_38] : memref<8x8x128xf32, #tpu.memory_space<vmem>>, vector<1x8x128xf32>
    %137 = vector.shape_cast %136 : vector<1x8x128xf32> to vector<8x128xf32>
    %138 = vector.shape_cast %134 : vector<8x128xf32> to vector<1x8x128xf32>
    tpu.vector_store %arg5[%135, %c0_37, %c0_38], %138 {strides = array<i32>} : memref<8x8x128xf32, #tpu.memory_space<vmem>>, vector<1x8x128xf32>,
    %c2_i32 = arith.constant 2 : i32
    %139 = arith.index_cast %c2_i32 : i32 to index
    %c0_39 = arith.constant 0 : index
    %c0_40 = arith.constant 0 : index
    %140 = vector.load %arg0[%139, %c0_39, %c0_40] : memref<8x8x128xf32, #tpu.memory_space<vmem>>, vector<1x8x128xf32>
    %141 = vector.shape_cast %140 : vector<1x8x128xf32> to vector<8x128xf32>
    %142 = tpu.concatenate %141, %103 in 1 : vector<8x128xf32>, vector<8x128xf32> -> vector<8x256xf32>
    %c0_41 = arith.constant 0 : index
    %c0_42 = arith.constant 0 : index
    %143 = vector.load %arg1[%c0_41, %c0_42] : memref<256x512xf32, #tpu.memory_space<vmem>>, vector<256x512xf32>
    %cst_43 = arith.constant dense<0.000000e+00> : vector<8x512xf32>
    %144 = tpu.matmul %142, %143, %cst_43 {dimension_numbers = #tpu.dot_dimension_numbers<[1], [0], [0], [1], [0, 0, 1, 1], [], []>} : vector<8x256xf32>, vector<256x512xf32>, vector<8x512xf32> -> vector<8x512xf32>
    %c0_44 = arith.constant 0 : index
    %c0_45 = arith.constant 0 : index
    %145 = vector.load %arg2[%c0_44, %c0_45] : memref<1x512xf32, #tpu.memory_space<vmem>>, vector<1x512xf32>
    %146 = vector.broadcast %145 : vector<1x512xf32> to vector<8x512xf32>
    %147 = arith.addf %144, %146 : vector<8x512xf32>
    %148 = vector.extract_strided_slice %147 {offsets = [0, 0], sizes = [8, 128], strides = [1, 1]} : vector<8x512xf32> to vector<8x128xf32>
    %149 = arith.negf %148 : vector<8x128xf32>
    %150 = math.exp %149 : vector<8x128xf32>
    %cst_46 = arith.constant 1.000000e+00 : f32
    %151 = vector.broadcast %cst_46 : f32 to vector<8x128xf32>
    %152 = arith.addf %151, %150 : vector<8x128xf32>
    %153 = arith.divf %151, %152 : vector<8x128xf32>
    %154 = vector.extract_strided_slice %147 {offsets = [0, 128], sizes = [8, 128], strides = [1, 1]} : vector<8x512xf32> to vector<8x128xf32>
    %155 = arith.negf %154 : vector<8x128xf32>
    %156 = math.exp %155 : vector<8x128xf32>
    %cst_47 = arith.constant 1.000000e+00 : f32
    %157 = vector.broadcast %cst_47 : f32 to vector<8x128xf32>
    %158 = arith.addf %157, %156 : vector<8x128xf32>
    %159 = arith.divf %157, %158 : vector<8x128xf32>
    %160 = vector.extract_strided_slice %147 {offsets = [0, 256], sizes = [8, 128], strides = [1, 1]} : vector<8x512xf32> to vector<8x128xf32>
    %161 = math.tanh %160 : vector<8x128xf32>
    %162 = vector.extract_strided_slice %147 {offsets = [0, 384], sizes = [8, 128], strides = [1, 1]} : vector<8x512xf32> to vector<8x128xf32>
    %163 = arith.negf %162 : vector<8x128xf32>
    %164 = math.exp %163 : vector<8x128xf32>
    %cst_48 = arith.constant 1.000000e+00 : f32
    %165 = vector.broadcast %cst_48 : f32 to vector<8x128xf32>
    %166 = arith.addf %165, %164 : vector<8x128xf32>
    %167 = arith.divf %165, %166 : vector<8x128xf32>
    %168 = arith.mulf %159, %101 : vector<8x128xf32>
    %169 = arith.mulf %153, %161 : vector<8x128xf32>
    %170 = arith.addf %168, %169 : vector<8x128xf32>
    %171 = math.tanh %170 : vector<8x128xf32>
    %172 = arith.mulf %167, %171 : vector<8x128xf32>
    %173 = tpu.concatenate %172, %134 in 1 : vector<8x128xf32>, vector<8x128xf32> -> vector<8x256xf32>
    %c0_49 = arith.constant 0 : index
    %c0_50 = arith.constant 0 : index
    %174 = vector.load %arg3[%c0_49, %c0_50] : memref<256x512xf32, #tpu.memory_space<vmem>>, vector<256x512xf32>
    %cst_51 = arith.constant dense<0.000000e+00> : vector<8x512xf32>
    %175 = tpu.matmul %173, %174, %cst_51 {dimension_numbers = #tpu.dot_dimension_numbers<[1], [0], [0], [1], [0, 0, 1, 1], [], []>} : vector<8x256xf32>, vector<256x512xf32>, vector<8x512xf32> -> vector<8x512xf32>
    %c0_52 = arith.constant 0 : index
    %c0_53 = arith.constant 0 : index
    %176 = vector.load %arg4[%c0_52, %c0_53] : memref<1x512xf32, #tpu.memory_space<vmem>>, vector<1x512xf32>
    %177 = vector.broadcast %176 : vector<1x512xf32> to vector<8x512xf32>
    %178 = arith.addf %175, %177 : vector<8x512xf32>
    %179 = vector.extract_strided_slice %178 {offsets = [0, 0], sizes = [8, 128], strides = [1, 1]} : vector<8x512xf32> to vector<8x128xf32>
    %180 = arith.negf %179 : vector<8x128xf32>
    %181 = math.exp %180 : vector<8x128xf32>
    %cst_54 = arith.constant 1.000000e+00 : f32
    %182 = vector.broadcast %cst_54 : f32 to vector<8x128xf32>
    %183 = arith.addf %182, %181 : vector<8x128xf32>
    %184 = arith.divf %182, %183 : vector<8x128xf32>
    %185 = vector.extract_strided_slice %178 {offsets = [0, 128], sizes = [8, 128], strides = [1, 1]} : vector<8x512xf32> to vector<8x128xf32>
    %186 = arith.negf %185 : vector<8x128xf32>
    %187 = math.exp %186 : vector<8x128xf32>
    %cst_55 = arith.constant 1.000000e+00 : f32
    %188 = vector.broadcast %cst_55 : f32 to vector<8x128xf32>
    %189 = arith.addf %188, %187 : vector<8x128xf32>
    %190 = arith.divf %188, %189 : vector<8x128xf32>
    %191 = vector.extract_strided_slice %178 {offsets = [0, 256], sizes = [8, 128], strides = [1, 1]} : vector<8x512xf32> to vector<8x128xf32>
    %192 = math.tanh %191 : vector<8x128xf32>
    %193 = vector.extract_strided_slice %178 {offsets = [0, 384], sizes = [8, 128], strides = [1, 1]} : vector<8x512xf32> to vector<8x128xf32>
    %194 = arith.negf %193 : vector<8x128xf32>
    %195 = math.exp %194 : vector<8x128xf32>
    %cst_56 = arith.constant 1.000000e+00 : f32
    %196 = vector.broadcast %cst_56 : f32 to vector<8x128xf32>
    %197 = arith.addf %196, %195 : vector<8x128xf32>
    %198 = arith.divf %196, %197 : vector<8x128xf32>
    %199 = arith.mulf %190, %132 : vector<8x128xf32>
    %200 = arith.mulf %184, %192 : vector<8x128xf32>
    %201 = arith.addf %199, %200 : vector<8x128xf32>
    %202 = math.tanh %201 : vector<8x128xf32>
    %203 = arith.mulf %198, %202 : vector<8x128xf32>
    %204 = arith.index_cast %c2_i32 : i32 to index
    %c0_57 = arith.constant 0 : index
    %c0_58 = arith.constant 0 : index
    %205 = vector.load %arg5[%204, %c0_57, %c0_58] : memref<8x8x128xf32, #tpu.memory_space<vmem>>, vector<1x8x128xf32>
    %206 = vector.shape_cast %205 : vector<1x8x128xf32> to vector<8x128xf32>
    %207 = vector.shape_cast %203 : vector<8x128xf32> to vector<1x8x128xf32>
    tpu.vector_store %arg5[%204, %c0_57, %c0_58], %207 {strides = array<i32>} : memref<8x8x128xf32, #tpu.memory_space<vmem>>, vector<1x8x128xf32>,
    %c3_i32 = arith.constant 3 : i32
    %208 = arith.index_cast %c3_i32 : i32 to index
    %c0_59 = arith.constant 0 : index
    %c0_60 = arith.constant 0 : index
    %209 = vector.load %arg0[%208, %c0_59, %c0_60] : memref<8x8x128xf32, #tpu.memory_space<vmem>>, vector<1x8x128xf32>
    %210 = vector.shape_cast %209 : vector<1x8x128xf32> to vector<8x128xf32>
    %211 = tpu.concatenate %210, %172 in 1 : vector<8x128xf32>, vector<8x128xf32> -> vector<8x256xf32>
    %c0_61 = arith.constant 0 : index
    %c0_62 = arith.constant 0 : index
    %212 = vector.load %arg1[%c0_61, %c0_62] : memref<256x512xf32, #tpu.memory_space<vmem>>, vector<256x512xf32>
    %cst_63 = arith.constant dense<0.000000e+00> : vector<8x512xf32>
    %213 = tpu.matmul %211, %212, %cst_63 {dimension_numbers = #tpu.dot_dimension_numbers<[1], [0], [0], [1], [0, 0, 1, 1], [], []>} : vector<8x256xf32>, vector<256x512xf32>, vector<8x512xf32> -> vector<8x512xf32>
    %c0_64 = arith.constant 0 : index
    %c0_65 = arith.constant 0 : index
    %214 = vector.load %arg2[%c0_64, %c0_65] : memref<1x512xf32, #tpu.memory_space<vmem>>, vector<1x512xf32>
    %215 = vector.broadcast %214 : vector<1x512xf32> to vector<8x512xf32>
    %216 = arith.addf %213, %215 : vector<8x512xf32>
    %217 = vector.extract_strided_slice %216 {offsets = [0, 0], sizes = [8, 128], strides = [1, 1]} : vector<8x512xf32> to vector<8x128xf32>
    %218 = arith.negf %217 : vector<8x128xf32>
    %219 = math.exp %218 : vector<8x128xf32>
    %cst_66 = arith.constant 1.000000e+00 : f32
    %220 = vector.broadcast %cst_66 : f32 to vector<8x128xf32>
    %221 = arith.addf %220, %219 : vector<8x128xf32>
    %222 = arith.divf %220, %221 : vector<8x128xf32>
    %223 = vector.extract_strided_slice %216 {offsets = [0, 128], sizes = [8, 128], strides = [1, 1]} : vector<8x512xf32> to vector<8x128xf32>
    %224 = arith.negf %223 : vector<8x128xf32>
    %225 = math.exp %224 : vector<8x128xf32>
    %cst_67 = arith.constant 1.000000e+00 : f32
    %226 = vector.broadcast %cst_67 : f32 to vector<8x128xf32>
    %227 = arith.addf %226, %225 : vector<8x128xf32>
    %228 = arith.divf %226, %227 : vector<8x128xf32>
    %229 = vector.extract_strided_slice %216 {offsets = [0, 256], sizes = [8, 128], strides = [1, 1]} : vector<8x512xf32> to vector<8x128xf32>
    %230 = math.tanh %229 : vector<8x128xf32>
    %231 = vector.extract_strided_slice %216 {offsets = [0, 384], sizes = [8, 128], strides = [1, 1]} : vector<8x512xf32> to vector<8x128xf32>
    %232 = arith.negf %231 : vector<8x128xf32>
    %233 = math.exp %232 : vector<8x128xf32>
    %cst_68 = arith.constant 1.000000e+00 : f32
    %234 = vector.broadcast %cst_68 : f32 to vector<8x128xf32>
    %235 = arith.addf %234, %233 : vector<8x128xf32>
    %236 = arith.divf %234, %235 : vector<8x128xf32>
    %237 = arith.mulf %228, %170 : vector<8x128xf32>
    %238 = arith.mulf %222, %230 : vector<8x128xf32>
    %239 = arith.addf %237, %238 : vector<8x128xf32>
    %240 = math.tanh %239 : vector<8x128xf32>
    %241 = arith.mulf %236, %240 : vector<8x128xf32>
    %242 = tpu.concatenate %241, %203 in 1 : vector<8x128xf32>, vector<8x128xf32> -> vector<8x256xf32>
    %c0_69 = arith.constant 0 : index
    %c0_70 = arith.constant 0 : index
    %243 = vector.load %arg3[%c0_69, %c0_70] : memref<256x512xf32, #tpu.memory_space<vmem>>, vector<256x512xf32>
    %cst_71 = arith.constant dense<0.000000e+00> : vector<8x512xf32>
    %244 = tpu.matmul %242, %243, %cst_71 {dimension_numbers = #tpu.dot_dimension_numbers<[1], [0], [0], [1], [0, 0, 1, 1], [], []>} : vector<8x256xf32>, vector<256x512xf32>, vector<8x512xf32> -> vector<8x512xf32>
    %c0_72 = arith.constant 0 : index
    %c0_73 = arith.constant 0 : index
    %245 = vector.load %arg4[%c0_72, %c0_73] : memref<1x512xf32, #tpu.memory_space<vmem>>, vector<1x512xf32>
    %246 = vector.broadcast %245 : vector<1x512xf32> to vector<8x512xf32>
    %247 = arith.addf %244, %246 : vector<8x512xf32>
    %248 = vector.extract_strided_slice %247 {offsets = [0, 0], sizes = [8, 128], strides = [1, 1]} : vector<8x512xf32> to vector<8x128xf32>
    %249 = arith.negf %248 : vector<8x128xf32>
    %250 = math.exp %249 : vector<8x128xf32>
    %cst_74 = arith.constant 1.000000e+00 : f32
    %251 = vector.broadcast %cst_74 : f32 to vector<8x128xf32>
    %252 = arith.addf %251, %250 : vector<8x128xf32>
    %253 = arith.divf %251, %252 : vector<8x128xf32>
    %254 = vector.extract_strided_slice %247 {offsets = [0, 128], sizes = [8, 128], strides = [1, 1]} : vector<8x512xf32> to vector<8x128xf32>
    %255 = arith.negf %254 : vector<8x128xf32>
    %256 = math.exp %255 : vector<8x128xf32>
    %cst_75 = arith.constant 1.000000e+00 : f32
    %257 = vector.broadcast %cst_75 : f32 to vector<8x128xf32>
    %258 = arith.addf %257, %256 : vector<8x128xf32>
    %259 = arith.divf %257, %258 : vector<8x128xf32>
    %260 = vector.extract_strided_slice %247 {offsets = [0, 256], sizes = [8, 128], strides = [1, 1]} : vector<8x512xf32> to vector<8x128xf32>
    %261 = math.tanh %260 : vector<8x128xf32>
    %262 = vector.extract_strided_slice %247 {offsets = [0, 384], sizes = [8, 128], strides = [1, 1]} : vector<8x512xf32> to vector<8x128xf32>
    %263 = arith.negf %262 : vector<8x128xf32>
    %264 = math.exp %263 : vector<8x128xf32>
    %cst_76 = arith.constant 1.000000e+00 : f32
    %265 = vector.broadcast %cst_76 : f32 to vector<8x128xf32>
    %266 = arith.addf %265, %264 : vector<8x128xf32>
    %267 = arith.divf %265, %266 : vector<8x128xf32>
    %268 = arith.mulf %259, %201 : vector<8x128xf32>
    %269 = arith.mulf %253, %261 : vector<8x128xf32>
    %270 = arith.addf %268, %269 : vector<8x128xf32>
    %271 = math.tanh %270 : vector<8x128xf32>
    %272 = arith.mulf %267, %271 : vector<8x128xf32>
    %273 = arith.index_cast %c3_i32 : i32 to index
    %c0_77 = arith.constant 0 : index
    %c0_78 = arith.constant 0 : index
    %274 = vector.load %arg5[%273, %c0_77, %c0_78] : memref<8x8x128xf32, #tpu.memory_space<vmem>>, vector<1x8x128xf32>
    %275 = vector.shape_cast %274 : vector<1x8x128xf32> to vector<8x128xf32>
    %276 = vector.shape_cast %272 : vector<8x128xf32> to vector<1x8x128xf32>
    tpu.vector_store %arg5[%273, %c0_77, %c0_78], %276 {strides = array<i32>} : memref<8x8x128xf32, #tpu.memory_space<vmem>>, vector<1x8x128xf32>,
    %c4_i32 = arith.constant 4 : i32
    %277 = arith.index_cast %c4_i32 : i32 to index
    %c0_79 = arith.constant 0 : index
    %c0_80 = arith.constant 0 : index
    %278 = vector.load %arg0[%277, %c0_79, %c0_80] : memref<8x8x128xf32, #tpu.memory_space<vmem>>, vector<1x8x128xf32>
    %279 = vector.shape_cast %278 : vector<1x8x128xf32> to vector<8x128xf32>
    %280 = tpu.concatenate %279, %241 in 1 : vector<8x128xf32>, vector<8x128xf32> -> vector<8x256xf32>
    %c0_81 = arith.constant 0 : index
    %c0_82 = arith.constant 0 : index
    %281 = vector.load %arg1[%c0_81, %c0_82] : memref<256x512xf32, #tpu.memory_space<vmem>>, vector<256x512xf32>
    %cst_83 = arith.constant dense<0.000000e+00> : vector<8x512xf32>
    %282 = tpu.matmul %280, %281, %cst_83 {dimension_numbers = #tpu.dot_dimension_numbers<[1], [0], [0], [1], [0, 0, 1, 1], [], []>} : vector<8x256xf32>, vector<256x512xf32>, vector<8x512xf32> -> vector<8x512xf32>
    %c0_84 = arith.constant 0 : index
    %c0_85 = arith.constant 0 : index
    %283 = vector.load %arg2[%c0_84, %c0_85] : memref<1x512xf32, #tpu.memory_space<vmem>>, vector<1x512xf32>
    %284 = vector.broadcast %283 : vector<1x512xf32> to vector<8x512xf32>
    %285 = arith.addf %282, %284 : vector<8x512xf32>
    %286 = vector.extract_strided_slice %285 {offsets = [0, 0], sizes = [8, 128], strides = [1, 1]} : vector<8x512xf32> to vector<8x128xf32>
    %287 = arith.negf %286 : vector<8x128xf32>
    %288 = math.exp %287 : vector<8x128xf32>
    %cst_86 = arith.constant 1.000000e+00 : f32
    %289 = vector.broadcast %cst_86 : f32 to vector<8x128xf32>
    %290 = arith.addf %289, %288 : vector<8x128xf32>
    %291 = arith.divf %289, %290 : vector<8x128xf32>
    %292 = vector.extract_strided_slice %285 {offsets = [0, 128], sizes = [8, 128], strides = [1, 1]} : vector<8x512xf32> to vector<8x128xf32>
    %293 = arith.negf %292 : vector<8x128xf32>
    %294 = math.exp %293 : vector<8x128xf32>
    %cst_87 = arith.constant 1.000000e+00 : f32
    %295 = vector.broadcast %cst_87 : f32 to vector<8x128xf32>
    %296 = arith.addf %295, %294 : vector<8x128xf32>
    %297 = arith.divf %295, %296 : vector<8x128xf32>
    %298 = vector.extract_strided_slice %285 {offsets = [0, 256], sizes = [8, 128], strides = [1, 1]} : vector<8x512xf32> to vector<8x128xf32>
    %299 = math.tanh %298 : vector<8x128xf32>
    %300 = vector.extract_strided_slice %285 {offsets = [0, 384], sizes = [8, 128], strides = [1, 1]} : vector<8x512xf32> to vector<8x128xf32>
    %301 = arith.negf %300 : vector<8x128xf32>
    %302 = math.exp %301 : vector<8x128xf32>
    %cst_88 = arith.constant 1.000000e+00 : f32
    %303 = vector.broadcast %cst_88 : f32 to vector<8x128xf32>
    %304 = arith.addf %303, %302 : vector<8x128xf32>
    %305 = arith.divf %303, %304 : vector<8x128xf32>
    %306 = arith.mulf %297, %239 : vector<8x128xf32>
    %307 = arith.mulf %291, %299 : vector<8x128xf32>
    %308 = arith.addf %306, %307 : vector<8x128xf32>
    %309 = math.tanh %308 : vector<8x128xf32>
    %310 = arith.mulf %305, %309 : vector<8x128xf32>
    %311 = tpu.concatenate %310, %272 in 1 : vector<8x128xf32>, vector<8x128xf32> -> vector<8x256xf32>
    %c0_89 = arith.constant 0 : index
    %c0_90 = arith.constant 0 : index
    %312 = vector.load %arg3[%c0_89, %c0_90] : memref<256x512xf32, #tpu.memory_space<vmem>>, vector<256x512xf32>
    %cst_91 = arith.constant dense<0.000000e+00> : vector<8x512xf32>
    %313 = tpu.matmul %311, %312, %cst_91 {dimension_numbers = #tpu.dot_dimension_numbers<[1], [0], [0], [1], [0, 0, 1, 1], [], []>} : vector<8x256xf32>, vector<256x512xf32>, vector<8x512xf32> -> vector<8x512xf32>
    %c0_92 = arith.constant 0 : index
    %c0_93 = arith.constant 0 : index
    %314 = vector.load %arg4[%c0_92, %c0_93] : memref<1x512xf32, #tpu.memory_space<vmem>>, vector<1x512xf32>
    %315 = vector.broadcast %314 : vector<1x512xf32> to vector<8x512xf32>
    %316 = arith.addf %313, %315 : vector<8x512xf32>
    %317 = vector.extract_strided_slice %316 {offsets = [0, 0], sizes = [8, 128], strides = [1, 1]} : vector<8x512xf32> to vector<8x128xf32>
    %318 = arith.negf %317 : vector<8x128xf32>
    %319 = math.exp %318 : vector<8x128xf32>
    %cst_94 = arith.constant 1.000000e+00 : f32
    %320 = vector.broadcast %cst_94 : f32 to vector<8x128xf32>
    %321 = arith.addf %320, %319 : vector<8x128xf32>
    %322 = arith.divf %320, %321 : vector<8x128xf32>
    %323 = vector.extract_strided_slice %316 {offsets = [0, 128], sizes = [8, 128], strides = [1, 1]} : vector<8x512xf32> to vector<8x128xf32>
    %324 = arith.negf %323 : vector<8x128xf32>
    %325 = math.exp %324 : vector<8x128xf32>
    %cst_95 = arith.constant 1.000000e+00 : f32
    %326 = vector.broadcast %cst_95 : f32 to vector<8x128xf32>
    %327 = arith.addf %326, %325 : vector<8x128xf32>
    %328 = arith.divf %326, %327 : vector<8x128xf32>
    %329 = vector.extract_strided_slice %316 {offsets = [0, 256], sizes = [8, 128], strides = [1, 1]} : vector<8x512xf32> to vector<8x128xf32>
    %330 = math.tanh %329 : vector<8x128xf32>
    %331 = vector.extract_strided_slice %316 {offsets = [0, 384], sizes = [8, 128], strides = [1, 1]} : vector<8x512xf32> to vector<8x128xf32>
    %332 = arith.negf %331 : vector<8x128xf32>
    %333 = math.exp %332 : vector<8x128xf32>
    %cst_96 = arith.constant 1.000000e+00 : f32
    %334 = vector.broadcast %cst_96 : f32 to vector<8x128xf32>
    %335 = arith.addf %334, %333 : vector<8x128xf32>
    %336 = arith.divf %334, %335 : vector<8x128xf32>
    %337 = arith.mulf %328, %270 : vector<8x128xf32>
    %338 = arith.mulf %322, %330 : vector<8x128xf32>
    %339 = arith.addf %337, %338 : vector<8x128xf32>
    %340 = math.tanh %339 : vector<8x128xf32>
    %341 = arith.mulf %336, %340 : vector<8x128xf32>
    %342 = arith.index_cast %c4_i32 : i32 to index
    %c0_97 = arith.constant 0 : index
    %c0_98 = arith.constant 0 : index
    %343 = vector.load %arg5[%342, %c0_97, %c0_98] : memref<8x8x128xf32, #tpu.memory_space<vmem>>, vector<1x8x128xf32>
    %344 = vector.shape_cast %343 : vector<1x8x128xf32> to vector<8x128xf32>
    %345 = vector.shape_cast %341 : vector<8x128xf32> to vector<1x8x128xf32>
    tpu.vector_store %arg5[%342, %c0_97, %c0_98], %345 {strides = array<i32>} : memref<8x8x128xf32, #tpu.memory_space<vmem>>, vector<1x8x128xf32>,
    %c5_i32 = arith.constant 5 : i32
    %346 = arith.index_cast %c5_i32 : i32 to index
    %c0_99 = arith.constant 0 : index
    %c0_100 = arith.constant 0 : index
    %347 = vector.load %arg0[%346, %c0_99, %c0_100] : memref<8x8x128xf32, #tpu.memory_space<vmem>>, vector<1x8x128xf32>
    %348 = vector.shape_cast %347 : vector<1x8x128xf32> to vector<8x128xf32>
    %349 = tpu.concatenate %348, %310 in 1 : vector<8x128xf32>, vector<8x128xf32> -> vector<8x256xf32>
    %c0_101 = arith.constant 0 : index
    %c0_102 = arith.constant 0 : index
    %350 = vector.load %arg1[%c0_101, %c0_102] : memref<256x512xf32, #tpu.memory_space<vmem>>, vector<256x512xf32>
    %cst_103 = arith.constant dense<0.000000e+00> : vector<8x512xf32>
    %351 = tpu.matmul %349, %350, %cst_103 {dimension_numbers = #tpu.dot_dimension_numbers<[1], [0], [0], [1], [0, 0, 1, 1], [], []>} : vector<8x256xf32>, vector<256x512xf32>, vector<8x512xf32> -> vector<8x512xf32>
    %c0_104 = arith.constant 0 : index
    %c0_105 = arith.constant 0 : index
    %352 = vector.load %arg2[%c0_104, %c0_105] : memref<1x512xf32, #tpu.memory_space<vmem>>, vector<1x512xf32>
    %353 = vector.broadcast %352 : vector<1x512xf32> to vector<8x512xf32>
    %354 = arith.addf %351, %353 : vector<8x512xf32>
    %355 = vector.extract_strided_slice %354 {offsets = [0, 0], sizes = [8, 128], strides = [1, 1]} : vector<8x512xf32> to vector<8x128xf32>
    %356 = arith.negf %355 : vector<8x128xf32>
    %357 = math.exp %356 : vector<8x128xf32>
    %cst_106 = arith.constant 1.000000e+00 : f32
    %358 = vector.broadcast %cst_106 : f32 to vector<8x128xf32>
    %359 = arith.addf %358, %357 : vector<8x128xf32>
    %360 = arith.divf %358, %359 : vector<8x128xf32>
    %361 = vector.extract_strided_slice %354 {offsets = [0, 128], sizes = [8, 128], strides = [1, 1]} : vector<8x512xf32> to vector<8x128xf32>
    %362 = arith.negf %361 : vector<8x128xf32>
    %363 = math.exp %362 : vector<8x128xf32>
    %cst_107 = arith.constant 1.000000e+00 : f32
    %364 = vector.broadcast %cst_107 : f32 to vector<8x128xf32>
    %365 = arith.addf %364, %363 : vector<8x128xf32>
    %366 = arith.divf %364, %365 : vector<8x128xf32>
    %367 = vector.extract_strided_slice %354 {offsets = [0, 256], sizes = [8, 128], strides = [1, 1]} : vector<8x512xf32> to vector<8x128xf32>
    %368 = math.tanh %367 : vector<8x128xf32>
    %369 = vector.extract_strided_slice %354 {offsets = [0, 384], sizes = [8, 128], strides = [1, 1]} : vector<8x512xf32> to vector<8x128xf32>
    %370 = arith.negf %369 : vector<8x128xf32>
    %371 = math.exp %370 : vector<8x128xf32>
    %cst_108 = arith.constant 1.000000e+00 : f32
    %372 = vector.broadcast %cst_108 : f32 to vector<8x128xf32>
    %373 = arith.addf %372, %371 : vector<8x128xf32>
    %374 = arith.divf %372, %373 : vector<8x128xf32>
    %375 = arith.mulf %366, %308 : vector<8x128xf32>
    %376 = arith.mulf %360, %368 : vector<8x128xf32>
    %377 = arith.addf %375, %376 : vector<8x128xf32>
    %378 = math.tanh %377 : vector<8x128xf32>
    %379 = arith.mulf %374, %378 : vector<8x128xf32>
    %380 = tpu.concatenate %379, %341 in 1 : vector<8x128xf32>, vector<8x128xf32> -> vector<8x256xf32>
    %c0_109 = arith.constant 0 : index
    %c0_110 = arith.constant 0 : index
    %381 = vector.load %arg3[%c0_109, %c0_110] : memref<256x512xf32, #tpu.memory_space<vmem>>, vector<256x512xf32>
    %cst_111 = arith.constant dense<0.000000e+00> : vector<8x512xf32>
    %382 = tpu.matmul %380, %381, %cst_111 {dimension_numbers = #tpu.dot_dimension_numbers<[1], [0], [0], [1], [0, 0, 1, 1], [], []>} : vector<8x256xf32>, vector<256x512xf32>, vector<8x512xf32> -> vector<8x512xf32>
    %c0_112 = arith.constant 0 : index
    %c0_113 = arith.constant 0 : index
    %383 = vector.load %arg4[%c0_112, %c0_113] : memref<1x512xf32, #tpu.memory_space<vmem>>, vector<1x512xf32>
    %384 = vector.broadcast %383 : vector<1x512xf32> to vector<8x512xf32>
    %385 = arith.addf %382, %384 : vector<8x512xf32>
    %386 = vector.extract_strided_slice %385 {offsets = [0, 0], sizes = [8, 128], strides = [1, 1]} : vector<8x512xf32> to vector<8x128xf32>
    %387 = arith.negf %386 : vector<8x128xf32>
    %388 = math.exp %387 : vector<8x128xf32>
    %cst_114 = arith.constant 1.000000e+00 : f32
    %389 = vector.broadcast %cst_114 : f32 to vector<8x128xf32>
    %390 = arith.addf %389, %388 : vector<8x128xf32>
    %391 = arith.divf %389, %390 : vector<8x128xf32>
    %392 = vector.extract_strided_slice %385 {offsets = [0, 128], sizes = [8, 128], strides = [1, 1]} : vector<8x512xf32> to vector<8x128xf32>
    %393 = arith.negf %392 : vector<8x128xf32>
    %394 = math.exp %393 : vector<8x128xf32>
    %cst_115 = arith.constant 1.000000e+00 : f32
    %395 = vector.broadcast %cst_115 : f32 to vector<8x128xf32>
    %396 = arith.addf %395, %394 : vector<8x128xf32>
    %397 = arith.divf %395, %396 : vector<8x128xf32>
    %398 = vector.extract_strided_slice %385 {offsets = [0, 256], sizes = [8, 128], strides = [1, 1]} : vector<8x512xf32> to vector<8x128xf32>
    %399 = math.tanh %398 : vector<8x128xf32>
    %400 = vector.extract_strided_slice %385 {offsets = [0, 384], sizes = [8, 128], strides = [1, 1]} : vector<8x512xf32> to vector<8x128xf32>
    %401 = arith.negf %400 : vector<8x128xf32>
    %402 = math.exp %401 : vector<8x128xf32>
    %cst_116 = arith.constant 1.000000e+00 : f32
    %403 = vector.broadcast %cst_116 : f32 to vector<8x128xf32>
    %404 = arith.addf %403, %402 : vector<8x128xf32>
    %405 = arith.divf %403, %404 : vector<8x128xf32>
    %406 = arith.mulf %397, %339 : vector<8x128xf32>
    %407 = arith.mulf %391, %399 : vector<8x128xf32>
    %408 = arith.addf %406, %407 : vector<8x128xf32>
    %409 = math.tanh %408 : vector<8x128xf32>
    %410 = arith.mulf %405, %409 : vector<8x128xf32>
    %411 = arith.index_cast %c5_i32 : i32 to index
    %c0_117 = arith.constant 0 : index
    %c0_118 = arith.constant 0 : index
    %412 = vector.load %arg5[%411, %c0_117, %c0_118] : memref<8x8x128xf32, #tpu.memory_space<vmem>>, vector<1x8x128xf32>
    %413 = vector.shape_cast %412 : vector<1x8x128xf32> to vector<8x128xf32>
    %414 = vector.shape_cast %410 : vector<8x128xf32> to vector<1x8x128xf32>
    tpu.vector_store %arg5[%411, %c0_117, %c0_118], %414 {strides = array<i32>} : memref<8x8x128xf32, #tpu.memory_space<vmem>>, vector<1x8x128xf32>,
    %c6_i32 = arith.constant 6 : i32
    %415 = arith.index_cast %c6_i32 : i32 to index
    %c0_119 = arith.constant 0 : index
    %c0_120 = arith.constant 0 : index
    %416 = vector.load %arg0[%415, %c0_119, %c0_120] : memref<8x8x128xf32, #tpu.memory_space<vmem>>, vector<1x8x128xf32>
    %417 = vector.shape_cast %416 : vector<1x8x128xf32> to vector<8x128xf32>
    %418 = tpu.concatenate %417, %379 in 1 : vector<8x128xf32>, vector<8x128xf32> -> vector<8x256xf32>
    %c0_121 = arith.constant 0 : index
    %c0_122 = arith.constant 0 : index
    %419 = vector.load %arg1[%c0_121, %c0_122] : memref<256x512xf32, #tpu.memory_space<vmem>>, vector<256x512xf32>
    %cst_123 = arith.constant dense<0.000000e+00> : vector<8x512xf32>
    %420 = tpu.matmul %418, %419, %cst_123 {dimension_numbers = #tpu.dot_dimension_numbers<[1], [0], [0], [1], [0, 0, 1, 1], [], []>} : vector<8x256xf32>, vector<256x512xf32>, vector<8x512xf32> -> vector<8x512xf32>
    %c0_124 = arith.constant 0 : index
    %c0_125 = arith.constant 0 : index
    %421 = vector.load %arg2[%c0_124, %c0_125] : memref<1x512xf32, #tpu.memory_space<vmem>>, vector<1x512xf32>
    %422 = vector.broadcast %421 : vector<1x512xf32> to vector<8x512xf32>
    %423 = arith.addf %420, %422 : vector<8x512xf32>
    %424 = vector.extract_strided_slice %423 {offsets = [0, 0], sizes = [8, 128], strides = [1, 1]} : vector<8x512xf32> to vector<8x128xf32>
    %425 = arith.negf %424 : vector<8x128xf32>
    %426 = math.exp %425 : vector<8x128xf32>
    %cst_126 = arith.constant 1.000000e+00 : f32
    %427 = vector.broadcast %cst_126 : f32 to vector<8x128xf32>
    %428 = arith.addf %427, %426 : vector<8x128xf32>
    %429 = arith.divf %427, %428 : vector<8x128xf32>
    %430 = vector.extract_strided_slice %423 {offsets = [0, 128], sizes = [8, 128], strides = [1, 1]} : vector<8x512xf32> to vector<8x128xf32>
    %431 = arith.negf %430 : vector<8x128xf32>
    %432 = math.exp %431 : vector<8x128xf32>
    %cst_127 = arith.constant 1.000000e+00 : f32
    %433 = vector.broadcast %cst_127 : f32 to vector<8x128xf32>
    %434 = arith.addf %433, %432 : vector<8x128xf32>
    %435 = arith.divf %433, %434 : vector<8x128xf32>
    %436 = vector.extract_strided_slice %423 {offsets = [0, 256], sizes = [8, 128], strides = [1, 1]} : vector<8x512xf32> to vector<8x128xf32>
    %437 = math.tanh %436 : vector<8x128xf32>
    %438 = vector.extract_strided_slice %423 {offsets = [0, 384], sizes = [8, 128], strides = [1, 1]} : vector<8x512xf32> to vector<8x128xf32>
    %439 = arith.negf %438 : vector<8x128xf32>
    %440 = math.exp %439 : vector<8x128xf32>
    %cst_128 = arith.constant 1.000000e+00 : f32
    %441 = vector.broadcast %cst_128 : f32 to vector<8x128xf32>
    %442 = arith.addf %441, %440 : vector<8x128xf32>
    %443 = arith.divf %441, %442 : vector<8x128xf32>
    %444 = arith.mulf %435, %377 : vector<8x128xf32>
    %445 = arith.mulf %429, %437 : vector<8x128xf32>
    %446 = arith.addf %444, %445 : vector<8x128xf32>
    %447 = math.tanh %446 : vector<8x128xf32>
    %448 = arith.mulf %443, %447 : vector<8x128xf32>
    %449 = tpu.concatenate %448, %410 in 1 : vector<8x128xf32>, vector<8x128xf32> -> vector<8x256xf32>
    %c0_129 = arith.constant 0 : index
    %c0_130 = arith.constant 0 : index
    %450 = vector.load %arg3[%c0_129, %c0_130] : memref<256x512xf32, #tpu.memory_space<vmem>>, vector<256x512xf32>
    %cst_131 = arith.constant dense<0.000000e+00> : vector<8x512xf32>
    %451 = tpu.matmul %449, %450, %cst_131 {dimension_numbers = #tpu.dot_dimension_numbers<[1], [0], [0], [1], [0, 0, 1, 1], [], []>} : vector<8x256xf32>, vector<256x512xf32>, vector<8x512xf32> -> vector<8x512xf32>
    %c0_132 = arith.constant 0 : index
    %c0_133 = arith.constant 0 : index
    %452 = vector.load %arg4[%c0_132, %c0_133] : memref<1x512xf32, #tpu.memory_space<vmem>>, vector<1x512xf32>
    %453 = vector.broadcast %452 : vector<1x512xf32> to vector<8x512xf32>
    %454 = arith.addf %451, %453 : vector<8x512xf32>
    %455 = vector.extract_strided_slice %454 {offsets = [0, 0], sizes = [8, 128], strides = [1, 1]} : vector<8x512xf32> to vector<8x128xf32>
    %456 = arith.negf %455 : vector<8x128xf32>
    %457 = math.exp %456 : vector<8x128xf32>
    %cst_134 = arith.constant 1.000000e+00 : f32
    %458 = vector.broadcast %cst_134 : f32 to vector<8x128xf32>
    %459 = arith.addf %458, %457 : vector<8x128xf32>
    %460 = arith.divf %458, %459 : vector<8x128xf32>
    %461 = vector.extract_strided_slice %454 {offsets = [0, 128], sizes = [8, 128], strides = [1, 1]} : vector<8x512xf32> to vector<8x128xf32>
    %462 = arith.negf %461 : vector<8x128xf32>
    %463 = math.exp %462 : vector<8x128xf32>
    %cst_135 = arith.constant 1.000000e+00 : f32
    %464 = vector.broadcast %cst_135 : f32 to vector<8x128xf32>
    %465 = arith.addf %464, %463 : vector<8x128xf32>
    %466 = arith.divf %464, %465 : vector<8x128xf32>
    %467 = vector.extract_strided_slice %454 {offsets = [0, 256], sizes = [8, 128], strides = [1, 1]} : vector<8x512xf32> to vector<8x128xf32>
    %468 = math.tanh %467 : vector<8x128xf32>
    %469 = vector.extract_strided_slice %454 {offsets = [0, 384], sizes = [8, 128], strides = [1, 1]} : vector<8x512xf32> to vector<8x128xf32>
    %470 = arith.negf %469 : vector<8x128xf32>
    %471 = math.exp %470 : vector<8x128xf32>
    %cst_136 = arith.constant 1.000000e+00 : f32
    %472 = vector.broadcast %cst_136 : f32 to vector<8x128xf32>
    %473 = arith.addf %472, %471 : vector<8x128xf32>
    %474 = arith.divf %472, %473 : vector<8x128xf32>
    %475 = arith.mulf %466, %408 : vector<8x128xf32>
    %476 = arith.mulf %460, %468 : vector<8x128xf32>
    %477 = arith.addf %475, %476 : vector<8x128xf32>
    %478 = math.tanh %477 : vector<8x128xf32>
    %479 = arith.mulf %474, %478 : vector<8x128xf32>
    %480 = arith.index_cast %c6_i32 : i32 to index
    %c0_137 = arith.constant 0 : index
    %c0_138 = arith.constant 0 : index
    %481 = vector.load %arg5[%480, %c0_137, %c0_138] : memref<8x8x128xf32, #tpu.memory_space<vmem>>, vector<1x8x128xf32>
    %482 = vector.shape_cast %481 : vector<1x8x128xf32> to vector<8x128xf32>
    %483 = vector.shape_cast %479 : vector<8x128xf32> to vector<1x8x128xf32>
    tpu.vector_store %arg5[%480, %c0_137, %c0_138], %483 {strides = array<i32>} : memref<8x8x128xf32, #tpu.memory_space<vmem>>, vector<1x8x128xf32>,
    %c7_i32 = arith.constant 7 : i32
    %484 = arith.index_cast %c7_i32 : i32 to index
    %c0_139 = arith.constant 0 : index
    %c0_140 = arith.constant 0 : index
    %485 = vector.load %arg0[%484, %c0_139, %c0_140] : memref<8x8x128xf32, #tpu.memory_space<vmem>>, vector<1x8x128xf32>
    %486 = vector.shape_cast %485 : vector<1x8x128xf32> to vector<8x128xf32>
    %487 = tpu.concatenate %486, %448 in 1 : vector<8x128xf32>, vector<8x128xf32> -> vector<8x256xf32>
    %c0_141 = arith.constant 0 : index
    %c0_142 = arith.constant 0 : index
    %488 = vector.load %arg1[%c0_141, %c0_142] : memref<256x512xf32, #tpu.memory_space<vmem>>, vector<256x512xf32>
    %cst_143 = arith.constant dense<0.000000e+00> : vector<8x512xf32>
    %489 = tpu.matmul %487, %488, %cst_143 {dimension_numbers = #tpu.dot_dimension_numbers<[1], [0], [0], [1], [0, 0, 1, 1], [], []>} : vector<8x256xf32>, vector<256x512xf32>, vector<8x512xf32> -> vector<8x512xf32>
    %c0_144 = arith.constant 0 : index
    %c0_145 = arith.constant 0 : index
    %490 = vector.load %arg2[%c0_144, %c0_145] : memref<1x512xf32, #tpu.memory_space<vmem>>, vector<1x512xf32>
    %491 = vector.broadcast %490 : vector<1x512xf32> to vector<8x512xf32>
    %492 = arith.addf %489, %491 : vector<8x512xf32>
    %493 = vector.extract_strided_slice %492 {offsets = [0, 0], sizes = [8, 128], strides = [1, 1]} : vector<8x512xf32> to vector<8x128xf32>
    %494 = arith.negf %493 : vector<8x128xf32>
    %495 = math.exp %494 : vector<8x128xf32>
    %cst_146 = arith.constant 1.000000e+00 : f32
    %496 = vector.broadcast %cst_146 : f32 to vector<8x128xf32>
    %497 = arith.addf %496, %495 : vector<8x128xf32>
    %498 = arith.divf %496, %497 : vector<8x128xf32>
    %499 = vector.extract_strided_slice %492 {offsets = [0, 128], sizes = [8, 128], strides = [1, 1]} : vector<8x512xf32> to vector<8x128xf32>
    %500 = arith.negf %499 : vector<8x128xf32>
    %501 = math.exp %500 : vector<8x128xf32>
    %cst_147 = arith.constant 1.000000e+00 : f32
    %502 = vector.broadcast %cst_147 : f32 to vector<8x128xf32>
    %503 = arith.addf %502, %501 : vector<8x128xf32>
    %504 = arith.divf %502, %503 : vector<8x128xf32>
    %505 = vector.extract_strided_slice %492 {offsets = [0, 256], sizes = [8, 128], strides = [1, 1]} : vector<8x512xf32> to vector<8x128xf32>
    %506 = math.tanh %505 : vector<8x128xf32>
    %507 = vector.extract_strided_slice %492 {offsets = [0, 384], sizes = [8, 128], strides = [1, 1]} : vector<8x512xf32> to vector<8x128xf32>
    %508 = arith.negf %507 : vector<8x128xf32>
    %509 = math.exp %508 : vector<8x128xf32>
    %cst_148 = arith.constant 1.000000e+00 : f32
    %510 = vector.broadcast %cst_148 : f32 to vector<8x128xf32>
    %511 = arith.addf %510, %509 : vector<8x128xf32>
    %512 = arith.divf %510, %511 : vector<8x128xf32>
    %513 = arith.mulf %504, %446 : vector<8x128xf32>
    %514 = arith.mulf %498, %506 : vector<8x128xf32>
    %515 = arith.addf %513, %514 : vector<8x128xf32>
    %516 = math.tanh %515 : vector<8x128xf32>
    %517 = arith.mulf %512, %516 : vector<8x128xf32>
    %518 = tpu.concatenate %517, %479 in 1 : vector<8x128xf32>, vector<8x128xf32> -> vector<8x256xf32>
    %c0_149 = arith.constant 0 : index
    %c0_150 = arith.constant 0 : index
    %519 = vector.load %arg3[%c0_149, %c0_150] : memref<256x512xf32, #tpu.memory_space<vmem>>, vector<256x512xf32>
    %cst_151 = arith.constant dense<0.000000e+00> : vector<8x512xf32>
    %520 = tpu.matmul %518, %519, %cst_151 {dimension_numbers = #tpu.dot_dimension_numbers<[1], [0], [0], [1], [0, 0, 1, 1], [], []>} : vector<8x256xf32>, vector<256x512xf32>, vector<8x512xf32> -> vector<8x512xf32>
    %c0_152 = arith.constant 0 : index
    %c0_153 = arith.constant 0 : index
    %521 = vector.load %arg4[%c0_152, %c0_153] : memref<1x512xf32, #tpu.memory_space<vmem>>, vector<1x512xf32>
    %522 = vector.broadcast %521 : vector<1x512xf32> to vector<8x512xf32>
    %523 = arith.addf %520, %522 : vector<8x512xf32>
    %524 = vector.extract_strided_slice %523 {offsets = [0, 0], sizes = [8, 128], strides = [1, 1]} : vector<8x512xf32> to vector<8x128xf32>
    %525 = arith.negf %524 : vector<8x128xf32>
    %526 = math.exp %525 : vector<8x128xf32>
    %cst_154 = arith.constant 1.000000e+00 : f32
    %527 = vector.broadcast %cst_154 : f32 to vector<8x128xf32>
    %528 = arith.addf %527, %526 : vector<8x128xf32>
    %529 = arith.divf %527, %528 : vector<8x128xf32>
    %530 = vector.extract_strided_slice %523 {offsets = [0, 128], sizes = [8, 128], strides = [1, 1]} : vector<8x512xf32> to vector<8x128xf32>
    %531 = arith.negf %530 : vector<8x128xf32>
    %532 = math.exp %531 : vector<8x128xf32>
    %cst_155 = arith.constant 1.000000e+00 : f32
    %533 = vector.broadcast %cst_155 : f32 to vector<8x128xf32>
    %534 = arith.addf %533, %532 : vector<8x128xf32>
    %535 = arith.divf %533, %534 : vector<8x128xf32>
    %536 = vector.extract_strided_slice %523 {offsets = [0, 256], sizes = [8, 128], strides = [1, 1]} : vector<8x512xf32> to vector<8x128xf32>
    %537 = math.tanh %536 : vector<8x128xf32>
    %538 = vector.extract_strided_slice %523 {offsets = [0, 384], sizes = [8, 128], strides = [1, 1]} : vector<8x512xf32> to vector<8x128xf32>
    %539 = arith.negf %538 : vector<8x128xf32>
    %540 = math.exp %539 : vector<8x128xf32>
    %cst_156 = arith.constant 1.000000e+00 : f32
    %541 = vector.broadcast %cst_156 : f32 to vector<8x128xf32>
    %542 = arith.addf %541, %540 : vector<8x128xf32>
    %543 = arith.divf %541, %542 : vector<8x128xf32>
    %544 = arith.mulf %535, %477 : vector<8x128xf32>
    %545 = arith.mulf %529, %537 : vector<8x128xf32>
    %546 = arith.addf %544, %545 : vector<8x128xf32>
    %547 = math.tanh %546 : vector<8x128xf32>
    %548 = arith.mulf %543, %547 : vector<8x128xf32>
    %549 = arith.index_cast %c7_i32 : i32 to index
    %c0_157 = arith.constant 0 : index
    %c0_158 = arith.constant 0 : index
    %550 = vector.load %arg5[%549, %c0_157, %c0_158] : memref<8x8x128xf32, #tpu.memory_space<vmem>>, vector<1x8x128xf32>
    %551 = vector.shape_cast %550 : vector<1x8x128xf32> to vector<8x128xf32>
    %552 = vector.shape_cast %548 : vector<8x128xf32> to vector<1x8x128xf32>
    tpu.vector_store %arg5[%549, %c0_157, %c0_158], %552 {strides = array<i32>} : memref<8x8x128xf32, #tpu.memory_space<vmem>>, vector<1x8x128xf32>,
    %c8_i32 = arith.constant 8 : i32
    %c0_159 = arith.constant 0 : index
    %c0_160 = arith.constant 0 : index
    %c0_161 = arith.constant 0 : index
    %553 = vector.load %arg6[%c0_159, %c0_160, %c0_161] : memref<2x8x128xf32, #tpu.memory_space<vmem>>, vector<1x8x128xf32>
    %554 = vector.shape_cast %553 : vector<1x8x128xf32> to vector<8x128xf32>
    %555 = vector.shape_cast %517 : vector<8x128xf32> to vector<1x8x128xf32>
    tpu.vector_store %arg6[%c0_159, %c0_160, %c0_161], %555 {strides = array<i32>} : memref<2x8x128xf32, #tpu.memory_space<vmem>>, vector<1x8x128xf32>,
    %c1 = arith.constant 1 : index
    %c0_162 = arith.constant 0 : index
    %c0_163 = arith.constant 0 : index
    %556 = vector.load %arg6[%c1, %c0_162, %c0_163] : memref<2x8x128xf32, #tpu.memory_space<vmem>>, vector<1x8x128xf32>
    %557 = vector.shape_cast %556 : vector<1x8x128xf32> to vector<8x128xf32>
    %558 = vector.shape_cast %548 : vector<8x128xf32> to vector<1x8x128xf32>
    tpu.vector_store %arg6[%c1, %c0_162, %c0_163], %558 {strides = array<i32>} : memref<2x8x128xf32, #tpu.memory_space<vmem>>, vector<1x8x128xf32>,
    %c0_164 = arith.constant 0 : index
    %c0_165 = arith.constant 0 : index
    %c0_166 = arith.constant 0 : index
    %559 = vector.load %arg7[%c0_164, %c0_165, %c0_166] : memref<2x8x128xf32, #tpu.memory_space<vmem>>, vector<1x8x128xf32>
    %560 = vector.shape_cast %559 : vector<1x8x128xf32> to vector<8x128xf32>
    %561 = vector.shape_cast %515 : vector<8x128xf32> to vector<1x8x128xf32>
    tpu.vector_store %arg7[%c0_164, %c0_165, %c0_166], %561 {strides = array<i32>} : memref<2x8x128xf32, #tpu.memory_space<vmem>>, vector<1x8x128xf32>,
    %c1_167 = arith.constant 1 : index
    %c0_168 = arith.constant 0 : index
    %c0_169 = arith.constant 0 : index
    %562 = vector.load %arg7[%c1_167, %c0_168, %c0_169] : memref<2x8x128xf32, #tpu.memory_space<vmem>>, vector<1x8x128xf32>
    %563 = vector.shape_cast %562 : vector<1x8x128xf32> to vector<8x128xf32>
    %564 = vector.shape_cast %546 : vector<8x128xf32> to vector<1x8x128xf32>
    tpu.vector_store %arg7[%c1_167, %c0_168, %c0_169], %564 {strides = array<i32>} : memref<2x8x128xf32, #tpu.memory_space<vmem>>, vector<1x8x128xf32>,
    return
  }
}

</mosaic_0001>

<bundles_post_ra>
// kernel: poetry_model_forward.3
= control target key start
LH: loop header
LB: loop body
LE: loop exit
PB: predicated region body
PF: predicated region fallthrough
CT: control target
= control target key end

     0   :  { %s398_s1 = inlined_call_operand.vmem [shape: f32[128,128], index: 1, kind: input, shape index: {}]   ;;  %s399_s0 = inlined_call_operand.vmem [shape: f32[64,128], index: 0, kind: input, shape index: {}]   ;;  %s400_s2 = inlined_call_operand.vmem [shape: f32[1,128], index: 2, kind: input, shape index: {}]   ;;  %s401_s3 = inlined_call_operand.vmem [shape: f32[64,128], index: 3, kind: output, shape index: {}]  }
   0x1   :  { %v22_v0 = vld [vmem:[%s398_s1] sm:$0xff]  ;;  %v23_v1 = vld [vmem:[%s398_s1 + $0x8] sm:$0xff]  ;;  %v24_v2 = vld [vmem:[%s398_s1 + $0x10] sm:$0xff] }
   0x2   :  { %v231_v3 = vpack.c.bf16 %v23_v1, %v22_v0  ;;  %v25_v4 = vld [vmem:[%s398_s1 + $0x18] sm:$0xff]  ;;  %v26_v6 = vld [vmem:[%s398_s1 + $0x20] sm:$0xff]  ;;  %v27_v7 = vld [vmem:[%s398_s1 + $0x28] sm:$0xff] }
   0x3   :  { %v235_v5 = vpack.c.bf16 %v25_v4, %v24_v2  ;;  %v239_v8 = vpack.c.bf16 %v27_v7, %v26_v6  ;;  %v14_v9 = vld [vmem:[%s399_s0] sm:$0xff]  ;;  %v28_v11 = vld [vmem:[%s398_s1 + $0x30] sm:$0xff]  ;;  %v29_v12 = vld [vmem:[%s398_s1 + $0x38] sm:$0xff] }
   0x4   :  { %232 = vmatprep.subr.bf16.mxu0 %v231_v3  ;;  %263 = vmatprep.subr.bf16.mxu1 %v231_v3  ;;  %v18_v10 = vld [vmem:[%s399_s0 + $0x20] sm:$0xff]  ;;  %v243_v13 = vpack.c.bf16 %v29_v12, %v28_v11  ;;  %v31_v15 = vld [vmem:[%s398_s1 + $0x48] sm:$0xff]  ;;  %v32_v17 = vld [vmem:[%s398_s1 + $0x50] sm:$0xff] }
   0x5   :  { %234 = vmatpush3.bf16.msra.mxu0 %v231_v3  ;;  %271 = vmatpush3.bf16.msra.mxu1 %v231_v3  ;;  %v30_v14 = vld [vmem:[%s398_s1 + $0x40] sm:$0xff]  ;;  %v33_v18 = vld [vmem:[%s398_s1 + $0x58] sm:$0xff]  ;;  %v35_v21 = vld [vmem:[%s398_s1 + $0x68] sm:$0xff] }
   0x6   :  { %236 = vmatprep.subr.bf16.mxu0 %v235_v5  ;;  %264 = vmatprep.subr.bf16.mxu1 %v235_v5  ;;  %v247_v16 = vpack.c.bf16 %v31_v15, %v30_v14  ;;  %v251_v19 = vpack.c.bf16 %v33_v18, %v32_v17  ;;  %v34_v20 = vld [vmem:[%s398_s1 + $0x60] sm:$0xff]  ;;  %v36_v23 = vld [vmem:[%s398_s1 + $0x70] sm:$0xff]  ;;  %v37_v24 = vld [vmem:[%s398_s1 + $0x78] sm:$0xff] }
   0x7   :  { %219 = vmatprep.mubr.f32.mxu0 %v14_v9  ;;  %225 = vmatprep.mubr.f32.mxu1 %v18_v10  ;;  %v255_v22 = vpack.c.bf16 %v35_v21, %v34_v20  ;;  %v259_v25 = vpack.c.bf16 %v37_v24, %v36_v23  ;;  %v15_v26 = vld [vmem:[%s399_s0 + $0x8] sm:$0xff]  ;;  %v16_v28 = vld [vmem:[%s399_s0 + $0x10] sm:$0xff]  ;;  %v17_v30 = vld [vmem:[%s399_s0 + $0x18] sm:$0xff] }
   0x8   :  { %v19_v27 = vld [vmem:[%s399_s0 + $0x28] sm:$0xff]  ;;  %v20_v29 = vld [vmem:[%s399_s0 + $0x30] sm:$0xff]  ;;  %v21_v31 = vld [vmem:[%s399_s0 + $0x38] sm:$0xff] }
   0x9   :  { %238 = vmatpush3.bf16.msra.mxu0 %v235_v5  ;;  %272 = vmatpush3.bf16.msra.mxu1 %v235_v5  ;;  %v162_v32 = vld [vmem:[%s400_s2] ss:$0 sm:$0xff] }
   0xa   :  { %240 = vmatprep.subr.bf16.mxu0 %v239_v8  ;;  %265 = vmatprep.subr.bf16.mxu1 %v239_v8 }
   0xd   :  { %242 = vmatpush3.bf16.msra.mxu0 %v239_v8  ;;  %273 = vmatpush3.bf16.msra.mxu1 %v239_v8 }
   0xe   :  { %244 = vmatprep.subr.bf16.mxu0 %v243_v13  ;;  %266 = vmatprep.subr.bf16.mxu1 %v243_v13 }
  0x11   :  { %246 = vmatpush3.bf16.msra.mxu0 %v243_v13  ;;  %274 = vmatpush3.bf16.msra.mxu1 %v243_v13 }
  0x12   :  { %248 = vmatprep.subr.bf16.mxu0 %v247_v16  ;;  %267 = vmatprep.subr.bf16.mxu1 %v247_v16 }
  0x15   :  { %250 = vmatpush3.bf16.msra.mxu0 %v247_v16  ;;  %275 = vmatpush3.bf16.msra.mxu1 %v247_v16 }
  0x16   :  { %252 = vmatprep.subr.bf16.mxu0 %v251_v19  ;;  %268 = vmatprep.subr.bf16.mxu1 %v251_v19 }
  0x19   :  { %254 = vmatpush3.bf16.msra.mxu0 %v251_v19  ;;  %276 = vmatpush3.bf16.msra.mxu1 %v251_v19 }
  0x1a   :  { %256 = vmatprep.subr.bf16.mxu0 %v255_v22  ;;  %269 = vmatprep.subr.bf16.mxu1 %v255_v22 }
  0x1d   :  { %258 = vmatpush3.bf16.msra.mxu0 %v255_v22  ;;  %277 = vmatpush3.bf16.msra.mxu1 %v255_v22 }
  0x1e   :  { %260 = vmatprep.subr.bf16.mxu0 %v259_v25  ;;  %270 = vmatprep.subr.bf16.mxu1 %v259_v25 }
  0x21   :  { %262 = vmatpush3.bf16.msra.mxu0 %v259_v25  ;;  %278 = vmatpush3.bf16.msra.mxu1 %v259_v25 }
  0x24   :  { %220 = vmatmul.mubr.f32.vlgmr.msra.gmra.mrb[0].mxu0 %v15_v26  ;;  %226 = vmatmul.mubr.f32.vlgmr.msra.gmra.mrb[0].mxu1 %v19_v27 }
  0x25   :  { %222 = vmatprep.mubr.f32.mxu0 %v16_v28  ;;  %228 = vmatprep.mubr.f32.mxu1 %v20_v29 }
  0x28   :  { %223 = vmatmul.mubr.f32.gmra.mrb[2].mxu0 %v17_v30  ;;  %229 = vmatmul.mubr.f32.gmra.mrb[2].mxu1 %v21_v31 }
  0xf7   :  { %v221_v33 = vpop.f32.mrb[0].mxu0  ;;  %v227_v34 = vpop.f32.mrb[0].mxu1 }
  0xf8   :  { %v117_v35 = vadd.f32 %v221_v33, %v162_v32  ;;  %v137_v36 = vadd.f32 %v227_v34, %v162_v32  ;;  %v111_v37 = vpop.f32.mrb[1].mxu0  ;;  %v131_v38 = vpop.f32.mrb[1].mxu1 }
  0xf9   :  { %v112_v39 = vadd.f32 %v162_v32, %v111_v37  ;;  %v132_v40 = vadd.f32 %v162_v32, %v131_v38 }
  0xfa   :  { %151 = vst [vmem:[%s401_s3 + $0x8] sm:$0xff] %v117_v35  ;;  %155 = vst [vmem:[%s401_s3 + $0x28] sm:$0xff] %v137_v36 }
  0xfb   :  { %150 = vst [vmem:[%s401_s3] sm:$0xff] %v112_v39  ;;  %154 = vst [vmem:[%s401_s3 + $0x20] sm:$0xff] %v132_v40  ;;  %v224_v41 = vpop.f32.mrb[2].mxu0  ;;  %v230_v42 = vpop.f32.mrb[2].mxu1 }
  0xfc   :  { %v127_v43 = vadd.f32 %v224_v41, %v162_v32  ;;  %v147_v44 = vadd.f32 %v230_v42, %v162_v32  ;;  %v121_v45 = vpop.f32.mrb[3].mxu0  ;;  %v141_v46 = vpop.f32.mrb[3].mxu1 }
  0xfd   :  { %v122_v47 = vadd.f32 %v162_v32, %v121_v45  ;;  %v142_v48 = vadd.f32 %v162_v32, %v141_v46 }
  0xfe   :  { %153 = vst [vmem:[%s401_s3 + $0x18] sm:$0xff] %v127_v43  ;;  %157 = vst [vmem:[%s401_s3 + $0x38] sm:$0xff] %v147_v44 }
  0xff   :  { %152 = vst [vmem:[%s401_s3 + $0x10] sm:$0xff] %v122_v47  ;;  %156 = vst [vmem:[%s401_s3 + $0x30] sm:$0xff] %v142_v48 }

// kernel: poetry_model_forward.2
= control target key start
LH: loop header
LB: loop body
LE: loop exit
PB: predicated region body
PF: predicated region fallthrough
CT: control target
= control target key end

     0   :  { %v7496_v3 = vmov 0.0   ;;  %s13921_s1 = inlined_call_operand.vmem [shape: f32[256,512], index: 1, kind: input, shape index: {}]   ;;  %s13922_s3 = inlined_call_operand.vmem [shape: f32[256,512], index: 3, kind: input, shape index: {}]   ;;  %s13923_s0 = inlined_call_operand.vmem [shape: f32[8,8,128], index: 0, kind: input, shape index: {}]   ;;  %s13924_s2 = inlined_call_operand.vmem [shape: f32[1,512], index: 2, kind: input, shape index: {}]   ;;  %s13925_s4 = inlined_call_operand.vmem [shape: f32[1,512], index: 4, kind: input, shape index: {}]   ;;  %s13926_s5 = inlined_call_operand.vmem [shape: f32[8,8,128], index: 5, kind: output, shape index: {0}]   ;;  %s13927_s7 = inlined_call_operand.vmem [shape: f32[2,8,128], index: 7, kind: output, shape index: {2}]   ;;  %s13928_s6 = inlined_call_operand.vmem [shape: f32[2,8,128], index: 6, kind: output, shape index: {1}]  }
   0x1   :  { %v25_v0 = vld [vmem:[%s13921_s1 + $0x8] sm:$0xff]  ;;  %v24_v2 = vld [vmem:[%s13921_s1] sm:$0xff]  ;;  %238 = vmatprep.mubr.f32.mxu0 %v7496_v3  ;;  %309 = vmatprep.mubr.f32.mxu1 %v7496_v3  ;;  %v27_v19 = vld [vmem:[%s13921_s1 + $0x18] sm:$0xff] }
   0x2   :  { %v29_v1 = vld [vmem:[%s13921_s1 + $0x28] sm:$0xff]  ;;  %v28_v5 = vld [vmem:[%s13921_s1 + $0x20] sm:$0xff]  ;;  %v31_v20 = vld [vmem:[%s13921_s1 + $0x38] sm:$0xff] }
   0x3   :  { %v5191_v4 = vpack.c.bf16 %v29_v1, %v25_v0  ;;  %v33_v6 = vld [vmem:[%s13921_s1 + $0x48] sm:$0xff]  ;;  %v5193_v8 = vpack.c.bf16 %v28_v5, %v24_v2  ;;  %v32_v10 = vld [vmem:[%s13921_s1 + $0x40] sm:$0xff]  ;;  %v5255_v22 = vpack.c.bf16 %v31_v20, %v27_v19  ;;  %v26_v23 = vld [vmem:[%s13921_s1 + $0x10] sm:$0xff] }
   0x4   :  { %v37_v7 = vld [vmem:[%s13921_s1 + $0x68] sm:$0xff]  ;;  %v36_v11 = vld [vmem:[%s13921_s1 + $0x60] sm:$0xff]  ;;  %v30_v24 = vld [vmem:[%s13921_s1 + $0x30] sm:$0xff] }
   0x5   :  { %v5195_v9 = vpack.c.bf16 %v37_v7, %v33_v6  ;;  %v41_v12 = vld [vmem:[%s13921_s1 + $0x88] sm:$0xff]  ;;  %5192 = vmatprep.subr.bf16.mxu0 %v5191_v4  ;;  %v5197_v14 = vpack.c.bf16 %v36_v11, %v32_v10  ;;  %v40_v15 = vld [vmem:[%s13921_s1 + $0x80] sm:$0xff]  ;;  %v5257_v25 = vpack.c.bf16 %v30_v24, %v26_v23  ;;  %5256 = vmatprep.subr.bf16.mxu1 %v5255_v22  ;;  %v35_v27 = vld [vmem:[%s13921_s1 + $0x58] sm:$0xff] }
   0x6   :  { %v45_v13 = vld [vmem:[%s13921_s1 + $0xa8] sm:$0xff]  ;;  %5194 = vmatpush1.bf16.msra.mxu0 %v5193_v8  ;;  %v44_v16 = vld [vmem:[%s13921_s1 + $0xa0] sm:$0xff]  ;;  %v39_v28 = vld [vmem:[%s13921_s1 + $0x78] sm:$0xff] }
   0x7   :  { %5196 = vmatprep.subr.bf16.mxu0 %v5195_v9  ;;  %v5199_v17 = vpack.c.bf16 %v45_v13, %v41_v12  ;;  %v49_v18 = vld [vmem:[%s13921_s1 + $0xc8] sm:$0xff]  ;;  %v5201_v26 = vpack.c.bf16 %v44_v16, %v40_v15  ;;  %v34_v29 = vld [vmem:[%s13921_s1 + $0x50] sm:$0xff]  ;;  %v48_v31 = vld [vmem:[%s13921_s1 + $0xc0] sm:$0xff]  ;;  %5258 = vmatpush1.bf16.msra.mxu1 %v5257_v25  ;;  %v5259_v33 = vpack.c.bf16 %v39_v28, %v35_v27 }
   0x8   :  { %v53_v21 = vld [vmem:[%s13921_s1 + $0xe8] sm:$0xff]  ;;  %v52_v32 = vld [vmem:[%s13921_s1 + $0xe0] sm:$0xff]  ;;  %v38_v34 = vld [vmem:[%s13921_s1 + $0x70] sm:$0xff] }
   0x9   :  { %v5203_v30 = vpack.c.bf16 %v53_v21, %v49_v18  ;;  %v57_v35 = vld [vmem:[%s13921_s1 + $0x108] sm:$0xff]  ;;  %v5261_v37 = vpack.c.bf16 %v38_v34, %v34_v29  ;;  %v43_v38 = vld [vmem:[%s13921_s1 + $0x98] sm:$0xff]  ;;  %5260 = vmatprep.subr.bf16.mxu1 %v5259_v33  ;;  %v42_v40 = vld [vmem:[%s13921_s1 + $0x90] sm:$0xff]  ;;  %v5205_v42 = vpack.c.bf16 %v52_v32, %v48_v31 }
   0xa   :  { %5198 = vmatpush1.bf16.msra.mxu0 %v5197_v14  ;;  %v61_v36 = vld [vmem:[%s13921_s1 + $0x128] sm:$0xff]  ;;  %v47_v39 = vld [vmem:[%s13921_s1 + $0xb8] sm:$0xff]  ;;  %v46_v41 = vld [vmem:[%s13921_s1 + $0xb0] sm:$0xff] }
   0xb   :  { %5200 = vmatprep.subr.bf16.mxu0 %v5199_v17  ;;  %v56_v43 = vld [vmem:[%s13921_s1 + $0x100] sm:$0xff]  ;;  %v5263_v45 = vpack.c.bf16 %v47_v39, %v43_v38  ;;  %v5207_v46 = vpack.c.bf16 %v61_v36, %v57_v35  ;;  %5262 = vmatpush1.bf16.msra.mxu1 %v5261_v37  ;;  %v65_v47 = vld [vmem:[%s13921_s1 + $0x148] sm:$0xff]  ;;  %v5265_v48 = vpack.c.bf16 %v46_v41, %v42_v40  ;;  %v51_v49 = vld [vmem:[%s13921_s1 + $0xd8] sm:$0xff] }
   0xc   :  { %v60_v44 = vld [vmem:[%s13921_s1 + $0x120] sm:$0xff]  ;;  %v55_v50 = vld [vmem:[%s13921_s1 + $0xf8] sm:$0xff]  ;;  %v69_v51 = vld [vmem:[%s13921_s1 + $0x168] sm:$0xff] }
   0xd   :  { %5264 = vmatprep.subr.bf16.mxu1 %v5263_v45  ;;  %v5267_v52 = vpack.c.bf16 %v55_v50, %v51_v49  ;;  %v50_v53 = vld [vmem:[%s13921_s1 + $0xd0] sm:$0xff]  ;;  %v5209_v55 = vpack.c.bf16 %v60_v44, %v56_v43  ;;  %v59_v56 = vld [vmem:[%s13921_s1 + $0x118] sm:$0xff]  ;;  %v5211_v58 = vpack.c.bf16 %v69_v51, %v65_v47  ;;  %v64_v59 = vld [vmem:[%s13921_s1 + $0x140] sm:$0xff] }
   0xe   :  { %5202 = vmatpush1.bf16.msra.mxu0 %v5201_v26  ;;  %v54_v54 = vld [vmem:[%s13921_s1 + $0xf0] sm:$0xff]  ;;  %v63_v57 = vld [vmem:[%s13921_s1 + $0x138] sm:$0xff]  ;;  %v68_v60 = vld [vmem:[%s13921_s1 + $0x160] sm:$0xff] }
   0xf   :  { %5204 = vmatprep.subr.bf16.mxu0 %v5203_v30  ;;  %5266 = vmatpush1.bf16.msra.mxu1 %v5265_v48  ;;  %v73_v61 = vld [vmem:[%s13921_s1 + $0x188] sm:$0xff]  ;;  %v5269_v62 = vpack.c.bf16 %v54_v54, %v50_v53  ;;  %v5271_v0 = vpack.c.bf16 %v63_v57, %v59_v56  ;;  %v58_v1 = vld [vmem:[%s13921_s1 + $0x110] sm:$0xff]  ;;  %v67_v4 = vld [vmem:[%s13921_s1 + $0x158] sm:$0xff]  ;;  %v5213_v6 = vpack.c.bf16 %v68_v60, %v64_v59 }
  0x10   :  { %v77_v63 = vld [vmem:[%s13921_s1 + $0x1a8] sm:$0xff]  ;;  %5268 = vmatprep.subr.bf16.mxu1 %v5267_v52  ;;  %v62_v2 = vld [vmem:[%s13921_s1 + $0x130] sm:$0xff]  ;;  %v71_v5 = vld [vmem:[%s13921_s1 + $0x178] sm:$0xff] }
  0x11   :  { %v5215_v7 = vpack.c.bf16 %v77_v63, %v73_v61  ;;  %v72_v8 = vld [vmem:[%s13921_s1 + $0x180] sm:$0xff]  ;;  %v81_v10 = vld [vmem:[%s13921_s1 + $0x1c8] sm:$0xff]  ;;  %v5273_v11 = vpack.c.bf16 %v62_v2, %v58_v1  ;;  %v5275_v13 = vpack.c.bf16 %v71_v5, %v67_v4  ;;  %v66_v14 = vld [vmem:[%s13921_s1 + $0x150] sm:$0xff] }
  0x12   :  { %5206 = vmatpush1.bf16.msra.mxu0 %v5205_v42  ;;  %v76_v9 = vld [vmem:[%s13921_s1 + $0x1a0] sm:$0xff]  ;;  %v85_v12 = vld [vmem:[%s13921_s1 + $0x1e8] sm:$0xff]  ;;  %v70_v15 = vld [vmem:[%s13921_s1 + $0x170] sm:$0xff] }
  0x13   :  { %5208 = vmatprep.subr.bf16.mxu0 %v5207_v46  ;;  %5270 = vmatpush1.bf16.msra.mxu1 %v5269_v62  ;;  %v75_v16 = vld [vmem:[%s13921_s1 + $0x198] sm:$0xff]  ;;  %v5217_v18 = vpack.c.bf16 %v76_v9, %v72_v8  ;;  %v5219_v19 = vpack.c.bf16 %v85_v12, %v81_v10  ;;  %v80_v20 = vld [vmem:[%s13921_s1 + $0x1c0] sm:$0xff]  ;;  %v89_v22 = vld [vmem:[%s13921_s1 + $0x208] sm:$0xff]  ;;  %v5277_v23 = vpack.c.bf16 %v70_v15, %v66_v14 }
  0x14   :  { %5272 = vmatprep.subr.bf16.mxu1 %v5271_v0  ;;  %v79_v17 = vld [vmem:[%s13921_s1 + $0x1b8] sm:$0xff]  ;;  %v84_v21 = vld [vmem:[%s13921_s1 + $0x1e0] sm:$0xff]  ;;  %v93_v24 = vld [vmem:[%s13921_s1 + $0x228] sm:$0xff] }
  0x15   :  { %v5279_v25 = vpack.c.bf16 %v79_v17, %v75_v16  ;;  %v74_v26 = vld [vmem:[%s13921_s1 + $0x190] sm:$0xff]  ;;  %v83_v28 = vld [vmem:[%s13921_s1 + $0x1d8] sm:$0xff]  ;;  %v5221_v30 = vpack.c.bf16 %v84_v21, %v80_v20  ;;  %v5223_v31 = vpack.c.bf16 %v93_v24, %v89_v22  ;;  %v88_v32 = vld [vmem:[%s13921_s1 + $0x200] sm:$0xff] }
  0x16   :  { %5210 = vmatpush1.bf16.msra.mxu0 %v5209_v55  ;;  %v78_v27 = vld [vmem:[%s13921_s1 + $0x1b0] sm:$0xff]  ;;  %v87_v29 = vld [vmem:[%s13921_s1 + $0x1f8] sm:$0xff]  ;;  %v92_v33 = vld [vmem:[%s13921_s1 + $0x220] sm:$0xff] }
  0x17   :  { %5212 = vmatprep.subr.bf16.mxu0 %v5211_v58  ;;  %5274 = vmatpush1.bf16.msra.mxu1 %v5273_v11  ;;  %v97_v34 = vld [vmem:[%s13921_s1 + $0x248] sm:$0xff]  ;;  %v5281_v35 = vpack.c.bf16 %v78_v27, %v74_v26  ;;  %v5283_v37 = vpack.c.bf16 %v87_v29, %v83_v28  ;;  %v82_v38 = vld [vmem:[%s13921_s1 + $0x1d0] sm:$0xff]  ;;  %v91_v40 = vld [vmem:[%s13921_s1 + $0x218] sm:$0xff]  ;;  %v5225_v42 = vpack.c.bf16 %v92_v33, %v88_v32 }
  0x18   :  { %5276 = vmatprep.subr.bf16.mxu1 %v5275_v13  ;;  %v101_v36 = vld [vmem:[%s13921_s1 + $0x268] sm:$0xff]  ;;  %v86_v39 = vld [vmem:[%s13921_s1 + $0x1f0] sm:$0xff]  ;;  %v95_v41 = vld [vmem:[%s13921_s1 + $0x238] sm:$0xff] }
  0x19   :  { %v5227_v43 = vpack.c.bf16 %v101_v36, %v97_v34  ;;  %v96_v44 = vld [vmem:[%s13921_s1 + $0x240] sm:$0xff]  ;;  %v105_v46 = vld [vmem:[%s13921_s1 + $0x288] sm:$0xff]  ;;  %v5285_v47 = vpack.c.bf16 %v86_v39, %v82_v38  ;;  %v5287_v49 = vpack.c.bf16 %v95_v41, %v91_v40  ;;  %v90_v50 = vld [vmem:[%s13921_s1 + $0x210] sm:$0xff] }
  0x1a   :  { %5214 = vmatpush1.bf16.msra.mxu0 %v5213_v6  ;;  %v100_v45 = vld [vmem:[%s13921_s1 + $0x260] sm:$0xff]  ;;  %v109_v48 = vld [vmem:[%s13921_s1 + $0x2a8] sm:$0xff]  ;;  %v94_v51 = vld [vmem:[%s13921_s1 + $0x230] sm:$0xff] }
  0x1b   :  { %5216 = vmatprep.subr.bf16.mxu0 %v5215_v7  ;;  %5278 = vmatpush1.bf16.msra.mxu1 %v5277_v23  ;;  %v99_v52 = vld [vmem:[%s13921_s1 + $0x258] sm:$0xff]  ;;  %v5229_v54 = vpack.c.bf16 %v100_v45, %v96_v44  ;;  %v5231_v55 = vpack.c.bf16 %v109_v48, %v105_v46  ;;  %v104_v56 = vld [vmem:[%s13921_s1 + $0x280] sm:$0xff]  ;;  %v113_v58 = vld [vmem:[%s13921_s1 + $0x2c8] sm:$0xff]  ;;  %v5289_v59 = vpack.c.bf16 %v94_v51, %v90_v50 }
  0x1c   :  { %5280 = vmatprep.subr.bf16.mxu1 %v5279_v25  ;;  %v103_v53 = vld [vmem:[%s13921_s1 + $0x278] sm:$0xff]  ;;  %v108_v57 = vld [vmem:[%s13921_s1 + $0x2a0] sm:$0xff]  ;;  %v117_v60 = vld [vmem:[%s13921_s1 + $0x2e8] sm:$0xff] }
  0x1d   :  { %v5291_v61 = vpack.c.bf16 %v103_v53, %v99_v52  ;;  %v98_v62 = vld [vmem:[%s13921_s1 + $0x250] sm:$0xff]  ;;  %v107_v0 = vld [vmem:[%s13921_s1 + $0x298] sm:$0xff]  ;;  %v5233_v2 = vpack.c.bf16 %v108_v57, %v104_v56  ;;  %v5235_v4 = vpack.c.bf16 %v117_v60, %v113_v58  ;;  %v112_v5 = vld [vmem:[%s13921_s1 + $0x2c0] sm:$0xff] }
  0x1e   :  { %5218 = vmatpush1.bf16.msra.mxu0 %v5217_v18  ;;  %v102_v63 = vld [vmem:[%s13921_s1 + $0x270] sm:$0xff]  ;;  %v111_v1 = vld [vmem:[%s13921_s1 + $0x2b8] sm:$0xff]  ;;  %v116_v6 = vld [vmem:[%s13921_s1 + $0x2e0] sm:$0xff] }
  0x1f   :  { %5220 = vmatprep.subr.bf16.mxu0 %v5219_v19  ;;  %5282 = vmatpush1.bf16.msra.mxu1 %v5281_v35  ;;  %v121_v7 = vld [vmem:[%s13921_s1 + $0x308] sm:$0xff]  ;;  %v5293_v8 = vpack.c.bf16 %v102_v63, %v98_v62  ;;  %v5295_v10 = vpack.c.bf16 %v111_v1, %v107_v0  ;;  %v106_v11 = vld [vmem:[%s13921_s1 + $0x290] sm:$0xff]  ;;  %v115_v13 = vld [vmem:[%s13921_s1 + $0x2d8] sm:$0xff]  ;;  %v5237_v15 = vpack.c.bf16 %v116_v6, %v112_v5 }
  0x20   :  { %5284 = vmatprep.subr.bf16.mxu1 %v5283_v37  ;;  %v125_v9 = vld [vmem:[%s13921_s1 + $0x328] sm:$0xff]  ;;  %v110_v12 = vld [vmem:[%s13921_s1 + $0x2b0] sm:$0xff]  ;;  %v119_v14 = vld [vmem:[%s13921_s1 + $0x2f8] sm:$0xff] }
  0x21   :  { %v5239_v16 = vpack.c.bf16 %v125_v9, %v121_v7  ;;  %v120_v17 = vld [vmem:[%s13921_s1 + $0x300] sm:$0xff]  ;;  %v129_v19 = vld [vmem:[%s13921_s1 + $0x348] sm:$0xff]  ;;  %v5297_v20 = vpack.c.bf16 %v110_v12, %v106_v11  ;;  %v5299_v22 = vpack.c.bf16 %v119_v14, %v115_v13  ;;  %v114_v23 = vld [vmem:[%s13921_s1 + $0x2d0] sm:$0xff] }
  0x22   :  { %5222 = vmatpush1.bf16.msra.mxu0 %v5221_v30  ;;  %v124_v18 = vld [vmem:[%s13921_s1 + $0x320] sm:$0xff]  ;;  %v133_v21 = vld [vmem:[%s13921_s1 + $0x368] sm:$0xff]  ;;  %v118_v24 = vld [vmem:[%s13921_s1 + $0x2f0] sm:$0xff] }
  0x23   :  { %5224 = vmatprep.subr.bf16.mxu0 %v5223_v31  ;;  %5286 = vmatpush1.bf16.msra.mxu1 %v5285_v47  ;;  %v123_v25 = vld [vmem:[%s13921_s1 + $0x318] sm:$0xff]  ;;  %v5241_v27 = vpack.c.bf16 %v124_v18, %v120_v17  ;;  %v5243_v28 = vpack.c.bf16 %v133_v21, %v129_v19  ;;  %v128_v29 = vld [vmem:[%s13921_s1 + $0x340] sm:$0xff]  ;;  %v137_v31 = vld [vmem:[%s13921_s1 + $0x388] sm:$0xff]  ;;  %v5301_v32 = vpack.c.bf16 %v118_v24, %v114_v23 }
  0x24   :  { %5288 = vmatprep.subr.bf16.mxu1 %v5287_v49  ;;  %v127_v26 = vld [vmem:[%s13921_s1 + $0x338] sm:$0xff]  ;;  %v132_v30 = vld [vmem:[%s13921_s1 + $0x360] sm:$0xff]  ;;  %v141_v33 = vld [vmem:[%s13921_s1 + $0x3a8] sm:$0xff] }
  0x25   :  { %v5303_v34 = vpack.c.bf16 %v127_v26, %v123_v25  ;;  %v122_v35 = vld [vmem:[%s13921_s1 + $0x310] sm:$0xff]  ;;  %v131_v37 = vld [vmem:[%s13921_s1 + $0x358] sm:$0xff]  ;;  %v5245_v39 = vpack.c.bf16 %v132_v30, %v128_v29  ;;  %v5247_v40 = vpack.c.bf16 %v141_v33, %v137_v31  ;;  %v136_v41 = vld [vmem:[%s13921_s1 + $0x380] sm:$0xff] }
  0x26   :  { %5226 = vmatpush1.bf16.msra.mxu0 %v5225_v42  ;;  %v126_v36 = vld [vmem:[%s13921_s1 + $0x330] sm:$0xff]  ;;  %v135_v38 = vld [vmem:[%s13921_s1 + $0x378] sm:$0xff]  ;;  %v140_v42 = vld [vmem:[%s13921_s1 + $0x3a0] sm:$0xff] }
  0x27   :  { %5228 = vmatprep.subr.bf16.mxu0 %v5227_v43  ;;  %5290 = vmatpush1.bf16.msra.mxu1 %v5289_v59  ;;  %v145_v43 = vld [vmem:[%s13921_s1 + $0x3c8] sm:$0xff]  ;;  %v5305_v44 = vpack.c.bf16 %v126_v36, %v122_v35  ;;  %v5307_v46 = vpack.c.bf16 %v135_v38, %v131_v37  ;;  %v130_v47 = vld [vmem:[%s13921_s1 + $0x350] sm:$0xff]  ;;  %v139_v49 = vld [vmem:[%s13921_s1 + $0x398] sm:$0xff]  ;;  %v5249_v51 = vpack.c.bf16 %v140_v42, %v136_v41 }
  0x28   :  { %5292 = vmatprep.subr.bf16.mxu1 %v5291_v61  ;;  %v149_v45 = vld [vmem:[%s13921_s1 + $0x3e8] sm:$0xff]  ;;  %v134_v48 = vld [vmem:[%s13921_s1 + $0x370] sm:$0xff]  ;;  %v143_v50 = vld [vmem:[%s13921_s1 + $0x3b8] sm:$0xff] }
  0x29   :  { %v5251_v52 = vpack.c.bf16 %v149_v45, %v145_v43  ;;  %v144_v53 = vld [vmem:[%s13921_s1 + $0x3c0] sm:$0xff]  ;;  %v138_v56 = vld [vmem:[%s13921_s1 + $0x390] sm:$0xff]  ;;  %v5311_v57 = vpack.c.bf16 %v143_v50, %v139_v49  ;;  %v341_v59 = vld [vmem:[%s13922_s3 + $0x8] sm:$0xff] }
  0x2a   :  { %5230 = vmatpush1.bf16.msra.mxu0 %v5229_v54  ;;  %v148_v54 = vld [vmem:[%s13921_s1 + $0x3e0] sm:$0xff]  ;;  %v142_v58 = vld [vmem:[%s13921_s1 + $0x3b0] sm:$0xff]  ;;  %v345_v60 = vld [vmem:[%s13922_s3 + $0x28] sm:$0xff] }
  0x2b   :  { %5232 = vmatprep.subr.bf16.mxu0 %v5231_v55  ;;  %5294 = vmatpush1.bf16.msra.mxu1 %v5293_v8  ;;  %v5309_v55 = vpack.c.bf16 %v134_v48, %v130_v47  ;;  %v147_v61 = vld [vmem:[%s13921_s1 + $0x3d8] sm:$0xff]  ;;  %v5253_v63 = vpack.c.bf16 %v148_v54, %v144_v53  ;;  %v5313_v0 = vpack.c.bf16 %v142_v58, %v138_v56  ;;  %v146_v1 = vld [vmem:[%s13921_s1 + $0x3d0] sm:$0xff]  ;;  %v344_v5 = vld [vmem:[%s13922_s3 + $0x20] sm:$0xff] }
  0x2c   :  { %5296 = vmatprep.subr.bf16.mxu1 %v5295_v10  ;;  %v151_v62 = vld [vmem:[%s13921_s1 + $0x3f8] sm:$0xff]  ;;  %v150_v7 = vld [vmem:[%s13921_s1 + $0x3f0] sm:$0xff]  ;;  %v349_v8 = vld [vmem:[%s13922_s3 + $0x48] sm:$0xff] }
  0x2d   :  { %v5315_v6 = vpack.c.bf16 %v151_v62, %v147_v61  ;;  %v353_v9 = vld [vmem:[%s13922_s3 + $0x68] sm:$0xff]  ;;  %v343_v10 = vld [vmem:[%s13922_s3 + $0x18] sm:$0xff]  ;;  %v23_v12 = vld [vmem:[%s13923_s0] sm:$0xff]  ;;  %v5317_v14 = vpack.c.bf16 %v150_v7, %v146_v1 }
  0x2e   :  { %5234 = vmatpush1.bf16.msra.mxu0 %v5233_v2  ;;  %v5319_v2 = vpack.c.bf16 %v345_v60, %v341_v59  ;;  %v347_v11 = vld [vmem:[%s13922_s3 + $0x38] sm:$0xff]  ;;  %v348_v17 = vld [vmem:[%s13922_s3 + $0x40] sm:$0xff]  ;;  %v357_v21 = vld [vmem:[%s13922_s3 + $0x88] sm:$0xff] }
  0x2f   :  { %5236 = vmatprep.subr.bf16.mxu0 %v5235_v4  ;;  %5298 = vmatpush1.bf16.msra.mxu1 %v5297_v20  ;;  %v340_v4 = vld [vmem:[%s13922_s3] sm:$0xff]  ;;  %v5383_v19 = vpack.c.bf16 %v347_v11, %v343_v10  ;;  %v346_v20 = vld [vmem:[%s13922_s3 + $0x30] sm:$0xff]  ;;  %v351_v23 = vld [vmem:[%s13922_s3 + $0x58] sm:$0xff] }
  0x30   :  { %5300 = vmatprep.subr.bf16.mxu1 %v5299_v22  ;;  %v5321_v13 = vpack.c.bf16 %v344_v5, %v340_v4  ;;  %v352_v18 = vld [vmem:[%s13922_s3 + $0x60] sm:$0xff]  ;;  %v361_v22 = vld [vmem:[%s13922_s3 + $0xa8] sm:$0xff]  ;;  %v355_v24 = vld [vmem:[%s13922_s3 + $0x78] sm:$0xff] }
  0x31   :  { %v5325_v25 = vpack.c.bf16 %v352_v18, %v348_v17  ;;  %v356_v29 = vld [vmem:[%s13922_s3 + $0x80] sm:$0xff]  ;;  %v5387_v31 = vpack.c.bf16 %v355_v24, %v351_v23  ;;  %v365_v33 = vld [vmem:[%s13922_s3 + $0xc8] sm:$0xff]  ;;  %v359_v35 = vld [vmem:[%s13922_s3 + $0x98] sm:$0xff] }
  0x32   :  { %5238 = vmatpush1.bf16.msra.mxu0 %v5237_v15  ;;  %v342_v15 = vld [vmem:[%s13922_s3 + $0x10] sm:$0xff]  ;;  %v360_v30 = vld [vmem:[%s13922_s3 + $0xa0] sm:$0xff]  ;;  %v363_v36 = vld [vmem:[%s13922_s3 + $0xb8] sm:$0xff] }
  0x33   :  { %5240 = vmatprep.subr.bf16.mxu0 %v5239_v16  ;;  %5302 = vmatpush1.bf16.msra.mxu1 %v5301_v32  ;;  %v5323_v16 = vpack.c.bf16 %v353_v9, %v349_v8  ;;  %v5385_v26 = vpack.c.bf16 %v346_v20, %v342_v15  ;;  %v354_v32 = vld [vmem:[%s13922_s3 + $0x70] sm:$0xff]  ;;  %v5329_v37 = vpack.c.bf16 %v360_v30, %v356_v29  ;;  %v364_v41 = vld [vmem:[%s13922_s3 + $0xc0] sm:$0xff]  ;;  %v373_v45 = vld [vmem:[%s13922_s3 + $0x108] sm:$0xff] }
  0x34   :  { %5304 = vmatprep.subr.bf16.mxu1 %v5303_v34  ;;  %v369_v34 = vld [vmem:[%s13922_s3 + $0xe8] sm:$0xff]  ;;  %v368_v42 = vld [vmem:[%s13922_s3 + $0xe0] sm:$0xff]  ;;  %v5391_v43 = vpack.c.bf16 %v363_v36, %v359_v35  ;;  %v367_v47 = vld [vmem:[%s13922_s3 + $0xd8] sm:$0xff] }
  0x35   :  { %v371_v48 = vld [vmem:[%s13922_s3 + $0xf8] sm:$0xff]  ;;  %v5333_v49 = vpack.c.bf16 %v368_v42, %v364_v41  ;;  %v366_v54 = vld [vmem:[%s13922_s3 + $0xd0] sm:$0xff]  ;;  %v385_v1 = vld [vmem:[%s13922_s3 + $0x168] sm:$0xff] }
  0x36   :  { %5242 = vmatpush1.bf16.msra.mxu0 %v5241_v27  ;;  %v350_v27 = vld [vmem:[%s13922_s3 + $0x50] sm:$0xff]  ;;  %v5395_v53 = vpack.c.bf16 %v371_v48, %v367_v47  ;;  %v375_v56 = vld [vmem:[%s13922_s3 + $0x118] sm:$0xff]  ;;  %v380_v4 = vld [vmem:[%s13922_s3 + $0x140] sm:$0xff] }
  0x37   :  { %5244 = vmatprep.subr.bf16.mxu0 %v5243_v28  ;;  %5306 = vmatpush1.bf16.msra.mxu1 %v5305_v44  ;;  %v5327_v28 = vpack.c.bf16 %v361_v22, %v357_v21  ;;  %v5389_v38 = vpack.c.bf16 %v354_v32, %v350_v27  ;;  %v362_v44 = vld [vmem:[%s13922_s3 + $0xb0] sm:$0xff]  ;;  %v384_v5 = vld [vmem:[%s13922_s3 + $0x160] sm:$0xff]  ;;  %v387_v8 = vld [vmem:[%s13922_s3 + $0x178] sm:$0xff] }
  0x38   :  { %5308 = vmatprep.subr.bf16.mxu1 %v5307_v46  ;;  %v377_v46 = vld [vmem:[%s13922_s3 + $0x128] sm:$0xff]  ;;  %v374_v61 = vld [vmem:[%s13922_s3 + $0x110] sm:$0xff]  ;;  %v5341_v7 = vpack.c.bf16 %v384_v5, %v380_v4  ;;  %v392_v17 = vld [vmem:[%s13922_s3 + $0x1a0] sm:$0xff] }
  0x39   :  { %v378_v62 = vld [vmem:[%s13922_s3 + $0x130] sm:$0xff]  ;;  %v391_v18 = vld [vmem:[%s13922_s3 + $0x198] sm:$0xff]  ;;  %v400_v29 = vld [vmem:[%s13922_s3 + $0x1e0] sm:$0xff] }
  0x3a   :  { %5246 = vmatpush1.bf16.msra.mxu0 %v5245_v39  ;;  %v358_v39 = vld [vmem:[%s13922_s3 + $0x90] sm:$0xff]  ;;  %v395_v20 = vld [vmem:[%s13922_s3 + $0x1b8] sm:$0xff]  ;;  %v408_v41 = vld [vmem:[%s13922_s3 + $0x220] sm:$0xff] }
  0x3b   :  { %5248 = vmatprep.subr.bf16.mxu0 %v5247_v40  ;;  %5310 = vmatpush1.bf16.msra.mxu1 %v5309_v55  ;;  %v5331_v40 = vpack.c.bf16 %v369_v34, %v365_v33  ;;  %v5393_v50 = vpack.c.bf16 %v362_v44, %v358_v39  ;;  %v370_v55 = vld [vmem:[%s13922_s3 + $0xf0] sm:$0xff]  ;;  %v5407_v23 = vpack.c.bf16 %v395_v20, %v391_v18  ;;  %v399_v30 = vld [vmem:[%s13922_s3 + $0x1d8] sm:$0xff] }
  0x3c   :  { %5312 = vmatprep.subr.bf16.mxu1 %v5311_v57  ;;  %v379_v57 = vld [vmem:[%s13922_s3 + $0x138] sm:$0xff]  ;;  %v5397_v59 = vpack.c.bf16 %v370_v55, %v366_v54  ;;  %v382_v9 = vld [vmem:[%s13922_s3 + $0x150] sm:$0xff] }
  0x3d   :  { %v5399_v60 = vpack.c.bf16 %v379_v57, %v375_v56  ;;  %v386_v10 = vld [vmem:[%s13922_s3 + $0x170] sm:$0xff]  ;;  %v403_v32 = vld [vmem:[%s13922_s3 + $0x1f8] sm:$0xff] }
  0x3e   :  { %5250 = vmatpush1.bf16.msra.mxu0 %v5249_v51  ;;  %v5335_v51 = vpack.c.bf16 %v377_v46, %v373_v45  ;;  %v390_v21 = vld [vmem:[%s13922_s3 + $0x190] sm:$0xff]  ;;  %v5411_v35 = vpack.c.bf16 %v403_v32, %v399_v30  ;;  %v407_v42 = vld [vmem:[%s13922_s3 + $0x218] sm:$0xff] }
  0x3f   :  { %5252 = vmatprep.subr.bf16.mxu0 %v5251_v52  ;;  %5314 = vmatpush1.bf16.msra.mxu1 %v5313_v0  ;;  %v372_v52 = vld [vmem:[%s13922_s3 + $0x100] sm:$0xff]  ;;  %v381_v0 = vld [vmem:[%s13922_s3 + $0x148] sm:$0xff]  ;;  %v394_v22 = vld [vmem:[%s13922_s3 + $0x1b0] sm:$0xff] }
  0x40   :  { %5316 = vmatprep.subr.bf16.mxu1 %v5315_v6  ;;  %v383_v6 = vld [vmem:[%s13922_s3 + $0x158] sm:$0xff]  ;;  %v5409_v24 = vpack.c.bf16 %v394_v22, %v390_v21  ;;  %v398_v33 = vld [vmem:[%s13922_s3 + $0x1d0] sm:$0xff]  ;;  %v437_v21 = vld [vmem:[%s13922_s3 + $0x308] sm:$0xff] }
  0x41   :  { %v5403_v11 = vpack.c.bf16 %v387_v8, %v383_v6  ;;  %v402_v34 = vld [vmem:[%s13922_s3 + $0x1f0] sm:$0xff]  ;;  %v411_v44 = vld [vmem:[%s13922_s3 + $0x238] sm:$0xff]  ;;  %v441_v22 = vld [vmem:[%s13922_s3 + $0x328] sm:$0xff] }
  0x42   :  { %5254 = vmatpush1.bf16.msra.mxu0 %v5253_v63  ;;  %v5401_v63 = vpack.c.bf16 %v378_v62, %v374_v61  ;;  %v5413_v36 = vpack.c.bf16 %v402_v34, %v398_v33  ;;  %v406_v45 = vld [vmem:[%s13922_s3 + $0x210] sm:$0xff]  ;;  %v5415_v47 = vpack.c.bf16 %v411_v44, %v407_v42  ;;  %v419_v55 = vld [vmem:[%s13922_s3 + $0x278] sm:$0xff]  ;;  %v425_v61 = vld [vmem:[%s13922_s3 + $0x2a8] sm:$0xff] }
  0x43   :  { %5320 = vmatprep.subr.bf16.mxu0 %v5319_v2  ;;  %5318 = vmatpush1.bf16.msra.mxu1 %v5317_v14  ;;  %v5339_v2 = vpack.c.bf16 %v385_v1, %v381_v0  ;;  %v393_v14 = vld [vmem:[%s13922_s3 + $0x1a8] sm:$0xff]  ;;  %v410_v46 = vld [vmem:[%s13922_s3 + $0x230] sm:$0xff]  ;;  %v424_v0 = vld [vmem:[%s13922_s3 + $0x2a0] sm:$0xff] }
  0x44   :  { %5384 = vmatprep.subr.bf16.mxu1 %v5383_v19  ;;  %v5417_v48 = vpack.c.bf16 %v410_v46, %v406_v45  ;;  %v414_v56 = vld [vmem:[%s13922_s3 + $0x250] sm:$0xff]  ;;  %v423_v1 = vld [vmem:[%s13922_s3 + $0x298] sm:$0xff]  ;;  %v445_v33 = vld [vmem:[%s13922_s3 + $0x348] sm:$0xff] }
  0x45   :  { %239 = vmatmul.mubr.f32.vlgmr.msra.gmra.mrb[0].mxu0 %v23_v12  ;;  %v418_v57 = vld [vmem:[%s13922_s3 + $0x270] sm:$0xff]  ;;  %v427_v4 = vld [vmem:[%s13922_s3 + $0x2b8] sm:$0xff]  ;;  %v449_v34 = vld [vmem:[%s13922_s3 + $0x368] sm:$0xff] }
  0x46   :  { %5322 = vmatpush1.bf16.msra.mxu0 %v5321_v13  ;;  %554 = vmatprep.mubr.f32.mxu0 %v7496_v3  ;;  %v389_v13 = vld [vmem:[%s13922_s3 + $0x188] sm:$0xff]  ;;  %v422_v5 = vld [vmem:[%s13922_s3 + $0x290] sm:$0xff] }
  0x47   :  { %5324 = vmatprep.subr.bf16.mxu0 %v5323_v16  ;;  %310 = vmatmul.mubr.f32.vlgmr.msra.gmra.mrb[0].mxu1 %v23_v12  ;;  %v5405_v12 = vpack.c.bf16 %v386_v10, %v382_v9  ;;  %v5343_v15 = vpack.c.bf16 %v393_v14, %v389_v13  ;;  %v388_v16 = vld [vmem:[%s13922_s3 + $0x180] sm:$0xff]  ;;  %v426_v6 = vld [vmem:[%s13922_s3 + $0x2b0] sm:$0xff]  ;;  %v429_v9 = vld [vmem:[%s13922_s3 + $0x2c8] sm:$0xff] }
  0x48   :  { %5386 = vmatpush1.bf16.msra.mxu1 %v5385_v26  ;;  %625 = vmatprep.mubr.f32.mxu1 %v7496_v3  ;;  %v376_v3 = vld [vmem:[%s13922_s3 + $0x120] sm:$0xff]  ;;  %v5345_v19 = vpack.c.bf16 %v392_v17, %v388_v16  ;;  %v401_v26 = vld [vmem:[%s13922_s3 + $0x1e8] sm:$0xff]  ;;  %v5425_v8 = vpack.c.bf16 %v426_v6, %v422_v5  ;;  %v431_v14 = vld [vmem:[%s13922_s3 + $0x2d8] sm:$0xff] }
  0x49   :  { %5388 = vmatprep.subr.bf16.mxu1 %v5387_v31  ;;  %v5337_v58 = vpack.c.bf16 %v376_v3, %v372_v52  ;;  %v412_v52 = vld [vmem:[%s13922_s3 + $0x240] sm:$0xff]  ;;  %v433_v10 = vld [vmem:[%s13922_s3 + $0x2e8] sm:$0xff]  ;;  %v435_v16 = vld [vmem:[%s13922_s3 + $0x2f8] sm:$0xff] }
  0x4a   :  { %5326 = vmatpush1.bf16.msra.mxu0 %v5325_v25  ;;  %v397_v25 = vld [vmem:[%s13922_s3 + $0x1c8] sm:$0xff]  ;;  %v416_v3 = vld [vmem:[%s13922_s3 + $0x260] sm:$0xff]  ;;  %v430_v17 = vld [vmem:[%s13922_s3 + $0x2d0] sm:$0xff] }
  0x4b   :  { %5328 = vmatprep.subr.bf16.mxu0 %v5327_v28  ;;  %v5347_v27 = vpack.c.bf16 %v401_v26, %v397_v25  ;;  %v396_v28 = vld [vmem:[%s13922_s3 + $0x1c0] sm:$0xff]  ;;  %v5357_v54 = vpack.c.bf16 %v416_v3, %v412_v52  ;;  %v434_v18 = vld [vmem:[%s13922_s3 + $0x2f0] sm:$0xff]  ;;  %v439_v26 = vld [vmem:[%s13922_s3 + $0x318] sm:$0xff] }
  0x4c   :  { %5390 = vmatpush1.bf16.msra.mxu1 %v5389_v38  ;;  %v5349_v31 = vpack.c.bf16 %v400_v29, %v396_v28  ;;  %v409_v38 = vld [vmem:[%s13922_s3 + $0x228] sm:$0xff]  ;;  %v432_v13 = vld [vmem:[%s13922_s3 + $0x2e0] sm:$0xff]  ;;  %v5429_v20 = vpack.c.bf16 %v434_v18, %v430_v17  ;;  %v443_v28 = vld [vmem:[%s13922_s3 + $0x338] sm:$0xff] }
  0x4d   :  { %5392 = vmatprep.subr.bf16.mxu1 %v5391_v43  ;;  %v440_v25 = vld [vmem:[%s13922_s3 + $0x320] sm:$0xff]  ;;  %v438_v29 = vld [vmem:[%s13922_s3 + $0x310] sm:$0xff]  ;;  %v453_v45 = vld [vmem:[%s13922_s3 + $0x388] sm:$0xff] }
  0x4e   :  { %5330 = vmatpush1.bf16.msra.mxu0 %v5329_v37  ;;  %v405_v37 = vld [vmem:[%s13922_s3 + $0x208] sm:$0xff]  ;;  %v442_v30 = vld [vmem:[%s13922_s3 + $0x330] sm:$0xff] }
  0x4f   :  { %5332 = vmatprep.subr.bf16.mxu0 %v5331_v40  ;;  %v5351_v39 = vpack.c.bf16 %v409_v38, %v405_v37  ;;  %v404_v40 = vld [vmem:[%s13922_s3 + $0x200] sm:$0xff]  ;;  %v5433_v32 = vpack.c.bf16 %v442_v30, %v438_v29  ;;  %v447_v38 = vld [vmem:[%s13922_s3 + $0x358] sm:$0xff]  ;;  %v450_v42 = vld [vmem:[%s13922_s3 + $0x370] sm:$0xff] }
  0x50   :  { %5394 = vmatpush1.bf16.msra.mxu1 %v5393_v50  ;;  %v5353_v43 = vpack.c.bf16 %v408_v41, %v404_v40  ;;  %v417_v50 = vld [vmem:[%s13922_s3 + $0x268] sm:$0xff]  ;;  %v448_v37 = vld [vmem:[%s13922_s3 + $0x360] sm:$0xff]  ;;  %v451_v40 = vld [vmem:[%s13922_s3 + $0x378] sm:$0xff] }
  0x51   :  { %5396 = vmatprep.subr.bf16.mxu1 %v5395_v53  ;;  %v415_v53 = vld [vmem:[%s13922_s3 + $0x258] sm:$0xff]  ;;  %v446_v41 = vld [vmem:[%s13922_s3 + $0x350] sm:$0xff]  ;;  %v457_v46 = vld [vmem:[%s13922_s3 + $0x3a8] sm:$0xff] }
  0x52   :  { %5334 = vmatpush1.bf16.msra.mxu0 %v5333_v49  ;;  %v413_v49 = vld [vmem:[%s13922_s3 + $0x248] sm:$0xff]  ;;  %v5437_v44 = vpack.c.bf16 %v450_v42, %v446_v41 }
  0x53   :  { %5336 = vmatprep.subr.bf16.mxu0 %v5335_v51  ;;  %v5355_v51 = vpack.c.bf16 %v417_v50, %v413_v49  ;;  %v456_v49 = vld [vmem:[%s13922_s3 + $0x3a0] sm:$0xff]  ;;  %v455_v50 = vld [vmem:[%s13922_s3 + $0x398] sm:$0xff]  ;;  %v664_v5 = vld [vmem:[%s13921_s1 + $0x28] sm:$0xff] }
  0x54   :  { %5398 = vmatpush1.bf16.msra.mxu1 %v5397_v59  ;;  %v5421_v59 = vpack.c.bf16 %v418_v57, %v414_v56  ;;  %v465_v57 = vld [vmem:[%s13922_s3 + $0x3e8] sm:$0xff] }
  0x55   :  { %5400 = vmatprep.subr.bf16.mxu1 %v5399_v60  ;;  %v421_v60 = vld [vmem:[%s13922_s3 + $0x288] sm:$0xff] }
  0x56   :  { %5338 = vmatpush1.bf16.msra.mxu0 %v5337_v58  ;;  %v5419_v58 = vpack.c.bf16 %v419_v55, %v415_v53  ;;  %v5359_v62 = vpack.c.bf16 %v425_v61, %v421_v60  ;;  %v454_v53 = vld [vmem:[%s13922_s3 + $0x390] sm:$0xff]  ;;  %v461_v55 = vld [vmem:[%s13922_s3 + $0x3c8] sm:$0xff]  ;;  %v463_v61 = vld [vmem:[%s13922_s3 + $0x3d8] sm:$0xff] }
  0x57   :  { %5340 = vmatprep.subr.bf16.mxu0 %v5339_v2  ;;  %v5379_v60 = vpack.c.bf16 %v465_v57, %v461_v55  ;;  %v667_v57 = vld [vmem:[%s13921_s1 + $0x40] sm:$0xff] }
  0x58   :  { %5402 = vmatpush1.bf16.msra.mxu1 %v5401_v63  ;;  %v420_v63 = vld [vmem:[%s13922_s3 + $0x280] sm:$0xff] }
  0x59   :  { %5404 = vmatprep.subr.bf16.mxu1 %v5403_v11  ;;  %v5361_v2 = vpack.c.bf16 %v424_v0, %v420_v63  ;;  %v5363_v11 = vpack.c.bf16 %v433_v10, %v429_v9  ;;  %v462_v63 = vld [vmem:[%s13922_s3 + $0x3d0] sm:$0xff]  ;;  %v666_v9 = vld [vmem:[%s13921_s1 + $0x38] sm:$0xff] }
  0x5a   :  { %5342 = vmatpush1.bf16.msra.mxu0 %v5341_v7  ;;  %v5423_v7 = vpack.c.bf16 %v427_v4, %v423_v1  ;;  %v660_v4 = vld [vmem:[%s13921_s1 + $0x8] sm:$0xff] }
  0x5b   :  { %5344 = vmatprep.subr.bf16.mxu0 %v5343_v15  ;;  %v5447_v6 = vpack.c.bf16 %v664_v5, %v660_v4  ;;  %v682_v4 = vld [vmem:[%s13921_s1 + $0xb8] sm:$0xff] }
  0x5c   :  { %5406 = vmatpush1.bf16.msra.mxu1 %v5405_v12  ;;  %v428_v12 = vld [vmem:[%s13922_s3 + $0x2c0] sm:$0xff] }
  0x5d   :  { %5408 = vmatprep.subr.bf16.mxu1 %v5407_v23  ;;  %v5365_v15 = vpack.c.bf16 %v432_v13, %v428_v12  ;;  %v5367_v23 = vpack.c.bf16 %v441_v22, %v437_v21 }
  0x5e   :  { %5346 = vmatpush1.bf16.msra.mxu0 %v5345_v19  ;;  %v5427_v19 = vpack.c.bf16 %v435_v16, %v431_v14  ;;  %v152_v14 = vld [vmem:[%s13924_s2] sm:$0xf] }
  0x5f   :  { %5348 = vmatprep.subr.bf16.mxu0 %v5347_v27 }
  0x60   :  { %5410 = vmatpush1.bf16.msra.mxu1 %v5409_v24  ;;  %v436_v24 = vld [vmem:[%s13922_s3 + $0x300] sm:$0xff] }
  0x61   :  { %5412 = vmatprep.subr.bf16.mxu1 %v5411_v35  ;;  %v5369_v27 = vpack.c.bf16 %v440_v25, %v436_v24  ;;  %v5371_v35 = vpack.c.bf16 %v449_v34, %v445_v33 }
  0x62   :  { %5350 = vmatpush1.bf16.msra.mxu0 %v5349_v31  ;;  %v5431_v31 = vpack.c.bf16 %v443_v28, %v439_v26 }
  0x63   :  { %5352 = vmatprep.subr.bf16.mxu0 %v5351_v39 }
  0x64   :  { %5414 = vmatpush1.bf16.msra.mxu1 %v5413_v36  ;;  %v444_v36 = vld [vmem:[%s13922_s3 + $0x340] sm:$0xff] }
  0x65   :  { %5416 = vmatprep.subr.bf16.mxu1 %v5415_v47  ;;  %v5373_v39 = vpack.c.bf16 %v448_v37, %v444_v36  ;;  %v452_v47 = vld [vmem:[%s13922_s3 + $0x380] sm:$0xff] }
  0x66   :  { %5354 = vmatpush1.bf16.msra.mxu0 %v5353_v43  ;;  %v5435_v43 = vpack.c.bf16 %v451_v40, %v447_v38  ;;  %v5377_v52 = vpack.c.bf16 %v456_v49, %v452_v47  ;;  %v672_v49 = vld [vmem:[%s13921_s1 + $0x68] sm:$0xff] }
  0x67   :  { %5356 = vmatprep.subr.bf16.mxu0 %v5355_v51  ;;  %v459_v51 = vld [vmem:[%s13922_s3 + $0x3b8] sm:$0xff] }
  0x68   :  { %5418 = vmatpush1.bf16.msra.mxu1 %v5417_v48  ;;  %v5375_v48 = vpack.c.bf16 %v457_v46, %v453_v45  ;;  %v5439_v3 = vpack.c.bf16 %v459_v51, %v455_v50  ;;  %v659_v45 = vld [vmem:[%s13921_s1] sm:$0xff]  ;;  %v661_v50 = vld [vmem:[%s13921_s1 + $0x10] sm:$0xff] }
  0x69   :  { %5420 = vmatprep.subr.bf16.mxu1 %v5419_v58  ;;  %v460_v58 = vld [vmem:[%s13922_s3 + $0x3c0] sm:$0xff]  ;;  %v665_v51 = vld [vmem:[%s13921_s1 + $0x30] sm:$0xff] }
  0x6a   :  { %5358 = vmatpush1.bf16.msra.mxu0 %v5357_v54  ;;  %v458_v54 = vld [vmem:[%s13922_s3 + $0x3b0] sm:$0xff]  ;;  %v663_v46 = vld [vmem:[%s13921_s1 + $0x20] sm:$0xff] }
  0x6b   :  { %5360 = vmatprep.subr.bf16.mxu0 %v5359_v62  ;;  %v5441_v56 = vpack.c.bf16 %v458_v54, %v454_v53  ;;  %v467_v62 = vld [vmem:[%s13922_s3 + $0x3f8] sm:$0xff] }
  0x6c   :  { %5422 = vmatpush1.bf16.msra.mxu1 %v5421_v59  ;;  %v464_v59 = vld [vmem:[%s13922_s3 + $0x3e0] sm:$0xff]  ;;  %v5443_v1 = vpack.c.bf16 %v467_v62, %v463_v61  ;;  %v670_v53 = vld [vmem:[%s13921_s1 + $0x58] sm:$0xff]  ;;  %v5513_v61 = vpack.c.bf16 %v665_v51, %v661_v50  ;;  %v712_v50 = vld [vmem:[%s13921_s1 + $0x1a8] sm:$0xff] }
  0x6d   :  { %5424 = vmatprep.subr.bf16.mxu1 %v5423_v7  ;;  %v5381_v0 = vpack.c.bf16 %v464_v59, %v460_v58  ;;  %v674_v54 = vld [vmem:[%s13921_s1 + $0x78] sm:$0xff]  ;;  %v671_v58 = vld [vmem:[%s13921_s1 + $0x60] sm:$0xff]  ;;  %v676_v59 = vld [vmem:[%s13921_s1 + $0x88] sm:$0xff] }
  0x6e   :  { %5362 = vmatpush1.bf16.msra.mxu0 %v5361_v2  ;;  %v466_v2 = vld [vmem:[%s13922_s3 + $0x3f0] sm:$0xff]  ;;  %v5515_v62 = vpack.c.bf16 %v674_v54, %v670_v53 }
  0x6f   :  { %5364 = vmatprep.subr.bf16.mxu0 %v5363_v11  ;;  %v5445_v7 = vpack.c.bf16 %v466_v2, %v462_v63  ;;  %v154_v11 = vlaneseq  ;;  %v669_v63 = vld [vmem:[%s13921_s1 + $0x50] sm:$0xff]  ;;  %v678_v2 = vld [vmem:[%s13921_s1 + $0x98] sm:$0xff] }
  0x70   :  { %5426 = vmatpush1.bf16.msra.mxu1 %v5425_v8  ;;  %v662_v8 = vld [vmem:[%s13921_s1 + $0x18] sm:$0xff]  ;;  %v705_v53 = vld [vmem:[%s13921_s1 + $0x170] sm:$0xff] }
  0x71   :  { %5428 = vmatprep.subr.bf16.mxu1 %v5427_v19  ;;  %v5511_v10 = vpack.c.bf16 %v666_v9, %v662_v8  ;;  %v155_v12 = vshrl.u32 %v154_v11, 7  ;;  %v684_v8 = vld [vmem:[%s13921_s1 + $0xc8] sm:$0xff]  ;;  %v5519_v11 = vpack.c.bf16 %v682_v4, %v678_v2  ;;  %v718_v4 = vld [vmem:[%s13921_s1 + $0x1d8] sm:$0xff] }
  0x72   :  { %5366 = vmatpush1.bf16.msra.mxu0 %v5365_v15  ;;  %v688_v9 = vld [vmem:[%s13921_s1 + $0xe8] sm:$0xff] }
  0x73   :  { %5368 = vmatprep.subr.bf16.mxu0 %v5367_v23  ;;  %v8324_v13 = vsub.s32 0, %v155_v12  ;;  %v8329_v15 = vsub.s32 1, %v155_v12  ;;  %v8333_v18 = vsub.s32 3, %v155_v12  ;;  %v8336_v26 = vsub.s32 2, %v155_v12  ;;  %v677_v12 = vld [vmem:[%s13921_s1 + $0x90] sm:$0xff] }
  0x74   :  { %5430 = vmatpush1.bf16.msra.mxu1 %v5429_v20 }
  0x75   :  { %5432 = vmatprep.subr.bf16.mxu1 %v5431_v31  ;;  %v157_v16 = vrot.slane %v152_v14, %v8324_v13  ;;  %v161_v17 = vrot.slane %v152_v14, %v8329_v15  ;;  %v169_v24 = vrot.slane %v152_v14, %v8333_v18  ;;  %v165_v30 = vrot.slane %v152_v14, %v8336_v26  ;;  %v681_v14 = vld [vmem:[%s13921_s1 + $0xb0] sm:$0xff] }
  0x76   :  { %5370 = vmatpush1.bf16.msra.mxu0 %v5369_v27 }
  0x77   :  { %5372 = vmatprep.subr.bf16.mxu0 %v5371_v35 }
  0x78   :  { %5434 = vmatpush1.bf16.msra.mxu1 %v5433_v32 }
  0x79   :  { %5436 = vmatprep.subr.bf16.mxu1 %v5435_v43 }
  0x7a   :  { %5374 = vmatpush1.bf16.msra.mxu0 %v5373_v39 }
  0x7b   :  { %5376 = vmatprep.subr.bf16.mxu0 %v5375_v48  ;;  %v668_v48 = vld [vmem:[%s13921_s1 + $0x48] sm:$0xff] }
  0x7c   :  { %5438 = vmatpush1.bf16.msra.mxu1 %v5437_v44 }
  0x7d   :  { %5440 = vmatprep.subr.bf16.mxu1 %v5439_v3  ;;  %v5449_v3 = vpack.c.bf16 %v663_v46, %v659_v45  ;;  %v706_v45 = vld [vmem:[%s13921_s1 + $0x178] sm:$0xff] }
  0x7e   :  { %5378 = vmatpush1.bf16.msra.mxu0 %v5377_v52 }
  0x7f   :  { %5380 = vmatprep.subr.bf16.mxu0 %v5379_v60  ;;  %v680_v60 = vld [vmem:[%s13921_s1 + $0xa8] sm:$0xff] }
  0x80   :  { %5442 = vmatpush1.bf16.msra.mxu1 %v5441_v56  ;;  %v5451_v56 = vpack.c.bf16 %v672_v49, %v668_v48  ;;  %v5455_v5 = vpack.c.bf16 %v680_v60, %v676_v59  ;;  %v703_v48 = vld [vmem:[%s13921_s1 + $0x160] sm:$0xff]  ;;  %v708_v49 = vld [vmem:[%s13921_s1 + $0x188] sm:$0xff] }
  0x81   :  { %5444 = vmatprep.subr.bf16.mxu1 %v5443_v1  ;;  %v5453_v1 = vpack.c.bf16 %v671_v58, %v667_v57  ;;  %v5471_v57 = vpack.c.bf16 %v712_v50, %v708_v49  ;;  %v707_v58 = vld [vmem:[%s13921_s1 + $0x180] sm:$0xff]  ;;  %v716_v60 = vld [vmem:[%s13921_s1 + $0x1c8] sm:$0xff] }
  0x82   :  { %5382 = vmatpush1.bf16.msra.mxu0 %v5381_v0  ;;  %v673_v0 = vld [vmem:[%s13921_s1 + $0x70] sm:$0xff]  ;;  %v711_v59 = vld [vmem:[%s13921_s1 + $0x1a0] sm:$0xff]  ;;  %v748_v50 = vld [vmem:[%s13921_s1 + $0x2c8] sm:$0xff] }
  0x83   :  { %5448 = vmatprep.subr.bf16.mxu0 %v5447_v6  ;;  %v675_v6 = vld [vmem:[%s13921_s1 + $0x80] sm:$0xff]  ;;  %v5473_v2 = vpack.c.bf16 %v711_v59, %v707_v58 }
  0x84   :  { %5446 = vmatpush1.bf16.msra.mxu1 %v5445_v7  ;;  %v679_v7 = vld [vmem:[%s13921_s1 + $0xa0] sm:$0xff] }
  0x85   :  { %5512 = vmatprep.subr.bf16.mxu1 %v5511_v10  ;;  %v5517_v10 = vpack.c.bf16 %v673_v0, %v669_v63  ;;  %v709_v0 = vld [vmem:[%s13921_s1 + $0x190] sm:$0xff]  ;;  %v743_v49 = vld [vmem:[%s13921_s1 + $0x2a0] sm:$0xff] }
  0x86   :  { %v747_v59 = vld [vmem:[%s13921_s1 + $0x2c0] sm:$0xff] }
 0x118   :  { %v240_v19 = vpop.f32.mrb[0].mxu0 }
 0x119   :  { %v241_v20 = vadd.f32 %v240_v19, %v157_v16  ;;  %v242_v21 = vpop.f32.mrb[1].mxu0  ;;  %v5457_v16 = vpack.c.bf16 %v679_v7, %v675_v6  ;;  %v690_v19 = vld [vmem:[%s13921_s1 + $0xf8] sm:$0xff]  ;;  %v715_v7 = vld [vmem:[%s13921_s1 + $0x1c0] sm:$0xff] }
 0x11a   :  { %v243_v22 = vadd.f32 %v242_v21, %v161_v17  ;;  %v311_v27 = vpop.f32.mrb[0].mxu1  ;;  %v686_v17 = vld [vmem:[%s13921_s1 + $0xd8] sm:$0xff]  ;;  %v683_v21 = vld [vmem:[%s13921_s1 + $0xc0] sm:$0xff] }
 0x11b   :  { %v5127_v23 = vmul.f32 -1.442695, %v241_v20  ;;  %v313_v28 = vpop.f32.mrb[1].mxu1  ;;  %v312_v32 = vadd.f32 %v311_v27, %v165_v30  ;;  %v5459_v20 = vpack.c.bf16 %v688_v9, %v684_v8  ;;  %v5523_v27 = vpack.c.bf16 %v690_v19, %v686_v17  ;;  %v719_v8 = vld [vmem:[%s13921_s1 + $0x1e0] sm:$0xff]  ;;  %v724_v9 = vld [vmem:[%s13921_s1 + $0x208] sm:$0xff]  ;;  %v726_v19 = vld [vmem:[%s13921_s1 + $0x218] sm:$0xff] }
 0x11c   :  { %v5128_v25 = vmul.f32 -1.442695, %v243_v22  ;;  %v314_v29 = vadd.f32 %v313_v28, %v169_v24  ;;  %v687_v22 = vld [vmem:[%s13921_s1 + $0xe0] sm:$0xff]  ;;  %v696_v24 = vld [vmem:[%s13921_s1 + $0x128] sm:$0xff]  ;;  %v685_v28 = vld [vmem:[%s13921_s1 + $0xd0] sm:$0xff]  ;;  %v5477_v17 = vpack.c.bf16 %v719_v8, %v715_v7 }
 0x11d   :  { %7240 = vpow2.f32 %v5127_v23  ;;  %v692_v23 = vld [vmem:[%s13921_s1 + $0x108] sm:$0xff]  ;;  %v5461_v30 = vpack.c.bf16 %v687_v22, %v683_v21  ;;  %v723_v22 = vld [vmem:[%s13921_s1 + $0x200] sm:$0xff] }
 0x11e   :  { %7242 = vpow2.f32 %v5128_v25  ;;  %v5129_v31 = vmul.f32 -1.442695, %v314_v29  ;;  %v5521_v25 = vpack.c.bf16 %v681_v14, %v677_v12  ;;  %v689_v29 = vld [vmem:[%s13921_s1 + $0xf0] sm:$0xff]  ;;  %v755_v8 = vld [vmem:[%s13921_s1 + $0x300] sm:$0xff] }
 0x11f   :  { %v717_v14 = vld [vmem:[%s13921_s1 + $0x1d0] sm:$0xff] }
 0x120   :  { %7244 = vpow2.f32 %v5129_v31  ;;  %v694_v31 = vld [vmem:[%s13921_s1 + $0x118] sm:$0xff] }
 0x121   :  { %7246 = vtanh.f32 %v312_v32  ;;  %v698_v32 = vld [vmem:[%s13921_s1 + $0x138] sm:$0xff] }
 0x127   :  { %v7241_v33 = vpop.eup %7240 }
 0x128   :  { %v7243_v34 = vpop.eup %7242  ;;  %v319_v35 = vadd.f32 1.0, %v7241_v33  ;;  %v5463_v33 = vpack.c.bf16 %v696_v24, %v692_v23  ;;  %v727_v23 = vld [vmem:[%s13921_s1 + $0x220] sm:$0xff]  ;;  %v732_v24 = vld [vmem:[%s13921_s1 + $0x248] sm:$0xff] }
 0x129   :  { %v325_v36 = vadd.f32 1.0, %v7243_v34  ;;  %v691_v34 = vld [vmem:[%s13921_s1 + $0x100] sm:$0xff] }
 0x12a   :  { %7248 = vrcp.f32 %v319_v35  ;;  %v7245_v37 = vpop.eup %7244  ;;  %v695_v35 = vld [vmem:[%s13921_s1 + $0x120] sm:$0xff] }
 0x12b   :  { %7250 = vrcp.f32 %v325_v36  ;;  %v7247_v38 = vpop.eup %7246  ;;  %v332_v40 = vadd.f32 1.0, %v7245_v37  ;;  %v700_v36 = vld [vmem:[%s13921_s1 + $0x148] sm:$0xff] }
 0x12c   :  { %v704_v37 = vld [vmem:[%s13921_s1 + $0x168] sm:$0xff] }
 0x12d   :  { %7252 = vrcp.f32 %v332_v40  ;;  %v693_v40 = vld [vmem:[%s13921_s1 + $0x110] sm:$0xff]  ;;  %v5467_v46 = vpack.c.bf16 %v704_v37, %v700_v36  ;;  %v735_v36 = vld [vmem:[%s13921_s1 + $0x260] sm:$0xff]  ;;  %v740_v37 = vld [vmem:[%s13921_s1 + $0x288] sm:$0xff] }
 0x134   :  { %v7249_v39 = vpop.eup %7248 }
 0x135   :  { %v7251_v41 = vpop.eup %7250  ;;  %v336_v42 = vmul.f32 %v7249_v39, %v7247_v38  ;;  %v5525_v38 = vpack.c.bf16 %v689_v29, %v685_v28  ;;  %v5527_v39 = vpack.c.bf16 %v698_v32, %v694_v31  ;;  %v725_v29 = vld [vmem:[%s13921_s1 + $0x210] sm:$0xff]  ;;  %v5481_v31 = vpack.c.bf16 %v727_v23, %v723_v22  ;;  %v734_v32 = vld [vmem:[%s13921_s1 + $0x258] sm:$0xff]  ;;  %v763_v23 = vld [vmem:[%s13921_s1 + $0x340] sm:$0xff] }
 0x136   :  { %v335_v43 = vmul.f32 0.0, %v7251_v41  ;;  %v697_v41 = vld [vmem:[%s13921_s1 + $0x130] sm:$0xff] }
 0x137   :  { %v7253_v47 = vpop.eup %7252  ;;  %v5529_v51 = vpack.c.bf16 %v697_v41, %v693_v40  ;;  %v733_v41 = vld [vmem:[%s13921_s1 + $0x250] sm:$0xff] }
 0x138   :  { %v8339_v44 = vadd.f32 %v336_v42, %v335_v43  ;;  %v5465_v42 = vpack.c.bf16 %v695_v35, %v691_v34  ;;  %v702_v43 = vld [vmem:[%s13921_s1 + $0x158] sm:$0xff]  ;;  %v731_v35 = vld [vmem:[%s13921_s1 + $0x240] sm:$0xff] }
 0x13a   :  { %7254 = vtanh.f32 %v8339_v44 }
 0x144   :  { %v7255_v52 = vpop.eup %7254 }
 0x145   :  { %v339_v55 = vmul.f32 %v7255_v52, %v7253_v47  ;;  %v699_v47 = vld [vmem:[%s13921_s1 + $0x140] sm:$0xff]  ;;  %v5531_v52 = vpack.c.bf16 %v706_v45, %v702_v43  ;;  %v5485_v43 = vpack.c.bf16 %v735_v36, %v731_v35  ;;  %v742_v45 = vld [vmem:[%s13921_s1 + $0x298] sm:$0xff] }
 0x146   :  { %v5469_v54 = vpack.c.bf16 %v703_v48, %v699_v47  ;;  %v739_v48 = vld [vmem:[%s13921_s1 + $0x280] sm:$0xff] }
 0x147   :  { %555 = vmatmul.mubr.f32.vlgmr.msra.gmra.mrb[2].mxu0 %v339_v55  ;;  %626 = vmatmul.mubr.f32.vlgmr.msra.gmra.mrb[2].mxu1 %v339_v55  ;;  %v771_v36 = vld [vmem:[%s13921_s1 + $0x380] sm:$0xff] }
 0x148   :  { %5450 = vmatpush1.bf16.msra.mxu0 %v5449_v3  ;;  %873 = vmatprep.mubr.f32.mxu0 %v339_v55  ;;  %v701_v3 = vld [vmem:[%s13921_s1 + $0x150] sm:$0xff] }
 0x149   :  { %944 = vmatprep.mubr.f32.mxu1 %v339_v55  ;;  %5452 = vmatprep.subr.bf16.mxu0 %v5451_v56  ;;  %v710_v55 = vld [vmem:[%s13921_s1 + $0x198] sm:$0xff] }
 0x14a   :  { %5514 = vmatpush1.bf16.msra.mxu1 %v5513_v61  ;;  %v714_v56 = vld [vmem:[%s13921_s1 + $0x1b8] sm:$0xff]  ;;  %v720_v61 = vld [vmem:[%s13921_s1 + $0x1e8] sm:$0xff] }
 0x14b   :  { %5516 = vmatprep.subr.bf16.mxu1 %v5515_v62  ;;  %v5533_v62 = vpack.c.bf16 %v705_v53, %v701_v3  ;;  %v5535_v63 = vpack.c.bf16 %v714_v56, %v710_v55  ;;  %v5475_v6 = vpack.c.bf16 %v720_v61, %v716_v60  ;;  %v741_v53 = vld [vmem:[%s13921_s1 + $0x290] sm:$0xff]  ;;  %v5489_v55 = vpack.c.bf16 %v743_v49, %v739_v48  ;;  %v750_v56 = vld [vmem:[%s13921_s1 + $0x2d8] sm:$0xff]  ;;  %v751_v60 = vld [vmem:[%s13921_s1 + $0x2e0] sm:$0xff] }
 0x14c   :  { %5454 = vmatpush1.bf16.msra.mxu0 %v5453_v1  ;;  %v713_v1 = vld [vmem:[%s13921_s1 + $0x1b0] sm:$0xff]  ;;  %v756_v61 = vld [vmem:[%s13921_s1 + $0x308] sm:$0xff]  ;;  %v779_v49 = vld [vmem:[%s13921_s1 + $0x3c0] sm:$0xff] }
 0x14d   :  { %5456 = vmatprep.subr.bf16.mxu0 %v5455_v5  ;;  %v722_v5 = vld [vmem:[%s13921_s1 + $0x1f8] sm:$0xff] }
 0x14e   :  { %5518 = vmatpush1.bf16.msra.mxu1 %v5517_v10  ;;  %v728_v10 = vld [vmem:[%s13921_s1 + $0x228] sm:$0xff]  ;;  %v5539_v12 = vpack.c.bf16 %v722_v5, %v718_v4  ;;  %v5493_v4 = vpack.c.bf16 %v751_v60, %v747_v59  ;;  %v758_v5 = vld [vmem:[%s13921_s1 + $0x318] sm:$0xff]  ;;  %v975_v59 = vld [vmem:[%s13922_s3] sm:$0xff] }
 0x14f   :  { %5520 = vmatprep.subr.bf16.mxu1 %v5519_v11  ;;  %v5537_v11 = vpack.c.bf16 %v713_v1, %v709_v0  ;;  %v5479_v21 = vpack.c.bf16 %v728_v10, %v724_v9  ;;  %v749_v1 = vld [vmem:[%s13921_s1 + $0x2d0] sm:$0xff]  ;;  %v759_v9 = vld [vmem:[%s13921_s1 + $0x320] sm:$0xff]  ;;  %v764_v10 = vld [vmem:[%s13921_s1 + $0x348] sm:$0xff] }
 0x150   :  { %5458 = vmatpush1.bf16.msra.mxu0 %v5457_v16  ;;  %v721_v16 = vld [vmem:[%s13921_s1 + $0x1f0] sm:$0xff] }
 0x151   :  { %5460 = vmatprep.subr.bf16.mxu0 %v5459_v20  ;;  %v730_v20 = vld [vmem:[%s13921_s1 + $0x238] sm:$0xff] }
 0x152   :  { %5522 = vmatpush1.bf16.msra.mxu1 %v5521_v25  ;;  %v736_v25 = vld [vmem:[%s13921_s1 + $0x268] sm:$0xff]  ;;  %v5543_v28 = vpack.c.bf16 %v730_v20, %v726_v19  ;;  %v5497_v19 = vpack.c.bf16 %v759_v9, %v755_v8  ;;  %v766_v20 = vld [vmem:[%s13921_s1 + $0x358] sm:$0xff]  ;;  %v983_v8 = vld [vmem:[%s13922_s3 + $0x40] sm:$0xff] }
 0x153   :  { %5524 = vmatprep.subr.bf16.mxu1 %v5523_v27  ;;  %v5541_v27 = vpack.c.bf16 %v721_v16, %v717_v14  ;;  %v5483_v34 = vpack.c.bf16 %v736_v25, %v732_v24  ;;  %v757_v16 = vld [vmem:[%s13921_s1 + $0x310] sm:$0xff]  ;;  %v767_v24 = vld [vmem:[%s13921_s1 + $0x360] sm:$0xff]  ;;  %v772_v25 = vld [vmem:[%s13921_s1 + $0x388] sm:$0xff] }
 0x154   :  { %5462 = vmatpush1.bf16.msra.mxu0 %v5461_v30  ;;  %v729_v30 = vld [vmem:[%s13921_s1 + $0x230] sm:$0xff] }
 0x155   :  { %5464 = vmatprep.subr.bf16.mxu0 %v5463_v33  ;;  %v738_v33 = vld [vmem:[%s13921_s1 + $0x278] sm:$0xff] }
 0x156   :  { %5526 = vmatpush1.bf16.msra.mxu1 %v5525_v38  ;;  %v744_v38 = vld [vmem:[%s13921_s1 + $0x2a8] sm:$0xff]  ;;  %v5547_v40 = vpack.c.bf16 %v738_v33, %v734_v32  ;;  %v5501_v32 = vpack.c.bf16 %v767_v24, %v763_v23  ;;  %v774_v33 = vld [vmem:[%s13921_s1 + $0x398] sm:$0xff]  ;;  %v991_v23 = vld [vmem:[%s13922_s3 + $0x80] sm:$0xff] }
 0x157   :  { %5528 = vmatprep.subr.bf16.mxu1 %v5527_v39  ;;  %v5545_v39 = vpack.c.bf16 %v729_v30, %v725_v29  ;;  %v5487_v47 = vpack.c.bf16 %v744_v38, %v740_v37  ;;  %v765_v30 = vld [vmem:[%s13921_s1 + $0x350] sm:$0xff]  ;;  %v775_v37 = vld [vmem:[%s13921_s1 + $0x3a0] sm:$0xff]  ;;  %v780_v38 = vld [vmem:[%s13921_s1 + $0x3c8] sm:$0xff] }
 0x158   :  { %5466 = vmatpush1.bf16.msra.mxu0 %v5465_v42  ;;  %v737_v42 = vld [vmem:[%s13921_s1 + $0x270] sm:$0xff]  ;;  %v995_v24 = vld [vmem:[%s13922_s3 + $0xa0] sm:$0xff] }
 0x159   :  { %5468 = vmatprep.subr.bf16.mxu0 %v5467_v46  ;;  %v746_v46 = vld [vmem:[%s13921_s1 + $0x2b8] sm:$0xff] }
 0x15a   :  { %5530 = vmatpush1.bf16.msra.mxu1 %v5529_v51  ;;  %v752_v51 = vld [vmem:[%s13921_s1 + $0x2e8] sm:$0xff]  ;;  %v5551_v3 = vpack.c.bf16 %v746_v46, %v742_v45  ;;  %v5505_v45 = vpack.c.bf16 %v775_v37, %v771_v36  ;;  %v782_v46 = vld [vmem:[%s13921_s1 + $0x3d8] sm:$0xff]  ;;  %v999_v37 = vld [vmem:[%s13922_s3 + $0xc0] sm:$0xff] }
 0x15b   :  { %5532 = vmatprep.subr.bf16.mxu1 %v5531_v52  ;;  %v5549_v52 = vpack.c.bf16 %v737_v42, %v733_v41  ;;  %v5491_v58 = vpack.c.bf16 %v752_v51, %v748_v50  ;;  %v773_v42 = vld [vmem:[%s13921_s1 + $0x390] sm:$0xff]  ;;  %v783_v50 = vld [vmem:[%s13921_s1 + $0x3e0] sm:$0xff] }
 0x15c   :  { %5470 = vmatpush1.bf16.msra.mxu0 %v5469_v54  ;;  %v745_v54 = vld [vmem:[%s13921_s1 + $0x2b0] sm:$0xff] }
 0x15d   :  { %5472 = vmatprep.subr.bf16.mxu0 %v5471_v57  ;;  %v754_v57 = vld [vmem:[%s13921_s1 + $0x2f8] sm:$0xff] }
 0x15e   :  { %5534 = vmatpush1.bf16.msra.mxu1 %v5533_v62  ;;  %v760_v62 = vld [vmem:[%s13921_s1 + $0x328] sm:$0xff]  ;;  %v5555_v0 = vpack.c.bf16 %v754_v57, %v750_v56 }
 0x15f   :  { %5536 = vmatprep.subr.bf16.mxu1 %v5535_v63  ;;  %v5553_v63 = vpack.c.bf16 %v745_v54, %v741_v53  ;;  %v5495_v7 = vpack.c.bf16 %v760_v62, %v756_v61  ;;  %v785_v53 = vld [vmem:[%s13921_s1 + $0x3f0] sm:$0xff]  ;;  %v5509_v54 = vpack.c.bf16 %v783_v50, %v779_v49  ;;  %v5133_v56 = vld [vmem:[%s13923_s0 + $0x8] sm:$0xff]  ;;  %v979_v61 = vld [vmem:[%s13922_s3 + $0x20] sm:$0xff] }
 0x160   :  { %5474 = vmatpush1.bf16.msra.mxu0 %v5473_v2  ;;  %v753_v2 = vld [vmem:[%s13921_s1 + $0x2f0] sm:$0xff]  ;;  %v976_v57 = vld [vmem:[%s13922_s3 + $0x8] sm:$0xff]  ;;  %v978_v62 = vld [vmem:[%s13922_s3 + $0x18] sm:$0xff] }
 0x161   :  { %5476 = vmatprep.subr.bf16.mxu0 %v5475_v6  ;;  %v762_v6 = vld [vmem:[%s13921_s1 + $0x338] sm:$0xff] }
 0x162   :  { %5538 = vmatpush1.bf16.msra.mxu1 %v5537_v11  ;;  %v768_v11 = vld [vmem:[%s13921_s1 + $0x368] sm:$0xff]  ;;  %v5559_v14 = vpack.c.bf16 %v762_v6, %v758_v5 }
 0x163   :  { %5540 = vmatprep.subr.bf16.mxu1 %v5539_v12  ;;  %v5557_v12 = vpack.c.bf16 %v753_v2, %v749_v1  ;;  %v5499_v22 = vpack.c.bf16 %v768_v11, %v764_v10  ;;  %v977_v2 = vld [vmem:[%s13922_s3 + $0x10] sm:$0xff]  ;;  %v984_v6 = vld [vmem:[%s13922_s3 + $0x48] sm:$0xff]  ;;  %v987_v10 = vld [vmem:[%s13922_s3 + $0x60] sm:$0xff] }
 0x164   :  { %5478 = vmatpush1.bf16.msra.mxu0 %v5477_v17  ;;  %v761_v17 = vld [vmem:[%s13921_s1 + $0x330] sm:$0xff]  ;;  %v986_v11 = vld [vmem:[%s13922_s3 + $0x58] sm:$0xff] }
 0x165   :  { %5480 = vmatprep.subr.bf16.mxu0 %v5479_v21  ;;  %v770_v21 = vld [vmem:[%s13921_s1 + $0x378] sm:$0xff] }
 0x166   :  { %5542 = vmatpush1.bf16.msra.mxu1 %v5541_v27  ;;  %v776_v27 = vld [vmem:[%s13921_s1 + $0x3a8] sm:$0xff]  ;;  %v5563_v29 = vpack.c.bf16 %v770_v21, %v766_v20 }
 0x167   :  { %5544 = vmatprep.subr.bf16.mxu1 %v5543_v28  ;;  %v5561_v28 = vpack.c.bf16 %v761_v17, %v757_v16  ;;  %v5503_v35 = vpack.c.bf16 %v776_v27, %v772_v25  ;;  %v985_v17 = vld [vmem:[%s13922_s3 + $0x50] sm:$0xff]  ;;  %v992_v20 = vld [vmem:[%s13922_s3 + $0x88] sm:$0xff]  ;;  %v5585_v27 = vpack.c.bf16 %v995_v24, %v991_v23 }
 0x168   :  { %5482 = vmatpush1.bf16.msra.mxu0 %v5481_v31  ;;  %v769_v31 = vld [vmem:[%s13921_s1 + $0x370] sm:$0xff]  ;;  %v1036_v23 = vld [vmem:[%s13922_s3 + $0x1e8] sm:$0xff] }
 0x169   :  { %5484 = vmatprep.subr.bf16.mxu0 %v5483_v34  ;;  %v778_v34 = vld [vmem:[%s13921_s1 + $0x3b8] sm:$0xff] }
 0x16a   :  { %5546 = vmatpush1.bf16.msra.mxu1 %v5545_v39  ;;  %v784_v39 = vld [vmem:[%s13921_s1 + $0x3e8] sm:$0xff]  ;;  %v5567_v41 = vpack.c.bf16 %v778_v34, %v774_v33 }
 0x16b   :  { %5548 = vmatprep.subr.bf16.mxu1 %v5547_v40  ;;  %v5565_v40 = vpack.c.bf16 %v769_v31, %v765_v30  ;;  %v5507_v48 = vpack.c.bf16 %v784_v39, %v780_v38  ;;  %v993_v30 = vld [vmem:[%s13922_s3 + $0x90] sm:$0xff]  ;;  %v1000_v33 = vld [vmem:[%s13922_s3 + $0xc8] sm:$0xff]  ;;  %v1003_v38 = vld [vmem:[%s13922_s3 + $0xe0] sm:$0xff] }
 0x16c   :  { %5486 = vmatpush1.bf16.msra.mxu0 %v5485_v43  ;;  %v777_v43 = vld [vmem:[%s13921_s1 + $0x3b0] sm:$0xff]  ;;  %v1004_v34 = vld [vmem:[%s13922_s3 + $0xe8] sm:$0xff]  ;;  %v1002_v39 = vld [vmem:[%s13922_s3 + $0xd8] sm:$0xff] }
 0x16d   :  { %5488 = vmatprep.subr.bf16.mxu0 %v5487_v47  ;;  %v786_v47 = vld [vmem:[%s13921_s1 + $0x3f8] sm:$0xff]  ;;  %v5569_v51 = vpack.c.bf16 %v777_v43, %v773_v42  ;;  %v5587_v36 = vpack.c.bf16 %v1004_v34, %v1000_v33  ;;  %v1005_v42 = vld [vmem:[%s13922_s3 + $0xf0] sm:$0xff]  ;;  %v5589_v43 = vpack.c.bf16 %v1003_v38, %v999_v37  ;;  %v1039_v38 = vld [vmem:[%s13922_s3 + $0x200] sm:$0xff] }
 0x16e   :  { %5550 = vmatpush1.bf16.msra.mxu1 %v5549_v52  ;;  %v5571_v52 = vpack.c.bf16 %v786_v47, %v782_v46  ;;  %v1008_v46 = vld [vmem:[%s13922_s3 + $0x108] sm:$0xff] }
 0x16f   :  { %5552 = vmatprep.subr.bf16.mxu1 %v5551_v3  ;;  %v781_v3 = vld [vmem:[%s13921_s1 + $0x3d0] sm:$0xff]  ;;  %v1012_v47 = vld [vmem:[%s13922_s3 + $0x128] sm:$0xff] }
 0x170   :  { %5490 = vmatpush1.bf16.msra.mxu0 %v5489_v55  ;;  %v5573_v55 = vpack.c.bf16 %v785_v53, %v781_v3  ;;  %v5591_v50 = vpack.c.bf16 %v1012_v47, %v1008_v46  ;;  %v1014_v3 = vld [vmem:[%s13922_s3 + $0x138] sm:$0xff] }
 0x171   :  { %5492 = vmatprep.subr.bf16.mxu0 %v5491_v58  ;;  %v980_v58 = vld [vmem:[%s13922_s3 + $0x28] sm:$0xff] }
 0x172   :  { %5554 = vmatpush1.bf16.msra.mxu1 %v5553_v63  ;;  %v5575_v60 = vpack.c.bf16 %v980_v58, %v976_v57  ;;  %v982_v63 = vld [vmem:[%s13922_s3 + $0x38] sm:$0xff]  ;;  %v1016_v58 = vld [vmem:[%s13922_s3 + $0x148] sm:$0xff] }
 0x173   :  { %5556 = vmatprep.subr.bf16.mxu1 %v5555_v0  ;;  %v5577_v0 = vpack.c.bf16 %v979_v61, %v975_v59  ;;  %v5639_v1 = vpack.c.bf16 %v982_v63, %v978_v62  ;;  %v1020_v59 = vld [vmem:[%s13922_s3 + $0x168] sm:$0xff]  ;;  %v1015_v61 = vld [vmem:[%s13922_s3 + $0x140] sm:$0xff]  ;;  %v1018_v63 = vld [vmem:[%s13922_s3 + $0x158] sm:$0xff] }
 0x174   :  { %5494 = vmatpush1.bf16.msra.mxu0 %v5493_v4  ;;  %v981_v4 = vld [vmem:[%s13922_s3 + $0x30] sm:$0xff]  ;;  %v1019_v62 = vld [vmem:[%s13922_s3 + $0x160] sm:$0xff] }
 0x175   :  { %5496 = vmatprep.subr.bf16.mxu0 %v5495_v7  ;;  %v5641_v5 = vpack.c.bf16 %v981_v4, %v977_v2  ;;  %v988_v7 = vld [vmem:[%s13922_s3 + $0x68] sm:$0xff]  ;;  %v1017_v2 = vld [vmem:[%s13922_s3 + $0x150] sm:$0xff] }
 0x176   :  { %5558 = vmatpush1.bf16.msra.mxu1 %v5557_v12  ;;  %v5579_v9 = vpack.c.bf16 %v988_v7, %v984_v6  ;;  %v990_v12 = vld [vmem:[%s13922_s3 + $0x78] sm:$0xff]  ;;  %v1021_v4 = vld [vmem:[%s13922_s3 + $0x170] sm:$0xff]  ;;  %v1024_v7 = vld [vmem:[%s13922_s3 + $0x188] sm:$0xff] }
 0x177   :  { %5560 = vmatprep.subr.bf16.mxu1 %v5559_v14  ;;  %v5581_v14 = vpack.c.bf16 %v987_v10, %v983_v8  ;;  %v5643_v16 = vpack.c.bf16 %v990_v12, %v986_v11  ;;  %v5661_v6 = vpack.c.bf16 %v1021_v4, %v1017_v2  ;;  %v1028_v8 = vld [vmem:[%s13922_s3 + $0x1a8] sm:$0xff]  ;;  %v1023_v10 = vld [vmem:[%s13922_s3 + $0x180] sm:$0xff]  ;;  %v1026_v12 = vld [vmem:[%s13922_s3 + $0x198] sm:$0xff] }
 0x178   :  { %5498 = vmatpush1.bf16.msra.mxu0 %v5497_v19  ;;  %v989_v19 = vld [vmem:[%s13922_s3 + $0x70] sm:$0xff]  ;;  %v1027_v11 = vld [vmem:[%s13922_s3 + $0x1a0] sm:$0xff]  ;;  %v1062_v2 = vld [vmem:[%s13922_s3 + $0x2b8] sm:$0xff] }
 0x179   :  { %5500 = vmatprep.subr.bf16.mxu0 %v5499_v22  ;;  %v5645_v21 = vpack.c.bf16 %v989_v19, %v985_v17  ;;  %v996_v22 = vld [vmem:[%s13922_s3 + $0xa8] sm:$0xff]  ;;  %v1025_v17 = vld [vmem:[%s13922_s3 + $0x190] sm:$0xff] }
 0x17a   :  { %5562 = vmatpush1.bf16.msra.mxu1 %v5561_v28  ;;  %v5583_v25 = vpack.c.bf16 %v996_v22, %v992_v20  ;;  %v994_v28 = vld [vmem:[%s13922_s3 + $0x98] sm:$0xff]  ;;  %v1029_v19 = vld [vmem:[%s13922_s3 + $0x1b0] sm:$0xff]  ;;  %v1032_v22 = vld [vmem:[%s13922_s3 + $0x1c8] sm:$0xff] }
 0x17b   :  { %5564 = vmatprep.subr.bf16.mxu1 %v5563_v29  ;;  %v998_v29 = vld [vmem:[%s13922_s3 + $0xb8] sm:$0xff]  ;;  %v5603_v24 = vpack.c.bf16 %v1036_v23, %v1032_v22  ;;  %v1057_v4 = vld [vmem:[%s13922_s3 + $0x290] sm:$0xff]  ;;  %v1072_v23 = vld [vmem:[%s13922_s3 + $0x308] sm:$0xff] }
 0x17c   :  { %5502 = vmatpush1.bf16.msra.mxu0 %v5501_v32  ;;  %v5647_v31 = vpack.c.bf16 %v998_v29, %v994_v28  ;;  %v997_v32 = vld [vmem:[%s13922_s3 + $0xb0] sm:$0xff]  ;;  %v1034_v28 = vld [vmem:[%s13922_s3 + $0x1d8] sm:$0xff] }
 0x17d   :  { %5504 = vmatprep.subr.bf16.mxu0 %v5503_v35  ;;  %v5649_v35 = vpack.c.bf16 %v997_v32, %v993_v30  ;;  %v1038_v30 = vld [vmem:[%s13922_s3 + $0x1f8] sm:$0xff]  ;;  %v1037_v32 = vld [vmem:[%s13922_s3 + $0x1f0] sm:$0xff] }
 0x17e   :  { %5566 = vmatpush1.bf16.msra.mxu1 %v5565_v40  ;;  %v1006_v40 = vld [vmem:[%s13922_s3 + $0xf8] sm:$0xff]  ;;  %v5667_v33 = vpack.c.bf16 %v1038_v30, %v1034_v28  ;;  %v1075_v28 = vld [vmem:[%s13922_s3 + $0x320] sm:$0xff] }
 0x17f   :  { %5568 = vmatprep.subr.bf16.mxu1 %v5567_v41  ;;  %v1001_v41 = vld [vmem:[%s13922_s3 + $0xd0] sm:$0xff] }
 0x180   :  { %5506 = vmatpush1.bf16.msra.mxu0 %v5505_v45  ;;  %v5651_v45 = vpack.c.bf16 %v1006_v40, %v1002_v39  ;;  %v5653_v49 = vpack.c.bf16 %v1005_v42, %v1001_v41  ;;  %v1043_v39 = vld [vmem:[%s13922_s3 + $0x220] sm:$0xff]  ;;  %v1042_v40 = vld [vmem:[%s13922_s3 + $0x218] sm:$0xff] }
 0x181   :  { %5508 = vmatprep.subr.bf16.mxu0 %v5507_v48  ;;  %v1007_v48 = vld [vmem:[%s13922_s3 + $0x100] sm:$0xff]  ;;  %v5609_v41 = vpack.c.bf16 %v1043_v39, %v1039_v38  ;;  %v1046_v42 = vld [vmem:[%s13922_s3 + $0x238] sm:$0xff] }
 0x182   :  { %5570 = vmatpush1.bf16.msra.mxu1 %v5569_v51  ;;  %v1011_v51 = vld [vmem:[%s13922_s3 + $0x120] sm:$0xff]  ;;  %v5671_v46 = vpack.c.bf16 %v1046_v42, %v1042_v40 }
 0x183   :  { %5572 = vmatprep.subr.bf16.mxu1 %v5571_v52  ;;  %v1010_v52 = vld [vmem:[%s13922_s3 + $0x118] sm:$0xff]  ;;  %v1079_v39 = vld [vmem:[%s13922_s3 + $0x340] sm:$0xff] }
 0x184   :  { %5510 = vmatpush1.bf16.msra.mxu0 %v5509_v54  ;;  %v5655_v53 = vpack.c.bf16 %v1014_v3, %v1010_v52  ;;  %v5593_v54 = vpack.c.bf16 %v1011_v51, %v1007_v48  ;;  %v1048_v48 = vld [vmem:[%s13922_s3 + $0x248] sm:$0xff]  ;;  %v1047_v51 = vld [vmem:[%s13922_s3 + $0x240] sm:$0xff]  ;;  %v1050_v3 = vld [vmem:[%s13922_s3 + $0x258] sm:$0xff] }
 0x185   :  { %5576 = vmatprep.subr.bf16.mxu0 %v5575_v60  ;;  %v5595_v60 = vpack.c.bf16 %v1020_v59, %v1016_v58  ;;  %v1051_v52 = vld [vmem:[%s13922_s3 + $0x260] sm:$0xff]  ;;  %v1056_v59 = vld [vmem:[%s13922_s3 + $0x288] sm:$0xff] }
 0x186   :  { %5574 = vmatpush1.bf16.msra.mxu1 %v5573_v55  ;;  %v1009_v55 = vld [vmem:[%s13922_s3 + $0x110] sm:$0xff]  ;;  %v1083_v40 = vld [vmem:[%s13922_s3 + $0x360] sm:$0xff] }
 0x187   :  { %874 = vmatmul.mubr.f32.vlgmr.msra.gmra.mrb[4].mxu0 %v5133_v56  ;;  %5640 = vmatprep.subr.bf16.mxu1 %v5639_v1  ;;  %v1022_v1 = vld [vmem:[%s13922_s3 + $0x178] sm:$0xff]  ;;  %v5629_v42 = vpack.c.bf16 %v1083_v40, %v1079_v39 }
 0x188   :  { %5578 = vmatpush1.bf16.msra.mxu0 %v5577_v0  ;;  %v5597_v0 = vpack.c.bf16 %v1019_v62, %v1015_v61  ;;  %v1055_v62 = vld [vmem:[%s13922_s3 + $0x280] sm:$0xff] }
 0x189   :  { %945 = vmatmul.mubr.f32.vlgmr.msra.gmra.mrb[4].mxu1 %v5133_v56  ;;  %5580 = vmatprep.subr.bf16.mxu0 %v5579_v9  ;;  %v1013_v56 = vld [vmem:[%s13922_s3 + $0x130] sm:$0xff]  ;;  %v5599_v9 = vpack.c.bf16 %v1028_v8, %v1024_v7  ;;  %v1064_v8 = vld [vmem:[%s13922_s3 + $0x2c8] sm:$0xff] }
 0x18a   :  { %5642 = vmatpush1.bf16.msra.mxu1 %v5641_v5  ;;  %v5657_v57 = vpack.c.bf16 %v1013_v56, %v1009_v55  ;;  %v5659_v5 = vpack.c.bf16 %v1022_v1, %v1018_v63  ;;  %v1049_v55 = vld [vmem:[%s13922_s3 + $0x250] sm:$0xff]  ;;  %v1059_v63 = vld [vmem:[%s13922_s3 + $0x2a0] sm:$0xff] }
 0x18b   :  { %5644 = vmatprep.subr.bf16.mxu1 %v5643_v16  ;;  %v1030_v16 = vld [vmem:[%s13922_s3 + $0x1b8] sm:$0xff]  ;;  %v1053_v56 = vld [vmem:[%s13922_s3 + $0x270] sm:$0xff]  ;;  %v5617_v1 = vpack.c.bf16 %v1059_v63, %v1055_v62  ;;  %v1095_v62 = vld [vmem:[%s13922_s3 + $0x3c0] sm:$0xff] }
 0x18c   :  { %5582 = vmatpush1.bf16.msra.mxu0 %v5581_v14  ;;  %v5601_v14 = vpack.c.bf16 %v1027_v11, %v1023_v10  ;;  %v5663_v20 = vpack.c.bf16 %v1030_v16, %v1026_v12  ;;  %v5677_v58 = vpack.c.bf16 %v1053_v56, %v1049_v55  ;;  %v1063_v11 = vld [vmem:[%s13922_s3 + $0x2c0] sm:$0xff] }
 0x18d   :  { %5584 = vmatprep.subr.bf16.mxu0 %v5583_v25  ;;  %v1031_v25 = vld [vmem:[%s13922_s3 + $0x1c0] sm:$0xff] }
 0x18e   :  { %5646 = vmatpush1.bf16.msra.mxu1 %v5645_v21  ;;  %v5665_v21 = vpack.c.bf16 %v1029_v19, %v1025_v17  ;;  %v1067_v12 = vld [vmem:[%s13922_s3 + $0x2e0] sm:$0xff]  ;;  %v1070_v17 = vld [vmem:[%s13922_s3 + $0x2f8] sm:$0xff]  ;;  %v1065_v19 = vld [vmem:[%s13922_s3 + $0x2d0] sm:$0xff] }
 0x18f   :  { %5648 = vmatprep.subr.bf16.mxu1 %v5647_v31  ;;  %v1033_v31 = vld [vmem:[%s13922_s3 + $0x1d0] sm:$0xff]  ;;  %v5621_v16 = vpack.c.bf16 %v1067_v12, %v1063_v11  ;;  %v1099_v63 = vld [vmem:[%s13922_s3 + $0x3e0] sm:$0xff] }
 0x190   :  { %5586 = vmatpush1.bf16.msra.mxu0 %v5585_v27  ;;  %v1035_v27 = vld [vmem:[%s13922_s3 + $0x1e0] sm:$0xff]  ;;  %v5669_v34 = vpack.c.bf16 %v1037_v32, %v1033_v31  ;;  %v1078_v31 = vld [vmem:[%s13922_s3 + $0x338] sm:$0xff]  ;;  %v1073_v32 = vld [vmem:[%s13922_s3 + $0x310] sm:$0xff] }
 0x191   :  { %5588 = vmatprep.subr.bf16.mxu0 %v5587_v36  ;;  %v5605_v29 = vpack.c.bf16 %v1035_v27, %v1031_v25  ;;  %v1044_v36 = vld [vmem:[%s13922_s3 + $0x228] sm:$0xff]  ;;  %v1071_v27 = vld [vmem:[%s13922_s3 + $0x300] sm:$0xff] }
 0x192   :  { %5650 = vmatpush1.bf16.msra.mxu1 %v5649_v35  ;;  %v1040_v35 = vld [vmem:[%s13922_s3 + $0x208] sm:$0xff]  ;;  %v5625_v30 = vpack.c.bf16 %v1075_v28, %v1071_v27  ;;  %v468_v12 = vld [vmem:[%s13925_s4] sm:$0xf] }
 0x193   :  { %5652 = vmatprep.subr.bf16.mxu1 %v5651_v45  ;;  %v5607_v37 = vpack.c.bf16 %v1044_v36, %v1040_v35  ;;  %v1045_v45 = vld [vmem:[%s13922_s3 + $0x230] sm:$0xff]  ;;  %v1080_v36 = vld [vmem:[%s13922_s3 + $0x348] sm:$0xff] }
 0x194   :  { %5590 = vmatpush1.bf16.msra.mxu0 %v5589_v43  ;;  %v1041_v43 = vld [vmem:[%s13922_s3 + $0x210] sm:$0xff] }
 0x195   :  { %5592 = vmatprep.subr.bf16.mxu0 %v5591_v50  ;;  %v5673_v47 = vpack.c.bf16 %v1045_v45, %v1041_v43  ;;  %v1086_v43 = vld [vmem:[%s13922_s3 + $0x378] sm:$0xff]  ;;  %v1081_v45 = vld [vmem:[%s13922_s3 + $0x350] sm:$0xff] }
 0x196   :  { %5654 = vmatpush1.bf16.msra.mxu1 %v5653_v49  ;;  %v1052_v49 = vld [vmem:[%s13922_s3 + $0x268] sm:$0xff] }
 0x197   :  { %5656 = vmatprep.subr.bf16.mxu1 %v5655_v53  ;;  %v5611_v50 = vpack.c.bf16 %v1052_v49, %v1048_v48  ;;  %v5613_v53 = vpack.c.bf16 %v1051_v52, %v1047_v51  ;;  %v1088_v49 = vld [vmem:[%s13922_s3 + $0x388] sm:$0xff]  ;;  %v1087_v51 = vld [vmem:[%s13922_s3 + $0x380] sm:$0xff] }
 0x198   :  { %5594 = vmatpush1.bf16.msra.mxu0 %v5593_v54  ;;  %v1054_v54 = vld [vmem:[%s13922_s3 + $0x278] sm:$0xff] }
 0x199   :  { %5596 = vmatprep.subr.bf16.mxu0 %v5595_v60  ;;  %v1060_v60 = vld [vmem:[%s13922_s3 + $0x2a8] sm:$0xff] }
 0x19a   :  { %5658 = vmatpush1.bf16.msra.mxu1 %v5657_v57  ;;  %v5675_v57 = vpack.c.bf16 %v1054_v54, %v1050_v3  ;;  %v5615_v61 = vpack.c.bf16 %v1060_v60, %v1056_v59  ;;  %v1091_v3 = vld [vmem:[%s13922_s3 + $0x3a0] sm:$0xff]  ;;  %v1094_v54 = vld [vmem:[%s13922_s3 + $0x3b8] sm:$0xff]  ;;  %v1096_v59 = vld [vmem:[%s13922_s3 + $0x3c8] sm:$0xff] }
 0x19b   :  { %5660 = vmatprep.subr.bf16.mxu1 %v5659_v5  ;;  %v1061_v5 = vld [vmem:[%s13922_s3 + $0x2b0] sm:$0xff]  ;;  %v5633_v55 = vpack.c.bf16 %v1091_v3, %v1087_v51  ;;  %v787_v51 = vld [vmem:[%s13924_s2] sm:$0xf] }
 0x19c   :  { %5598 = vmatpush1.bf16.msra.mxu0 %v5597_v0  ;;  %v1058_v0 = vld [vmem:[%s13922_s3 + $0x298] sm:$0xff]  ;;  %v5681_v7 = vpack.c.bf16 %v1061_v5, %v1057_v4  ;;  %v1097_v4 = vld [vmem:[%s13922_s3 + $0x3d0] sm:$0xff]  ;;  %v5637_v5 = vpack.c.bf16 %v1099_v63, %v1095_v62  ;;  %v796_v3 = vrot.slane %v787_v51, %v8329_v15  ;;  %v800_v63 = vrot.slane %v787_v51, %v8336_v26 }
 0x19d   :  { %5600 = vmatprep.subr.bf16.mxu0 %v5599_v9  ;;  %v1068_v9 = vld [vmem:[%s13922_s3 + $0x2e8] sm:$0xff] }
 0x19e   :  { %5662 = vmatpush1.bf16.msra.mxu1 %v5661_v6  ;;  %v5679_v6 = vpack.c.bf16 %v1062_v2, %v1058_v0  ;;  %v5619_v10 = vpack.c.bf16 %v1068_v9, %v1064_v8  ;;  %v1102_v2 = vld [vmem:[%s13922_s3 + $0x3f8] sm:$0xff]  ;;  %v1296_v8 = vld [vmem:[%s13921_s1 + $0x8] sm:$0xff] }
 0x19f   :  { %5664 = vmatprep.subr.bf16.mxu1 %v5663_v20  ;;  %v1069_v20 = vld [vmem:[%s13922_s3 + $0x2f0] sm:$0xff]  ;;  %v1300_v9 = vld [vmem:[%s13921_s1 + $0x28] sm:$0xff] }
 0x1a0   :  { %5602 = vmatpush1.bf16.msra.mxu0 %v5601_v14  ;;  %v1066_v14 = vld [vmem:[%s13922_s3 + $0x2d8] sm:$0xff]  ;;  %v5685_v22 = vpack.c.bf16 %v1069_v20, %v1065_v19  ;;  %v473_v19 = vrot.slane %v468_v12, %v8324_v13  ;;  %v477_v20 = vrot.slane %v468_v12, %v8329_v15 }
 0x1a1   :  { %5604 = vmatprep.subr.bf16.mxu0 %v5603_v24  ;;  %v1076_v24 = vld [vmem:[%s13922_s3 + $0x328] sm:$0xff] }
 0x1a2   :  { %5666 = vmatpush1.bf16.msra.mxu1 %v5665_v21  ;;  %v5683_v21 = vpack.c.bf16 %v1070_v17, %v1066_v14  ;;  %v5623_v25 = vpack.c.bf16 %v1076_v24, %v1072_v23  ;;  %v1298_v14 = vld [vmem:[%s13921_s1 + $0x18] sm:$0xff] }
 0x1a3   :  { %5668 = vmatprep.subr.bf16.mxu1 %v5667_v33  ;;  %v1077_v33 = vld [vmem:[%s13922_s3 + $0x330] sm:$0xff] }
 0x1a4   :  { %5606 = vmatpush1.bf16.msra.mxu0 %v5605_v29  ;;  %v1074_v29 = vld [vmem:[%s13922_s3 + $0x318] sm:$0xff]  ;;  %v5689_v35 = vpack.c.bf16 %v1077_v33, %v1073_v32  ;;  %v481_v32 = vrot.slane %v468_v12, %v8336_v26 }
 0x1a5   :  { %5608 = vmatprep.subr.bf16.mxu0 %v5607_v37  ;;  %v1084_v37 = vld [vmem:[%s13922_s3 + $0x368] sm:$0xff] }
 0x1a6   :  { %5670 = vmatpush1.bf16.msra.mxu1 %v5669_v34  ;;  %v5687_v34 = vpack.c.bf16 %v1078_v31, %v1074_v29  ;;  %v5627_v38 = vpack.c.bf16 %v1084_v37, %v1080_v36 }
 0x1a7   :  { %5672 = vmatprep.subr.bf16.mxu1 %v5671_v46  ;;  %v1085_v46 = vld [vmem:[%s13922_s3 + $0x370] sm:$0xff] }
 0x1a8   :  { %5610 = vmatpush1.bf16.msra.mxu0 %v5609_v41  ;;  %v1082_v41 = vld [vmem:[%s13922_s3 + $0x358] sm:$0xff]  ;;  %v5693_v48 = vpack.c.bf16 %v1085_v46, %v1081_v45 }
 0x1a9   :  { %5612 = vmatprep.subr.bf16.mxu0 %v5611_v50  ;;  %v1092_v50 = vld [vmem:[%s13922_s3 + $0x3a8] sm:$0xff] }
 0x1aa   :  { %5674 = vmatpush1.bf16.msra.mxu1 %v5673_v47  ;;  %v5691_v47 = vpack.c.bf16 %v1086_v43, %v1082_v41  ;;  %v5631_v52 = vpack.c.bf16 %v1092_v50, %v1088_v49 }
 0x1ab   :  { %5676 = vmatprep.subr.bf16.mxu1 %v5675_v57  ;;  %v1089_v57 = vld [vmem:[%s13922_s3 + $0x390] sm:$0xff] }
 0x1ac   :  { %5614 = vmatpush1.bf16.msra.mxu0 %v5613_v53  ;;  %v1090_v53 = vld [vmem:[%s13922_s3 + $0x398] sm:$0xff] }
 0x1ad   :  { %5616 = vmatprep.subr.bf16.mxu0 %v5615_v61  ;;  %v5695_v56 = vpack.c.bf16 %v1094_v54, %v1090_v53  ;;  %v1100_v61 = vld [vmem:[%s13922_s3 + $0x3e8] sm:$0xff] }
 0x1ae   :  { %5678 = vmatpush1.bf16.msra.mxu1 %v5677_v58  ;;  %v1093_v58 = vld [vmem:[%s13922_s3 + $0x3b0] sm:$0xff]  ;;  %v5635_v0 = vpack.c.bf16 %v1100_v61, %v1096_v59  ;;  %v804_v59 = vrot.slane %v787_v51, %v8333_v18 }
 0x1af   :  { %5680 = vmatprep.subr.bf16.mxu1 %v5679_v6  ;;  %v5697_v60 = vpack.c.bf16 %v1093_v58, %v1089_v57 }
 0x1b0   :  { %5618 = vmatpush1.bf16.msra.mxu0 %v5617_v1  ;;  %v1098_v1 = vld [vmem:[%s13922_s3 + $0x3d8] sm:$0xff] }
 0x1b1   :  { %5620 = vmatprep.subr.bf16.mxu0 %v5619_v10  ;;  %v5699_v6 = vpack.c.bf16 %v1102_v2, %v1098_v1  ;;  %v5703_v10 = vpack.c.bf16 %v1300_v9, %v1296_v8 }
 0x1b2   :  { %5682 = vmatpush1.bf16.msra.mxu1 %v5681_v7  ;;  %v1101_v7 = vld [vmem:[%s13922_s3 + $0x3f0] sm:$0xff] }
 0x1b3   :  { %5684 = vmatprep.subr.bf16.mxu1 %v5683_v21  ;;  %v5701_v11 = vpack.c.bf16 %v1101_v7, %v1097_v4 }
 0x1b4   :  { %5622 = vmatpush1.bf16.msra.mxu0 %v5621_v16  ;;  %v1302_v16 = vld [vmem:[%s13921_s1 + $0x38] sm:$0xff] }
 0x1b5   :  { %5624 = vmatprep.subr.bf16.mxu0 %v5623_v25  ;;  %v5767_v17 = vpack.c.bf16 %v1302_v16, %v1298_v14 }
 0x1b6   :  { %5686 = vmatpush1.bf16.msra.mxu1 %v5685_v22 }
 0x1b7   :  { %5688 = vmatprep.subr.bf16.mxu1 %v5687_v34 }
 0x1b8   :  { %5626 = vmatpush1.bf16.msra.mxu0 %v5625_v30  ;;  %v485_v30 = vrot.slane %v468_v12, %v8333_v18 }
 0x1b9   :  { %5628 = vmatprep.subr.bf16.mxu0 %v5627_v38 }
 0x1ba   :  { %5690 = vmatpush1.bf16.msra.mxu1 %v5689_v35 }
 0x1bb   :  { %5692 = vmatprep.subr.bf16.mxu1 %v5691_v47 }
 0x1bc   :  { %5630 = vmatpush1.bf16.msra.mxu0 %v5629_v42 }
 0x1bd   :  { %5632 = vmatprep.subr.bf16.mxu0 %v5631_v52  ;;  %v792_v52 = vrot.slane %v787_v51, %v8324_v13  ;;  %v1313_v51 = vld [vmem:[%s13921_s1 + $0x90] sm:$0xff] }
 0x1be   :  { %5694 = vmatpush1.bf16.msra.mxu1 %v5693_v48 }
 0x1bf   :  { %5696 = vmatprep.subr.bf16.mxu1 %v5695_v56 }
 0x1c0   :  { %5634 = vmatpush1.bf16.msra.mxu0 %v5633_v55 }
 0x1c1   :  { %5636 = vmatprep.subr.bf16.mxu0 %v5635_v0 }
 0x1c2   :  { %5698 = vmatpush1.bf16.msra.mxu1 %v5697_v60 }
 0x1c3   :  { %5700 = vmatprep.subr.bf16.mxu1 %v5699_v6 }
 0x1c4   :  { %5638 = vmatpush1.bf16.msra.mxu0 %v5637_v5 }
 0x1c5   :  { %5704 = vmatprep.subr.bf16.mxu0 %v5703_v10 }
 0x1c6   :  { %5702 = vmatpush1.bf16.msra.mxu1 %v5701_v11 }
 0x1c7   :  { %5768 = vmatprep.subr.bf16.mxu1 %v5767_v17  ;;  %v1295_v17 = vld [vmem:[%s13921_s1] sm:$0xff] }
 0x21a   :  { %v556_v21 = vpop.f32.mrb[2].mxu0  ;;  %v627_v22 = vpop.f32.mrb[2].mxu1 }
 0x21b   :  { %v557_v23 = vadd.f32 %v556_v21, %v473_v19  ;;  %v558_v24 = vpop.f32.mrb[3].mxu0  ;;  %v629_v25 = vpop.f32.mrb[3].mxu1  ;;  %v628_v34 = vadd.f32 %v627_v22, %v481_v32  ;;  %v1299_v19 = vld [vmem:[%s13921_s1 + $0x20] sm:$0xff]  ;;  %v1304_v21 = vld [vmem:[%s13921_s1 + $0x48] sm:$0xff]  ;;  %v1297_v22 = vld [vmem:[%s13921_s1 + $0x10] sm:$0xff] }
 0x21c   :  { %v559_v27 = vadd.f32 %v558_v24, %v477_v20  ;;  %v630_v31 = vadd.f32 %v629_v25, %v485_v30  ;;  %v5705_v25 = vpack.c.bf16 %v1299_v19, %v1295_v17  ;;  %v1307_v32 = vld [vmem:[%s13921_s1 + $0x60] sm:$0xff]  ;;  %v1338_v17 = vld [vmem:[%s13921_s1 + $0x158] sm:$0xff] }
 0x21d   :  { %v5130_v28 = vmul.f32 -1.442695, %v557_v23  ;;  %v1301_v23 = vld [vmem:[%s13921_s1 + $0x30] sm:$0xff]  ;;  %v1342_v19 = vld [vmem:[%s13921_s1 + $0x178] sm:$0xff] }
 0x21e   :  { %v5131_v29 = vmul.f32 -1.442695, %v559_v27  ;;  %v5132_v33 = vmul.f32 -1.442695, %v630_v31  ;;  %v1306_v27 = vld [vmem:[%s13921_s1 + $0x58] sm:$0xff]  ;;  %v1303_v31 = vld [vmem:[%s13921_s1 + $0x40] sm:$0xff] }
 0x21f   :  { %7256 = vpow2.f32 %v5130_v28  ;;  %v1310_v28 = vld [vmem:[%s13921_s1 + $0x78] sm:$0xff] }
 0x220   :  { %7258 = vpow2.f32 %v5131_v29 }
 0x221   :  { %7260 = vpow2.f32 %v5132_v33  ;;  %v1312_v33 = vld [vmem:[%s13921_s1 + $0x88] sm:$0xff] }
 0x222   :  { %7262 = vtanh.f32 %v628_v34  ;;  %v1316_v34 = vld [vmem:[%s13921_s1 + $0xa8] sm:$0xff] }
 0x229   :  { %v7257_v35 = vpop.eup %7256 }
 0x22a   :  { %v7259_v36 = vpop.eup %7258  ;;  %v635_v37 = vadd.f32 1.0, %v7257_v35  ;;  %v5769_v35 = vpack.c.bf16 %v1301_v23, %v1297_v22  ;;  %v1344_v22 = vld [vmem:[%s13921_s1 + $0x188] sm:$0xff] }
 0x22b   :  { %v641_v38 = vadd.f32 1.0, %v7259_v36  ;;  %v7261_v39 = vpop.eup %7260  ;;  %v5771_v36 = vpack.c.bf16 %v1310_v28, %v1306_v27  ;;  %v1348_v23 = vld [vmem:[%s13921_s1 + $0x1a8] sm:$0xff]  ;;  %v1337_v27 = vld [vmem:[%s13921_s1 + $0x150] sm:$0xff] }
 0x22c   :  { %7264 = vrcp.f32 %v635_v37  ;;  %v7263_v40 = vpop.eup %7262  ;;  %v648_v45 = vadd.f32 1.0, %v7261_v39  ;;  %v1305_v37 = vld [vmem:[%s13921_s1 + $0x50] sm:$0xff]  ;;  %v5709_v39 = vpack.c.bf16 %v1307_v32, %v1303_v31  ;;  %v1350_v31 = vld [vmem:[%s13921_s1 + $0x1b8] sm:$0xff]  ;;  %v5727_v32 = vpack.c.bf16 %v1348_v23, %v1344_v22  ;;  %v1375_v22 = vld [vmem:[%s13921_s1 + $0x280] sm:$0xff] }
 0x22d   :  { %7266 = vrcp.f32 %v641_v38  ;;  %v1309_v38 = vld [vmem:[%s13921_s1 + $0x70] sm:$0xff]  ;;  %v1379_v23 = vld [vmem:[%s13921_s1 + $0x2a0] sm:$0xff] }
 0x22e   :  { %7268 = vrcp.f32 %v648_v45  ;;  %v1315_v45 = vld [vmem:[%s13921_s1 + $0xa0] sm:$0xff]  ;;  %v1341_v28 = vld [vmem:[%s13921_s1 + $0x170] sm:$0xff] }
 0x236   :  { %v7265_v41 = vpop.eup %7264 }
 0x237   :  { %v7267_v42 = vpop.eup %7266  ;;  %v652_v43 = vmul.f32 %v7265_v41, %v7263_v40  ;;  %v1314_v40 = vld [vmem:[%s13921_s1 + $0x98] sm:$0xff] }
 0x238   :  { %v651_v46 = vmul.f32 0.0, %v7267_v42  ;;  %v7269_v48 = vpop.eup %7268  ;;  %v1318_v41 = vld [vmem:[%s13921_s1 + $0xb8] sm:$0xff]  ;;  %v5711_v42 = vpack.c.bf16 %v1316_v34, %v1312_v33  ;;  %v1343_v33 = vld [vmem:[%s13921_s1 + $0x180] sm:$0xff] }
 0x239   :  { %v1347_v34 = vld [vmem:[%s13921_s1 + $0x1a0] sm:$0xff] }
 0x23a   :  { %v9120_v47 = vadd.f32 %v652_v43, %v651_v46  ;;  %v1311_v43 = vld [vmem:[%s13921_s1 + $0x80] sm:$0xff]  ;;  %v1320_v46 = vld [vmem:[%s13921_s1 + $0xc8] sm:$0xff] }
 0x23c   :  { %7270 = vtanh.f32 %v9120_v47 }
 0x246   :  { %v7271_v49 = vpop.eup %7270 }
 0x247   :  { %v655_v50 = vmul.f32 %v7271_v49, %v7269_v48  ;;  %v1324_v48 = vld [vmem:[%s13921_s1 + $0xe8] sm:$0xff]  ;;  %v5773_v49 = vpack.c.bf16 %v1309_v38, %v1305_v37  ;;  %v5789_v37 = vpack.c.bf16 %v1341_v28, %v1337_v27 }
 0x249   :  { %656 = vst [vmem:[%s13926_s5] sm:$0xff] %v655_v50  ;;  %1189 = vmatprep.mubr.f32.mxu0 %v655_v50  ;;  %1260 = vmatprep.mubr.f32.mxu1 %v655_v50  ;;  %v5775_v50 = vpack.c.bf16 %v1318_v41, %v1314_v40  ;;  %v1349_v40 = vld [vmem:[%s13921_s1 + $0x1b0] sm:$0xff]  ;;  %v5729_v41 = vpack.c.bf16 %v1347_v34, %v1343_v33  ;;  %v1390_v33 = vld [vmem:[%s13921_s1 + $0x2f8] sm:$0xff] }
 0x25a   :  { %v875_v53 = vpop.f32.mrb[4].mxu0 }
 0x25b   :  { %v876_v54 = vadd.f32 %v875_v53, %v792_v52  ;;  %v877_v55 = vpop.f32.mrb[5].mxu0  ;;  %v1317_v52 = vld [vmem:[%s13921_s1 + $0xb0] sm:$0xff]  ;;  %v1322_v53 = vld [vmem:[%s13921_s1 + $0xd8] sm:$0xff] }
 0x25c   :  { %v878_v56 = vadd.f32 %v877_v55, %v796_v3  ;;  %v946_v57 = vpop.f32.mrb[4].mxu1  ;;  %v5713_v3 = vpack.c.bf16 %v1315_v45, %v1311_v43  ;;  %v5715_v55 = vpack.c.bf16 %v1324_v48, %v1320_v46  ;;  %v1358_v43 = vld [vmem:[%s13921_s1 + $0x1f8] sm:$0xff]  ;;  %v1351_v46 = vld [vmem:[%s13921_s1 + $0x1c0] sm:$0xff] }
 0x25d   :  { %v5134_v58 = vmul.f32 -1.442695, %v876_v54  ;;  %v948_v60 = vpop.f32.mrb[5].mxu1  ;;  %v947_v1 = vadd.f32 %v946_v57, %v800_v63  ;;  %v1326_v54 = vld [vmem:[%s13921_s1 + $0xf8] sm:$0xff]  ;;  %v1323_v57 = vld [vmem:[%s13921_s1 + $0xe0] sm:$0xff]  ;;  %v1325_v63 = vld [vmem:[%s13921_s1 + $0xf0] sm:$0xff] }
 0x25e   :  { %v5135_v61 = vmul.f32 -1.442695, %v878_v56  ;;  %v949_v62 = vadd.f32 %v948_v60, %v804_v59  ;;  %v1319_v56 = vld [vmem:[%s13921_s1 + $0xc0] sm:$0xff]  ;;  %v1332_v59 = vld [vmem:[%s13921_s1 + $0x128] sm:$0xff]  ;;  %v5777_v60 = vpack.c.bf16 %v1317_v52, %v1313_v51 }
 0x25f   :  { %7272 = vpow2.f32 %v5134_v58  ;;  %v1328_v58 = vld [vmem:[%s13921_s1 + $0x108] sm:$0xff]  ;;  %v1355_v48 = vld [vmem:[%s13921_s1 + $0x1e0] sm:$0xff] }
 0x260   :  { %7274 = vpow2.f32 %v5135_v61  ;;  %v5136_v0 = vmul.f32 -1.442695, %v949_v62  ;;  %v5779_v61 = vpack.c.bf16 %v1326_v54, %v1322_v53  ;;  %v1321_v62 = vld [vmem:[%s13921_s1 + $0xd0] sm:$0xff]  ;;  %v5733_v54 = vpack.c.bf16 %v1355_v48, %v1351_v46  ;;  %v1398_v46 = vld [vmem:[%s13921_s1 + $0x338] sm:$0xff] }
 0x261   :  { %v1357_v53 = vld [vmem:[%s13921_s1 + $0x1f0] sm:$0xff] }
 0x262   :  { %7276 = vpow2.f32 %v5136_v0  ;;  %v5717_v0 = vpack.c.bf16 %v1323_v57, %v1319_v56  ;;  %v1366_v56 = vld [vmem:[%s13921_s1 + $0x238] sm:$0xff] }
 0x263   :  { %7278 = vtanh.f32 %v947_v1  ;;  %v1330_v1 = vld [vmem:[%s13921_s1 + $0x118] sm:$0xff] }
 0x269   :  { %v7273_v2 = vpop.eup %7272 }
 0x26a   :  { %v7275_v4 = vpop.eup %7274  ;;  %v954_v5 = vadd.f32 1.0, %v7273_v2  ;;  %v1334_v2 = vld [vmem:[%s13921_s1 + $0x138] sm:$0xff] }
 0x26b   :  { %v960_v6 = vadd.f32 1.0, %v7275_v4  ;;  %v5719_v4 = vpack.c.bf16 %v1332_v59, %v1328_v58  ;;  %v1359_v58 = vld [vmem:[%s13921_s1 + $0x200] sm:$0xff] }
 0x26c   :  { %7280 = vrcp.f32 %v954_v5  ;;  %v7277_v7 = vpop.eup %7276  ;;  %v1327_v5 = vld [vmem:[%s13921_s1 + $0x100] sm:$0xff] }
 0x26d   :  { %7282 = vrcp.f32 %v960_v6  ;;  %v7279_v8 = vpop.eup %7278  ;;  %v967_v10 = vadd.f32 1.0, %v7277_v7  ;;  %v1331_v6 = vld [vmem:[%s13921_s1 + $0x120] sm:$0xff]  ;;  %v1336_v7 = vld [vmem:[%s13921_s1 + $0x148] sm:$0xff] }
 0x26e   :  { %v1363_v59 = vld [vmem:[%s13921_s1 + $0x220] sm:$0xff] }
 0x26f   :  { %7284 = vrcp.f32 %v967_v10  ;;  %v5783_v10 = vpack.c.bf16 %v1334_v2, %v1330_v1  ;;  %v1365_v1 = vld [vmem:[%s13921_s1 + $0x230] sm:$0xff]  ;;  %v5737_v2 = vpack.c.bf16 %v1363_v59, %v1359_v58  ;;  %v1406_v58 = vld [vmem:[%s13921_s1 + $0x378] sm:$0xff] }
 0x276   :  { %v7281_v9 = vpop.eup %7280 }
 0x277   :  { %v7283_v11 = vpop.eup %7282  ;;  %v971_v12 = vmul.f32 %v7281_v9, %v7279_v8  ;;  %v1340_v8 = vld [vmem:[%s13921_s1 + $0x168] sm:$0xff]  ;;  %v5781_v9 = vpack.c.bf16 %v1325_v63, %v1321_v62 }
 0x278   :  { %v970_v14 = vmul.f32 %v7283_v11, %v8339_v44  ;;  %v1308_v44 = vld [vmem:[%s13921_s1 + $0x68] sm:$0xff]  ;;  %v1329_v11 = vld [vmem:[%s13921_s1 + $0x110] sm:$0xff] }
 0x279   :  { %v7285_v20 = vpop.eup %7284  ;;  %v5707_v30 = vpack.c.bf16 %v1308_v44, %v1304_v21  ;;  %v1335_v21 = vld [vmem:[%s13921_s1 + $0x140] sm:$0xff] }
 0x27a   :  { %v9134_v16 = vadd.f32 %v971_v12, %v970_v14  ;;  %v1333_v12 = vld [vmem:[%s13921_s1 + $0x130] sm:$0xff]  ;;  %v5721_v14 = vpack.c.bf16 %v1331_v6, %v1327_v5  ;;  %v1339_v44 = vld [vmem:[%s13921_s1 + $0x160] sm:$0xff]  ;;  %v1374_v5 = vld [vmem:[%s13921_s1 + $0x278] sm:$0xff] }
 0x27c   :  { %7286 = vtanh.f32 %v9134_v16 }
 0x286   :  { %v7287_v24 = vpop.eup %7286 }
 0x287   :  { %v974_v29 = vmul.f32 %v7287_v24, %v7285_v20  ;;  %v5723_v20 = vpack.c.bf16 %v1340_v8, %v1336_v7  ;;  %v5785_v24 = vpack.c.bf16 %v1333_v12, %v1329_v11  ;;  %v1367_v7 = vld [vmem:[%s13921_s1 + $0x240] sm:$0xff] }
 0x288   :  { %v1371_v8 = vld [vmem:[%s13921_s1 + $0x260] sm:$0xff] }
 0x289   :  { %1190 = vmatmul.mubr.f32.vlgmr.msra.gmra.mrb[6].mxu0 %v974_v29  ;;  %1261 = vmatmul.mubr.f32.vlgmr.msra.gmra.mrb[6].mxu1 %v974_v29 }
 0x28a   :  { %5706 = vmatpush1.bf16.msra.mxu0 %v5705_v25  ;;  %1509 = vmatprep.mubr.f32.mxu0 %v974_v29  ;;  %v5787_v25 = vpack.c.bf16 %v1342_v19, %v1338_v17  ;;  %v1373_v17 = vld [vmem:[%s13921_s1 + $0x270] sm:$0xff]  ;;  %v5741_v19 = vpack.c.bf16 %v1371_v8, %v1367_v7  ;;  %v1414_v7 = vld [vmem:[%s13921_s1 + $0x3b8] sm:$0xff] }
 0x28b   :  { %1580 = vmatprep.mubr.f32.mxu1 %v974_v29  ;;  %5708 = vmatprep.subr.bf16.mxu0 %v5707_v30  ;;  %v5725_v29 = vpack.c.bf16 %v1339_v44, %v1335_v21  ;;  %v1346_v30 = vld [vmem:[%s13921_s1 + $0x198] sm:$0xff] }
 0x28c   :  { %5770 = vmatpush1.bf16.msra.mxu1 %v5769_v35  ;;  %v1352_v35 = vld [vmem:[%s13921_s1 + $0x1c8] sm:$0xff]  ;;  %v5791_v38 = vpack.c.bf16 %v1350_v31, %v1346_v30  ;;  %v1382_v21 = vld [vmem:[%s13921_s1 + $0x2b8] sm:$0xff]  ;;  %v1381_v30 = vld [vmem:[%s13921_s1 + $0x2b0] sm:$0xff]  ;;  %v5745_v31 = vpack.c.bf16 %v1379_v23, %v1375_v22 }
 0x28d   :  { %5772 = vmatprep.subr.bf16.mxu1 %v5771_v36  ;;  %v1356_v36 = vld [vmem:[%s13921_s1 + $0x1e8] sm:$0xff]  ;;  %v1422_v22 = vld [vmem:[%s13921_s1 + $0x3f8] sm:$0xff] }
 0x28e   :  { %5710 = vmatpush1.bf16.msra.mxu0 %v5709_v39  ;;  %v1345_v39 = vld [vmem:[%s13921_s1 + $0x190] sm:$0xff]  ;;  %v5731_v45 = vpack.c.bf16 %v1356_v36, %v1352_v35  ;;  %v1383_v35 = vld [vmem:[%s13921_s1 + $0x2c0] sm:$0xff] }
 0x28f   :  { %5712 = vmatprep.subr.bf16.mxu0 %v5711_v42  ;;  %v1354_v42 = vld [vmem:[%s13921_s1 + $0x1d8] sm:$0xff]  ;;  %v5793_v51 = vpack.c.bf16 %v1349_v40, %v1345_v39  ;;  %v1387_v36 = vld [vmem:[%s13921_s1 + $0x2e0] sm:$0xff] }
 0x290   :  { %5774 = vmatpush1.bf16.msra.mxu1 %v5773_v49  ;;  %v1360_v49 = vld [vmem:[%s13921_s1 + $0x208] sm:$0xff]  ;;  %v5795_v52 = vpack.c.bf16 %v1358_v43, %v1354_v42  ;;  %v1389_v42 = vld [vmem:[%s13921_s1 + $0x2f0] sm:$0xff]  ;;  %v5749_v43 = vpack.c.bf16 %v1387_v36, %v1383_v35  ;;  %v1611_v36 = vld [vmem:[%s13922_s3] sm:$0xff] }
 0x291   :  { %5776 = vmatprep.subr.bf16.mxu1 %v5775_v50  ;;  %v1364_v50 = vld [vmem:[%s13921_s1 + $0x228] sm:$0xff] }
 0x292   :  { %5714 = vmatpush1.bf16.msra.mxu0 %v5713_v3  ;;  %v1353_v3 = vld [vmem:[%s13921_s1 + $0x1d0] sm:$0xff]  ;;  %v5735_v57 = vpack.c.bf16 %v1364_v50, %v1360_v49  ;;  %v1391_v49 = vld [vmem:[%s13921_s1 + $0x300] sm:$0xff]  ;;  %v1616_v35 = vld [vmem:[%s13922_s3 + $0x28] sm:$0xff] }
 0x293   :  { %5716 = vmatprep.subr.bf16.mxu0 %v5715_v55  ;;  %v1362_v55 = vld [vmem:[%s13921_s1 + $0x218] sm:$0xff]  ;;  %v5797_v62 = vpack.c.bf16 %v1357_v53, %v1353_v3  ;;  %v1395_v50 = vld [vmem:[%s13921_s1 + $0x320] sm:$0xff] }
 0x294   :  { %5778 = vmatpush1.bf16.msra.mxu1 %v5777_v60  ;;  %v1368_v60 = vld [vmem:[%s13921_s1 + $0x248] sm:$0xff]  ;;  %v5799_v63 = vpack.c.bf16 %v1366_v56, %v1362_v55  ;;  %v1397_v55 = vld [vmem:[%s13921_s1 + $0x330] sm:$0xff]  ;;  %v5753_v56 = vpack.c.bf16 %v1395_v50, %v1391_v49  ;;  %v1619_v50 = vld [vmem:[%s13922_s3 + $0x40] sm:$0xff] }
 0x295   :  { %5780 = vmatprep.subr.bf16.mxu1 %v5779_v61  ;;  %v1372_v61 = vld [vmem:[%s13921_s1 + $0x268] sm:$0xff] }
 0x296   :  { %5718 = vmatpush1.bf16.msra.mxu0 %v5717_v0  ;;  %v1361_v0 = vld [vmem:[%s13921_s1 + $0x210] sm:$0xff]  ;;  %v5739_v6 = vpack.c.bf16 %v1372_v61, %v1368_v60  ;;  %v1399_v60 = vld [vmem:[%s13921_s1 + $0x340] sm:$0xff]  ;;  %v1624_v49 = vld [vmem:[%s13922_s3 + $0x68] sm:$0xff] }
 0x297   :  { %5720 = vmatprep.subr.bf16.mxu0 %v5719_v4  ;;  %v1370_v4 = vld [vmem:[%s13921_s1 + $0x258] sm:$0xff]  ;;  %v5801_v11 = vpack.c.bf16 %v1365_v1, %v1361_v0  ;;  %v1403_v61 = vld [vmem:[%s13921_s1 + $0x360] sm:$0xff] }
 0x298   :  { %5782 = vmatpush1.bf16.msra.mxu1 %v5781_v9  ;;  %v1376_v9 = vld [vmem:[%s13921_s1 + $0x288] sm:$0xff]  ;;  %v5803_v12 = vpack.c.bf16 %v1374_v5, %v1370_v4  ;;  %v1405_v4 = vld [vmem:[%s13921_s1 + $0x370] sm:$0xff]  ;;  %v5757_v5 = vpack.c.bf16 %v1403_v61, %v1399_v60  ;;  %v1627_v61 = vld [vmem:[%s13922_s3 + $0x80] sm:$0xff] }
 0x299   :  { %5784 = vmatprep.subr.bf16.mxu1 %v5783_v10  ;;  %v1380_v10 = vld [vmem:[%s13921_s1 + $0x2a8] sm:$0xff] }
 0x29a   :  { %5722 = vmatpush1.bf16.msra.mxu0 %v5721_v14  ;;  %v1369_v14 = vld [vmem:[%s13921_s1 + $0x250] sm:$0xff]  ;;  %v5743_v44 = vpack.c.bf16 %v1380_v10, %v1376_v9  ;;  %v1407_v9 = vld [vmem:[%s13921_s1 + $0x380] sm:$0xff]  ;;  %v1632_v60 = vld [vmem:[%s13922_s3 + $0xa8] sm:$0xff] }
 0x29b   :  { %5724 = vmatprep.subr.bf16.mxu0 %v5723_v20  ;;  %v1378_v20 = vld [vmem:[%s13921_s1 + $0x298] sm:$0xff]  ;;  %v5805_v27 = vpack.c.bf16 %v1373_v17, %v1369_v14  ;;  %v1411_v10 = vld [vmem:[%s13921_s1 + $0x3a0] sm:$0xff] }
 0x29c   :  { %5786 = vmatpush1.bf16.msra.mxu1 %v5785_v24  ;;  %v1384_v24 = vld [vmem:[%s13921_s1 + $0x2c8] sm:$0xff]  ;;  %v5807_v28 = vpack.c.bf16 %v1382_v21, %v1378_v20  ;;  %v1413_v20 = vld [vmem:[%s13921_s1 + $0x3b0] sm:$0xff]  ;;  %v5761_v21 = vpack.c.bf16 %v1411_v10, %v1407_v9 }
 0x29d   :  { %5788 = vmatprep.subr.bf16.mxu1 %v5787_v25  ;;  %v1388_v25 = vld [vmem:[%s13921_s1 + $0x2e8] sm:$0xff] }
 0x29e   :  { %5726 = vmatpush1.bf16.msra.mxu0 %v5725_v29  ;;  %v1377_v29 = vld [vmem:[%s13921_s1 + $0x290] sm:$0xff]  ;;  %v5747_v34 = vpack.c.bf16 %v1388_v25, %v1384_v24  ;;  %v1415_v24 = vld [vmem:[%s13921_s1 + $0x3c0] sm:$0xff] }
 0x29f   :  { %5728 = vmatprep.subr.bf16.mxu0 %v5727_v32  ;;  %v1386_v32 = vld [vmem:[%s13921_s1 + $0x2d8] sm:$0xff]  ;;  %v5809_v39 = vpack.c.bf16 %v1381_v30, %v1377_v29  ;;  %v1419_v25 = vld [vmem:[%s13921_s1 + $0x3e0] sm:$0xff]  ;;  %v1417_v29 = vld [vmem:[%s13921_s1 + $0x3d0] sm:$0xff] }
 0x2a0   :  { %5790 = vmatpush1.bf16.msra.mxu1 %v5789_v37  ;;  %v1392_v37 = vld [vmem:[%s13921_s1 + $0x308] sm:$0xff]  ;;  %v5811_v40 = vpack.c.bf16 %v1390_v33, %v1386_v32  ;;  %v1421_v30 = vld [vmem:[%s13921_s1 + $0x3f0] sm:$0xff] }
 0x2a1   :  { %5792 = vmatprep.subr.bf16.mxu1 %v5791_v38  ;;  %v1396_v38 = vld [vmem:[%s13921_s1 + $0x328] sm:$0xff]  ;;  %v5829_v32 = vpack.c.bf16 %v1421_v30, %v1417_v29  ;;  %v5141_v33 = vld [vmem:[%s13923_s0 + $0x10] sm:$0xff]  ;;  %v1646_v29 = vld [vmem:[%s13922_s3 + $0x118] sm:$0xff] }
 0x2a2   :  { %5730 = vmatpush1.bf16.msra.mxu0 %v5729_v41  ;;  %v1385_v41 = vld [vmem:[%s13921_s1 + $0x2d0] sm:$0xff]  ;;  %v5751_v48 = vpack.c.bf16 %v1396_v38, %v1392_v37  ;;  %v1615_v38 = vld [vmem:[%s13922_s3 + $0x20] sm:$0xff]  ;;  %v1650_v30 = vld [vmem:[%s13922_s3 + $0x138] sm:$0xff] }
 0x2a3   :  { %5732 = vmatprep.subr.bf16.mxu0 %v5731_v45  ;;  %v1394_v45 = vld [vmem:[%s13921_s1 + $0x318] sm:$0xff]  ;;  %v5813_v3 = vpack.c.bf16 %v1389_v42, %v1385_v41  ;;  %v5833_v41 = vpack.c.bf16 %v1615_v38, %v1611_v36  ;;  %v1652_v36 = vld [vmem:[%s13922_s3 + $0x148] sm:$0xff] }
 0x2a4   :  { %5794 = vmatpush1.bf16.msra.mxu1 %v5793_v51  ;;  %v1400_v51 = vld [vmem:[%s13921_s1 + $0x348] sm:$0xff]  ;;  %v5815_v53 = vpack.c.bf16 %v1398_v46, %v1394_v45  ;;  %v1617_v45 = vld [vmem:[%s13922_s3 + $0x30] sm:$0xff] }
 0x2a5   :  { %5796 = vmatprep.subr.bf16.mxu1 %v5795_v52  ;;  %v1404_v52 = vld [vmem:[%s13921_s1 + $0x368] sm:$0xff] }
 0x2a6   :  { %5734 = vmatpush1.bf16.msra.mxu0 %v5733_v54  ;;  %v1393_v54 = vld [vmem:[%s13921_s1 + $0x310] sm:$0xff]  ;;  %v5755_v59 = vpack.c.bf16 %v1404_v52, %v1400_v51  ;;  %v1623_v52 = vld [vmem:[%s13922_s3 + $0x60] sm:$0xff] }
 0x2a7   :  { %5736 = vmatprep.subr.bf16.mxu0 %v5735_v57  ;;  %v1402_v57 = vld [vmem:[%s13921_s1 + $0x358] sm:$0xff]  ;;  %v5817_v0 = vpack.c.bf16 %v1397_v55, %v1393_v54  ;;  %v5837_v54 = vpack.c.bf16 %v1623_v52, %v1619_v50  ;;  %v1660_v50 = vld [vmem:[%s13922_s3 + $0x188] sm:$0xff] }
 0x2a8   :  { %5798 = vmatpush1.bf16.msra.mxu1 %v5797_v62  ;;  %v1408_v62 = vld [vmem:[%s13921_s1 + $0x388] sm:$0xff]  ;;  %v5819_v1 = vpack.c.bf16 %v1406_v58, %v1402_v57  ;;  %v1625_v57 = vld [vmem:[%s13922_s3 + $0x70] sm:$0xff] }
 0x2a9   :  { %5800 = vmatprep.subr.bf16.mxu1 %v5799_v63  ;;  %v1412_v63 = vld [vmem:[%s13921_s1 + $0x3a8] sm:$0xff] }
 0x2aa   :  { %5738 = vmatpush1.bf16.msra.mxu0 %v5737_v2  ;;  %v1401_v2 = vld [vmem:[%s13921_s1 + $0x350] sm:$0xff]  ;;  %v5759_v8 = vpack.c.bf16 %v1412_v63, %v1408_v62  ;;  %v1628_v58 = vld [vmem:[%s13922_s3 + $0x88] sm:$0xff]  ;;  %v1631_v62 = vld [vmem:[%s13922_s3 + $0xa0] sm:$0xff] }
 0x2ab   :  { %5740 = vmatprep.subr.bf16.mxu0 %v5739_v6  ;;  %v1410_v6 = vld [vmem:[%s13921_s1 + $0x398] sm:$0xff]  ;;  %v5821_v14 = vpack.c.bf16 %v1405_v4, %v1401_v2  ;;  %v5839_v63 = vpack.c.bf16 %v1632_v60, %v1628_v58  ;;  %v1629_v4 = vld [vmem:[%s13922_s3 + $0x90] sm:$0xff] }
 0x2ac   :  { %5802 = vmatpush1.bf16.msra.mxu1 %v5801_v11  ;;  %v1416_v11 = vld [vmem:[%s13921_s1 + $0x3c8] sm:$0xff]  ;;  %v5823_v17 = vpack.c.bf16 %v1414_v7, %v1410_v6  ;;  %v1634_v2 = vld [vmem:[%s13922_s3 + $0xb8] sm:$0xff]  ;;  %v1633_v6 = vld [vmem:[%s13922_s3 + $0xb0] sm:$0xff] }
 0x2ad   :  { %5804 = vmatprep.subr.bf16.mxu1 %v5803_v12  ;;  %v1420_v12 = vld [vmem:[%s13921_s1 + $0x3e8] sm:$0xff]  ;;  %v5905_v9 = vpack.c.bf16 %v1633_v6, %v1629_v4  ;;  %v1665_v58 = vld [vmem:[%s13922_s3 + $0x1b0] sm:$0xff] }
 0x2ae   :  { %5742 = vmatpush1.bf16.msra.mxu0 %v5741_v19  ;;  %v1409_v19 = vld [vmem:[%s13921_s1 + $0x390] sm:$0xff]  ;;  %v5763_v23 = vpack.c.bf16 %v1420_v12, %v1416_v11  ;;  %v1636_v7 = vld [vmem:[%s13922_s3 + $0xc8] sm:$0xff]  ;;  %v1635_v11 = vld [vmem:[%s13922_s3 + $0xc0] sm:$0xff] }
 0x2af   :  { %5744 = vmatprep.subr.bf16.mxu0 %v5743_v44  ;;  %v1418_v44 = vld [vmem:[%s13921_s1 + $0x3d8] sm:$0xff]  ;;  %v1639_v12 = vld [vmem:[%s13922_s3 + $0xe0] sm:$0xff]  ;;  %v1669_v6 = vld [vmem:[%s13922_s3 + $0x1d0] sm:$0xff] }
 0x2b0   :  { %5806 = vmatpush1.bf16.msra.mxu1 %v5805_v27  ;;  %v5825_v27 = vpack.c.bf16 %v1413_v20, %v1409_v19  ;;  %v1637_v19 = vld [vmem:[%s13922_s3 + $0xd0] sm:$0xff] }
 0x2b1   :  { %5808 = vmatprep.subr.bf16.mxu1 %v5807_v28  ;;  %v5827_v28 = vpack.c.bf16 %v1422_v22, %v1418_v44  ;;  %v1641_v20 = vld [vmem:[%s13922_s3 + $0xf0] sm:$0xff]  ;;  %v1644_v22 = vld [vmem:[%s13922_s3 + $0x108] sm:$0xff] }
 0x2b2   :  { %5746 = vmatpush1.bf16.msra.mxu0 %v5745_v31  ;;  %v5765_v31 = vpack.c.bf16 %v1419_v25, %v1415_v24  ;;  %v1643_v24 = vld [vmem:[%s13922_s3 + $0x100] sm:$0xff]  ;;  %v5909_v25 = vpack.c.bf16 %v1641_v20, %v1637_v19  ;;  %v1678_v19 = vld [vmem:[%s13922_s3 + $0x218] sm:$0xff] }
 0x2b3   :  { %5748 = vmatprep.subr.bf16.mxu0 %v5747_v34  ;;  %v1612_v34 = vld [vmem:[%s13922_s3 + $0x8] sm:$0xff] }
 0x2b4   :  { %5810 = vmatpush1.bf16.msra.mxu1 %v5809_v39  ;;  %v5831_v37 = vpack.c.bf16 %v1616_v35, %v1612_v34  ;;  %v1614_v39 = vld [vmem:[%s13922_s3 + $0x18] sm:$0xff]  ;;  %v1649_v34 = vld [vmem:[%s13922_s3 + $0x130] sm:$0xff] }
 0x2b5   :  { %5812 = vmatprep.subr.bf16.mxu1 %v5811_v40  ;;  %v1618_v40 = vld [vmem:[%s13922_s3 + $0x38] sm:$0xff] }
 0x2b6   :  { %5750 = vmatpush1.bf16.msra.mxu0 %v5749_v43  ;;  %v5895_v42 = vpack.c.bf16 %v1618_v40, %v1614_v39  ;;  %v1613_v43 = vld [vmem:[%s13922_s3 + $0x10] sm:$0xff]  ;;  %v1651_v39 = vld [vmem:[%s13922_s3 + $0x140] sm:$0xff] }
 0x2b7   :  { %5752 = vmatprep.subr.bf16.mxu0 %v5751_v48  ;;  %v5897_v46 = vpack.c.bf16 %v1617_v45, %v1613_v43  ;;  %v1620_v48 = vld [vmem:[%s13922_s3 + $0x48] sm:$0xff]  ;;  %v1655_v40 = vld [vmem:[%s13922_s3 + $0x160] sm:$0xff]  ;;  %v1658_v43 = vld [vmem:[%s13922_s3 + $0x178] sm:$0xff] }
 0x2b8   :  { %5814 = vmatpush1.bf16.msra.mxu1 %v5813_v3  ;;  %v5835_v51 = vpack.c.bf16 %v1624_v49, %v1620_v48  ;;  %v1622_v3 = vld [vmem:[%s13922_s3 + $0x58] sm:$0xff]  ;;  %v1653_v45 = vld [vmem:[%s13922_s3 + $0x150] sm:$0xff] }
 0x2b9   :  { %5816 = vmatprep.subr.bf16.mxu1 %v5815_v53  ;;  %v1626_v53 = vld [vmem:[%s13922_s3 + $0x78] sm:$0xff] }
 0x2ba   :  { %5754 = vmatpush1.bf16.msra.mxu0 %v5753_v56  ;;  %v5899_v55 = vpack.c.bf16 %v1626_v53, %v1622_v3  ;;  %v1621_v56 = vld [vmem:[%s13922_s3 + $0x50] sm:$0xff]  ;;  %v1659_v3 = vld [vmem:[%s13922_s3 + $0x180] sm:$0xff] }
 0x2bb   :  { %5756 = vmatprep.subr.bf16.mxu0 %v5755_v59  ;;  %v5901_v59 = vpack.c.bf16 %v1625_v57, %v1621_v56  ;;  %v1663_v53 = vld [vmem:[%s13922_s3 + $0x1a0] sm:$0xff]  ;;  %v1666_v56 = vld [vmem:[%s13922_s3 + $0x1b8] sm:$0xff]  ;;  %v1661_v57 = vld [vmem:[%s13922_s3 + $0x190] sm:$0xff] }
 0x2bc   :  { %5818 = vmatpush1.bf16.msra.mxu1 %v5817_v0  ;;  %v5841_v0 = vpack.c.bf16 %v1631_v62, %v1627_v61  ;;  %v5921_v60 = vpack.c.bf16 %v1665_v58, %v1661_v57  ;;  %v1668_v61 = vld [vmem:[%s13922_s3 + $0x1c8] sm:$0xff]  ;;  %v1706_v58 = vld [vmem:[%s13922_s3 + $0x2f8] sm:$0xff] }
 0x2bd   :  { %5820 = vmatprep.subr.bf16.mxu1 %v5819_v1  ;;  %v1630_v1 = vld [vmem:[%s13922_s3 + $0x98] sm:$0xff]  ;;  %v1672_v62 = vld [vmem:[%s13922_s3 + $0x1e8] sm:$0xff] }
 0x2be   :  { %5758 = vmatpush1.bf16.msra.mxu0 %v5757_v5  ;;  %v5903_v5 = vpack.c.bf16 %v1634_v2, %v1630_v1  ;;  %v1671_v1 = vld [vmem:[%s13922_s3 + $0x1e0] sm:$0xff]  ;;  %v1670_v2 = vld [vmem:[%s13922_s3 + $0x1d8] sm:$0xff] }
 0x2bf   :  { %5760 = vmatprep.subr.bf16.mxu0 %v5759_v8  ;;  %v1640_v8 = vld [vmem:[%s13922_s3 + $0xe8] sm:$0xff] }
 0x2c0   :  { %5822 = vmatpush1.bf16.msra.mxu1 %v5821_v14  ;;  %v5843_v10 = vpack.c.bf16 %v1640_v8, %v1636_v7  ;;  %v1638_v14 = vld [vmem:[%s13922_s3 + $0xd8] sm:$0xff]  ;;  %v1673_v7 = vld [vmem:[%s13922_s3 + $0x1f0] sm:$0xff] }
 0x2c1   :  { %5824 = vmatprep.subr.bf16.mxu1 %v5823_v17  ;;  %v1642_v17 = vld [vmem:[%s13922_s3 + $0xf8] sm:$0xff] }
 0x2c2   :  { %5762 = vmatpush1.bf16.msra.mxu0 %v5761_v21  ;;  %v5845_v21 = vpack.c.bf16 %v1639_v12, %v1635_v11  ;;  %v5907_v44 = vpack.c.bf16 %v1642_v17, %v1638_v14  ;;  %v1680_v11 = vld [vmem:[%s13922_s3 + $0x228] sm:$0xff]  ;;  %v1675_v14 = vld [vmem:[%s13922_s3 + $0x200] sm:$0xff] }
 0x2c3   :  { %5764 = vmatprep.subr.bf16.mxu0 %v5763_v23  ;;  %v1648_v23 = vld [vmem:[%s13922_s3 + $0x128] sm:$0xff]  ;;  %v1679_v17 = vld [vmem:[%s13922_s3 + $0x220] sm:$0xff] }
 0x2c4   :  { %5826 = vmatpush1.bf16.msra.mxu1 %v5825_v27  ;;  %v5847_v27 = vpack.c.bf16 %v1648_v23, %v1644_v22  ;;  %v5865_v20 = vpack.c.bf16 %v1679_v17, %v1675_v14  ;;  %v1681_v22 = vld [vmem:[%s13922_s3 + $0x230] sm:$0xff]  ;;  %v1720_v14 = vld [vmem:[%s13922_s3 + $0x368] sm:$0xff] }
 0x2c5   :  { %5828 = vmatprep.subr.bf16.mxu1 %v5827_v28  ;;  %v1647_v28 = vld [vmem:[%s13922_s3 + $0x120] sm:$0xff] }
 0x2c6   :  { %5766 = vmatpush1.bf16.msra.mxu0 %v5765_v31  ;;  %v5911_v31 = vpack.c.bf16 %v1650_v30, %v1646_v29  ;;  %v1683_v29 = vld [vmem:[%s13922_s3 + $0x240] sm:$0xff] }
 0x2c7   :  { %5832 = vmatprep.subr.bf16.mxu0 %v5831_v37  ;;  %v1656_v37 = vld [vmem:[%s13922_s3 + $0x168] sm:$0xff]  ;;  %v1687_v30 = vld [vmem:[%s13922_s3 + $0x260] sm:$0xff] }
 0x2c8   :  { %5830 = vmatpush1.bf16.msra.mxu1 %v5829_v32  ;;  %v5849_v32 = vpack.c.bf16 %v1647_v28, %v1643_v24  ;;  %v5851_v38 = vpack.c.bf16 %v1656_v37, %v1652_v36 }
 0x2c9   :  { %1510 = vmatmul.mubr.f32.vlgmr.msra.gmra.mrb[8].mxu0 %v5141_v33  ;;  %5896 = vmatprep.subr.bf16.mxu1 %v5895_v42  ;;  %v5853_v42 = vpack.c.bf16 %v1655_v40, %v1651_v39  ;;  %v1696_v39 = vld [vmem:[%s13922_s3 + $0x2a8] sm:$0xff] }
 0x2ca   :  { %5834 = vmatpush1.bf16.msra.mxu0 %v5833_v41  ;;  %v1654_v41 = vld [vmem:[%s13922_s3 + $0x158] sm:$0xff] }
 0x2cb   :  { %1581 = vmatmul.mubr.f32.vlgmr.msra.gmra.mrb[8].mxu1 %v5141_v33  ;;  %5836 = vmatprep.subr.bf16.mxu0 %v5835_v51  ;;  %v1645_v33 = vld [vmem:[%s13922_s3 + $0x110] sm:$0xff]  ;;  %v5915_v48 = vpack.c.bf16 %v1658_v43, %v1654_v41  ;;  %v1664_v51 = vld [vmem:[%s13922_s3 + $0x1a8] sm:$0xff]  ;;  %v1691_v41 = vld [vmem:[%s13922_s3 + $0x280] sm:$0xff] }
 0x2cc   :  { %5898 = vmatpush1.bf16.msra.mxu1 %v5897_v46  ;;  %v5913_v35 = vpack.c.bf16 %v1649_v34, %v1645_v33  ;;  %v1657_v46 = vld [vmem:[%s13922_s3 + $0x170] sm:$0xff]  ;;  %v5855_v52 = vpack.c.bf16 %v1664_v51, %v1660_v50  ;;  %v1690_v33 = vld [vmem:[%s13922_s3 + $0x278] sm:$0xff] }
 0x2cd   :  { %5900 = vmatprep.subr.bf16.mxu1 %v5899_v55  ;;  %v5917_v49 = vpack.c.bf16 %v1657_v46, %v1653_v45  ;;  %v5857_v55 = vpack.c.bf16 %v1663_v53, %v1659_v3  ;;  %v1685_v34 = vld [vmem:[%s13922_s3 + $0x250] sm:$0xff]  ;;  %v1694_v43 = vld [vmem:[%s13922_s3 + $0x298] sm:$0xff]  ;;  %v1704_v3 = vld [vmem:[%s13922_s3 + $0x2e8] sm:$0xff] }
 0x2ce   :  { %5838 = vmatpush1.bf16.msra.mxu0 %v5837_v54  ;;  %v1662_v54 = vld [vmem:[%s13922_s3 + $0x198] sm:$0xff] }
 0x2cf   :  { %5840 = vmatprep.subr.bf16.mxu0 %v5839_v63  ;;  %v5859_v63 = vpack.c.bf16 %v1672_v62, %v1668_v61  ;;  %v1698_v46 = vld [vmem:[%s13922_s3 + $0x2b8] sm:$0xff] }
 0x2d0   :  { %5902 = vmatpush1.bf16.msra.mxu1 %v5901_v59  ;;  %v5919_v59 = vpack.c.bf16 %v1666_v56, %v1662_v54  ;;  %v5935_v50 = vpack.c.bf16 %v1698_v46, %v1694_v43  ;;  %v1699_v54 = vld [vmem:[%s13922_s3 + $0x2c0] sm:$0xff]  ;;  %v1702_v56 = vld [vmem:[%s13922_s3 + $0x2d8] sm:$0xff] }
 0x2d1   :  { %5904 = vmatprep.subr.bf16.mxu1 %v5903_v5  ;;  %v1674_v5 = vld [vmem:[%s13922_s3 + $0x1f8] sm:$0xff]  ;;  %v5939_v61 = vpack.c.bf16 %v1706_v58, %v1702_v56  ;;  %v1735_v43 = vld [vmem:[%s13922_s3 + $0x3e0] sm:$0xff] }
 0x2d2   :  { %5842 = vmatpush1.bf16.msra.mxu0 %v5841_v0  ;;  %v1667_v0 = vld [vmem:[%s13922_s3 + $0x1c0] sm:$0xff]  ;;  %v5923_v8 = vpack.c.bf16 %v1674_v5, %v1670_v2  ;;  %v1710_v5 = vld [vmem:[%s13922_s3 + $0x318] sm:$0xff] }
 0x2d3   :  { %5844 = vmatprep.subr.bf16.mxu0 %v5843_v10  ;;  %v5861_v4 = vpack.c.bf16 %v1671_v1, %v1667_v0  ;;  %v1676_v10 = vld [vmem:[%s13922_s3 + $0x208] sm:$0xff]  ;;  %v1707_v2 = vld [vmem:[%s13922_s3 + $0x300] sm:$0xff]  ;;  %v1734_v46 = vld [vmem:[%s13922_s3 + $0x3d8] sm:$0xff] }
 0x2d4   :  { %5906 = vmatpush1.bf16.msra.mxu1 %v5905_v9  ;;  %v5925_v9 = vpack.c.bf16 %v1673_v7, %v1669_v6  ;;  %v5863_v12 = vpack.c.bf16 %v1680_v11, %v1676_v10  ;;  %v1712_v0 = vld [vmem:[%s13922_s3 + $0x328] sm:$0xff]  ;;  %v1714_v7 = vld [vmem:[%s13922_s3 + $0x338] sm:$0xff]  ;;  %v1103_v56 = vld [vmem:[%s13925_s4] sm:$0xf] }
 0x2d5   :  { %5908 = vmatprep.subr.bf16.mxu1 %v5907_v44  ;;  %v1677_v44 = vld [vmem:[%s13922_s3 + $0x210] sm:$0xff]  ;;  %v5943_v10 = vpack.c.bf16 %v1714_v7, %v1710_v5  ;;  %v1938_v58 = vld [vmem:[%s13921_s1 + $0x38] sm:$0xff]  ;;  %v1120_v7 = vrot.slane %v1103_v56, %v8333_v18 }
 0x2d6   :  { %5846 = vmatpush1.bf16.msra.mxu0 %v5845_v21  ;;  %v1682_v21 = vld [vmem:[%s13922_s3 + $0x238] sm:$0xff]  ;;  %v5929_v24 = vpack.c.bf16 %v1681_v22, %v1677_v44 }
 0x2d7   :  { %5848 = vmatprep.subr.bf16.mxu0 %v5847_v27  ;;  %v5927_v23 = vpack.c.bf16 %v1682_v21, %v1678_v19  ;;  %v1688_v27 = vld [vmem:[%s13922_s3 + $0x268] sm:$0xff]  ;;  %v1715_v19 = vld [vmem:[%s13922_s3 + $0x340] sm:$0xff]  ;;  %v1718_v21 = vld [vmem:[%s13922_s3 + $0x358] sm:$0xff] }
 0x2d8   :  { %5910 = vmatpush1.bf16.msra.mxu1 %v5909_v25  ;;  %v1684_v25 = vld [vmem:[%s13922_s3 + $0x248] sm:$0xff]  ;;  %v1722_v22 = vld [vmem:[%s13922_s3 + $0x378] sm:$0xff] }
 0x2d9   :  { %5912 = vmatprep.subr.bf16.mxu1 %v5911_v31  ;;  %v5867_v28 = vpack.c.bf16 %v1688_v27, %v1684_v25  ;;  %v1686_v31 = vld [vmem:[%s13922_s3 + $0x258] sm:$0xff]  ;;  %v5947_v25 = vpack.c.bf16 %v1722_v22, %v1718_v21 }
 0x2da   :  { %5850 = vmatpush1.bf16.msra.mxu0 %v5849_v32  ;;  %v5869_v32 = vpack.c.bf16 %v1687_v30, %v1683_v29  ;;  %v5931_v36 = vpack.c.bf16 %v1690_v33, %v1686_v31  ;;  %v1728_v29 = vld [vmem:[%s13922_s3 + $0x3a8] sm:$0xff]  ;;  %v1723_v30 = vld [vmem:[%s13922_s3 + $0x380] sm:$0xff]  ;;  %v1726_v33 = vld [vmem:[%s13922_s3 + $0x398] sm:$0xff] }
 0x2db   :  { %5852 = vmatprep.subr.bf16.mxu0 %v5851_v38  ;;  %v1692_v38 = vld [vmem:[%s13922_s3 + $0x288] sm:$0xff] }
 0x2dc   :  { %5914 = vmatpush1.bf16.msra.mxu1 %v5913_v35  ;;  %v1689_v35 = vld [vmem:[%s13922_s3 + $0x270] sm:$0xff]  ;;  %v5871_v40 = vpack.c.bf16 %v1696_v39, %v1692_v38  ;;  %v1732_v39 = vld [vmem:[%s13922_s3 + $0x3c8] sm:$0xff] }
 0x2dd   :  { %5916 = vmatprep.subr.bf16.mxu1 %v5915_v48  ;;  %v5933_v37 = vpack.c.bf16 %v1689_v35, %v1685_v34  ;;  %v1693_v48 = vld [vmem:[%s13922_s3 + $0x290] sm:$0xff]  ;;  %v1730_v34 = vld [vmem:[%s13922_s3 + $0x3b8] sm:$0xff] }
 0x2de   :  { %5854 = vmatpush1.bf16.msra.mxu0 %v5853_v42  ;;  %v1695_v42 = vld [vmem:[%s13922_s3 + $0x2a0] sm:$0xff]  ;;  %v1729_v38 = vld [vmem:[%s13922_s3 + $0x3b0] sm:$0xff] }
 0x2df   :  { %5856 = vmatprep.subr.bf16.mxu0 %v5855_v52  ;;  %v5873_v45 = vpack.c.bf16 %v1695_v42, %v1691_v41  ;;  %v1700_v52 = vld [vmem:[%s13922_s3 + $0x2c8] sm:$0xff]  ;;  %v1731_v42 = vld [vmem:[%s13922_s3 + $0x3c0] sm:$0xff] }
 0x2e0   :  { %5918 = vmatpush1.bf16.msra.mxu1 %v5917_v49  ;;  %v1697_v49 = vld [vmem:[%s13922_s3 + $0x2b0] sm:$0xff]  ;;  %v5875_v53 = vpack.c.bf16 %v1704_v3, %v1700_v52  ;;  %v1736_v41 = vld [vmem:[%s13922_s3 + $0x3e8] sm:$0xff] }
 0x2e1   :  { %5920 = vmatprep.subr.bf16.mxu1 %v5919_v59  ;;  %v5937_v51 = vpack.c.bf16 %v1697_v49, %v1693_v48  ;;  %v1701_v59 = vld [vmem:[%s13922_s3 + $0x2d0] sm:$0xff]  ;;  %v1738_v48 = vld [vmem:[%s13922_s3 + $0x3f8] sm:$0xff]  ;;  %v1932_v3 = vld [vmem:[%s13921_s1 + $0x8] sm:$0xff] }
 0x2e2   :  { %5858 = vmatpush1.bf16.msra.mxu0 %v5857_v55  ;;  %v1703_v55 = vld [vmem:[%s13922_s3 + $0x2e0] sm:$0xff]  ;;  %v1733_v49 = vld [vmem:[%s13922_s3 + $0x3d0] sm:$0xff] }
 0x2e3   :  { %5860 = vmatprep.subr.bf16.mxu0 %v5859_v63  ;;  %v5877_v57 = vpack.c.bf16 %v1703_v55, %v1699_v54  ;;  %v1708_v63 = vld [vmem:[%s13922_s3 + $0x308] sm:$0xff]  ;;  %v1737_v52 = vld [vmem:[%s13922_s3 + $0x3f0] sm:$0xff] }
 0x2e4   :  { %5922 = vmatpush1.bf16.msra.mxu1 %v5921_v60  ;;  %v1705_v60 = vld [vmem:[%s13922_s3 + $0x2f0] sm:$0xff]  ;;  %v5879_v1 = vpack.c.bf16 %v1712_v0, %v1708_v63  ;;  %v5957_v55 = vpack.c.bf16 %v1737_v52, %v1733_v49 }
 0x2e5   :  { %5924 = vmatprep.subr.bf16.mxu1 %v5923_v8  ;;  %v5941_v62 = vpack.c.bf16 %v1705_v60, %v1701_v59  ;;  %v1709_v8 = vld [vmem:[%s13922_s3 + $0x310] sm:$0xff]  ;;  %v1108_v60 = vrot.slane %v1103_v56, %v8324_v13 }
 0x2e6   :  { %5862 = vmatpush1.bf16.msra.mxu0 %v5861_v4  ;;  %v1711_v4 = vld [vmem:[%s13922_s3 + $0x320] sm:$0xff] }
 0x2e7   :  { %5864 = vmatprep.subr.bf16.mxu0 %v5863_v12  ;;  %v5881_v6 = vpack.c.bf16 %v1711_v4, %v1707_v2  ;;  %v1716_v12 = vld [vmem:[%s13922_s3 + $0x348] sm:$0xff] }
 0x2e8   :  { %5926 = vmatpush1.bf16.msra.mxu1 %v5925_v9  ;;  %v1713_v9 = vld [vmem:[%s13922_s3 + $0x330] sm:$0xff]  ;;  %v5883_v17 = vpack.c.bf16 %v1720_v14, %v1716_v12 }
 0x2e9   :  { %5928 = vmatprep.subr.bf16.mxu1 %v5927_v23  ;;  %v5945_v11 = vpack.c.bf16 %v1713_v9, %v1709_v8  ;;  %v1717_v23 = vld [vmem:[%s13922_s3 + $0x350] sm:$0xff]  ;;  %v1116_v9 = vrot.slane %v1103_v56, %v8336_v26 }
 0x2ea   :  { %5866 = vmatpush1.bf16.msra.mxu0 %v5865_v20  ;;  %v1719_v20 = vld [vmem:[%s13922_s3 + $0x360] sm:$0xff] }
 0x2eb   :  { %5868 = vmatprep.subr.bf16.mxu0 %v5867_v28  ;;  %v5885_v44 = vpack.c.bf16 %v1719_v20, %v1715_v19  ;;  %v1724_v28 = vld [vmem:[%s13922_s3 + $0x388] sm:$0xff] }
 0x2ec   :  { %5930 = vmatpush1.bf16.msra.mxu1 %v5929_v24  ;;  %v1721_v24 = vld [vmem:[%s13922_s3 + $0x370] sm:$0xff]  ;;  %v5887_v31 = vpack.c.bf16 %v1728_v29, %v1724_v28 }
 0x2ed   :  { %5932 = vmatprep.subr.bf16.mxu1 %v5931_v36  ;;  %v5949_v27 = vpack.c.bf16 %v1721_v24, %v1717_v23  ;;  %v5951_v36 = vpack.c.bf16 %v1730_v34, %v1726_v33 }
 0x2ee   :  { %5870 = vmatpush1.bf16.msra.mxu0 %v5869_v32  ;;  %v1727_v32 = vld [vmem:[%s13922_s3 + $0x3a0] sm:$0xff] }
 0x2ef   :  { %5872 = vmatprep.subr.bf16.mxu0 %v5871_v40  ;;  %v5889_v35 = vpack.c.bf16 %v1727_v32, %v1723_v30 }
 0x2f0   :  { %5934 = vmatpush1.bf16.msra.mxu1 %v5933_v37  ;;  %v1725_v37 = vld [vmem:[%s13922_s3 + $0x390] sm:$0xff] }
 0x2f1   :  { %5936 = vmatprep.subr.bf16.mxu1 %v5935_v50  ;;  %v5953_v40 = vpack.c.bf16 %v1729_v38, %v1725_v37  ;;  %v5893_v50 = vpack.c.bf16 %v1735_v43, %v1731_v42 }
 0x2f2   :  { %5874 = vmatpush1.bf16.msra.mxu0 %v5873_v45  ;;  %v5891_v45 = vpack.c.bf16 %v1736_v41, %v1732_v39 }
 0x2f3   :  { %5876 = vmatprep.subr.bf16.mxu0 %v5875_v53  ;;  %v1936_v53 = vld [vmem:[%s13921_s1 + $0x28] sm:$0xff] }
 0x2f4   :  { %5938 = vmatpush1.bf16.msra.mxu1 %v5937_v51  ;;  %v5955_v51 = vpack.c.bf16 %v1738_v48, %v1734_v46  ;;  %v5959_v54 = vpack.c.bf16 %v1936_v53, %v1932_v3 }
 0x2f5   :  { %5940 = vmatprep.subr.bf16.mxu1 %v5939_v61  ;;  %v1112_v61 = vrot.slane %v1103_v56, %v8329_v15 }
 0x2f6   :  { %5878 = vmatpush1.bf16.msra.mxu0 %v5877_v57  ;;  %v1934_v57 = vld [vmem:[%s13921_s1 + $0x18] sm:$0xff] }
 0x2f7   :  { %5880 = vmatprep.subr.bf16.mxu0 %v5879_v1  ;;  %v6023_v59 = vpack.c.bf16 %v1938_v58, %v1934_v57 }
 0x2f8   :  { %5942 = vmatpush1.bf16.msra.mxu1 %v5941_v62 }
 0x2f9   :  { %5944 = vmatprep.subr.bf16.mxu1 %v5943_v10 }
 0x2fa   :  { %5882 = vmatpush1.bf16.msra.mxu0 %v5881_v6 }
 0x2fb   :  { %5884 = vmatprep.subr.bf16.mxu0 %v5883_v17 }
 0x2fc   :  { %5946 = vmatpush1.bf16.msra.mxu1 %v5945_v11 }
 0x2fd   :  { %5948 = vmatprep.subr.bf16.mxu1 %v5947_v25 }
 0x2fe   :  { %5886 = vmatpush1.bf16.msra.mxu0 %v5885_v44 }
 0x2ff   :  { %5888 = vmatprep.subr.bf16.mxu0 %v5887_v31  ;;  %v1423_v31 = vld [vmem:[%s13924_s2] sm:$0xf] }
 0x300   :  { %5950 = vmatpush1.bf16.msra.mxu1 %v5949_v27  ;;  %v1432_v32 = vrot.slane %v1423_v31, %v8329_v15  ;;  %v1440_v39 = vrot.slane %v1423_v31, %v8333_v18  ;;  %v1436_v43 = vrot.slane %v1423_v31, %v8336_v26 }
 0x301   :  { %5952 = vmatprep.subr.bf16.mxu1 %v5951_v36 }
 0x302   :  { %5890 = vmatpush1.bf16.msra.mxu0 %v5889_v35 }
 0x303   :  { %5892 = vmatprep.subr.bf16.mxu0 %v5891_v45 }
 0x304   :  { %5954 = vmatpush1.bf16.msra.mxu1 %v5953_v40 }
 0x305   :  { %5956 = vmatprep.subr.bf16.mxu1 %v5955_v51 }
 0x306   :  { %5894 = vmatpush1.bf16.msra.mxu0 %v5893_v50 }
 0x307   :  { %5960 = vmatprep.subr.bf16.mxu0 %v5959_v54 }
 0x308   :  { %5958 = vmatpush1.bf16.msra.mxu1 %v5957_v55 }
 0x309   :  { %6024 = vmatprep.subr.bf16.mxu1 %v6023_v59  ;;  %v1931_v59 = vld [vmem:[%s13921_s1] sm:$0xff] }
 0x35c   :  { %v1191_v62 = vpop.f32.mrb[6].mxu0  ;;  %v1262_v63 = vpop.f32.mrb[6].mxu1 }
 0x35d   :  { %v1192_v0 = vadd.f32 %v1191_v62, %v1108_v60  ;;  %v1193_v1 = vpop.f32.mrb[7].mxu0  ;;  %v1264_v2 = vpop.f32.mrb[7].mxu1  ;;  %v1263_v11 = vadd.f32 %v1262_v63, %v1116_v9  ;;  %v1935_v60 = vld [vmem:[%s13921_s1 + $0x20] sm:$0xff]  ;;  %v1940_v62 = vld [vmem:[%s13921_s1 + $0x48] sm:$0xff]  ;;  %v1933_v63 = vld [vmem:[%s13921_s1 + $0x10] sm:$0xff] }
 0x35e   :  { %v1194_v4 = vadd.f32 %v1193_v1, %v1112_v61  ;;  %v1265_v8 = vadd.f32 %v1264_v2, %v1120_v7  ;;  %v5961_v2 = vpack.c.bf16 %v1935_v60, %v1931_v59  ;;  %v1943_v9 = vld [vmem:[%s13921_s1 + $0x60] sm:$0xff]  ;;  %v1974_v59 = vld [vmem:[%s13921_s1 + $0x158] sm:$0xff] }
 0x35f   :  { %v5137_v5 = vmul.f32 -1.442695, %v1192_v0  ;;  %v1937_v0 = vld [vmem:[%s13921_s1 + $0x30] sm:$0xff]  ;;  %v1978_v60 = vld [vmem:[%s13921_s1 + $0x178] sm:$0xff] }
 0x360   :  { %v5138_v6 = vmul.f32 -1.442695, %v1194_v4  ;;  %v5139_v10 = vmul.f32 -1.442695, %v1265_v8  ;;  %v1942_v4 = vld [vmem:[%s13921_s1 + $0x58] sm:$0xff]  ;;  %v1939_v8 = vld [vmem:[%s13921_s1 + $0x40] sm:$0xff] }
 0x361   :  { %7288 = vpow2.f32 %v5137_v5  ;;  %v1946_v5 = vld [vmem:[%s13921_s1 + $0x78] sm:$0xff] }
 0x362   :  { %7290 = vpow2.f32 %v5138_v6 }
 0x363   :  { %7292 = vpow2.f32 %v5139_v10  ;;  %v1948_v10 = vld [vmem:[%s13921_s1 + $0x88] sm:$0xff] }
 0x364   :  { %7294 = vtanh.f32 %v1263_v11  ;;  %v1952_v11 = vld [vmem:[%s13921_s1 + $0xa8] sm:$0xff] }
 0x36b   :  { %v7289_v12 = vpop.eup %7288 }
 0x36c   :  { %v7291_v14 = vpop.eup %7290  ;;  %v1270_v17 = vadd.f32 1.0, %v7289_v12  ;;  %v6025_v12 = vpack.c.bf16 %v1937_v0, %v1933_v63  ;;  %v1980_v63 = vld [vmem:[%s13921_s1 + $0x188] sm:$0xff] }
 0x36d   :  { %v1276_v19 = vadd.f32 1.0, %v7291_v14  ;;  %v7293_v20 = vpop.eup %7292  ;;  %v6027_v14 = vpack.c.bf16 %v1946_v5, %v1942_v4  ;;  %v1984_v0 = vld [vmem:[%s13921_s1 + $0x1a8] sm:$0xff]  ;;  %v1973_v4 = vld [vmem:[%s13921_s1 + $0x150] sm:$0xff] }
 0x36e   :  { %7296 = vrcp.f32 %v1270_v17  ;;  %v7295_v21 = vpop.eup %7294  ;;  %v1283_v24 = vadd.f32 1.0, %v7293_v20  ;;  %v1941_v17 = vld [vmem:[%s13921_s1 + $0x50] sm:$0xff]  ;;  %v5965_v20 = vpack.c.bf16 %v1943_v9, %v1939_v8  ;;  %v1986_v8 = vld [vmem:[%s13921_s1 + $0x1b8] sm:$0xff]  ;;  %v5983_v9 = vpack.c.bf16 %v1984_v0, %v1980_v63  ;;  %v2011_v63 = vld [vmem:[%s13921_s1 + $0x280] sm:$0xff] }
 0x36f   :  { %7298 = vrcp.f32 %v1276_v19  ;;  %v1945_v19 = vld [vmem:[%s13921_s1 + $0x70] sm:$0xff]  ;;  %v2015_v0 = vld [vmem:[%s13921_s1 + $0x2a0] sm:$0xff] }
 0x370   :  { %7300 = vrcp.f32 %v1283_v24  ;;  %v1951_v24 = vld [vmem:[%s13921_s1 + $0xa0] sm:$0xff]  ;;  %v1977_v5 = vld [vmem:[%s13921_s1 + $0x170] sm:$0xff] }
 0x378   :  { %v7297_v44 = vpop.eup %7296 }
 0x379   :  { %v7299_v22 = vpop.eup %7298  ;;  %v1287_v23 = vmul.f32 %v7297_v44, %v7295_v21  ;;  %v1950_v21 = vld [vmem:[%s13921_s1 + $0x98] sm:$0xff] }
 0x37a   :  { %v1286_v25 = vmul.f32 %v7299_v22, %v9120_v47  ;;  %v7301_v28 = vpop.eup %7300  ;;  %v1428_v47 = vrot.slane %v1423_v31, %v8324_v13  ;;  %v1954_v44 = vld [vmem:[%s13921_s1 + $0xb8] sm:$0xff]  ;;  %v5967_v22 = vpack.c.bf16 %v1952_v11, %v1948_v10  ;;  %v1949_v31 = vld [vmem:[%s13921_s1 + $0x90] sm:$0xff]  ;;  %v1979_v10 = vld [vmem:[%s13921_s1 + $0x180] sm:$0xff] }
 0x37b   :  { %v1983_v11 = vld [vmem:[%s13921_s1 + $0x1a0] sm:$0xff] }
 0x37c   :  { %v9916_v27 = vadd.f32 %v1287_v23, %v1286_v25  ;;  %v1947_v23 = vld [vmem:[%s13921_s1 + $0x80] sm:$0xff]  ;;  %v1956_v25 = vld [vmem:[%s13921_s1 + $0xc8] sm:$0xff] }
 0x37e   :  { %7302 = vtanh.f32 %v9916_v27 }
 0x388   :  { %v7303_v29 = vpop.eup %7302 }
 0x389   :  { %v1290_v30 = vmul.f32 %v7303_v29, %v7301_v28  ;;  %v1960_v28 = vld [vmem:[%s13921_s1 + $0xe8] sm:$0xff]  ;;  %v6029_v29 = vpack.c.bf16 %v1945_v19, %v1941_v17  ;;  %v6045_v17 = vpack.c.bf16 %v1977_v5, %v1973_v4 }
 0x38b   :  { %5140 = vst [vmem:[%s13926_s5 + $0x8] sm:$0xff] %v1290_v30  ;;  %1825 = vmatprep.mubr.f32.mxu0 %v1290_v30  ;;  %1896 = vmatprep.mubr.f32.mxu1 %v1290_v30  ;;  %v6031_v30 = vpack.c.bf16 %v1954_v44, %v1950_v21  ;;  %v1985_v21 = vld [vmem:[%s13921_s1 + $0x1b0] sm:$0xff]  ;;  %v5985_v44 = vpack.c.bf16 %v1983_v11, %v1979_v10  ;;  %v2026_v10 = vld [vmem:[%s13921_s1 + $0x2f8] sm:$0xff] }
 0x39c   :  { %v1511_v33 = vpop.f32.mrb[8].mxu0 }
 0x39d   :  { %v1512_v34 = vadd.f32 %v1511_v33, %v1428_v47  ;;  %v1513_v35 = vpop.f32.mrb[9].mxu0  ;;  %v1953_v47 = vld [vmem:[%s13921_s1 + $0xb0] sm:$0xff]  ;;  %v1958_v33 = vld [vmem:[%s13921_s1 + $0xd8] sm:$0xff] }
 0x39e   :  { %v1514_v36 = vadd.f32 %v1513_v35, %v1432_v32  ;;  %v1582_v37 = vpop.f32.mrb[8].mxu1  ;;  %v5969_v32 = vpack.c.bf16 %v1951_v24, %v1947_v23  ;;  %v5971_v35 = vpack.c.bf16 %v1960_v28, %v1956_v25  ;;  %v1994_v23 = vld [vmem:[%s13921_s1 + $0x1f8] sm:$0xff]  ;;  %v1987_v25 = vld [vmem:[%s13921_s1 + $0x1c0] sm:$0xff] }
 0x39f   :  { %v5142_v38 = vmul.f32 -1.442695, %v1512_v34  ;;  %v1584_v40 = vpop.f32.mrb[9].mxu1  ;;  %v1583_v46 = vadd.f32 %v1582_v37, %v1436_v43  ;;  %v1962_v34 = vld [vmem:[%s13921_s1 + $0xf8] sm:$0xff]  ;;  %v1959_v37 = vld [vmem:[%s13921_s1 + $0xe0] sm:$0xff]  ;;  %v1961_v43 = vld [vmem:[%s13921_s1 + $0xf0] sm:$0xff] }
 0x3a0   :  { %v5143_v41 = vmul.f32 -1.442695, %v1514_v36  ;;  %v1585_v42 = vadd.f32 %v1584_v40, %v1440_v39  ;;  %v1955_v36 = vld [vmem:[%s13921_s1 + $0xc0] sm:$0xff]  ;;  %v1968_v39 = vld [vmem:[%s13921_s1 + $0x128] sm:$0xff]  ;;  %v6033_v40 = vpack.c.bf16 %v1953_v47, %v1949_v31 }
 0x3a1   :  { %7304 = vpow2.f32 %v5142_v38  ;;  %v1964_v38 = vld [vmem:[%s13921_s1 + $0x108] sm:$0xff]  ;;  %v1991_v28 = vld [vmem:[%s13921_s1 + $0x1e0] sm:$0xff] }
 0x3a2   :  { %7306 = vpow2.f32 %v5143_v41  ;;  %v5144_v45 = vmul.f32 -1.442695, %v1585_v42  ;;  %v6035_v41 = vpack.c.bf16 %v1962_v34, %v1958_v33  ;;  %v1957_v42 = vld [vmem:[%s13921_s1 + $0xd0] sm:$0xff]  ;;  %v5989_v34 = vpack.c.bf16 %v1991_v28, %v1987_v25  ;;  %v2034_v25 = vld [vmem:[%s13921_s1 + $0x338] sm:$0xff] }
 0x3a3   :  { %v1993_v33 = vld [vmem:[%s13921_s1 + $0x1f0] sm:$0xff] }
 0x3a4   :  { %7308 = vpow2.f32 %v5144_v45  ;;  %v5973_v45 = vpack.c.bf16 %v1959_v37, %v1955_v36  ;;  %v2002_v36 = vld [vmem:[%s13921_s1 + $0x238] sm:$0xff] }
 0x3a5   :  { %7310 = vtanh.f32 %v1583_v46  ;;  %v1966_v46 = vld [vmem:[%s13921_s1 + $0x118] sm:$0xff] }
 0x3ab   :  { %v7305_v48 = vpop.eup %7304 }
 0x3ac   :  { %v7307_v49 = vpop.eup %7306  ;;  %v1590_v50 = vadd.f32 1.0, %v7305_v48  ;;  %v1970_v48 = vld [vmem:[%s13921_s1 + $0x138] sm:$0xff] }
 0x3ad   :  { %v1596_v51 = vadd.f32 1.0, %v7307_v49  ;;  %v5975_v49 = vpack.c.bf16 %v1968_v39, %v1964_v38  ;;  %v1995_v38 = vld [vmem:[%s13921_s1 + $0x200] sm:$0xff] }
 0x3ae   :  { %7312 = vrcp.f32 %v1590_v50  ;;  %v7309_v52 = vpop.eup %7308  ;;  %v1963_v50 = vld [vmem:[%s13921_s1 + $0x100] sm:$0xff] }
 0x3af   :  { %7314 = vrcp.f32 %v1596_v51  ;;  %v7311_v3 = vpop.eup %7310  ;;  %v1603_v54 = vadd.f32 1.0, %v7309_v52  ;;  %v1967_v51 = vld [vmem:[%s13921_s1 + $0x120] sm:$0xff]  ;;  %v1972_v52 = vld [vmem:[%s13921_s1 + $0x148] sm:$0xff] }
 0x3b0   :  { %v1999_v39 = vld [vmem:[%s13921_s1 + $0x220] sm:$0xff] }
 0x3b1   :  { %7316 = vrcp.f32 %v1603_v54  ;;  %v6039_v54 = vpack.c.bf16 %v1970_v48, %v1966_v46  ;;  %v2001_v46 = vld [vmem:[%s13921_s1 + $0x230] sm:$0xff]  ;;  %v5993_v48 = vpack.c.bf16 %v1999_v39, %v1995_v38  ;;  %v2042_v38 = vld [vmem:[%s13921_s1 + $0x378] sm:$0xff] }
 0x3b8   :  { %v7313_v53 = vpop.eup %7312 }
 0x3b9   :  { %v7315_v55 = vpop.eup %7314  ;;  %v1607_v56 = vmul.f32 %v7313_v53, %v7311_v3  ;;  %v1976_v3 = vld [vmem:[%s13921_s1 + $0x168] sm:$0xff]  ;;  %v6037_v53 = vpack.c.bf16 %v1961_v43, %v1957_v42 }
 0x3ba   :  { %v1606_v57 = vmul.f32 %v7315_v55, %v9134_v16  ;;  %v1944_v16 = vld [vmem:[%s13921_s1 + $0x68] sm:$0xff]  ;;  %v1965_v55 = vld [vmem:[%s13921_s1 + $0x110] sm:$0xff] }
 0x3bb   :  { %v7317_v61 = vpop.eup %7316  ;;  %v5963_v7 = vpack.c.bf16 %v1944_v16, %v1940_v62  ;;  %v1971_v62 = vld [vmem:[%s13921_s1 + $0x140] sm:$0xff] }
 0x3bc   :  { %v9930_v58 = vadd.f32 %v1607_v56, %v1606_v57  ;;  %v1969_v56 = vld [vmem:[%s13921_s1 + $0x130] sm:$0xff]  ;;  %v5977_v57 = vpack.c.bf16 %v1967_v51, %v1963_v50  ;;  %v1975_v16 = vld [vmem:[%s13921_s1 + $0x160] sm:$0xff]  ;;  %v2010_v50 = vld [vmem:[%s13921_s1 + $0x278] sm:$0xff] }
 0x3be   :  { %7318 = vtanh.f32 %v9930_v58 }
 0x3c8   :  { %v7319_v1 = vpop.eup %7318 }
 0x3c9   :  { %v1610_v6 = vmul.f32 %v7319_v1, %v7317_v61  ;;  %v5979_v61 = vpack.c.bf16 %v1976_v3, %v1972_v52  ;;  %v6041_v1 = vpack.c.bf16 %v1969_v56, %v1965_v55  ;;  %v2003_v52 = vld [vmem:[%s13921_s1 + $0x240] sm:$0xff] }
 0x3ca   :  { %v2007_v3 = vld [vmem:[%s13921_s1 + $0x260] sm:$0xff] }
 0x3cb   :  { %1826 = vmatmul.mubr.f32.vlgmr.msra.gmra.mrb[10].mxu0 %v1610_v6  ;;  %1897 = vmatmul.mubr.f32.vlgmr.msra.gmra.mrb[10].mxu1 %v1610_v6 }
 0x3cc   :  { %5962 = vmatpush1.bf16.msra.mxu0 %v5961_v2  ;;  %2145 = vmatprep.mubr.f32.mxu0 %v1610_v6  ;;  %v6043_v2 = vpack.c.bf16 %v1978_v60, %v1974_v59  ;;  %v2009_v59 = vld [vmem:[%s13921_s1 + $0x270] sm:$0xff]  ;;  %v5997_v60 = vpack.c.bf16 %v2007_v3, %v2003_v52  ;;  %v2050_v52 = vld [vmem:[%s13921_s1 + $0x3b8] sm:$0xff] }
 0x3cd   :  { %2216 = vmatprep.mubr.f32.mxu1 %v1610_v6  ;;  %5964 = vmatprep.subr.bf16.mxu0 %v5963_v7  ;;  %v5981_v6 = vpack.c.bf16 %v1975_v16, %v1971_v62  ;;  %v1982_v7 = vld [vmem:[%s13921_s1 + $0x198] sm:$0xff] }
 0x3ce   :  { %6026 = vmatpush1.bf16.msra.mxu1 %v6025_v12  ;;  %v1988_v12 = vld [vmem:[%s13921_s1 + $0x1c8] sm:$0xff]  ;;  %v6047_v19 = vpack.c.bf16 %v1986_v8, %v1982_v7  ;;  %v2018_v62 = vld [vmem:[%s13921_s1 + $0x2b8] sm:$0xff]  ;;  %v2017_v7 = vld [vmem:[%s13921_s1 + $0x2b0] sm:$0xff]  ;;  %v6001_v8 = vpack.c.bf16 %v2015_v0, %v2011_v63 }
 0x3cf   :  { %6028 = vmatprep.subr.bf16.mxu1 %v6027_v14  ;;  %v1992_v14 = vld [vmem:[%s13921_s1 + $0x1e8] sm:$0xff]  ;;  %v2058_v63 = vld [vmem:[%s13921_s1 + $0x3f8] sm:$0xff] }
 0x3d0   :  { %5966 = vmatpush1.bf16.msra.mxu0 %v5965_v20  ;;  %v1981_v20 = vld [vmem:[%s13921_s1 + $0x190] sm:$0xff]  ;;  %v5987_v24 = vpack.c.bf16 %v1992_v14, %v1988_v12  ;;  %v2019_v12 = vld [vmem:[%s13921_s1 + $0x2c0] sm:$0xff] }
 0x3d1   :  { %5968 = vmatprep.subr.bf16.mxu0 %v5967_v22  ;;  %v1990_v22 = vld [vmem:[%s13921_s1 + $0x1d8] sm:$0xff]  ;;  %v6049_v31 = vpack.c.bf16 %v1985_v21, %v1981_v20  ;;  %v2023_v14 = vld [vmem:[%s13921_s1 + $0x2e0] sm:$0xff] }
 0x3d2   :  { %6030 = vmatpush1.bf16.msra.mxu1 %v6029_v29  ;;  %v1996_v29 = vld [vmem:[%s13921_s1 + $0x208] sm:$0xff]  ;;  %v6051_v47 = vpack.c.bf16 %v1994_v23, %v1990_v22  ;;  %v2025_v22 = vld [vmem:[%s13921_s1 + $0x2f0] sm:$0xff]  ;;  %v6005_v23 = vpack.c.bf16 %v2023_v14, %v2019_v12  ;;  %v2247_v14 = vld [vmem:[%s13922_s3] sm:$0xff] }
 0x3d3   :  { %6032 = vmatprep.subr.bf16.mxu1 %v6031_v30  ;;  %v2000_v30 = vld [vmem:[%s13921_s1 + $0x228] sm:$0xff] }
 0x3d4   :  { %5970 = vmatpush1.bf16.msra.mxu0 %v5969_v32  ;;  %v1989_v32 = vld [vmem:[%s13921_s1 + $0x1d0] sm:$0xff]  ;;  %v5991_v37 = vpack.c.bf16 %v2000_v30, %v1996_v29  ;;  %v2027_v29 = vld [vmem:[%s13921_s1 + $0x300] sm:$0xff]  ;;  %v2252_v12 = vld [vmem:[%s13922_s3 + $0x28] sm:$0xff] }
 0x3d5   :  { %5972 = vmatprep.subr.bf16.mxu0 %v5971_v35  ;;  %v1998_v35 = vld [vmem:[%s13921_s1 + $0x218] sm:$0xff]  ;;  %v6053_v42 = vpack.c.bf16 %v1993_v33, %v1989_v32  ;;  %v2031_v30 = vld [vmem:[%s13921_s1 + $0x320] sm:$0xff] }
 0x3d6   :  { %6034 = vmatpush1.bf16.msra.mxu1 %v6033_v40  ;;  %v2004_v40 = vld [vmem:[%s13921_s1 + $0x248] sm:$0xff]  ;;  %v6055_v43 = vpack.c.bf16 %v2002_v36, %v1998_v35  ;;  %v2033_v35 = vld [vmem:[%s13921_s1 + $0x330] sm:$0xff]  ;;  %v6009_v36 = vpack.c.bf16 %v2031_v30, %v2027_v29  ;;  %v2255_v30 = vld [vmem:[%s13922_s3 + $0x40] sm:$0xff] }
 0x3d7   :  { %6036 = vmatprep.subr.bf16.mxu1 %v6035_v41  ;;  %v2008_v41 = vld [vmem:[%s13921_s1 + $0x268] sm:$0xff] }
 0x3d8   :  { %5974 = vmatpush1.bf16.msra.mxu0 %v5973_v45  ;;  %v1997_v45 = vld [vmem:[%s13921_s1 + $0x210] sm:$0xff]  ;;  %v5995_v51 = vpack.c.bf16 %v2008_v41, %v2004_v40  ;;  %v2035_v40 = vld [vmem:[%s13921_s1 + $0x340] sm:$0xff]  ;;  %v2260_v29 = vld [vmem:[%s13922_s3 + $0x68] sm:$0xff] }
 0x3d9   :  { %5976 = vmatprep.subr.bf16.mxu0 %v5975_v49  ;;  %v2006_v49 = vld [vmem:[%s13921_s1 + $0x258] sm:$0xff]  ;;  %v6057_v55 = vpack.c.bf16 %v2001_v46, %v1997_v45  ;;  %v2039_v41 = vld [vmem:[%s13921_s1 + $0x360] sm:$0xff] }
 0x3da   :  { %6038 = vmatpush1.bf16.msra.mxu1 %v6037_v53  ;;  %v2012_v53 = vld [vmem:[%s13921_s1 + $0x288] sm:$0xff]  ;;  %v6059_v56 = vpack.c.bf16 %v2010_v50, %v2006_v49  ;;  %v2041_v49 = vld [vmem:[%s13921_s1 + $0x370] sm:$0xff]  ;;  %v6013_v50 = vpack.c.bf16 %v2039_v41, %v2035_v40  ;;  %v2263_v41 = vld [vmem:[%s13922_s3 + $0x80] sm:$0xff] }
 0x3db   :  { %6040 = vmatprep.subr.bf16.mxu1 %v6039_v54  ;;  %v2016_v54 = vld [vmem:[%s13921_s1 + $0x2a8] sm:$0xff] }
 0x3dc   :  { %5978 = vmatpush1.bf16.msra.mxu0 %v5977_v57  ;;  %v2005_v57 = vld [vmem:[%s13921_s1 + $0x250] sm:$0xff]  ;;  %v5999_v16 = vpack.c.bf16 %v2016_v54, %v2012_v53  ;;  %v2043_v53 = vld [vmem:[%s13921_s1 + $0x380] sm:$0xff]  ;;  %v2268_v40 = vld [vmem:[%s13922_s3 + $0xa8] sm:$0xff] }
 0x3dd   :  { %5980 = vmatprep.subr.bf16.mxu0 %v5979_v61  ;;  %v2014_v61 = vld [vmem:[%s13921_s1 + $0x298] sm:$0xff]  ;;  %v6061_v4 = vpack.c.bf16 %v2009_v59, %v2005_v57  ;;  %v2047_v54 = vld [vmem:[%s13921_s1 + $0x3a0] sm:$0xff] }
 0x3de   :  { %6042 = vmatpush1.bf16.msra.mxu1 %v6041_v1  ;;  %v2020_v1 = vld [vmem:[%s13921_s1 + $0x2c8] sm:$0xff]  ;;  %v6063_v5 = vpack.c.bf16 %v2018_v62, %v2014_v61  ;;  %v2049_v61 = vld [vmem:[%s13921_s1 + $0x3b0] sm:$0xff]  ;;  %v6017_v62 = vpack.c.bf16 %v2047_v54, %v2043_v53 }
 0x3df   :  { %6044 = vmatprep.subr.bf16.mxu1 %v6043_v2  ;;  %v2024_v2 = vld [vmem:[%s13921_s1 + $0x2e8] sm:$0xff] }
 0x3e0   :  { %5982 = vmatpush1.bf16.msra.mxu0 %v5981_v6  ;;  %v2013_v6 = vld [vmem:[%s13921_s1 + $0x290] sm:$0xff]  ;;  %v6003_v11 = vpack.c.bf16 %v2024_v2, %v2020_v1  ;;  %v2051_v1 = vld [vmem:[%s13921_s1 + $0x3c0] sm:$0xff] }
 0x3e1   :  { %5984 = vmatprep.subr.bf16.mxu0 %v5983_v9  ;;  %v2022_v9 = vld [vmem:[%s13921_s1 + $0x2d8] sm:$0xff]  ;;  %v6065_v20 = vpack.c.bf16 %v2017_v7, %v2013_v6  ;;  %v2055_v2 = vld [vmem:[%s13921_s1 + $0x3e0] sm:$0xff]  ;;  %v2053_v6 = vld [vmem:[%s13921_s1 + $0x3d0] sm:$0xff] }
 0x3e2   :  { %6046 = vmatpush1.bf16.msra.mxu1 %v6045_v17  ;;  %v2028_v17 = vld [vmem:[%s13921_s1 + $0x308] sm:$0xff]  ;;  %v6067_v21 = vpack.c.bf16 %v2026_v10, %v2022_v9  ;;  %v2057_v7 = vld [vmem:[%s13921_s1 + $0x3f0] sm:$0xff]  ;;  %v5149_v10 = vld [vmem:[%s13923_s0 + $0x18] sm:$0xff] }
 0x3e3   :  { %6048 = vmatprep.subr.bf16.mxu1 %v6047_v19  ;;  %v2032_v19 = vld [vmem:[%s13921_s1 + $0x328] sm:$0xff]  ;;  %v6085_v9 = vpack.c.bf16 %v2057_v7, %v2053_v6  ;;  %v2282_v6 = vld [vmem:[%s13922_s3 + $0x118] sm:$0xff] }
 0x3e4   :  { %5986 = vmatpush1.bf16.msra.mxu0 %v5985_v44  ;;  %v2021_v44 = vld [vmem:[%s13921_s1 + $0x2d0] sm:$0xff]  ;;  %v6007_v28 = vpack.c.bf16 %v2032_v19, %v2028_v17  ;;  %v2251_v19 = vld [vmem:[%s13922_s3 + $0x20] sm:$0xff]  ;;  %v2286_v7 = vld [vmem:[%s13922_s3 + $0x138] sm:$0xff] }
 0x3e5   :  { %5988 = vmatprep.subr.bf16.mxu0 %v5987_v24  ;;  %v2030_v24 = vld [vmem:[%s13921_s1 + $0x318] sm:$0xff]  ;;  %v6069_v32 = vpack.c.bf16 %v2025_v22, %v2021_v44  ;;  %v6089_v44 = vpack.c.bf16 %v2251_v19, %v2247_v14  ;;  %v2288_v14 = vld [vmem:[%s13922_s3 + $0x148] sm:$0xff] }
 0x3e6   :  { %6050 = vmatpush1.bf16.msra.mxu1 %v6049_v31  ;;  %v2036_v31 = vld [vmem:[%s13921_s1 + $0x348] sm:$0xff]  ;;  %v6071_v33 = vpack.c.bf16 %v2034_v25, %v2030_v24  ;;  %v2253_v24 = vld [vmem:[%s13922_s3 + $0x30] sm:$0xff] }
 0x3e7   :  { %6052 = vmatprep.subr.bf16.mxu1 %v6051_v47  ;;  %v2040_v47 = vld [vmem:[%s13921_s1 + $0x368] sm:$0xff] }
 0x3e8   :  { %5990 = vmatpush1.bf16.msra.mxu0 %v5989_v34  ;;  %v2029_v34 = vld [vmem:[%s13921_s1 + $0x310] sm:$0xff]  ;;  %v6011_v39 = vpack.c.bf16 %v2040_v47, %v2036_v31  ;;  %v2259_v47 = vld [vmem:[%s13922_s3 + $0x60] sm:$0xff] }
 0x3e9   :  { %5992 = vmatprep.subr.bf16.mxu0 %v5991_v37  ;;  %v2038_v37 = vld [vmem:[%s13921_s1 + $0x358] sm:$0xff]  ;;  %v6073_v45 = vpack.c.bf16 %v2033_v35, %v2029_v34  ;;  %v6093_v34 = vpack.c.bf16 %v2259_v47, %v2255_v30  ;;  %v2296_v30 = vld [vmem:[%s13922_s3 + $0x188] sm:$0xff] }
 0x3ea   :  { %6054 = vmatpush1.bf16.msra.mxu1 %v6053_v42  ;;  %v2044_v42 = vld [vmem:[%s13921_s1 + $0x388] sm:$0xff]  ;;  %v6075_v46 = vpack.c.bf16 %v2042_v38, %v2038_v37  ;;  %v2261_v37 = vld [vmem:[%s13922_s3 + $0x70] sm:$0xff] }
 0x3eb   :  { %6056 = vmatprep.subr.bf16.mxu1 %v6055_v43  ;;  %v2048_v43 = vld [vmem:[%s13921_s1 + $0x3a8] sm:$0xff] }
 0x3ec   :  { %5994 = vmatpush1.bf16.msra.mxu0 %v5993_v48  ;;  %v2037_v48 = vld [vmem:[%s13921_s1 + $0x350] sm:$0xff]  ;;  %v6015_v3 = vpack.c.bf16 %v2048_v43, %v2044_v42  ;;  %v2264_v38 = vld [vmem:[%s13922_s3 + $0x88] sm:$0xff]  ;;  %v2267_v42 = vld [vmem:[%s13922_s3 + $0xa0] sm:$0xff] }
 0x3ed   :  { %5996 = vmatprep.subr.bf16.mxu0 %v5995_v51  ;;  %v2046_v51 = vld [vmem:[%s13921_s1 + $0x398] sm:$0xff]  ;;  %v6077_v57 = vpack.c.bf16 %v2041_v49, %v2037_v48  ;;  %v6095_v43 = vpack.c.bf16 %v2268_v40, %v2264_v38  ;;  %v2265_v49 = vld [vmem:[%s13922_s3 + $0x90] sm:$0xff] }
 0x3ee   :  { %6058 = vmatpush1.bf16.msra.mxu1 %v6057_v55  ;;  %v2052_v55 = vld [vmem:[%s13921_s1 + $0x3c8] sm:$0xff]  ;;  %v6079_v59 = vpack.c.bf16 %v2050_v52, %v2046_v51  ;;  %v2270_v48 = vld [vmem:[%s13922_s3 + $0xb8] sm:$0xff]  ;;  %v2269_v51 = vld [vmem:[%s13922_s3 + $0xb0] sm:$0xff] }
 0x3ef   :  { %6060 = vmatprep.subr.bf16.mxu1 %v6059_v56  ;;  %v2056_v56 = vld [vmem:[%s13921_s1 + $0x3e8] sm:$0xff]  ;;  %v6161_v53 = vpack.c.bf16 %v2269_v51, %v2265_v49  ;;  %v2301_v38 = vld [vmem:[%s13922_s3 + $0x1b0] sm:$0xff] }
 0x3f0   :  { %5998 = vmatpush1.bf16.msra.mxu0 %v5997_v60  ;;  %v2045_v60 = vld [vmem:[%s13921_s1 + $0x390] sm:$0xff]  ;;  %v6019_v0 = vpack.c.bf16 %v2056_v56, %v2052_v55  ;;  %v2272_v52 = vld [vmem:[%s13922_s3 + $0xc8] sm:$0xff]  ;;  %v2271_v55 = vld [vmem:[%s13922_s3 + $0xc0] sm:$0xff] }
 0x3f1   :  { %6000 = vmatprep.subr.bf16.mxu0 %v5999_v16  ;;  %v2054_v16 = vld [vmem:[%s13921_s1 + $0x3d8] sm:$0xff]  ;;  %v2275_v56 = vld [vmem:[%s13922_s3 + $0xe0] sm:$0xff]  ;;  %v2305_v51 = vld [vmem:[%s13922_s3 + $0x1d0] sm:$0xff] }
 0x3f2   :  { %6062 = vmatpush1.bf16.msra.mxu1 %v6061_v4  ;;  %v6081_v4 = vpack.c.bf16 %v2049_v61, %v2045_v60  ;;  %v2273_v60 = vld [vmem:[%s13922_s3 + $0xd0] sm:$0xff] }
 0x3f3   :  { %6064 = vmatprep.subr.bf16.mxu1 %v6063_v5  ;;  %v6083_v5 = vpack.c.bf16 %v2058_v63, %v2054_v16  ;;  %v2277_v61 = vld [vmem:[%s13922_s3 + $0xf0] sm:$0xff]  ;;  %v2280_v63 = vld [vmem:[%s13922_s3 + $0x108] sm:$0xff] }
 0x3f4   :  { %6002 = vmatpush1.bf16.msra.mxu0 %v6001_v8  ;;  %v6021_v8 = vpack.c.bf16 %v2055_v2, %v2051_v1  ;;  %v2279_v1 = vld [vmem:[%s13922_s3 + $0x100] sm:$0xff]  ;;  %v6165_v2 = vpack.c.bf16 %v2277_v61, %v2273_v60  ;;  %v2314_v60 = vld [vmem:[%s13922_s3 + $0x218] sm:$0xff] }
 0x3f5   :  { %6004 = vmatprep.subr.bf16.mxu0 %v6003_v11  ;;  %v2248_v11 = vld [vmem:[%s13922_s3 + $0x8] sm:$0xff] }
 0x3f6   :  { %6066 = vmatpush1.bf16.msra.mxu1 %v6065_v20  ;;  %v6087_v17 = vpack.c.bf16 %v2252_v12, %v2248_v11  ;;  %v2250_v20 = vld [vmem:[%s13922_s3 + $0x18] sm:$0xff]  ;;  %v2285_v11 = vld [vmem:[%s13922_s3 + $0x130] sm:$0xff] }
 0x3f7   :  { %6068 = vmatprep.subr.bf16.mxu1 %v6067_v21  ;;  %v2254_v21 = vld [vmem:[%s13922_s3 + $0x38] sm:$0xff] }
 0x3f8   :  { %6006 = vmatpush1.bf16.msra.mxu0 %v6005_v23  ;;  %v6151_v22 = vpack.c.bf16 %v2254_v21, %v2250_v20  ;;  %v2249_v23 = vld [vmem:[%s13922_s3 + $0x10] sm:$0xff]  ;;  %v2287_v20 = vld [vmem:[%s13922_s3 + $0x140] sm:$0xff] }
 0x3f9   :  { %6008 = vmatprep.subr.bf16.mxu0 %v6007_v28  ;;  %v6153_v25 = vpack.c.bf16 %v2253_v24, %v2249_v23  ;;  %v2256_v28 = vld [vmem:[%s13922_s3 + $0x48] sm:$0xff]  ;;  %v2291_v21 = vld [vmem:[%s13922_s3 + $0x160] sm:$0xff]  ;;  %v2294_v23 = vld [vmem:[%s13922_s3 + $0x178] sm:$0xff] }
 0x3fa   :  { %6070 = vmatpush1.bf16.msra.mxu1 %v6069_v32  ;;  %v6091_v31 = vpack.c.bf16 %v2260_v29, %v2256_v28  ;;  %v2258_v32 = vld [vmem:[%s13922_s3 + $0x58] sm:$0xff]  ;;  %v2289_v24 = vld [vmem:[%s13922_s3 + $0x150] sm:$0xff] }
 0x3fb   :  { %6072 = vmatprep.subr.bf16.mxu1 %v6071_v33  ;;  %v2262_v33 = vld [vmem:[%s13922_s3 + $0x78] sm:$0xff] }
 0x3fc   :  { %6010 = vmatpush1.bf16.msra.mxu0 %v6009_v36  ;;  %v6155_v35 = vpack.c.bf16 %v2262_v33, %v2258_v32  ;;  %v2257_v36 = vld [vmem:[%s13922_s3 + $0x50] sm:$0xff]  ;;  %v2295_v32 = vld [vmem:[%s13922_s3 + $0x180] sm:$0xff] }
 0x3fd   :  { %6012 = vmatprep.subr.bf16.mxu0 %v6011_v39  ;;  %v6157_v39 = vpack.c.bf16 %v2261_v37, %v2257_v36  ;;  %v2299_v33 = vld [vmem:[%s13922_s3 + $0x1a0] sm:$0xff]  ;;  %v2302_v36 = vld [vmem:[%s13922_s3 + $0x1b8] sm:$0xff]  ;;  %v2297_v37 = vld [vmem:[%s13922_s3 + $0x190] sm:$0xff] }
 0x3fe   :  { %6074 = vmatpush1.bf16.msra.mxu1 %v6073_v45  ;;  %v6097_v45 = vpack.c.bf16 %v2267_v42, %v2263_v41  ;;  %v6177_v40 = vpack.c.bf16 %v2301_v38, %v2297_v37  ;;  %v2304_v41 = vld [vmem:[%s13922_s3 + $0x1c8] sm:$0xff]  ;;  %v2342_v38 = vld [vmem:[%s13922_s3 + $0x2f8] sm:$0xff] }
 0x3ff   :  { %6076 = vmatprep.subr.bf16.mxu1 %v6075_v46  ;;  %v2266_v46 = vld [vmem:[%s13922_s3 + $0x98] sm:$0xff]  ;;  %v2308_v42 = vld [vmem:[%s13922_s3 + $0x1e8] sm:$0xff] }
 0x400   :  { %6014 = vmatpush1.bf16.msra.mxu0 %v6013_v50  ;;  %v6159_v50 = vpack.c.bf16 %v2270_v48, %v2266_v46  ;;  %v2307_v46 = vld [vmem:[%s13922_s3 + $0x1e0] sm:$0xff]  ;;  %v2306_v48 = vld [vmem:[%s13922_s3 + $0x1d8] sm:$0xff] }
 0x401   :  { %6016 = vmatprep.subr.bf16.mxu0 %v6015_v3  ;;  %v2276_v3 = vld [vmem:[%s13922_s3 + $0xe8] sm:$0xff] }
 0x402   :  { %6078 = vmatpush1.bf16.msra.mxu1 %v6077_v57  ;;  %v6099_v54 = vpack.c.bf16 %v2276_v3, %v2272_v52  ;;  %v2274_v57 = vld [vmem:[%s13922_s3 + $0xd8] sm:$0xff]  ;;  %v2309_v52 = vld [vmem:[%s13922_s3 + $0x1f0] sm:$0xff] }
 0x403   :  { %6080 = vmatprep.subr.bf16.mxu1 %v6079_v59  ;;  %v2278_v59 = vld [vmem:[%s13922_s3 + $0xf8] sm:$0xff] }
 0x404   :  { %6018 = vmatpush1.bf16.msra.mxu0 %v6017_v62  ;;  %v6101_v62 = vpack.c.bf16 %v2275_v56, %v2271_v55  ;;  %v6163_v16 = vpack.c.bf16 %v2278_v59, %v2274_v57  ;;  %v2316_v55 = vld [vmem:[%s13922_s3 + $0x228] sm:$0xff]  ;;  %v2311_v57 = vld [vmem:[%s13922_s3 + $0x200] sm:$0xff] }
 0x405   :  { %6020 = vmatprep.subr.bf16.mxu0 %v6019_v0  ;;  %v2284_v0 = vld [vmem:[%s13922_s3 + $0x128] sm:$0xff]  ;;  %v2315_v59 = vld [vmem:[%s13922_s3 + $0x220] sm:$0xff] }
 0x406   :  { %6082 = vmatpush1.bf16.msra.mxu1 %v6081_v4  ;;  %v6103_v4 = vpack.c.bf16 %v2284_v0, %v2280_v63  ;;  %v6121_v61 = vpack.c.bf16 %v2315_v59, %v2311_v57  ;;  %v2317_v63 = vld [vmem:[%s13922_s3 + $0x230] sm:$0xff]  ;;  %v2356_v57 = vld [vmem:[%s13922_s3 + $0x368] sm:$0xff] }
 0x407   :  { %6084 = vmatprep.subr.bf16.mxu1 %v6083_v5  ;;  %v2283_v5 = vld [vmem:[%s13922_s3 + $0x120] sm:$0xff] }
 0x408   :  { %6022 = vmatpush1.bf16.msra.mxu0 %v6021_v8  ;;  %v6167_v8 = vpack.c.bf16 %v2286_v7, %v2282_v6  ;;  %v2319_v6 = vld [vmem:[%s13922_s3 + $0x240] sm:$0xff] }
 0x409   :  { %6088 = vmatprep.subr.bf16.mxu0 %v6087_v17  ;;  %v2292_v17 = vld [vmem:[%s13922_s3 + $0x168] sm:$0xff]  ;;  %v2323_v7 = vld [vmem:[%s13922_s3 + $0x260] sm:$0xff] }
 0x40a   :  { %6086 = vmatpush1.bf16.msra.mxu1 %v6085_v9  ;;  %v6105_v9 = vpack.c.bf16 %v2283_v5, %v2279_v1  ;;  %v6107_v19 = vpack.c.bf16 %v2292_v17, %v2288_v14 }
 0x40b   :  { %2146 = vmatmul.mubr.f32.vlgmr.msra.gmra.mrb[12].mxu0 %v5149_v10  ;;  %6152 = vmatprep.subr.bf16.mxu1 %v6151_v22  ;;  %v6109_v22 = vpack.c.bf16 %v2291_v21, %v2287_v20  ;;  %v2332_v20 = vld [vmem:[%s13922_s3 + $0x2a8] sm:$0xff] }
 0x40c   :  { %6090 = vmatpush1.bf16.msra.mxu0 %v6089_v44  ;;  %v2290_v44 = vld [vmem:[%s13922_s3 + $0x158] sm:$0xff] }
 0x40d   :  { %2217 = vmatmul.mubr.f32.vlgmr.msra.gmra.mrb[12].mxu1 %v5149_v10  ;;  %6092 = vmatprep.subr.bf16.mxu0 %v6091_v31  ;;  %v2281_v10 = vld [vmem:[%s13922_s3 + $0x110] sm:$0xff]  ;;  %v6171_v28 = vpack.c.bf16 %v2294_v23, %v2290_v44  ;;  %v2300_v31 = vld [vmem:[%s13922_s3 + $0x1a8] sm:$0xff]  ;;  %v2327_v44 = vld [vmem:[%s13922_s3 + $0x280] sm:$0xff] }
 0x40e   :  { %6154 = vmatpush1.bf16.msra.mxu1 %v6153_v25  ;;  %v6169_v12 = vpack.c.bf16 %v2285_v11, %v2281_v10  ;;  %v2293_v25 = vld [vmem:[%s13922_s3 + $0x170] sm:$0xff]  ;;  %v6111_v47 = vpack.c.bf16 %v2300_v31, %v2296_v30  ;;  %v2326_v10 = vld [vmem:[%s13922_s3 + $0x278] sm:$0xff] }
 0x40f   :  { %6156 = vmatprep.subr.bf16.mxu1 %v6155_v35  ;;  %v6173_v29 = vpack.c.bf16 %v2293_v25, %v2289_v24  ;;  %v6113_v35 = vpack.c.bf16 %v2299_v33, %v2295_v32  ;;  %v2321_v11 = vld [vmem:[%s13922_s3 + $0x250] sm:$0xff]  ;;  %v2330_v23 = vld [vmem:[%s13922_s3 + $0x298] sm:$0xff]  ;;  %v2340_v32 = vld [vmem:[%s13922_s3 + $0x2e8] sm:$0xff] }
 0x410   :  { %6094 = vmatpush1.bf16.msra.mxu0 %v6093_v34  ;;  %v2298_v34 = vld [vmem:[%s13922_s3 + $0x198] sm:$0xff] }
 0x411   :  { %6096 = vmatprep.subr.bf16.mxu0 %v6095_v43  ;;  %v6115_v43 = vpack.c.bf16 %v2308_v42, %v2304_v41  ;;  %v2334_v25 = vld [vmem:[%s13922_s3 + $0x2b8] sm:$0xff] }
 0x412   :  { %6158 = vmatpush1.bf16.msra.mxu1 %v6157_v39  ;;  %v6175_v39 = vpack.c.bf16 %v2302_v36, %v2298_v34  ;;  %v6191_v30 = vpack.c.bf16 %v2334_v25, %v2330_v23  ;;  %v2335_v34 = vld [vmem:[%s13922_s3 + $0x2c0] sm:$0xff]  ;;  %v2338_v36 = vld [vmem:[%s13922_s3 + $0x2d8] sm:$0xff] }
 0x413   :  { %6160 = vmatprep.subr.bf16.mxu1 %v6159_v50  ;;  %v2310_v50 = vld [vmem:[%s13922_s3 + $0x1f8] sm:$0xff]  ;;  %v6195_v41 = vpack.c.bf16 %v2342_v38, %v2338_v36  ;;  %v2371_v23 = vld [vmem:[%s13922_s3 + $0x3e0] sm:$0xff] }
 0x414   :  { %6098 = vmatpush1.bf16.msra.mxu0 %v6097_v45  ;;  %v2303_v45 = vld [vmem:[%s13922_s3 + $0x1c0] sm:$0xff]  ;;  %v6179_v3 = vpack.c.bf16 %v2310_v50, %v2306_v48  ;;  %v2346_v50 = vld [vmem:[%s13922_s3 + $0x318] sm:$0xff] }
 0x415   :  { %6100 = vmatprep.subr.bf16.mxu0 %v6099_v54  ;;  %v6117_v49 = vpack.c.bf16 %v2307_v46, %v2303_v45  ;;  %v2312_v54 = vld [vmem:[%s13922_s3 + $0x208] sm:$0xff]  ;;  %v2343_v48 = vld [vmem:[%s13922_s3 + $0x300] sm:$0xff]  ;;  %v2370_v25 = vld [vmem:[%s13922_s3 + $0x3d8] sm:$0xff] }
 0x416   :  { %6162 = vmatpush1.bf16.msra.mxu1 %v6161_v53  ;;  %v6181_v53 = vpack.c.bf16 %v2309_v52, %v2305_v51  ;;  %v6119_v56 = vpack.c.bf16 %v2316_v55, %v2312_v54  ;;  %v2348_v45 = vld [vmem:[%s13922_s3 + $0x328] sm:$0xff]  ;;  %v2350_v52 = vld [vmem:[%s13922_s3 + $0x338] sm:$0xff]  ;;  %v1739_v36 = vld [vmem:[%s13925_s4] sm:$0xf] }
 0x417   :  { %6164 = vmatprep.subr.bf16.mxu1 %v6163_v16  ;;  %v2313_v16 = vld [vmem:[%s13922_s3 + $0x210] sm:$0xff]  ;;  %v6199_v54 = vpack.c.bf16 %v2350_v52, %v2346_v50  ;;  %v2574_v38 = vld [vmem:[%s13921_s1 + $0x38] sm:$0xff]  ;;  %v1756_v52 = vrot.slane %v1739_v36, %v8333_v18 }
 0x418   :  { %6102 = vmatpush1.bf16.msra.mxu0 %v6101_v62  ;;  %v2318_v62 = vld [vmem:[%s13922_s3 + $0x238] sm:$0xff]  ;;  %v6185_v1 = vpack.c.bf16 %v2317_v63, %v2313_v16 }
 0x419   :  { %6104 = vmatprep.subr.bf16.mxu0 %v6103_v4  ;;  %v6183_v0 = vpack.c.bf16 %v2318_v62, %v2314_v60  ;;  %v2324_v4 = vld [vmem:[%s13922_s3 + $0x268] sm:$0xff]  ;;  %v2351_v60 = vld [vmem:[%s13922_s3 + $0x340] sm:$0xff]  ;;  %v2354_v62 = vld [vmem:[%s13922_s3 + $0x358] sm:$0xff] }
 0x41a   :  { %6166 = vmatpush1.bf16.msra.mxu1 %v6165_v2  ;;  %v2320_v2 = vld [vmem:[%s13922_s3 + $0x248] sm:$0xff]  ;;  %v2358_v63 = vld [vmem:[%s13922_s3 + $0x378] sm:$0xff] }
 0x41b   :  { %6168 = vmatprep.subr.bf16.mxu1 %v6167_v8  ;;  %v6123_v5 = vpack.c.bf16 %v2324_v4, %v2320_v2  ;;  %v2322_v8 = vld [vmem:[%s13922_s3 + $0x258] sm:$0xff]  ;;  %v6203_v2 = vpack.c.bf16 %v2358_v63, %v2354_v62 }
 0x41c   :  { %6106 = vmatpush1.bf16.msra.mxu0 %v6105_v9  ;;  %v6125_v9 = vpack.c.bf16 %v2323_v7, %v2319_v6  ;;  %v6187_v14 = vpack.c.bf16 %v2326_v10, %v2322_v8  ;;  %v2364_v6 = vld [vmem:[%s13922_s3 + $0x3a8] sm:$0xff]  ;;  %v2359_v7 = vld [vmem:[%s13922_s3 + $0x380] sm:$0xff]  ;;  %v2362_v10 = vld [vmem:[%s13922_s3 + $0x398] sm:$0xff] }
 0x41d   :  { %6108 = vmatprep.subr.bf16.mxu0 %v6107_v19  ;;  %v2328_v19 = vld [vmem:[%s13922_s3 + $0x288] sm:$0xff] }
 0x41e   :  { %6170 = vmatpush1.bf16.msra.mxu1 %v6169_v12  ;;  %v2325_v12 = vld [vmem:[%s13922_s3 + $0x270] sm:$0xff]  ;;  %v6127_v21 = vpack.c.bf16 %v2332_v20, %v2328_v19  ;;  %v2368_v20 = vld [vmem:[%s13922_s3 + $0x3c8] sm:$0xff] }
 0x41f   :  { %6172 = vmatprep.subr.bf16.mxu1 %v6171_v28  ;;  %v6189_v17 = vpack.c.bf16 %v2325_v12, %v2321_v11  ;;  %v2329_v28 = vld [vmem:[%s13922_s3 + $0x290] sm:$0xff]  ;;  %v2366_v11 = vld [vmem:[%s13922_s3 + $0x3b8] sm:$0xff] }
 0x420   :  { %6110 = vmatpush1.bf16.msra.mxu0 %v6109_v22  ;;  %v2331_v22 = vld [vmem:[%s13922_s3 + $0x2a0] sm:$0xff]  ;;  %v2365_v19 = vld [vmem:[%s13922_s3 + $0x3b0] sm:$0xff] }
 0x421   :  { %6112 = vmatprep.subr.bf16.mxu0 %v6111_v47  ;;  %v6129_v24 = vpack.c.bf16 %v2331_v22, %v2327_v44  ;;  %v2336_v47 = vld [vmem:[%s13922_s3 + $0x2c8] sm:$0xff]  ;;  %v2367_v22 = vld [vmem:[%s13922_s3 + $0x3c0] sm:$0xff] }
 0x422   :  { %6174 = vmatpush1.bf16.msra.mxu1 %v6173_v29  ;;  %v2333_v29 = vld [vmem:[%s13922_s3 + $0x2b0] sm:$0xff]  ;;  %v6131_v33 = vpack.c.bf16 %v2340_v32, %v2336_v47  ;;  %v2372_v44 = vld [vmem:[%s13922_s3 + $0x3e8] sm:$0xff] }
 0x423   :  { %6176 = vmatprep.subr.bf16.mxu1 %v6175_v39  ;;  %v6193_v31 = vpack.c.bf16 %v2333_v29, %v2329_v28  ;;  %v2337_v39 = vld [vmem:[%s13922_s3 + $0x2d0] sm:$0xff]  ;;  %v2374_v28 = vld [vmem:[%s13922_s3 + $0x3f8] sm:$0xff]  ;;  %v2568_v32 = vld [vmem:[%s13921_s1 + $0x8] sm:$0xff] }
 0x424   :  { %6114 = vmatpush1.bf16.msra.mxu0 %v6113_v35  ;;  %v2339_v35 = vld [vmem:[%s13922_s3 + $0x2e0] sm:$0xff]  ;;  %v2369_v29 = vld [vmem:[%s13922_s3 + $0x3d0] sm:$0xff] }
 0x425   :  { %6116 = vmatprep.subr.bf16.mxu0 %v6115_v43  ;;  %v6133_v37 = vpack.c.bf16 %v2339_v35, %v2335_v34  ;;  %v2344_v43 = vld [vmem:[%s13922_s3 + $0x308] sm:$0xff]  ;;  %v2373_v47 = vld [vmem:[%s13922_s3 + $0x3f0] sm:$0xff] }
 0x426   :  { %6178 = vmatpush1.bf16.msra.mxu1 %v6177_v40  ;;  %v2341_v40 = vld [vmem:[%s13922_s3 + $0x2f0] sm:$0xff]  ;;  %v6135_v46 = vpack.c.bf16 %v2348_v45, %v2344_v43  ;;  %v6213_v35 = vpack.c.bf16 %v2373_v47, %v2369_v29 }
 0x427   :  { %6180 = vmatprep.subr.bf16.mxu1 %v6179_v3  ;;  %v6197_v42 = vpack.c.bf16 %v2341_v40, %v2337_v39  ;;  %v2345_v3 = vld [vmem:[%s13922_s3 + $0x310] sm:$0xff]  ;;  %v1744_v40 = vrot.slane %v1739_v36, %v8324_v13 }
 0x428   :  { %6118 = vmatpush1.bf16.msra.mxu0 %v6117_v49  ;;  %v2347_v49 = vld [vmem:[%s13922_s3 + $0x320] sm:$0xff] }
 0x429   :  { %6120 = vmatprep.subr.bf16.mxu0 %v6119_v56  ;;  %v6137_v51 = vpack.c.bf16 %v2347_v49, %v2343_v48  ;;  %v2352_v56 = vld [vmem:[%s13922_s3 + $0x348] sm:$0xff] }
 0x42a   :  { %6182 = vmatpush1.bf16.msra.mxu1 %v6181_v53  ;;  %v2349_v53 = vld [vmem:[%s13922_s3 + $0x330] sm:$0xff]  ;;  %v6139_v59 = vpack.c.bf16 %v2356_v57, %v2352_v56 }
 0x42b   :  { %6184 = vmatprep.subr.bf16.mxu1 %v6183_v0  ;;  %v6201_v55 = vpack.c.bf16 %v2349_v53, %v2345_v3  ;;  %v2353_v0 = vld [vmem:[%s13922_s3 + $0x350] sm:$0xff]  ;;  %v1752_v53 = vrot.slane %v1739_v36, %v8336_v26 }
 0x42c   :  { %6122 = vmatpush1.bf16.msra.mxu0 %v6121_v61  ;;  %v2355_v61 = vld [vmem:[%s13922_s3 + $0x360] sm:$0xff] }
 0x42d   :  { %6124 = vmatprep.subr.bf16.mxu0 %v6123_v5  ;;  %v6141_v16 = vpack.c.bf16 %v2355_v61, %v2351_v60  ;;  %v2360_v5 = vld [vmem:[%s13922_s3 + $0x388] sm:$0xff] }
 0x42e   :  { %6186 = vmatpush1.bf16.msra.mxu1 %v6185_v1  ;;  %v2357_v1 = vld [vmem:[%s13922_s3 + $0x370] sm:$0xff]  ;;  %v6143_v8 = vpack.c.bf16 %v2364_v6, %v2360_v5 }
 0x42f   :  { %6188 = vmatprep.subr.bf16.mxu1 %v6187_v14  ;;  %v6205_v4 = vpack.c.bf16 %v2357_v1, %v2353_v0  ;;  %v6207_v14 = vpack.c.bf16 %v2366_v11, %v2362_v10 }
 0x430   :  { %6126 = vmatpush1.bf16.msra.mxu0 %v6125_v9  ;;  %v2363_v9 = vld [vmem:[%s13922_s3 + $0x3a0] sm:$0xff] }
 0x431   :  { %6128 = vmatprep.subr.bf16.mxu0 %v6127_v21  ;;  %v6145_v12 = vpack.c.bf16 %v2363_v9, %v2359_v7 }
 0x432   :  { %6190 = vmatpush1.bf16.msra.mxu1 %v6189_v17  ;;  %v2361_v17 = vld [vmem:[%s13922_s3 + $0x390] sm:$0xff] }
 0x433   :  { %6192 = vmatprep.subr.bf16.mxu1 %v6191_v30  ;;  %v6209_v21 = vpack.c.bf16 %v2365_v19, %v2361_v17  ;;  %v6149_v30 = vpack.c.bf16 %v2371_v23, %v2367_v22 }
 0x434   :  { %6130 = vmatpush1.bf16.msra.mxu0 %v6129_v24  ;;  %v6147_v24 = vpack.c.bf16 %v2372_v44, %v2368_v20 }
 0x435   :  { %6132 = vmatprep.subr.bf16.mxu0 %v6131_v33  ;;  %v2572_v33 = vld [vmem:[%s13921_s1 + $0x28] sm:$0xff] }
 0x436   :  { %6194 = vmatpush1.bf16.msra.mxu1 %v6193_v31  ;;  %v6211_v31 = vpack.c.bf16 %v2374_v28, %v2370_v25  ;;  %v6215_v34 = vpack.c.bf16 %v2572_v33, %v2568_v32 }
 0x437   :  { %6196 = vmatprep.subr.bf16.mxu1 %v6195_v41  ;;  %v1748_v41 = vrot.slane %v1739_v36, %v8329_v15 }
 0x438   :  { %6134 = vmatpush1.bf16.msra.mxu0 %v6133_v37  ;;  %v2570_v37 = vld [vmem:[%s13921_s1 + $0x18] sm:$0xff] }
 0x439   :  { %6136 = vmatprep.subr.bf16.mxu0 %v6135_v46  ;;  %v6279_v39 = vpack.c.bf16 %v2574_v38, %v2570_v37 }
 0x43a   :  { %6198 = vmatpush1.bf16.msra.mxu1 %v6197_v42 }
 0x43b   :  { %6200 = vmatprep.subr.bf16.mxu1 %v6199_v54 }
 0x43c   :  { %6138 = vmatpush1.bf16.msra.mxu0 %v6137_v51 }
 0x43d   :  { %6140 = vmatprep.subr.bf16.mxu0 %v6139_v59 }
 0x43e   :  { %6202 = vmatpush1.bf16.msra.mxu1 %v6201_v55 }
 0x43f   :  { %6204 = vmatprep.subr.bf16.mxu1 %v6203_v2 }
 0x440   :  { %6142 = vmatpush1.bf16.msra.mxu0 %v6141_v16 }
 0x441   :  { %6144 = vmatprep.subr.bf16.mxu0 %v6143_v8  ;;  %v2059_v8 = vld [vmem:[%s13924_s2] sm:$0xf] }
 0x442   :  { %6206 = vmatpush1.bf16.msra.mxu1 %v6205_v4  ;;  %v2068_v9 = vrot.slane %v2059_v8, %v8329_v15  ;;  %v2076_v20 = vrot.slane %v2059_v8, %v8333_v18  ;;  %v2072_v23 = vrot.slane %v2059_v8, %v8336_v26 }
 0x443   :  { %6208 = vmatprep.subr.bf16.mxu1 %v6207_v14 }
 0x444   :  { %6146 = vmatpush1.bf16.msra.mxu0 %v6145_v12 }
 0x445   :  { %6148 = vmatprep.subr.bf16.mxu0 %v6147_v24 }
 0x446   :  { %6210 = vmatpush1.bf16.msra.mxu1 %v6209_v21 }
 0x447   :  { %6212 = vmatprep.subr.bf16.mxu1 %v6211_v31 }
 0x448   :  { %6150 = vmatpush1.bf16.msra.mxu0 %v6149_v30 }
 0x449   :  { %6216 = vmatprep.subr.bf16.mxu0 %v6215_v34 }
 0x44a   :  { %6214 = vmatpush1.bf16.msra.mxu1 %v6213_v35 }
 0x44b   :  { %6280 = vmatprep.subr.bf16.mxu1 %v6279_v39  ;;  %v2567_v39 = vld [vmem:[%s13921_s1] sm:$0xff] }
 0x49e   :  { %v1827_v42 = vpop.f32.mrb[10].mxu0  ;;  %v1898_v43 = vpop.f32.mrb[10].mxu1 }
 0x49f   :  { %v1828_v45 = vadd.f32 %v1827_v42, %v1744_v40  ;;  %v1829_v46 = vpop.f32.mrb[11].mxu0  ;;  %v1900_v48 = vpop.f32.mrb[11].mxu1  ;;  %v1899_v55 = vadd.f32 %v1898_v43, %v1752_v53  ;;  %v2571_v40 = vld [vmem:[%s13921_s1 + $0x20] sm:$0xff]  ;;  %v2576_v42 = vld [vmem:[%s13921_s1 + $0x48] sm:$0xff]  ;;  %v2569_v43 = vld [vmem:[%s13921_s1 + $0x10] sm:$0xff] }
 0x4a0   :  { %v1830_v49 = vadd.f32 %v1829_v46, %v1748_v41  ;;  %v1901_v3 = vadd.f32 %v1900_v48, %v1756_v52  ;;  %v6217_v48 = vpack.c.bf16 %v2571_v40, %v2567_v39  ;;  %v2579_v53 = vld [vmem:[%s13921_s1 + $0x60] sm:$0xff]  ;;  %v2610_v39 = vld [vmem:[%s13921_s1 + $0x158] sm:$0xff] }
 0x4a1   :  { %v5145_v50 = vmul.f32 -1.442695, %v1828_v45  ;;  %v2573_v45 = vld [vmem:[%s13921_s1 + $0x30] sm:$0xff]  ;;  %v2614_v40 = vld [vmem:[%s13921_s1 + $0x178] sm:$0xff] }
 0x4a2   :  { %v5146_v51 = vmul.f32 -1.442695, %v1830_v49  ;;  %v5147_v54 = vmul.f32 -1.442695, %v1901_v3  ;;  %v2578_v49 = vld [vmem:[%s13921_s1 + $0x58] sm:$0xff]  ;;  %v2575_v3 = vld [vmem:[%s13921_s1 + $0x40] sm:$0xff] }
 0x4a3   :  { %7320 = vpow2.f32 %v5145_v50  ;;  %v2582_v50 = vld [vmem:[%s13921_s1 + $0x78] sm:$0xff] }
 0x4a4   :  { %7322 = vpow2.f32 %v5146_v51 }
 0x4a5   :  { %7324 = vpow2.f32 %v5147_v54  ;;  %v2584_v54 = vld [vmem:[%s13921_s1 + $0x88] sm:$0xff] }
 0x4a6   :  { %7326 = vtanh.f32 %v1899_v55  ;;  %v2588_v55 = vld [vmem:[%s13921_s1 + $0xa8] sm:$0xff] }
 0x4ad   :  { %v7321_v56 = vpop.eup %7320 }
 0x4ae   :  { %v7323_v57 = vpop.eup %7322  ;;  %v1906_v59 = vadd.f32 1.0, %v7321_v56  ;;  %v6281_v56 = vpack.c.bf16 %v2573_v45, %v2569_v43  ;;  %v2616_v43 = vld [vmem:[%s13921_s1 + $0x188] sm:$0xff] }
 0x4af   :  { %v1912_v60 = vadd.f32 1.0, %v7323_v57  ;;  %v7325_v61 = vpop.eup %7324  ;;  %v6283_v57 = vpack.c.bf16 %v2582_v50, %v2578_v49  ;;  %v2620_v45 = vld [vmem:[%s13921_s1 + $0x1a8] sm:$0xff]  ;;  %v2609_v49 = vld [vmem:[%s13921_s1 + $0x150] sm:$0xff] }
 0x4b0   :  { %7328 = vrcp.f32 %v1906_v59  ;;  %v7327_v62 = vpop.eup %7326  ;;  %v1919_v1 = vadd.f32 1.0, %v7325_v61  ;;  %v2577_v59 = vld [vmem:[%s13921_s1 + $0x50] sm:$0xff]  ;;  %v6221_v61 = vpack.c.bf16 %v2579_v53, %v2575_v3  ;;  %v2622_v3 = vld [vmem:[%s13921_s1 + $0x1b8] sm:$0xff]  ;;  %v6239_v53 = vpack.c.bf16 %v2620_v45, %v2616_v43  ;;  %v2647_v43 = vld [vmem:[%s13921_s1 + $0x280] sm:$0xff] }
 0x4b1   :  { %7330 = vrcp.f32 %v1912_v60  ;;  %v2581_v60 = vld [vmem:[%s13921_s1 + $0x70] sm:$0xff]  ;;  %v2651_v45 = vld [vmem:[%s13921_s1 + $0x2a0] sm:$0xff] }
 0x4b2   :  { %7332 = vrcp.f32 %v1919_v1  ;;  %v2587_v1 = vld [vmem:[%s13921_s1 + $0xa0] sm:$0xff]  ;;  %v2613_v50 = vld [vmem:[%s13921_s1 + $0x170] sm:$0xff] }
 0x4ba   :  { %v7329_v16 = vpop.eup %7328 }
 0x4bb   :  { %v7331_v63 = vpop.eup %7330  ;;  %v1923_v0 = vmul.f32 %v7329_v16, %v7327_v62  ;;  %v2586_v62 = vld [vmem:[%s13921_s1 + $0x98] sm:$0xff] }
 0x4bc   :  { %v1922_v2 = vmul.f32 %v7331_v63, %v9916_v27  ;;  %v7333_v5 = vpop.eup %7332  ;;  %v2064_v27 = vrot.slane %v2059_v8, %v8324_v13  ;;  %v2590_v16 = vld [vmem:[%s13921_s1 + $0xb8] sm:$0xff]  ;;  %v6223_v63 = vpack.c.bf16 %v2588_v55, %v2584_v54  ;;  %v2585_v8 = vld [vmem:[%s13921_s1 + $0x90] sm:$0xff]  ;;  %v2615_v54 = vld [vmem:[%s13921_s1 + $0x180] sm:$0xff] }
 0x4bd   :  { %v2619_v55 = vld [vmem:[%s13921_s1 + $0x1a0] sm:$0xff] }
 0x4be   :  { %v10712_v4 = vadd.f32 %v1923_v0, %v1922_v2  ;;  %v2583_v0 = vld [vmem:[%s13921_s1 + $0x80] sm:$0xff]  ;;  %v2592_v2 = vld [vmem:[%s13921_s1 + $0xc8] sm:$0xff] }
 0x4c0   :  { %7334 = vtanh.f32 %v10712_v4 }
 0x4ca   :  { %v7335_v6 = vpop.eup %7334 }
 0x4cb   :  { %v1926_v7 = vmul.f32 %v7335_v6, %v7333_v5  ;;  %v2596_v5 = vld [vmem:[%s13921_s1 + $0xe8] sm:$0xff]  ;;  %v6285_v6 = vpack.c.bf16 %v2581_v60, %v2577_v59  ;;  %v6301_v59 = vpack.c.bf16 %v2613_v50, %v2609_v49 }
 0x4cd   :  { %5148 = vst [vmem:[%s13926_s5 + $0x10] sm:$0xff] %v1926_v7  ;;  %2461 = vmatprep.mubr.f32.mxu0 %v1926_v7  ;;  %2532 = vmatprep.mubr.f32.mxu1 %v1926_v7  ;;  %v6287_v7 = vpack.c.bf16 %v2590_v16, %v2586_v62  ;;  %v2621_v62 = vld [vmem:[%s13921_s1 + $0x1b0] sm:$0xff]  ;;  %v6241_v16 = vpack.c.bf16 %v2619_v55, %v2615_v54  ;;  %v2662_v54 = vld [vmem:[%s13921_s1 + $0x2f8] sm:$0xff] }
 0x4de   :  { %v2147_v10 = vpop.f32.mrb[12].mxu0 }
 0x4df   :  { %v2148_v11 = vadd.f32 %v2147_v10, %v2064_v27  ;;  %v2149_v12 = vpop.f32.mrb[13].mxu0  ;;  %v2589_v27 = vld [vmem:[%s13921_s1 + $0xb0] sm:$0xff]  ;;  %v2594_v10 = vld [vmem:[%s13921_s1 + $0xd8] sm:$0xff] }
 0x4e0   :  { %v2150_v14 = vadd.f32 %v2149_v12, %v2068_v9  ;;  %v2218_v17 = vpop.f32.mrb[12].mxu1  ;;  %v6225_v9 = vpack.c.bf16 %v2587_v1, %v2583_v0  ;;  %v6227_v12 = vpack.c.bf16 %v2596_v5, %v2592_v2  ;;  %v2630_v0 = vld [vmem:[%s13921_s1 + $0x1f8] sm:$0xff]  ;;  %v2623_v2 = vld [vmem:[%s13921_s1 + $0x1c0] sm:$0xff] }
 0x4e1   :  { %v5150_v19 = vmul.f32 -1.442695, %v2148_v11  ;;  %v2220_v21 = vpop.f32.mrb[13].mxu1  ;;  %v2219_v25 = vadd.f32 %v2218_v17, %v2072_v23  ;;  %v2598_v11 = vld [vmem:[%s13921_s1 + $0xf8] sm:$0xff]  ;;  %v2595_v17 = vld [vmem:[%s13921_s1 + $0xe0] sm:$0xff]  ;;  %v2597_v23 = vld [vmem:[%s13921_s1 + $0xf0] sm:$0xff] }
 0x4e2   :  { %v5151_v44 = vmul.f32 -1.442695, %v2150_v14  ;;  %v2221_v22 = vadd.f32 %v2220_v21, %v2076_v20  ;;  %v2591_v14 = vld [vmem:[%s13921_s1 + $0xc0] sm:$0xff]  ;;  %v2604_v20 = vld [vmem:[%s13921_s1 + $0x128] sm:$0xff]  ;;  %v6289_v21 = vpack.c.bf16 %v2589_v27, %v2585_v8 }
 0x4e3   :  { %7336 = vpow2.f32 %v5150_v19  ;;  %v2600_v19 = vld [vmem:[%s13921_s1 + $0x108] sm:$0xff]  ;;  %v2627_v5 = vld [vmem:[%s13921_s1 + $0x1e0] sm:$0xff] }
 0x4e4   :  { %7338 = vpow2.f32 %v5151_v44  ;;  %v5152_v24 = vmul.f32 -1.442695, %v2221_v22  ;;  %v6291_v44 = vpack.c.bf16 %v2598_v11, %v2594_v10  ;;  %v2593_v22 = vld [vmem:[%s13921_s1 + $0xd0] sm:$0xff]  ;;  %v6245_v11 = vpack.c.bf16 %v2627_v5, %v2623_v2  ;;  %v2670_v2 = vld [vmem:[%s13921_s1 + $0x338] sm:$0xff] }
 0x4e5   :  { %v2629_v10 = vld [vmem:[%s13921_s1 + $0x1f0] sm:$0xff] }
 0x4e6   :  { %7340 = vpow2.f32 %v5152_v24  ;;  %v6229_v24 = vpack.c.bf16 %v2595_v17, %v2591_v14  ;;  %v2638_v14 = vld [vmem:[%s13921_s1 + $0x238] sm:$0xff] }
 0x4e7   :  { %7342 = vtanh.f32 %v2219_v25  ;;  %v2602_v25 = vld [vmem:[%s13921_s1 + $0x118] sm:$0xff] }
 0x4ed   :  { %v7337_v28 = vpop.eup %7336 }
 0x4ee   :  { %v7339_v29 = vpop.eup %7338  ;;  %v2226_v30 = vadd.f32 1.0, %v7337_v28  ;;  %v2606_v28 = vld [vmem:[%s13921_s1 + $0x138] sm:$0xff] }
 0x4ef   :  { %v2232_v31 = vadd.f32 1.0, %v7339_v29  ;;  %v6231_v29 = vpack.c.bf16 %v2604_v20, %v2600_v19  ;;  %v2631_v19 = vld [vmem:[%s13921_s1 + $0x200] sm:$0xff] }
 0x4f0   :  { %7344 = vrcp.f32 %v2226_v30  ;;  %v7341_v47 = vpop.eup %7340  ;;  %v2599_v30 = vld [vmem:[%s13921_s1 + $0x100] sm:$0xff] }
 0x4f1   :  { %7346 = vrcp.f32 %v2232_v31  ;;  %v7343_v32 = vpop.eup %7342  ;;  %v2239_v34 = vadd.f32 1.0, %v7341_v47  ;;  %v2603_v31 = vld [vmem:[%s13921_s1 + $0x120] sm:$0xff]  ;;  %v2608_v47 = vld [vmem:[%s13921_s1 + $0x148] sm:$0xff] }
 0x4f2   :  { %v2635_v20 = vld [vmem:[%s13921_s1 + $0x220] sm:$0xff] }
 0x4f3   :  { %7348 = vrcp.f32 %v2239_v34  ;;  %v6295_v34 = vpack.c.bf16 %v2606_v28, %v2602_v25  ;;  %v2637_v25 = vld [vmem:[%s13921_s1 + $0x230] sm:$0xff]  ;;  %v6249_v28 = vpack.c.bf16 %v2635_v20, %v2631_v19  ;;  %v2678_v19 = vld [vmem:[%s13921_s1 + $0x378] sm:$0xff] }
 0x4fa   :  { %v7345_v33 = vpop.eup %7344 }
 0x4fb   :  { %v7347_v35 = vpop.eup %7346  ;;  %v2243_v36 = vmul.f32 %v7345_v33, %v7343_v32  ;;  %v2612_v32 = vld [vmem:[%s13921_s1 + $0x168] sm:$0xff]  ;;  %v6293_v33 = vpack.c.bf16 %v2597_v23, %v2593_v22 }
 0x4fc   :  { %v2242_v37 = vmul.f32 %v7347_v35, %v9930_v58  ;;  %v2580_v58 = vld [vmem:[%s13921_s1 + $0x68] sm:$0xff]  ;;  %v2601_v35 = vld [vmem:[%s13921_s1 + $0x110] sm:$0xff] }
 0x4fd   :  { %v7349_v41 = vpop.eup %7348  ;;  %v6219_v52 = vpack.c.bf16 %v2580_v58, %v2576_v42  ;;  %v2607_v42 = vld [vmem:[%s13921_s1 + $0x140] sm:$0xff] }
 0x4fe   :  { %v10726_v38 = vadd.f32 %v2243_v36, %v2242_v37  ;;  %v2605_v36 = vld [vmem:[%s13921_s1 + $0x130] sm:$0xff]  ;;  %v6233_v37 = vpack.c.bf16 %v2603_v31, %v2599_v30  ;;  %v2611_v58 = vld [vmem:[%s13921_s1 + $0x160] sm:$0xff]  ;;  %v2646_v30 = vld [vmem:[%s13921_s1 + $0x278] sm:$0xff] }
 0x500   :  { %7350 = vtanh.f32 %v10726_v38 }
 0x50a   :  { %v7351_v46 = vpop.eup %7350 }
 0x50b   :  { %v2246_v51 = vmul.f32 %v7351_v46, %v7349_v41  ;;  %v6235_v41 = vpack.c.bf16 %v2612_v32, %v2608_v47  ;;  %v6297_v46 = vpack.c.bf16 %v2605_v36, %v2601_v35  ;;  %v2639_v47 = vld [vmem:[%s13921_s1 + $0x240] sm:$0xff] }
 0x50c   :  { %v2643_v32 = vld [vmem:[%s13921_s1 + $0x260] sm:$0xff] }
 0x50d   :  { %2462 = vmatmul.mubr.f32.vlgmr.msra.gmra.mrb[14].mxu0 %v2246_v51  ;;  %2533 = vmatmul.mubr.f32.vlgmr.msra.gmra.mrb[14].mxu1 %v2246_v51 }
 0x50e   :  { %6218 = vmatpush1.bf16.msra.mxu0 %v6217_v48  ;;  %2781 = vmatprep.mubr.f32.mxu0 %v2246_v51  ;;  %v6299_v48 = vpack.c.bf16 %v2614_v40, %v2610_v39  ;;  %v2645_v39 = vld [vmem:[%s13921_s1 + $0x270] sm:$0xff]  ;;  %v6253_v40 = vpack.c.bf16 %v2643_v32, %v2639_v47  ;;  %v2686_v47 = vld [vmem:[%s13921_s1 + $0x3b8] sm:$0xff] }
 0x50f   :  { %2852 = vmatprep.mubr.f32.mxu1 %v2246_v51  ;;  %6220 = vmatprep.subr.bf16.mxu0 %v6219_v52  ;;  %v6237_v51 = vpack.c.bf16 %v2611_v58, %v2607_v42  ;;  %v2618_v52 = vld [vmem:[%s13921_s1 + $0x198] sm:$0xff] }
 0x510   :  { %6282 = vmatpush1.bf16.msra.mxu1 %v6281_v56  ;;  %v2624_v56 = vld [vmem:[%s13921_s1 + $0x1c8] sm:$0xff]  ;;  %v6303_v60 = vpack.c.bf16 %v2622_v3, %v2618_v52  ;;  %v2654_v42 = vld [vmem:[%s13921_s1 + $0x2b8] sm:$0xff]  ;;  %v2653_v52 = vld [vmem:[%s13921_s1 + $0x2b0] sm:$0xff]  ;;  %v6257_v3 = vpack.c.bf16 %v2651_v45, %v2647_v43 }
 0x511   :  { %6284 = vmatprep.subr.bf16.mxu1 %v6283_v57  ;;  %v2628_v57 = vld [vmem:[%s13921_s1 + $0x1e8] sm:$0xff]  ;;  %v2694_v43 = vld [vmem:[%s13921_s1 + $0x3f8] sm:$0xff] }
 0x512   :  { %6222 = vmatpush1.bf16.msra.mxu0 %v6221_v61  ;;  %v2617_v61 = vld [vmem:[%s13921_s1 + $0x190] sm:$0xff]  ;;  %v6243_v1 = vpack.c.bf16 %v2628_v57, %v2624_v56  ;;  %v2655_v56 = vld [vmem:[%s13921_s1 + $0x2c0] sm:$0xff] }
 0x513   :  { %6224 = vmatprep.subr.bf16.mxu0 %v6223_v63  ;;  %v2626_v63 = vld [vmem:[%s13921_s1 + $0x1d8] sm:$0xff]  ;;  %v6305_v8 = vpack.c.bf16 %v2621_v62, %v2617_v61  ;;  %v2659_v57 = vld [vmem:[%s13921_s1 + $0x2e0] sm:$0xff] }
 0x514   :  { %6286 = vmatpush1.bf16.msra.mxu1 %v6285_v6  ;;  %v2632_v6 = vld [vmem:[%s13921_s1 + $0x208] sm:$0xff]  ;;  %v6307_v27 = vpack.c.bf16 %v2630_v0, %v2626_v63  ;;  %v2661_v63 = vld [vmem:[%s13921_s1 + $0x2f0] sm:$0xff]  ;;  %v6261_v0 = vpack.c.bf16 %v2659_v57, %v2655_v56  ;;  %v2883_v57 = vld [vmem:[%s13922_s3] sm:$0xff] }
 0x515   :  { %6288 = vmatprep.subr.bf16.mxu1 %v6287_v7  ;;  %v2636_v7 = vld [vmem:[%s13921_s1 + $0x228] sm:$0xff] }
 0x516   :  { %6226 = vmatpush1.bf16.msra.mxu0 %v6225_v9  ;;  %v2625_v9 = vld [vmem:[%s13921_s1 + $0x1d0] sm:$0xff]  ;;  %v6247_v17 = vpack.c.bf16 %v2636_v7, %v2632_v6  ;;  %v2663_v6 = vld [vmem:[%s13921_s1 + $0x300] sm:$0xff]  ;;  %v2888_v56 = vld [vmem:[%s13922_s3 + $0x28] sm:$0xff] }
 0x517   :  { %6228 = vmatprep.subr.bf16.mxu0 %v6227_v12  ;;  %v2634_v12 = vld [vmem:[%s13921_s1 + $0x218] sm:$0xff]  ;;  %v6309_v22 = vpack.c.bf16 %v2629_v10, %v2625_v9  ;;  %v2667_v7 = vld [vmem:[%s13921_s1 + $0x320] sm:$0xff] }
 0x518   :  { %6290 = vmatpush1.bf16.msra.mxu1 %v6289_v21  ;;  %v2640_v21 = vld [vmem:[%s13921_s1 + $0x248] sm:$0xff]  ;;  %v6311_v23 = vpack.c.bf16 %v2638_v14, %v2634_v12  ;;  %v2669_v12 = vld [vmem:[%s13921_s1 + $0x330] sm:$0xff]  ;;  %v6265_v14 = vpack.c.bf16 %v2667_v7, %v2663_v6  ;;  %v2891_v7 = vld [vmem:[%s13922_s3 + $0x40] sm:$0xff] }
 0x519   :  { %6292 = vmatprep.subr.bf16.mxu1 %v6291_v44  ;;  %v2644_v44 = vld [vmem:[%s13921_s1 + $0x268] sm:$0xff] }
 0x51a   :  { %6230 = vmatpush1.bf16.msra.mxu0 %v6229_v24  ;;  %v2633_v24 = vld [vmem:[%s13921_s1 + $0x210] sm:$0xff]  ;;  %v6251_v31 = vpack.c.bf16 %v2644_v44, %v2640_v21  ;;  %v2671_v21 = vld [vmem:[%s13921_s1 + $0x340] sm:$0xff]  ;;  %v2896_v6 = vld [vmem:[%s13922_s3 + $0x68] sm:$0xff] }
 0x51b   :  { %6232 = vmatprep.subr.bf16.mxu0 %v6231_v29  ;;  %v2642_v29 = vld [vmem:[%s13921_s1 + $0x258] sm:$0xff]  ;;  %v6313_v35 = vpack.c.bf16 %v2637_v25, %v2633_v24  ;;  %v2675_v44 = vld [vmem:[%s13921_s1 + $0x360] sm:$0xff] }
 0x51c   :  { %6294 = vmatpush1.bf16.msra.mxu1 %v6293_v33  ;;  %v2648_v33 = vld [vmem:[%s13921_s1 + $0x288] sm:$0xff]  ;;  %v6315_v36 = vpack.c.bf16 %v2646_v30, %v2642_v29  ;;  %v2677_v29 = vld [vmem:[%s13921_s1 + $0x370] sm:$0xff]  ;;  %v6269_v30 = vpack.c.bf16 %v2675_v44, %v2671_v21  ;;  %v2899_v44 = vld [vmem:[%s13922_s3 + $0x80] sm:$0xff] }
 0x51d   :  { %6296 = vmatprep.subr.bf16.mxu1 %v6295_v34  ;;  %v2652_v34 = vld [vmem:[%s13921_s1 + $0x2a8] sm:$0xff] }
 0x51e   :  { %6234 = vmatpush1.bf16.msra.mxu0 %v6233_v37  ;;  %v2641_v37 = vld [vmem:[%s13921_s1 + $0x250] sm:$0xff]  ;;  %v6255_v58 = vpack.c.bf16 %v2652_v34, %v2648_v33  ;;  %v2679_v33 = vld [vmem:[%s13921_s1 + $0x380] sm:$0xff]  ;;  %v2904_v21 = vld [vmem:[%s13922_s3 + $0xa8] sm:$0xff] }
 0x51f   :  { %6236 = vmatprep.subr.bf16.mxu0 %v6235_v41  ;;  %v2650_v41 = vld [vmem:[%s13921_s1 + $0x298] sm:$0xff]  ;;  %v6317_v49 = vpack.c.bf16 %v2645_v39, %v2641_v37  ;;  %v2683_v34 = vld [vmem:[%s13921_s1 + $0x3a0] sm:$0xff] }
 0x520   :  { %6298 = vmatpush1.bf16.msra.mxu1 %v6297_v46  ;;  %v2656_v46 = vld [vmem:[%s13921_s1 + $0x2c8] sm:$0xff]  ;;  %v6319_v50 = vpack.c.bf16 %v2654_v42, %v2650_v41  ;;  %v2685_v41 = vld [vmem:[%s13921_s1 + $0x3b0] sm:$0xff]  ;;  %v6273_v42 = vpack.c.bf16 %v2683_v34, %v2679_v33 }
 0x521   :  { %6300 = vmatprep.subr.bf16.mxu1 %v6299_v48  ;;  %v2660_v48 = vld [vmem:[%s13921_s1 + $0x2e8] sm:$0xff] }
 0x522   :  { %6238 = vmatpush1.bf16.msra.mxu0 %v6237_v51  ;;  %v2649_v51 = vld [vmem:[%s13921_s1 + $0x290] sm:$0xff]  ;;  %v6259_v55 = vpack.c.bf16 %v2660_v48, %v2656_v46  ;;  %v2687_v46 = vld [vmem:[%s13921_s1 + $0x3c0] sm:$0xff] }
 0x523   :  { %6240 = vmatprep.subr.bf16.mxu0 %v6239_v53  ;;  %v2658_v53 = vld [vmem:[%s13921_s1 + $0x2d8] sm:$0xff]  ;;  %v6321_v61 = vpack.c.bf16 %v2653_v52, %v2649_v51  ;;  %v2691_v48 = vld [vmem:[%s13921_s1 + $0x3e0] sm:$0xff]  ;;  %v2689_v51 = vld [vmem:[%s13921_s1 + $0x3d0] sm:$0xff] }
 0x524   :  { %6302 = vmatpush1.bf16.msra.mxu1 %v6301_v59  ;;  %v2664_v59 = vld [vmem:[%s13921_s1 + $0x308] sm:$0xff]  ;;  %v6323_v62 = vpack.c.bf16 %v2662_v54, %v2658_v53  ;;  %v2693_v52 = vld [vmem:[%s13921_s1 + $0x3f0] sm:$0xff]  ;;  %v5157_v54 = vld [vmem:[%s13923_s0 + $0x20] sm:$0xff] }
 0x525   :  { %6304 = vmatprep.subr.bf16.mxu1 %v6303_v60  ;;  %v2668_v60 = vld [vmem:[%s13921_s1 + $0x328] sm:$0xff]  ;;  %v6341_v53 = vpack.c.bf16 %v2693_v52, %v2689_v51  ;;  %v2918_v51 = vld [vmem:[%s13922_s3 + $0x118] sm:$0xff] }
 0x526   :  { %6242 = vmatpush1.bf16.msra.mxu0 %v6241_v16  ;;  %v2657_v16 = vld [vmem:[%s13921_s1 + $0x2d0] sm:$0xff]  ;;  %v6263_v5 = vpack.c.bf16 %v2668_v60, %v2664_v59  ;;  %v2887_v60 = vld [vmem:[%s13922_s3 + $0x20] sm:$0xff]  ;;  %v2922_v52 = vld [vmem:[%s13922_s3 + $0x138] sm:$0xff] }
 0x527   :  { %6244 = vmatprep.subr.bf16.mxu0 %v6243_v1  ;;  %v2666_v1 = vld [vmem:[%s13921_s1 + $0x318] sm:$0xff]  ;;  %v6325_v9 = vpack.c.bf16 %v2661_v63, %v2657_v16  ;;  %v6345_v16 = vpack.c.bf16 %v2887_v60, %v2883_v57  ;;  %v2924_v57 = vld [vmem:[%s13922_s3 + $0x148] sm:$0xff] }
 0x528   :  { %6306 = vmatpush1.bf16.msra.mxu1 %v6305_v8  ;;  %v2672_v8 = vld [vmem:[%s13921_s1 + $0x348] sm:$0xff]  ;;  %v6327_v10 = vpack.c.bf16 %v2670_v2, %v2666_v1  ;;  %v2889_v1 = vld [vmem:[%s13922_s3 + $0x30] sm:$0xff] }
 0x529   :  { %6308 = vmatprep.subr.bf16.mxu1 %v6307_v27  ;;  %v2676_v27 = vld [vmem:[%s13921_s1 + $0x368] sm:$0xff] }
 0x52a   :  { %6246 = vmatpush1.bf16.msra.mxu0 %v6245_v11  ;;  %v2665_v11 = vld [vmem:[%s13921_s1 + $0x310] sm:$0xff]  ;;  %v6267_v20 = vpack.c.bf16 %v2676_v27, %v2672_v8  ;;  %v2895_v27 = vld [vmem:[%s13922_s3 + $0x60] sm:$0xff] }
 0x52b   :  { %6248 = vmatprep.subr.bf16.mxu0 %v6247_v17  ;;  %v2674_v17 = vld [vmem:[%s13921_s1 + $0x358] sm:$0xff]  ;;  %v6329_v24 = vpack.c.bf16 %v2669_v12, %v2665_v11  ;;  %v6349_v11 = vpack.c.bf16 %v2895_v27, %v2891_v7  ;;  %v2932_v7 = vld [vmem:[%s13922_s3 + $0x188] sm:$0xff] }
 0x52c   :  { %6310 = vmatpush1.bf16.msra.mxu1 %v6309_v22  ;;  %v2680_v22 = vld [vmem:[%s13921_s1 + $0x388] sm:$0xff]  ;;  %v6331_v25 = vpack.c.bf16 %v2678_v19, %v2674_v17  ;;  %v2897_v17 = vld [vmem:[%s13922_s3 + $0x70] sm:$0xff] }
 0x52d   :  { %6312 = vmatprep.subr.bf16.mxu1 %v6311_v23  ;;  %v2684_v23 = vld [vmem:[%s13921_s1 + $0x3a8] sm:$0xff] }
 0x52e   :  { %6250 = vmatpush1.bf16.msra.mxu0 %v6249_v28  ;;  %v2673_v28 = vld [vmem:[%s13921_s1 + $0x350] sm:$0xff]  ;;  %v6271_v32 = vpack.c.bf16 %v2684_v23, %v2680_v22  ;;  %v2900_v19 = vld [vmem:[%s13922_s3 + $0x88] sm:$0xff]  ;;  %v2903_v22 = vld [vmem:[%s13922_s3 + $0xa0] sm:$0xff] }
 0x52f   :  { %6252 = vmatprep.subr.bf16.mxu0 %v6251_v31  ;;  %v2682_v31 = vld [vmem:[%s13921_s1 + $0x398] sm:$0xff]  ;;  %v6333_v37 = vpack.c.bf16 %v2677_v29, %v2673_v28  ;;  %v6351_v23 = vpack.c.bf16 %v2904_v21, %v2900_v19  ;;  %v2901_v29 = vld [vmem:[%s13922_s3 + $0x90] sm:$0xff] }
 0x530   :  { %6314 = vmatpush1.bf16.msra.mxu1 %v6313_v35  ;;  %v2688_v35 = vld [vmem:[%s13921_s1 + $0x3c8] sm:$0xff]  ;;  %v6335_v39 = vpack.c.bf16 %v2686_v47, %v2682_v31  ;;  %v2906_v28 = vld [vmem:[%s13922_s3 + $0xb8] sm:$0xff]  ;;  %v2905_v31 = vld [vmem:[%s13922_s3 + $0xb0] sm:$0xff] }
 0x531   :  { %6316 = vmatprep.subr.bf16.mxu1 %v6315_v36  ;;  %v2692_v36 = vld [vmem:[%s13921_s1 + $0x3e8] sm:$0xff]  ;;  %v6417_v33 = vpack.c.bf16 %v2905_v31, %v2901_v29  ;;  %v2937_v19 = vld [vmem:[%s13922_s3 + $0x1b0] sm:$0xff] }
 0x532   :  { %6254 = vmatpush1.bf16.msra.mxu0 %v6253_v40  ;;  %v2681_v40 = vld [vmem:[%s13921_s1 + $0x390] sm:$0xff]  ;;  %v6275_v45 = vpack.c.bf16 %v2692_v36, %v2688_v35  ;;  %v2908_v47 = vld [vmem:[%s13922_s3 + $0xc8] sm:$0xff]  ;;  %v2907_v35 = vld [vmem:[%s13922_s3 + $0xc0] sm:$0xff] }
 0x533   :  { %6256 = vmatprep.subr.bf16.mxu0 %v6255_v58  ;;  %v2690_v58 = vld [vmem:[%s13921_s1 + $0x3d8] sm:$0xff]  ;;  %v2911_v36 = vld [vmem:[%s13922_s3 + $0xe0] sm:$0xff]  ;;  %v2941_v31 = vld [vmem:[%s13922_s3 + $0x1d0] sm:$0xff] }
 0x534   :  { %6318 = vmatpush1.bf16.msra.mxu1 %v6317_v49  ;;  %v6337_v49 = vpack.c.bf16 %v2685_v41, %v2681_v40  ;;  %v2909_v40 = vld [vmem:[%s13922_s3 + $0xd0] sm:$0xff] }
 0x535   :  { %6320 = vmatprep.subr.bf16.mxu1 %v6319_v50  ;;  %v6339_v50 = vpack.c.bf16 %v2694_v43, %v2690_v58  ;;  %v2913_v41 = vld [vmem:[%s13922_s3 + $0xf0] sm:$0xff]  ;;  %v2916_v43 = vld [vmem:[%s13922_s3 + $0x108] sm:$0xff] }
 0x536   :  { %6258 = vmatpush1.bf16.msra.mxu0 %v6257_v3  ;;  %v6277_v3 = vpack.c.bf16 %v2691_v48, %v2687_v46  ;;  %v2915_v46 = vld [vmem:[%s13922_s3 + $0x100] sm:$0xff]  ;;  %v6421_v48 = vpack.c.bf16 %v2913_v41, %v2909_v40  ;;  %v2950_v40 = vld [vmem:[%s13922_s3 + $0x218] sm:$0xff] }
 0x537   :  { %6260 = vmatprep.subr.bf16.mxu0 %v6259_v55  ;;  %v2884_v55 = vld [vmem:[%s13922_s3 + $0x8] sm:$0xff] }
 0x538   :  { %6322 = vmatpush1.bf16.msra.mxu1 %v6321_v61  ;;  %v6343_v59 = vpack.c.bf16 %v2888_v56, %v2884_v55  ;;  %v2886_v61 = vld [vmem:[%s13922_s3 + $0x18] sm:$0xff]  ;;  %v2921_v55 = vld [vmem:[%s13922_s3 + $0x130] sm:$0xff] }
 0x539   :  { %6324 = vmatprep.subr.bf16.mxu1 %v6323_v62  ;;  %v2890_v62 = vld [vmem:[%s13922_s3 + $0x38] sm:$0xff] }
 0x53a   :  { %6262 = vmatpush1.bf16.msra.mxu0 %v6261_v0  ;;  %v6407_v63 = vpack.c.bf16 %v2890_v62, %v2886_v61  ;;  %v2885_v0 = vld [vmem:[%s13922_s3 + $0x10] sm:$0xff]  ;;  %v2923_v61 = vld [vmem:[%s13922_s3 + $0x140] sm:$0xff] }
 0x53b   :  { %6264 = vmatprep.subr.bf16.mxu0 %v6263_v5  ;;  %v6409_v2 = vpack.c.bf16 %v2889_v1, %v2885_v0  ;;  %v2892_v5 = vld [vmem:[%s13922_s3 + $0x48] sm:$0xff]  ;;  %v2927_v62 = vld [vmem:[%s13922_s3 + $0x160] sm:$0xff]  ;;  %v2930_v0 = vld [vmem:[%s13922_s3 + $0x178] sm:$0xff] }
 0x53c   :  { %6326 = vmatpush1.bf16.msra.mxu1 %v6325_v9  ;;  %v6347_v8 = vpack.c.bf16 %v2896_v6, %v2892_v5  ;;  %v2894_v9 = vld [vmem:[%s13922_s3 + $0x58] sm:$0xff]  ;;  %v2925_v1 = vld [vmem:[%s13922_s3 + $0x150] sm:$0xff] }
 0x53d   :  { %6328 = vmatprep.subr.bf16.mxu1 %v6327_v10  ;;  %v2898_v10 = vld [vmem:[%s13922_s3 + $0x78] sm:$0xff] }
 0x53e   :  { %6266 = vmatpush1.bf16.msra.mxu0 %v6265_v14  ;;  %v6411_v12 = vpack.c.bf16 %v2898_v10, %v2894_v9  ;;  %v2893_v14 = vld [vmem:[%s13922_s3 + $0x50] sm:$0xff]  ;;  %v2931_v9 = vld [vmem:[%s13922_s3 + $0x180] sm:$0xff] }
 0x53f   :  { %6268 = vmatprep.subr.bf16.mxu0 %v6267_v20  ;;  %v6413_v20 = vpack.c.bf16 %v2897_v17, %v2893_v14  ;;  %v2935_v10 = vld [vmem:[%s13922_s3 + $0x1a0] sm:$0xff]  ;;  %v2938_v14 = vld [vmem:[%s13922_s3 + $0x1b8] sm:$0xff]  ;;  %v2933_v17 = vld [vmem:[%s13922_s3 + $0x190] sm:$0xff] }
 0x540   :  { %6330 = vmatpush1.bf16.msra.mxu1 %v6329_v24  ;;  %v6353_v24 = vpack.c.bf16 %v2903_v22, %v2899_v44  ;;  %v6433_v21 = vpack.c.bf16 %v2937_v19, %v2933_v17  ;;  %v2940_v44 = vld [vmem:[%s13922_s3 + $0x1c8] sm:$0xff]  ;;  %v2978_v19 = vld [vmem:[%s13922_s3 + $0x2f8] sm:$0xff] }
 0x541   :  { %6332 = vmatprep.subr.bf16.mxu1 %v6331_v25  ;;  %v2902_v25 = vld [vmem:[%s13922_s3 + $0x98] sm:$0xff]  ;;  %v2944_v22 = vld [vmem:[%s13922_s3 + $0x1e8] sm:$0xff] }
 0x542   :  { %6270 = vmatpush1.bf16.msra.mxu0 %v6269_v30  ;;  %v6415_v30 = vpack.c.bf16 %v2906_v28, %v2902_v25  ;;  %v2943_v25 = vld [vmem:[%s13922_s3 + $0x1e0] sm:$0xff]  ;;  %v2942_v28 = vld [vmem:[%s13922_s3 + $0x1d8] sm:$0xff] }
 0x543   :  { %6272 = vmatprep.subr.bf16.mxu0 %v6271_v32  ;;  %v2912_v32 = vld [vmem:[%s13922_s3 + $0xe8] sm:$0xff] }
 0x544   :  { %6334 = vmatpush1.bf16.msra.mxu1 %v6333_v37  ;;  %v6355_v34 = vpack.c.bf16 %v2912_v32, %v2908_v47  ;;  %v2910_v37 = vld [vmem:[%s13922_s3 + $0xd8] sm:$0xff]  ;;  %v2945_v47 = vld [vmem:[%s13922_s3 + $0x1f0] sm:$0xff] }
 0x545   :  { %6336 = vmatprep.subr.bf16.mxu1 %v6335_v39  ;;  %v2914_v39 = vld [vmem:[%s13922_s3 + $0xf8] sm:$0xff] }
 0x546   :  { %6274 = vmatpush1.bf16.msra.mxu0 %v6273_v42  ;;  %v6357_v42 = vpack.c.bf16 %v2911_v36, %v2907_v35  ;;  %v6419_v58 = vpack.c.bf16 %v2914_v39, %v2910_v37  ;;  %v2952_v35 = vld [vmem:[%s13922_s3 + $0x228] sm:$0xff]  ;;  %v2947_v37 = vld [vmem:[%s13922_s3 + $0x200] sm:$0xff] }
 0x547   :  { %6276 = vmatprep.subr.bf16.mxu0 %v6275_v45  ;;  %v2920_v45 = vld [vmem:[%s13922_s3 + $0x128] sm:$0xff]  ;;  %v2951_v39 = vld [vmem:[%s13922_s3 + $0x220] sm:$0xff] }
 0x548   :  { %6338 = vmatpush1.bf16.msra.mxu1 %v6337_v49  ;;  %v6359_v49 = vpack.c.bf16 %v2920_v45, %v2916_v43  ;;  %v6377_v41 = vpack.c.bf16 %v2951_v39, %v2947_v37  ;;  %v2953_v43 = vld [vmem:[%s13922_s3 + $0x230] sm:$0xff]  ;;  %v2992_v37 = vld [vmem:[%s13922_s3 + $0x368] sm:$0xff] }
 0x549   :  { %6340 = vmatprep.subr.bf16.mxu1 %v6339_v50  ;;  %v2919_v50 = vld [vmem:[%s13922_s3 + $0x120] sm:$0xff] }
 0x54a   :  { %6278 = vmatpush1.bf16.msra.mxu0 %v6277_v3  ;;  %v6423_v3 = vpack.c.bf16 %v2922_v52, %v2918_v51  ;;  %v2955_v51 = vld [vmem:[%s13922_s3 + $0x240] sm:$0xff] }
 0x54b   :  { %6344 = vmatprep.subr.bf16.mxu0 %v6343_v59  ;;  %v2928_v59 = vld [vmem:[%s13922_s3 + $0x168] sm:$0xff]  ;;  %v2959_v52 = vld [vmem:[%s13922_s3 + $0x260] sm:$0xff] }
 0x54c   :  { %6342 = vmatpush1.bf16.msra.mxu1 %v6341_v53  ;;  %v6361_v53 = vpack.c.bf16 %v2919_v50, %v2915_v46  ;;  %v6363_v60 = vpack.c.bf16 %v2928_v59, %v2924_v57 }
 0x54d   :  { %2782 = vmatmul.mubr.f32.vlgmr.msra.gmra.mrb[16].mxu0 %v5157_v54  ;;  %6408 = vmatprep.subr.bf16.mxu1 %v6407_v63  ;;  %v6365_v63 = vpack.c.bf16 %v2927_v62, %v2923_v61  ;;  %v2968_v61 = vld [vmem:[%s13922_s3 + $0x2a8] sm:$0xff] }
 0x54e   :  { %6346 = vmatpush1.bf16.msra.mxu0 %v6345_v16  ;;  %v2926_v16 = vld [vmem:[%s13922_s3 + $0x158] sm:$0xff] }
 0x54f   :  { %2853 = vmatmul.mubr.f32.vlgmr.msra.gmra.mrb[16].mxu1 %v5157_v54  ;;  %6348 = vmatprep.subr.bf16.mxu0 %v6347_v8  ;;  %v2917_v54 = vld [vmem:[%s13922_s3 + $0x110] sm:$0xff]  ;;  %v6427_v5 = vpack.c.bf16 %v2930_v0, %v2926_v16  ;;  %v2936_v8 = vld [vmem:[%s13922_s3 + $0x1a8] sm:$0xff]  ;;  %v2963_v16 = vld [vmem:[%s13922_s3 + $0x280] sm:$0xff] }
 0x550   :  { %6410 = vmatpush1.bf16.msra.mxu1 %v6409_v2  ;;  %v6425_v56 = vpack.c.bf16 %v2921_v55, %v2917_v54  ;;  %v2929_v2 = vld [vmem:[%s13922_s3 + $0x170] sm:$0xff]  ;;  %v6367_v27 = vpack.c.bf16 %v2936_v8, %v2932_v7  ;;  %v2962_v54 = vld [vmem:[%s13922_s3 + $0x278] sm:$0xff] }
 0x551   :  { %6412 = vmatprep.subr.bf16.mxu1 %v6411_v12  ;;  %v6429_v6 = vpack.c.bf16 %v2929_v2, %v2925_v1  ;;  %v6369_v12 = vpack.c.bf16 %v2935_v10, %v2931_v9  ;;  %v2957_v55 = vld [vmem:[%s13922_s3 + $0x250] sm:$0xff]  ;;  %v2966_v0 = vld [vmem:[%s13922_s3 + $0x298] sm:$0xff]  ;;  %v2976_v9 = vld [vmem:[%s13922_s3 + $0x2e8] sm:$0xff] }
 0x552   :  { %6350 = vmatpush1.bf16.msra.mxu0 %v6349_v11  ;;  %v2934_v11 = vld [vmem:[%s13922_s3 + $0x198] sm:$0xff] }
 0x553   :  { %6352 = vmatprep.subr.bf16.mxu0 %v6351_v23  ;;  %v6371_v23 = vpack.c.bf16 %v2944_v22, %v2940_v44  ;;  %v2970_v2 = vld [vmem:[%s13922_s3 + $0x2b8] sm:$0xff] }
 0x554   :  { %6414 = vmatpush1.bf16.msra.mxu1 %v6413_v20  ;;  %v6431_v20 = vpack.c.bf16 %v2938_v14, %v2934_v11  ;;  %v6447_v7 = vpack.c.bf16 %v2970_v2, %v2966_v0  ;;  %v2971_v11 = vld [vmem:[%s13922_s3 + $0x2c0] sm:$0xff]  ;;  %v2974_v14 = vld [vmem:[%s13922_s3 + $0x2d8] sm:$0xff] }
 0x555   :  { %6416 = vmatprep.subr.bf16.mxu1 %v6415_v30  ;;  %v2946_v30 = vld [vmem:[%s13922_s3 + $0x1f8] sm:$0xff]  ;;  %v6451_v44 = vpack.c.bf16 %v2978_v19, %v2974_v14  ;;  %v3007_v0 = vld [vmem:[%s13922_s3 + $0x3e0] sm:$0xff] }
 0x556   :  { %6354 = vmatpush1.bf16.msra.mxu0 %v6353_v24  ;;  %v2939_v24 = vld [vmem:[%s13922_s3 + $0x1c0] sm:$0xff]  ;;  %v6435_v32 = vpack.c.bf16 %v2946_v30, %v2942_v28  ;;  %v2982_v30 = vld [vmem:[%s13922_s3 + $0x318] sm:$0xff] }
 0x557   :  { %6356 = vmatprep.subr.bf16.mxu0 %v6355_v34  ;;  %v6373_v29 = vpack.c.bf16 %v2943_v25, %v2939_v24  ;;  %v2948_v34 = vld [vmem:[%s13922_s3 + $0x208] sm:$0xff]  ;;  %v2979_v28 = vld [vmem:[%s13922_s3 + $0x300] sm:$0xff]  ;;  %v3006_v2 = vld [vmem:[%s13922_s3 + $0x3d8] sm:$0xff] }
 0x558   :  { %6418 = vmatpush1.bf16.msra.mxu1 %v6417_v33  ;;  %v6437_v33 = vpack.c.bf16 %v2945_v47, %v2941_v31  ;;  %v6375_v36 = vpack.c.bf16 %v2952_v35, %v2948_v34  ;;  %v2984_v24 = vld [vmem:[%s13922_s3 + $0x328] sm:$0xff]  ;;  %v2986_v47 = vld [vmem:[%s13922_s3 + $0x338] sm:$0xff]  ;;  %v2375_v14 = vld [vmem:[%s13925_s4] sm:$0xf] }
 0x559   :  { %6420 = vmatprep.subr.bf16.mxu1 %v6419_v58  ;;  %v2949_v58 = vld [vmem:[%s13922_s3 + $0x210] sm:$0xff]  ;;  %v6455_v34 = vpack.c.bf16 %v2986_v47, %v2982_v30  ;;  %v3210_v19 = vld [vmem:[%s13921_s1 + $0x38] sm:$0xff]  ;;  %v2392_v47 = vrot.slane %v2375_v14, %v8333_v18 }
 0x55a   :  { %6358 = vmatpush1.bf16.msra.mxu0 %v6357_v42  ;;  %v2954_v42 = vld [vmem:[%s13922_s3 + $0x238] sm:$0xff]  ;;  %v6441_v46 = vpack.c.bf16 %v2953_v43, %v2949_v58 }
 0x55b   :  { %6360 = vmatprep.subr.bf16.mxu0 %v6359_v49  ;;  %v6439_v45 = vpack.c.bf16 %v2954_v42, %v2950_v40  ;;  %v2960_v49 = vld [vmem:[%s13922_s3 + $0x268] sm:$0xff]  ;;  %v2987_v40 = vld [vmem:[%s13922_s3 + $0x340] sm:$0xff]  ;;  %v2990_v42 = vld [vmem:[%s13922_s3 + $0x358] sm:$0xff] }
 0x55c   :  { %6422 = vmatpush1.bf16.msra.mxu1 %v6421_v48  ;;  %v2956_v48 = vld [vmem:[%s13922_s3 + $0x248] sm:$0xff]  ;;  %v2994_v43 = vld [vmem:[%s13922_s3 + $0x378] sm:$0xff] }
 0x55d   :  { %6424 = vmatprep.subr.bf16.mxu1 %v6423_v3  ;;  %v6379_v50 = vpack.c.bf16 %v2960_v49, %v2956_v48  ;;  %v2958_v3 = vld [vmem:[%s13922_s3 + $0x258] sm:$0xff]  ;;  %v6459_v48 = vpack.c.bf16 %v2994_v43, %v2990_v42 }
 0x55e   :  { %6362 = vmatpush1.bf16.msra.mxu0 %v6361_v53  ;;  %v6381_v53 = vpack.c.bf16 %v2959_v52, %v2955_v51  ;;  %v6443_v57 = vpack.c.bf16 %v2962_v54, %v2958_v3  ;;  %v3000_v51 = vld [vmem:[%s13922_s3 + $0x3a8] sm:$0xff]  ;;  %v2995_v52 = vld [vmem:[%s13922_s3 + $0x380] sm:$0xff]  ;;  %v2998_v54 = vld [vmem:[%s13922_s3 + $0x398] sm:$0xff] }
 0x55f   :  { %6364 = vmatprep.subr.bf16.mxu0 %v6363_v60  ;;  %v2964_v60 = vld [vmem:[%s13922_s3 + $0x288] sm:$0xff] }
 0x560   :  { %6426 = vmatpush1.bf16.msra.mxu1 %v6425_v56  ;;  %v2961_v56 = vld [vmem:[%s13922_s3 + $0x270] sm:$0xff]  ;;  %v6383_v62 = vpack.c.bf16 %v2968_v61, %v2964_v60  ;;  %v3004_v61 = vld [vmem:[%s13922_s3 + $0x3c8] sm:$0xff] }
 0x561   :  { %6428 = vmatprep.subr.bf16.mxu1 %v6427_v5  ;;  %v6445_v59 = vpack.c.bf16 %v2961_v56, %v2957_v55  ;;  %v2965_v5 = vld [vmem:[%s13922_s3 + $0x290] sm:$0xff]  ;;  %v3002_v55 = vld [vmem:[%s13922_s3 + $0x3b8] sm:$0xff] }
 0x562   :  { %6366 = vmatpush1.bf16.msra.mxu0 %v6365_v63  ;;  %v2967_v63 = vld [vmem:[%s13922_s3 + $0x2a0] sm:$0xff]  ;;  %v3001_v60 = vld [vmem:[%s13922_s3 + $0x3b0] sm:$0xff] }
 0x563   :  { %6368 = vmatprep.subr.bf16.mxu0 %v6367_v27  ;;  %v6385_v1 = vpack.c.bf16 %v2967_v63, %v2963_v16  ;;  %v2972_v27 = vld [vmem:[%s13922_s3 + $0x2c8] sm:$0xff]  ;;  %v3003_v63 = vld [vmem:[%s13922_s3 + $0x3c0] sm:$0xff] }
 0x564   :  { %6430 = vmatpush1.bf16.msra.mxu1 %v6429_v6  ;;  %v2969_v6 = vld [vmem:[%s13922_s3 + $0x2b0] sm:$0xff]  ;;  %v6387_v10 = vpack.c.bf16 %v2976_v9, %v2972_v27  ;;  %v3008_v16 = vld [vmem:[%s13922_s3 + $0x3e8] sm:$0xff] }
 0x565   :  { %6432 = vmatprep.subr.bf16.mxu1 %v6431_v20  ;;  %v6449_v8 = vpack.c.bf16 %v2969_v6, %v2965_v5  ;;  %v2973_v20 = vld [vmem:[%s13922_s3 + $0x2d0] sm:$0xff]  ;;  %v3010_v5 = vld [vmem:[%s13922_s3 + $0x3f8] sm:$0xff]  ;;  %v3204_v9 = vld [vmem:[%s13921_s1 + $0x8] sm:$0xff] }
 0x566   :  { %6370 = vmatpush1.bf16.msra.mxu0 %v6369_v12  ;;  %v2975_v12 = vld [vmem:[%s13922_s3 + $0x2e0] sm:$0xff]  ;;  %v3005_v6 = vld [vmem:[%s13922_s3 + $0x3d0] sm:$0xff] }
 0x567   :  { %6372 = vmatprep.subr.bf16.mxu0 %v6371_v23  ;;  %v6389_v17 = vpack.c.bf16 %v2975_v12, %v2971_v11  ;;  %v2980_v23 = vld [vmem:[%s13922_s3 + $0x308] sm:$0xff]  ;;  %v3009_v27 = vld [vmem:[%s13922_s3 + $0x3f0] sm:$0xff] }
 0x568   :  { %6434 = vmatpush1.bf16.msra.mxu1 %v6433_v21  ;;  %v2977_v21 = vld [vmem:[%s13922_s3 + $0x2f0] sm:$0xff]  ;;  %v6391_v25 = vpack.c.bf16 %v2984_v24, %v2980_v23  ;;  %v6469_v12 = vpack.c.bf16 %v3009_v27, %v3005_v6 }
 0x569   :  { %6436 = vmatprep.subr.bf16.mxu1 %v6435_v32  ;;  %v6453_v22 = vpack.c.bf16 %v2977_v21, %v2973_v20  ;;  %v2981_v32 = vld [vmem:[%s13922_s3 + $0x310] sm:$0xff]  ;;  %v2380_v21 = vrot.slane %v2375_v14, %v8324_v13 }
 0x56a   :  { %6374 = vmatpush1.bf16.msra.mxu0 %v6373_v29  ;;  %v2983_v29 = vld [vmem:[%s13922_s3 + $0x320] sm:$0xff] }
 0x56b   :  { %6376 = vmatprep.subr.bf16.mxu0 %v6375_v36  ;;  %v6393_v31 = vpack.c.bf16 %v2983_v29, %v2979_v28  ;;  %v2988_v36 = vld [vmem:[%s13922_s3 + $0x348] sm:$0xff] }
 0x56c   :  { %6438 = vmatpush1.bf16.msra.mxu1 %v6437_v33  ;;  %v2985_v33 = vld [vmem:[%s13922_s3 + $0x330] sm:$0xff]  ;;  %v6395_v39 = vpack.c.bf16 %v2992_v37, %v2988_v36 }
 0x56d   :  { %6440 = vmatprep.subr.bf16.mxu1 %v6439_v45  ;;  %v6457_v35 = vpack.c.bf16 %v2985_v33, %v2981_v32  ;;  %v2989_v45 = vld [vmem:[%s13922_s3 + $0x350] sm:$0xff]  ;;  %v2388_v33 = vrot.slane %v2375_v14, %v8336_v26 }
 0x56e   :  { %6378 = vmatpush1.bf16.msra.mxu0 %v6377_v41  ;;  %v2991_v41 = vld [vmem:[%s13922_s3 + $0x360] sm:$0xff] }
 0x56f   :  { %6380 = vmatprep.subr.bf16.mxu0 %v6379_v50  ;;  %v6397_v58 = vpack.c.bf16 %v2991_v41, %v2987_v40  ;;  %v2996_v50 = vld [vmem:[%s13922_s3 + $0x388] sm:$0xff] }
 0x570   :  { %6442 = vmatpush1.bf16.msra.mxu1 %v6441_v46  ;;  %v2993_v46 = vld [vmem:[%s13922_s3 + $0x370] sm:$0xff]  ;;  %v6399_v3 = vpack.c.bf16 %v3000_v51, %v2996_v50 }
 0x571   :  { %6444 = vmatprep.subr.bf16.mxu1 %v6443_v57  ;;  %v6461_v49 = vpack.c.bf16 %v2993_v46, %v2989_v45  ;;  %v6463_v57 = vpack.c.bf16 %v3002_v55, %v2998_v54 }
 0x572   :  { %6382 = vmatpush1.bf16.msra.mxu0 %v6381_v53  ;;  %v2999_v53 = vld [vmem:[%s13922_s3 + $0x3a0] sm:$0xff] }
 0x573   :  { %6384 = vmatprep.subr.bf16.mxu0 %v6383_v62  ;;  %v6401_v56 = vpack.c.bf16 %v2999_v53, %v2995_v52 }
 0x574   :  { %6446 = vmatpush1.bf16.msra.mxu1 %v6445_v59  ;;  %v2997_v59 = vld [vmem:[%s13922_s3 + $0x390] sm:$0xff] }
 0x575   :  { %6448 = vmatprep.subr.bf16.mxu1 %v6447_v7  ;;  %v6465_v62 = vpack.c.bf16 %v3001_v60, %v2997_v59  ;;  %v6405_v7 = vpack.c.bf16 %v3007_v0, %v3003_v63 }
 0x576   :  { %6386 = vmatpush1.bf16.msra.mxu0 %v6385_v1  ;;  %v6403_v1 = vpack.c.bf16 %v3008_v16, %v3004_v61 }
 0x577   :  { %6388 = vmatprep.subr.bf16.mxu0 %v6387_v10  ;;  %v3208_v10 = vld [vmem:[%s13921_s1 + $0x28] sm:$0xff] }
 0x578   :  { %6450 = vmatpush1.bf16.msra.mxu1 %v6449_v8  ;;  %v6467_v8 = vpack.c.bf16 %v3010_v5, %v3006_v2  ;;  %v6471_v11 = vpack.c.bf16 %v3208_v10, %v3204_v9 }
 0x579   :  { %6452 = vmatprep.subr.bf16.mxu1 %v6451_v44  ;;  %v2384_v44 = vrot.slane %v2375_v14, %v8329_v15 }
 0x57a   :  { %6390 = vmatpush1.bf16.msra.mxu0 %v6389_v17  ;;  %v3206_v17 = vld [vmem:[%s13921_s1 + $0x18] sm:$0xff] }
 0x57b   :  { %6392 = vmatprep.subr.bf16.mxu0 %v6391_v25  ;;  %v6535_v20 = vpack.c.bf16 %v3210_v19, %v3206_v17 }
 0x57c   :  { %6454 = vmatpush1.bf16.msra.mxu1 %v6453_v22 }
 0x57d   :  { %6456 = vmatprep.subr.bf16.mxu1 %v6455_v34 }
 0x57e   :  { %6394 = vmatpush1.bf16.msra.mxu0 %v6393_v31 }
 0x57f   :  { %6396 = vmatprep.subr.bf16.mxu0 %v6395_v39 }
 0x580   :  { %6458 = vmatpush1.bf16.msra.mxu1 %v6457_v35 }
 0x581   :  { %6460 = vmatprep.subr.bf16.mxu1 %v6459_v48 }
 0x582   :  { %6398 = vmatpush1.bf16.msra.mxu0 %v6397_v58 }
 0x583   :  { %6400 = vmatprep.subr.bf16.mxu0 %v6399_v3  ;;  %v2695_v3 = vld [vmem:[%s13924_s2] sm:$0xf] }
 0x584   :  { %6462 = vmatpush1.bf16.msra.mxu1 %v6461_v49  ;;  %v2704_v53 = vrot.slane %v2695_v3, %v8329_v15  ;;  %v2712_v61 = vrot.slane %v2695_v3, %v8333_v18  ;;  %v2708_v0 = vrot.slane %v2695_v3, %v8336_v26 }
 0x585   :  { %6464 = vmatprep.subr.bf16.mxu1 %v6463_v57 }
 0x586   :  { %6402 = vmatpush1.bf16.msra.mxu0 %v6401_v56 }
 0x587   :  { %6404 = vmatprep.subr.bf16.mxu0 %v6403_v1 }
 0x588   :  { %6466 = vmatpush1.bf16.msra.mxu1 %v6465_v62 }
 0x589   :  { %6468 = vmatprep.subr.bf16.mxu1 %v6467_v8 }
 0x58a   :  { %6406 = vmatpush1.bf16.msra.mxu0 %v6405_v7 }
 0x58b   :  { %6472 = vmatprep.subr.bf16.mxu0 %v6471_v11 }
 0x58c   :  { %6470 = vmatpush1.bf16.msra.mxu1 %v6469_v12 }
 0x58d   :  { %6536 = vmatprep.subr.bf16.mxu1 %v6535_v20  ;;  %v3203_v20 = vld [vmem:[%s13921_s1] sm:$0xff] }
 0x5e0   :  { %v2463_v22 = vpop.f32.mrb[14].mxu0  ;;  %v2534_v23 = vpop.f32.mrb[14].mxu1 }
 0x5e1   :  { %v2464_v24 = vadd.f32 %v2463_v22, %v2380_v21  ;;  %v2465_v25 = vpop.f32.mrb[15].mxu0  ;;  %v2536_v28 = vpop.f32.mrb[15].mxu1  ;;  %v2535_v35 = vadd.f32 %v2534_v23, %v2388_v33  ;;  %v3207_v21 = vld [vmem:[%s13921_s1 + $0x20] sm:$0xff]  ;;  %v3212_v22 = vld [vmem:[%s13921_s1 + $0x48] sm:$0xff]  ;;  %v3205_v23 = vld [vmem:[%s13921_s1 + $0x10] sm:$0xff] }
 0x5e2   :  { %v2466_v29 = vadd.f32 %v2465_v25, %v2384_v44  ;;  %v2537_v32 = vadd.f32 %v2536_v28, %v2392_v47  ;;  %v6473_v28 = vpack.c.bf16 %v3207_v21, %v3203_v20  ;;  %v3215_v33 = vld [vmem:[%s13921_s1 + $0x60] sm:$0xff]  ;;  %v3246_v20 = vld [vmem:[%s13921_s1 + $0x158] sm:$0xff] }
 0x5e3   :  { %v5153_v30 = vmul.f32 -1.442695, %v2464_v24  ;;  %v3209_v24 = vld [vmem:[%s13921_s1 + $0x30] sm:$0xff]  ;;  %v3250_v21 = vld [vmem:[%s13921_s1 + $0x178] sm:$0xff] }
 0x5e4   :  { %v5154_v31 = vmul.f32 -1.442695, %v2466_v29  ;;  %v5155_v34 = vmul.f32 -1.442695, %v2537_v32  ;;  %v3214_v29 = vld [vmem:[%s13921_s1 + $0x58] sm:$0xff]  ;;  %v3211_v32 = vld [vmem:[%s13921_s1 + $0x40] sm:$0xff] }
 0x5e5   :  { %7352 = vpow2.f32 %v5153_v30  ;;  %v3218_v30 = vld [vmem:[%s13921_s1 + $0x78] sm:$0xff] }
 0x5e6   :  { %7354 = vpow2.f32 %v5154_v31 }
 0x5e7   :  { %7356 = vpow2.f32 %v5155_v34  ;;  %v3220_v34 = vld [vmem:[%s13921_s1 + $0x88] sm:$0xff] }
 0x5e8   :  { %7358 = vtanh.f32 %v2535_v35  ;;  %v3224_v35 = vld [vmem:[%s13921_s1 + $0xa8] sm:$0xff] }
 0x5ef   :  { %v7353_v36 = vpop.eup %7352 }
 0x5f0   :  { %v7355_v37 = vpop.eup %7354  ;;  %v2542_v39 = vadd.f32 1.0, %v7353_v36  ;;  %v6537_v36 = vpack.c.bf16 %v3209_v24, %v3205_v23  ;;  %v3252_v23 = vld [vmem:[%s13921_s1 + $0x188] sm:$0xff] }
 0x5f1   :  { %v2548_v40 = vadd.f32 1.0, %v7355_v37  ;;  %v7357_v41 = vpop.eup %7356  ;;  %v6539_v37 = vpack.c.bf16 %v3218_v30, %v3214_v29  ;;  %v3256_v24 = vld [vmem:[%s13921_s1 + $0x1a8] sm:$0xff]  ;;  %v3245_v29 = vld [vmem:[%s13921_s1 + $0x150] sm:$0xff] }
 0x5f2   :  { %7360 = vrcp.f32 %v2542_v39  ;;  %v7359_v42 = vpop.eup %7358  ;;  %v2555_v46 = vadd.f32 1.0, %v7357_v41  ;;  %v3213_v39 = vld [vmem:[%s13921_s1 + $0x50] sm:$0xff]  ;;  %v6477_v41 = vpack.c.bf16 %v3215_v33, %v3211_v32  ;;  %v3258_v32 = vld [vmem:[%s13921_s1 + $0x1b8] sm:$0xff]  ;;  %v6495_v33 = vpack.c.bf16 %v3256_v24, %v3252_v23  ;;  %v3283_v23 = vld [vmem:[%s13921_s1 + $0x280] sm:$0xff] }
 0x5f3   :  { %7362 = vrcp.f32 %v2548_v40  ;;  %v3217_v40 = vld [vmem:[%s13921_s1 + $0x70] sm:$0xff]  ;;  %v3287_v24 = vld [vmem:[%s13921_s1 + $0x2a0] sm:$0xff] }
 0x5f4   :  { %7364 = vrcp.f32 %v2555_v46  ;;  %v3223_v46 = vld [vmem:[%s13921_s1 + $0xa0] sm:$0xff]  ;;  %v3249_v30 = vld [vmem:[%s13921_s1 + $0x170] sm:$0xff] }
 0x5fc   :  { %v7361_v58 = vpop.eup %7360 }
 0x5fd   :  { %v7363_v43 = vpop.eup %7362  ;;  %v2559_v45 = vmul.f32 %v7361_v58, %v7359_v42  ;;  %v3222_v42 = vld [vmem:[%s13921_s1 + $0x98] sm:$0xff] }
 0x5fe   :  { %v2558_v48 = vmul.f32 %v7363_v43, %v10712_v4  ;;  %v7365_v50 = vpop.eup %7364  ;;  %v2700_v4 = vrot.slane %v2695_v3, %v8324_v13  ;;  %v3226_v58 = vld [vmem:[%s13921_s1 + $0xb8] sm:$0xff]  ;;  %v6479_v43 = vpack.c.bf16 %v3224_v35, %v3220_v34  ;;  %v3221_v3 = vld [vmem:[%s13921_s1 + $0x90] sm:$0xff]  ;;  %v3251_v34 = vld [vmem:[%s13921_s1 + $0x180] sm:$0xff] }
 0x5ff   :  { %v3255_v35 = vld [vmem:[%s13921_s1 + $0x1a0] sm:$0xff] }
 0x600   :  { %v11508_v49 = vadd.f32 %v2559_v45, %v2558_v48  ;;  %v3219_v45 = vld [vmem:[%s13921_s1 + $0x80] sm:$0xff]  ;;  %v3228_v48 = vld [vmem:[%s13921_s1 + $0xc8] sm:$0xff] }
 0x602   :  { %7366 = vtanh.f32 %v11508_v49 }
 0x60c   :  { %v7367_v51 = vpop.eup %7366 }
 0x60d   :  { %v2562_v52 = vmul.f32 %v7367_v51, %v7365_v50  ;;  %v3232_v50 = vld [vmem:[%s13921_s1 + $0xe8] sm:$0xff]  ;;  %v6541_v51 = vpack.c.bf16 %v3217_v40, %v3213_v39  ;;  %v6557_v39 = vpack.c.bf16 %v3249_v30, %v3245_v29 }
 0x60f   :  { %5156 = vst [vmem:[%s13926_s5 + $0x18] sm:$0xff] %v2562_v52  ;;  %3097 = vmatprep.mubr.f32.mxu0 %v2562_v52  ;;  %3168 = vmatprep.mubr.f32.mxu1 %v2562_v52  ;;  %v6543_v52 = vpack.c.bf16 %v3226_v58, %v3222_v42  ;;  %v3257_v42 = vld [vmem:[%s13921_s1 + $0x1b0] sm:$0xff]  ;;  %v6497_v58 = vpack.c.bf16 %v3255_v35, %v3251_v34  ;;  %v3298_v34 = vld [vmem:[%s13921_s1 + $0x2f8] sm:$0xff] }
 0x620   :  { %v2783_v54 = vpop.f32.mrb[16].mxu0 }
 0x621   :  { %v2784_v55 = vadd.f32 %v2783_v54, %v2700_v4  ;;  %v2785_v56 = vpop.f32.mrb[17].mxu0  ;;  %v3225_v4 = vld [vmem:[%s13921_s1 + $0xb0] sm:$0xff]  ;;  %v3230_v54 = vld [vmem:[%s13921_s1 + $0xd8] sm:$0xff] }
 0x622   :  { %v2786_v57 = vadd.f32 %v2785_v56, %v2704_v53  ;;  %v2854_v59 = vpop.f32.mrb[16].mxu1  ;;  %v6481_v53 = vpack.c.bf16 %v3223_v46, %v3219_v45  ;;  %v6483_v56 = vpack.c.bf16 %v3232_v50, %v3228_v48  ;;  %v3266_v45 = vld [vmem:[%s13921_s1 + $0x1f8] sm:$0xff]  ;;  %v3259_v48 = vld [vmem:[%s13921_s1 + $0x1c0] sm:$0xff] }
 0x623   :  { %v5158_v60 = vmul.f32 -1.442695, %v2784_v55  ;;  %v2856_v62 = vpop.f32.mrb[17].mxu1  ;;  %v2855_v2 = vadd.f32 %v2854_v59, %v2708_v0  ;;  %v3234_v55 = vld [vmem:[%s13921_s1 + $0xf8] sm:$0xff]  ;;  %v3231_v59 = vld [vmem:[%s13921_s1 + $0xe0] sm:$0xff]  ;;  %v3233_v0 = vld [vmem:[%s13921_s1 + $0xf0] sm:$0xff] }
 0x624   :  { %v5159_v16 = vmul.f32 -1.442695, %v2786_v57  ;;  %v2857_v63 = vadd.f32 %v2856_v62, %v2712_v61  ;;  %v3227_v57 = vld [vmem:[%s13921_s1 + $0xc0] sm:$0xff]  ;;  %v3240_v61 = vld [vmem:[%s13921_s1 + $0x128] sm:$0xff]  ;;  %v6545_v62 = vpack.c.bf16 %v3225_v4, %v3221_v3 }
 0x625   :  { %7368 = vpow2.f32 %v5158_v60  ;;  %v3236_v60 = vld [vmem:[%s13921_s1 + $0x108] sm:$0xff]  ;;  %v3263_v50 = vld [vmem:[%s13921_s1 + $0x1e0] sm:$0xff] }
 0x626   :  { %7370 = vpow2.f32 %v5159_v16  ;;  %v5160_v1 = vmul.f32 -1.442695, %v2857_v63  ;;  %v6547_v16 = vpack.c.bf16 %v3234_v55, %v3230_v54  ;;  %v3229_v63 = vld [vmem:[%s13921_s1 + $0xd0] sm:$0xff]  ;;  %v6501_v55 = vpack.c.bf16 %v3263_v50, %v3259_v48  ;;  %v3306_v48 = vld [vmem:[%s13921_s1 + $0x338] sm:$0xff] }
 0x627   :  { %v3265_v54 = vld [vmem:[%s13921_s1 + $0x1f0] sm:$0xff] }
 0x628   :  { %7372 = vpow2.f32 %v5160_v1  ;;  %v6485_v1 = vpack.c.bf16 %v3231_v59, %v3227_v57  ;;  %v3274_v57 = vld [vmem:[%s13921_s1 + $0x238] sm:$0xff] }
 0x629   :  { %7374 = vtanh.f32 %v2855_v2  ;;  %v3238_v2 = vld [vmem:[%s13921_s1 + $0x118] sm:$0xff] }
 0x62f   :  { %v7369_v5 = vpop.eup %7368 }
 0x630   :  { %v7371_v6 = vpop.eup %7370  ;;  %v2862_v7 = vadd.f32 1.0, %v7369_v5  ;;  %v3242_v5 = vld [vmem:[%s13921_s1 + $0x138] sm:$0xff] }
 0x631   :  { %v2868_v8 = vadd.f32 1.0, %v7371_v6  ;;  %v6487_v6 = vpack.c.bf16 %v3240_v61, %v3236_v60  ;;  %v3267_v60 = vld [vmem:[%s13921_s1 + $0x200] sm:$0xff] }
 0x632   :  { %7376 = vrcp.f32 %v2862_v7  ;;  %v7373_v27 = vpop.eup %7372  ;;  %v3235_v7 = vld [vmem:[%s13921_s1 + $0x100] sm:$0xff] }
 0x633   :  { %7378 = vrcp.f32 %v2868_v8  ;;  %v7375_v9 = vpop.eup %7374  ;;  %v2875_v11 = vadd.f32 1.0, %v7373_v27  ;;  %v3239_v8 = vld [vmem:[%s13921_s1 + $0x120] sm:$0xff]  ;;  %v3244_v27 = vld [vmem:[%s13921_s1 + $0x148] sm:$0xff] }
 0x634   :  { %v3271_v61 = vld [vmem:[%s13921_s1 + $0x220] sm:$0xff] }
 0x635   :  { %7380 = vrcp.f32 %v2875_v11  ;;  %v6551_v11 = vpack.c.bf16 %v3242_v5, %v3238_v2  ;;  %v3273_v2 = vld [vmem:[%s13921_s1 + $0x230] sm:$0xff]  ;;  %v6505_v5 = vpack.c.bf16 %v3271_v61, %v3267_v60  ;;  %v3314_v60 = vld [vmem:[%s13921_s1 + $0x378] sm:$0xff] }
 0x63c   :  { %v7377_v10 = vpop.eup %7376 }
 0x63d   :  { %v7379_v12 = vpop.eup %7378  ;;  %v2879_v14 = vmul.f32 %v7377_v10, %v7375_v9  ;;  %v3248_v9 = vld [vmem:[%s13921_s1 + $0x168] sm:$0xff]  ;;  %v6549_v10 = vpack.c.bf16 %v3233_v0, %v3229_v63 }
 0x63e   :  { %v2878_v17 = vmul.f32 %v7379_v12, %v10726_v38  ;;  %v3216_v38 = vld [vmem:[%s13921_s1 + $0x68] sm:$0xff]  ;;  %v3237_v12 = vld [vmem:[%s13921_s1 + $0x110] sm:$0xff] }
 0x63f   :  { %v7381_v44 = vpop.eup %7380  ;;  %v6475_v47 = vpack.c.bf16 %v3216_v38, %v3212_v22  ;;  %v3243_v22 = vld [vmem:[%s13921_s1 + $0x140] sm:$0xff] }
 0x640   :  { %v11522_v19 = vadd.f32 %v2879_v14, %v2878_v17  ;;  %v3241_v14 = vld [vmem:[%s13921_s1 + $0x130] sm:$0xff]  ;;  %v6489_v17 = vpack.c.bf16 %v3239_v8, %v3235_v7  ;;  %v3247_v38 = vld [vmem:[%s13921_s1 + $0x160] sm:$0xff]  ;;  %v3282_v7 = vld [vmem:[%s13921_s1 + $0x278] sm:$0xff] }
 0x642   :  { %7382 = vtanh.f32 %v11522_v19 }
 0x64c   :  { %v7383_v25 = vpop.eup %7382 }
 0x64d   :  { %v2882_v31 = vmul.f32 %v7383_v25, %v7381_v44  ;;  %v6491_v44 = vpack.c.bf16 %v3248_v9, %v3244_v27  ;;  %v6553_v25 = vpack.c.bf16 %v3241_v14, %v3237_v12  ;;  %v3275_v27 = vld [vmem:[%s13921_s1 + $0x240] sm:$0xff] }
 0x64e   :  { %v3279_v9 = vld [vmem:[%s13921_s1 + $0x260] sm:$0xff] }
 0x64f   :  { %3098 = vmatmul.mubr.f32.vlgmr.msra.gmra.mrb[18].mxu0 %v2882_v31  ;;  %3169 = vmatmul.mubr.f32.vlgmr.msra.gmra.mrb[18].mxu1 %v2882_v31 }
 0x650   :  { %6474 = vmatpush1.bf16.msra.mxu0 %v6473_v28  ;;  %3417 = vmatprep.mubr.f32.mxu0 %v2882_v31  ;;  %v6555_v28 = vpack.c.bf16 %v3250_v21, %v3246_v20  ;;  %v3281_v20 = vld [vmem:[%s13921_s1 + $0x270] sm:$0xff]  ;;  %v6509_v21 = vpack.c.bf16 %v3279_v9, %v3275_v27  ;;  %v3322_v27 = vld [vmem:[%s13921_s1 + $0x3b8] sm:$0xff] }
 0x651   :  { %3488 = vmatprep.mubr.f32.mxu1 %v2882_v31  ;;  %6476 = vmatprep.subr.bf16.mxu0 %v6475_v47  ;;  %v6493_v31 = vpack.c.bf16 %v3247_v38, %v3243_v22  ;;  %v3254_v47 = vld [vmem:[%s13921_s1 + $0x198] sm:$0xff] }
 0x652   :  { %6538 = vmatpush1.bf16.msra.mxu1 %v6537_v36  ;;  %v3260_v36 = vld [vmem:[%s13921_s1 + $0x1c8] sm:$0xff]  ;;  %v6559_v40 = vpack.c.bf16 %v3258_v32, %v3254_v47  ;;  %v3290_v22 = vld [vmem:[%s13921_s1 + $0x2b8] sm:$0xff]  ;;  %v3289_v47 = vld [vmem:[%s13921_s1 + $0x2b0] sm:$0xff]  ;;  %v6513_v32 = vpack.c.bf16 %v3287_v24, %v3283_v23 }
 0x653   :  { %6540 = vmatprep.subr.bf16.mxu1 %v6539_v37  ;;  %v3264_v37 = vld [vmem:[%s13921_s1 + $0x1e8] sm:$0xff]  ;;  %v3330_v23 = vld [vmem:[%s13921_s1 + $0x3f8] sm:$0xff] }
 0x654   :  { %6478 = vmatpush1.bf16.msra.mxu0 %v6477_v41  ;;  %v3253_v41 = vld [vmem:[%s13921_s1 + $0x190] sm:$0xff]  ;;  %v6499_v46 = vpack.c.bf16 %v3264_v37, %v3260_v36  ;;  %v3291_v36 = vld [vmem:[%s13921_s1 + $0x2c0] sm:$0xff] }
 0x655   :  { %6480 = vmatprep.subr.bf16.mxu0 %v6479_v43  ;;  %v3262_v43 = vld [vmem:[%s13921_s1 + $0x1d8] sm:$0xff]  ;;  %v6561_v3 = vpack.c.bf16 %v3257_v42, %v3253_v41  ;;  %v3295_v37 = vld [vmem:[%s13921_s1 + $0x2e0] sm:$0xff] }
 0x656   :  { %6542 = vmatpush1.bf16.msra.mxu1 %v6541_v51  ;;  %v3268_v51 = vld [vmem:[%s13921_s1 + $0x208] sm:$0xff]  ;;  %v6563_v4 = vpack.c.bf16 %v3266_v45, %v3262_v43  ;;  %v3297_v43 = vld [vmem:[%s13921_s1 + $0x2f0] sm:$0xff]  ;;  %v6517_v45 = vpack.c.bf16 %v3295_v37, %v3291_v36  ;;  %v3519_v37 = vld [vmem:[%s13922_s3] sm:$0xff] }
 0x657   :  { %6544 = vmatprep.subr.bf16.mxu1 %v6543_v52  ;;  %v3272_v52 = vld [vmem:[%s13921_s1 + $0x228] sm:$0xff] }
 0x658   :  { %6482 = vmatpush1.bf16.msra.mxu0 %v6481_v53  ;;  %v3261_v53 = vld [vmem:[%s13921_s1 + $0x1d0] sm:$0xff]  ;;  %v6503_v59 = vpack.c.bf16 %v3272_v52, %v3268_v51  ;;  %v3299_v51 = vld [vmem:[%s13921_s1 + $0x300] sm:$0xff]  ;;  %v3524_v36 = vld [vmem:[%s13922_s3 + $0x28] sm:$0xff] }
 0x659   :  { %6484 = vmatprep.subr.bf16.mxu0 %v6483_v56  ;;  %v3270_v56 = vld [vmem:[%s13921_s1 + $0x218] sm:$0xff]  ;;  %v6565_v63 = vpack.c.bf16 %v3265_v54, %v3261_v53  ;;  %v3303_v52 = vld [vmem:[%s13921_s1 + $0x320] sm:$0xff] }
 0x65a   :  { %6546 = vmatpush1.bf16.msra.mxu1 %v6545_v62  ;;  %v3276_v62 = vld [vmem:[%s13921_s1 + $0x248] sm:$0xff]  ;;  %v6567_v0 = vpack.c.bf16 %v3274_v57, %v3270_v56  ;;  %v3305_v56 = vld [vmem:[%s13921_s1 + $0x330] sm:$0xff]  ;;  %v6521_v57 = vpack.c.bf16 %v3303_v52, %v3299_v51  ;;  %v3527_v52 = vld [vmem:[%s13922_s3 + $0x40] sm:$0xff] }
 0x65b   :  { %6548 = vmatprep.subr.bf16.mxu1 %v6547_v16  ;;  %v3280_v16 = vld [vmem:[%s13921_s1 + $0x268] sm:$0xff] }
 0x65c   :  { %6486 = vmatpush1.bf16.msra.mxu0 %v6485_v1  ;;  %v3269_v1 = vld [vmem:[%s13921_s1 + $0x210] sm:$0xff]  ;;  %v6507_v8 = vpack.c.bf16 %v3280_v16, %v3276_v62  ;;  %v3307_v62 = vld [vmem:[%s13921_s1 + $0x340] sm:$0xff]  ;;  %v3532_v51 = vld [vmem:[%s13922_s3 + $0x68] sm:$0xff] }
 0x65d   :  { %6488 = vmatprep.subr.bf16.mxu0 %v6487_v6  ;;  %v3278_v6 = vld [vmem:[%s13921_s1 + $0x258] sm:$0xff]  ;;  %v6569_v12 = vpack.c.bf16 %v3273_v2, %v3269_v1  ;;  %v3311_v16 = vld [vmem:[%s13921_s1 + $0x360] sm:$0xff] }
 0x65e   :  { %6550 = vmatpush1.bf16.msra.mxu1 %v6549_v10  ;;  %v3284_v10 = vld [vmem:[%s13921_s1 + $0x288] sm:$0xff]  ;;  %v6571_v14 = vpack.c.bf16 %v3282_v7, %v3278_v6  ;;  %v3313_v6 = vld [vmem:[%s13921_s1 + $0x370] sm:$0xff]  ;;  %v6525_v7 = vpack.c.bf16 %v3311_v16, %v3307_v62  ;;  %v3535_v16 = vld [vmem:[%s13922_s3 + $0x80] sm:$0xff] }
 0x65f   :  { %6552 = vmatprep.subr.bf16.mxu1 %v6551_v11  ;;  %v3288_v11 = vld [vmem:[%s13921_s1 + $0x2a8] sm:$0xff] }
 0x660   :  { %6490 = vmatpush1.bf16.msra.mxu0 %v6489_v17  ;;  %v3277_v17 = vld [vmem:[%s13921_s1 + $0x250] sm:$0xff]  ;;  %v6511_v38 = vpack.c.bf16 %v3288_v11, %v3284_v10  ;;  %v3315_v10 = vld [vmem:[%s13921_s1 + $0x380] sm:$0xff]  ;;  %v3540_v62 = vld [vmem:[%s13922_s3 + $0xa8] sm:$0xff] }
 0x661   :  { %6492 = vmatprep.subr.bf16.mxu0 %v6491_v44  ;;  %v3286_v44 = vld [vmem:[%s13921_s1 + $0x298] sm:$0xff]  ;;  %v6573_v29 = vpack.c.bf16 %v3281_v20, %v3277_v17  ;;  %v3319_v11 = vld [vmem:[%s13921_s1 + $0x3a0] sm:$0xff] }
 0x662   :  { %6554 = vmatpush1.bf16.msra.mxu1 %v6553_v25  ;;  %v3292_v25 = vld [vmem:[%s13921_s1 + $0x2c8] sm:$0xff]  ;;  %v6575_v30 = vpack.c.bf16 %v3290_v22, %v3286_v44  ;;  %v3321_v44 = vld [vmem:[%s13921_s1 + $0x3b0] sm:$0xff]  ;;  %v6529_v22 = vpack.c.bf16 %v3319_v11, %v3315_v10 }
 0x663   :  { %6556 = vmatprep.subr.bf16.mxu1 %v6555_v28  ;;  %v3296_v28 = vld [vmem:[%s13921_s1 + $0x2e8] sm:$0xff] }
 0x664   :  { %6494 = vmatpush1.bf16.msra.mxu0 %v6493_v31  ;;  %v3285_v31 = vld [vmem:[%s13921_s1 + $0x290] sm:$0xff]  ;;  %v6515_v35 = vpack.c.bf16 %v3296_v28, %v3292_v25  ;;  %v3323_v25 = vld [vmem:[%s13921_s1 + $0x3c0] sm:$0xff] }
 0x665   :  { %6496 = vmatprep.subr.bf16.mxu0 %v6495_v33  ;;  %v3294_v33 = vld [vmem:[%s13921_s1 + $0x2d8] sm:$0xff]  ;;  %v6577_v41 = vpack.c.bf16 %v3289_v47, %v3285_v31  ;;  %v3327_v28 = vld [vmem:[%s13921_s1 + $0x3e0] sm:$0xff]  ;;  %v3325_v31 = vld [vmem:[%s13921_s1 + $0x3d0] sm:$0xff] }
 0x666   :  { %6558 = vmatpush1.bf16.msra.mxu1 %v6557_v39  ;;  %v3300_v39 = vld [vmem:[%s13921_s1 + $0x308] sm:$0xff]  ;;  %v6579_v42 = vpack.c.bf16 %v3298_v34, %v3294_v33  ;;  %v3329_v47 = vld [vmem:[%s13921_s1 + $0x3f0] sm:$0xff] }
 0x667   :  { %6560 = vmatprep.subr.bf16.mxu1 %v6559_v40  ;;  %v3304_v40 = vld [vmem:[%s13921_s1 + $0x328] sm:$0xff]  ;;  %v6597_v33 = vpack.c.bf16 %v3329_v47, %v3325_v31  ;;  %v3554_v31 = vld [vmem:[%s13922_s3 + $0x118] sm:$0xff] }
 0x668   :  { %6498 = vmatpush1.bf16.msra.mxu0 %v6497_v58  ;;  %v3293_v58 = vld [vmem:[%s13921_s1 + $0x2d0] sm:$0xff]  ;;  %v6519_v50 = vpack.c.bf16 %v3304_v40, %v3300_v39  ;;  %v5165_v34 = vld [vmem:[%s13923_s0 + $0x28] sm:$0xff]  ;;  %v3523_v40 = vld [vmem:[%s13922_s3 + $0x20] sm:$0xff] }
 0x669   :  { %6500 = vmatprep.subr.bf16.mxu0 %v6499_v46  ;;  %v3302_v46 = vld [vmem:[%s13921_s1 + $0x318] sm:$0xff]  ;;  %v6581_v53 = vpack.c.bf16 %v3297_v43, %v3293_v58  ;;  %v6601_v58 = vpack.c.bf16 %v3523_v40, %v3519_v37  ;;  %v3560_v37 = vld [vmem:[%s13922_s3 + $0x148] sm:$0xff] }
 0x66a   :  { %6562 = vmatpush1.bf16.msra.mxu1 %v6561_v3  ;;  %v3308_v3 = vld [vmem:[%s13921_s1 + $0x348] sm:$0xff]  ;;  %v6583_v54 = vpack.c.bf16 %v3306_v48, %v3302_v46  ;;  %v3525_v46 = vld [vmem:[%s13922_s3 + $0x30] sm:$0xff]  ;;  %v3558_v47 = vld [vmem:[%s13922_s3 + $0x138] sm:$0xff] }
 0x66b   :  { %6564 = vmatprep.subr.bf16.mxu1 %v6563_v4  ;;  %v3312_v4 = vld [vmem:[%s13921_s1 + $0x368] sm:$0xff] }
 0x66c   :  { %6502 = vmatpush1.bf16.msra.mxu0 %v6501_v55  ;;  %v3301_v55 = vld [vmem:[%s13921_s1 + $0x310] sm:$0xff]  ;;  %v6523_v61 = vpack.c.bf16 %v3312_v4, %v3308_v3  ;;  %v3531_v4 = vld [vmem:[%s13922_s3 + $0x60] sm:$0xff] }
 0x66d   :  { %6504 = vmatprep.subr.bf16.mxu0 %v6503_v59  ;;  %v3310_v59 = vld [vmem:[%s13921_s1 + $0x358] sm:$0xff]  ;;  %v6585_v1 = vpack.c.bf16 %v3305_v56, %v3301_v55  ;;  %v6605_v55 = vpack.c.bf16 %v3531_v4, %v3527_v52  ;;  %v3568_v52 = vld [vmem:[%s13922_s3 + $0x188] sm:$0xff] }
 0x66e   :  { %6566 = vmatpush1.bf16.msra.mxu1 %v6565_v63  ;;  %v3316_v63 = vld [vmem:[%s13921_s1 + $0x388] sm:$0xff]  ;;  %v6587_v2 = vpack.c.bf16 %v3314_v60, %v3310_v59  ;;  %v3533_v59 = vld [vmem:[%s13922_s3 + $0x70] sm:$0xff] }
 0x66f   :  { %6568 = vmatprep.subr.bf16.mxu1 %v6567_v0  ;;  %v3320_v0 = vld [vmem:[%s13921_s1 + $0x3a8] sm:$0xff] }
 0x670   :  { %6506 = vmatpush1.bf16.msra.mxu0 %v6505_v5  ;;  %v3309_v5 = vld [vmem:[%s13921_s1 + $0x350] sm:$0xff]  ;;  %v6527_v9 = vpack.c.bf16 %v3320_v0, %v3316_v63  ;;  %v3536_v60 = vld [vmem:[%s13922_s3 + $0x88] sm:$0xff]  ;;  %v3539_v63 = vld [vmem:[%s13922_s3 + $0xa0] sm:$0xff] }
 0x671   :  { %6508 = vmatprep.subr.bf16.mxu0 %v6507_v8  ;;  %v3318_v8 = vld [vmem:[%s13921_s1 + $0x398] sm:$0xff]  ;;  %v6589_v17 = vpack.c.bf16 %v3313_v6, %v3309_v5  ;;  %v6607_v0 = vpack.c.bf16 %v3540_v62, %v3536_v60  ;;  %v3537_v6 = vld [vmem:[%s13922_s3 + $0x90] sm:$0xff] }
 0x672   :  { %6570 = vmatpush1.bf16.msra.mxu1 %v6569_v12  ;;  %v3324_v12 = vld [vmem:[%s13921_s1 + $0x3c8] sm:$0xff]  ;;  %v6591_v20 = vpack.c.bf16 %v3322_v27, %v3318_v8  ;;  %v3542_v5 = vld [vmem:[%s13922_s3 + $0xb8] sm:$0xff]  ;;  %v3541_v8 = vld [vmem:[%s13922_s3 + $0xb0] sm:$0xff] }
 0x673   :  { %6572 = vmatprep.subr.bf16.mxu1 %v6571_v14  ;;  %v3328_v14 = vld [vmem:[%s13921_s1 + $0x3e8] sm:$0xff]  ;;  %v6673_v10 = vpack.c.bf16 %v3541_v8, %v3537_v6  ;;  %v3573_v60 = vld [vmem:[%s13922_s3 + $0x1b0] sm:$0xff] }
 0x674   :  { %6510 = vmatpush1.bf16.msra.mxu0 %v6509_v21  ;;  %v3317_v21 = vld [vmem:[%s13921_s1 + $0x390] sm:$0xff]  ;;  %v6531_v24 = vpack.c.bf16 %v3328_v14, %v3324_v12  ;;  %v3544_v27 = vld [vmem:[%s13922_s3 + $0xc8] sm:$0xff]  ;;  %v3543_v12 = vld [vmem:[%s13922_s3 + $0xc0] sm:$0xff] }
 0x675   :  { %6512 = vmatprep.subr.bf16.mxu0 %v6511_v38  ;;  %v3326_v38 = vld [vmem:[%s13921_s1 + $0x3d8] sm:$0xff]  ;;  %v3547_v14 = vld [vmem:[%s13922_s3 + $0xe0] sm:$0xff]  ;;  %v3577_v8 = vld [vmem:[%s13922_s3 + $0x1d0] sm:$0xff] }
 0x676   :  { %6574 = vmatpush1.bf16.msra.mxu1 %v6573_v29  ;;  %v6593_v29 = vpack.c.bf16 %v3321_v44, %v3317_v21  ;;  %v3545_v21 = vld [vmem:[%s13922_s3 + $0xd0] sm:$0xff] }
 0x677   :  { %6576 = vmatprep.subr.bf16.mxu1 %v6575_v30  ;;  %v6595_v30 = vpack.c.bf16 %v3330_v23, %v3326_v38  ;;  %v3549_v44 = vld [vmem:[%s13922_s3 + $0xf0] sm:$0xff]  ;;  %v3552_v23 = vld [vmem:[%s13922_s3 + $0x108] sm:$0xff] }
 0x678   :  { %6514 = vmatpush1.bf16.msra.mxu0 %v6513_v32  ;;  %v6533_v32 = vpack.c.bf16 %v3327_v28, %v3323_v25  ;;  %v3551_v25 = vld [vmem:[%s13922_s3 + $0x100] sm:$0xff]  ;;  %v6677_v28 = vpack.c.bf16 %v3549_v44, %v3545_v21  ;;  %v3586_v21 = vld [vmem:[%s13922_s3 + $0x218] sm:$0xff] }
 0x679   :  { %6516 = vmatprep.subr.bf16.mxu0 %v6515_v35  ;;  %v3520_v35 = vld [vmem:[%s13922_s3 + $0x8] sm:$0xff] }
 0x67a   :  { %6578 = vmatpush1.bf16.msra.mxu1 %v6577_v41  ;;  %v6599_v39 = vpack.c.bf16 %v3524_v36, %v3520_v35  ;;  %v3522_v41 = vld [vmem:[%s13922_s3 + $0x18] sm:$0xff]  ;;  %v3557_v35 = vld [vmem:[%s13922_s3 + $0x130] sm:$0xff] }
 0x67b   :  { %6580 = vmatprep.subr.bf16.mxu1 %v6579_v42  ;;  %v3526_v42 = vld [vmem:[%s13922_s3 + $0x38] sm:$0xff] }
 0x67c   :  { %6518 = vmatpush1.bf16.msra.mxu0 %v6517_v45  ;;  %v6663_v43 = vpack.c.bf16 %v3526_v42, %v3522_v41  ;;  %v3521_v45 = vld [vmem:[%s13922_s3 + $0x10] sm:$0xff]  ;;  %v3559_v41 = vld [vmem:[%s13922_s3 + $0x140] sm:$0xff] }
 0x67d   :  { %6520 = vmatprep.subr.bf16.mxu0 %v6519_v50  ;;  %v6665_v48 = vpack.c.bf16 %v3525_v46, %v3521_v45  ;;  %v3528_v50 = vld [vmem:[%s13922_s3 + $0x48] sm:$0xff]  ;;  %v3563_v42 = vld [vmem:[%s13922_s3 + $0x160] sm:$0xff]  ;;  %v3566_v45 = vld [vmem:[%s13922_s3 + $0x178] sm:$0xff] }
 0x67e   :  { %6582 = vmatpush1.bf16.msra.mxu1 %v6581_v53  ;;  %v6603_v3 = vpack.c.bf16 %v3532_v51, %v3528_v50  ;;  %v3530_v53 = vld [vmem:[%s13922_s3 + $0x58] sm:$0xff]  ;;  %v3561_v46 = vld [vmem:[%s13922_s3 + $0x150] sm:$0xff] }
 0x67f   :  { %6584 = vmatprep.subr.bf16.mxu1 %v6583_v54  ;;  %v3534_v54 = vld [vmem:[%s13922_s3 + $0x78] sm:$0xff] }
 0x680   :  { %6522 = vmatpush1.bf16.msra.mxu0 %v6521_v57  ;;  %v6667_v56 = vpack.c.bf16 %v3534_v54, %v3530_v53  ;;  %v3529_v57 = vld [vmem:[%s13922_s3 + $0x50] sm:$0xff]  ;;  %v3567_v53 = vld [vmem:[%s13922_s3 + $0x180] sm:$0xff] }
 0x681   :  { %6524 = vmatprep.subr.bf16.mxu0 %v6523_v61  ;;  %v6669_v61 = vpack.c.bf16 %v3533_v59, %v3529_v57  ;;  %v3571_v54 = vld [vmem:[%s13922_s3 + $0x1a0] sm:$0xff]  ;;  %v3574_v57 = vld [vmem:[%s13922_s3 + $0x1b8] sm:$0xff]  ;;  %v3569_v59 = vld [vmem:[%s13922_s3 + $0x190] sm:$0xff] }
 0x682   :  { %6586 = vmatpush1.bf16.msra.mxu1 %v6585_v1  ;;  %v6609_v1 = vpack.c.bf16 %v3539_v63, %v3535_v16  ;;  %v6689_v62 = vpack.c.bf16 %v3573_v60, %v3569_v59  ;;  %v3576_v16 = vld [vmem:[%s13922_s3 + $0x1c8] sm:$0xff]  ;;  %v3614_v60 = vld [vmem:[%s13922_s3 + $0x2f8] sm:$0xff] }
 0x683   :  { %6588 = vmatprep.subr.bf16.mxu1 %v6587_v2  ;;  %v3538_v2 = vld [vmem:[%s13922_s3 + $0x98] sm:$0xff]  ;;  %v3580_v63 = vld [vmem:[%s13922_s3 + $0x1e8] sm:$0xff] }
 0x684   :  { %6526 = vmatpush1.bf16.msra.mxu0 %v6525_v7  ;;  %v6671_v7 = vpack.c.bf16 %v3542_v5, %v3538_v2  ;;  %v3579_v2 = vld [vmem:[%s13922_s3 + $0x1e0] sm:$0xff]  ;;  %v3578_v5 = vld [vmem:[%s13922_s3 + $0x1d8] sm:$0xff] }
 0x685   :  { %6528 = vmatprep.subr.bf16.mxu0 %v6527_v9  ;;  %v3548_v9 = vld [vmem:[%s13922_s3 + $0xe8] sm:$0xff] }
 0x686   :  { %6590 = vmatpush1.bf16.msra.mxu1 %v6589_v17  ;;  %v6611_v11 = vpack.c.bf16 %v3548_v9, %v3544_v27  ;;  %v3546_v17 = vld [vmem:[%s13922_s3 + $0xd8] sm:$0xff]  ;;  %v3581_v27 = vld [vmem:[%s13922_s3 + $0x1f0] sm:$0xff] }
 0x687   :  { %6592 = vmatprep.subr.bf16.mxu1 %v6591_v20  ;;  %v3550_v20 = vld [vmem:[%s13922_s3 + $0xf8] sm:$0xff] }
 0x688   :  { %6530 = vmatpush1.bf16.msra.mxu0 %v6529_v22  ;;  %v6613_v22 = vpack.c.bf16 %v3547_v14, %v3543_v12  ;;  %v6675_v38 = vpack.c.bf16 %v3550_v20, %v3546_v17  ;;  %v3588_v12 = vld [vmem:[%s13922_s3 + $0x228] sm:$0xff]  ;;  %v3583_v17 = vld [vmem:[%s13922_s3 + $0x200] sm:$0xff] }
 0x689   :  { %6532 = vmatprep.subr.bf16.mxu0 %v6531_v24  ;;  %v3556_v24 = vld [vmem:[%s13922_s3 + $0x128] sm:$0xff]  ;;  %v3587_v20 = vld [vmem:[%s13922_s3 + $0x220] sm:$0xff] }
 0x68a   :  { %6594 = vmatpush1.bf16.msra.mxu1 %v6593_v29  ;;  %v6615_v29 = vpack.c.bf16 %v3556_v24, %v3552_v23  ;;  %v6633_v44 = vpack.c.bf16 %v3587_v20, %v3583_v17  ;;  %v3589_v23 = vld [vmem:[%s13922_s3 + $0x230] sm:$0xff]  ;;  %v3628_v17 = vld [vmem:[%s13922_s3 + $0x368] sm:$0xff] }
 0x68b   :  { %6596 = vmatprep.subr.bf16.mxu1 %v6595_v30  ;;  %v3555_v30 = vld [vmem:[%s13922_s3 + $0x120] sm:$0xff] }
 0x68c   :  { %6534 = vmatpush1.bf16.msra.mxu0 %v6533_v32  ;;  %v6679_v32 = vpack.c.bf16 %v3558_v47, %v3554_v31  ;;  %v3591_v31 = vld [vmem:[%s13922_s3 + $0x240] sm:$0xff] }
 0x68d   :  { %6600 = vmatprep.subr.bf16.mxu0 %v6599_v39  ;;  %v3564_v39 = vld [vmem:[%s13922_s3 + $0x168] sm:$0xff]  ;;  %v3595_v47 = vld [vmem:[%s13922_s3 + $0x260] sm:$0xff] }
 0x68e   :  { %6598 = vmatpush1.bf16.msra.mxu1 %v6597_v33  ;;  %v6617_v33 = vpack.c.bf16 %v3555_v30, %v3551_v25  ;;  %v6619_v40 = vpack.c.bf16 %v3564_v39, %v3560_v37 }
 0x68f   :  { %3418 = vmatmul.mubr.f32.vlgmr.msra.gmra.mrb[20].mxu0 %v5165_v34  ;;  %6664 = vmatprep.subr.bf16.mxu1 %v6663_v43  ;;  %v6621_v43 = vpack.c.bf16 %v3563_v42, %v3559_v41  ;;  %v3604_v41 = vld [vmem:[%s13922_s3 + $0x2a8] sm:$0xff] }
 0x690   :  { %6602 = vmatpush1.bf16.msra.mxu0 %v6601_v58  ;;  %v3562_v58 = vld [vmem:[%s13922_s3 + $0x158] sm:$0xff] }
 0x691   :  { %3489 = vmatmul.mubr.f32.vlgmr.msra.gmra.mrb[20].mxu1 %v5165_v34  ;;  %6604 = vmatprep.subr.bf16.mxu0 %v6603_v3  ;;  %v3553_v34 = vld [vmem:[%s13922_s3 + $0x110] sm:$0xff]  ;;  %v6683_v50 = vpack.c.bf16 %v3566_v45, %v3562_v58  ;;  %v3572_v3 = vld [vmem:[%s13922_s3 + $0x1a8] sm:$0xff]  ;;  %v3599_v58 = vld [vmem:[%s13922_s3 + $0x280] sm:$0xff] }
 0x692   :  { %6666 = vmatpush1.bf16.msra.mxu1 %v6665_v48  ;;  %v6681_v36 = vpack.c.bf16 %v3557_v35, %v3553_v34  ;;  %v3565_v48 = vld [vmem:[%s13922_s3 + $0x170] sm:$0xff]  ;;  %v6623_v4 = vpack.c.bf16 %v3572_v3, %v3568_v52  ;;  %v3598_v34 = vld [vmem:[%s13922_s3 + $0x278] sm:$0xff] }
 0x693   :  { %6668 = vmatprep.subr.bf16.mxu1 %v6667_v56  ;;  %v6685_v51 = vpack.c.bf16 %v3565_v48, %v3561_v46  ;;  %v6625_v56 = vpack.c.bf16 %v3571_v54, %v3567_v53  ;;  %v3593_v35 = vld [vmem:[%s13922_s3 + $0x250] sm:$0xff]  ;;  %v3602_v45 = vld [vmem:[%s13922_s3 + $0x298] sm:$0xff]  ;;  %v3612_v53 = vld [vmem:[%s13922_s3 + $0x2e8] sm:$0xff] }
 0x694   :  { %6606 = vmatpush1.bf16.msra.mxu0 %v6605_v55  ;;  %v3570_v55 = vld [vmem:[%s13922_s3 + $0x198] sm:$0xff] }
 0x695   :  { %6608 = vmatprep.subr.bf16.mxu0 %v6607_v0  ;;  %v6627_v0 = vpack.c.bf16 %v3580_v63, %v3576_v16  ;;  %v3606_v48 = vld [vmem:[%s13922_s3 + $0x2b8] sm:$0xff] }
 0x696   :  { %6670 = vmatpush1.bf16.msra.mxu1 %v6669_v61  ;;  %v6687_v61 = vpack.c.bf16 %v3574_v57, %v3570_v55  ;;  %v6703_v52 = vpack.c.bf16 %v3606_v48, %v3602_v45  ;;  %v3607_v55 = vld [vmem:[%s13922_s3 + $0x2c0] sm:$0xff]  ;;  %v3610_v57 = vld [vmem:[%s13922_s3 + $0x2d8] sm:$0xff] }
 0x697   :  { %6672 = vmatprep.subr.bf16.mxu1 %v6671_v7  ;;  %v3582_v7 = vld [vmem:[%s13922_s3 + $0x1f8] sm:$0xff]  ;;  %v6707_v16 = vpack.c.bf16 %v3614_v60, %v3610_v57  ;;  %v3643_v45 = vld [vmem:[%s13922_s3 + $0x3e0] sm:$0xff] }
 0x698   :  { %6610 = vmatpush1.bf16.msra.mxu0 %v6609_v1  ;;  %v3575_v1 = vld [vmem:[%s13922_s3 + $0x1c0] sm:$0xff]  ;;  %v6691_v9 = vpack.c.bf16 %v3582_v7, %v3578_v5  ;;  %v3618_v7 = vld [vmem:[%s13922_s3 + $0x318] sm:$0xff] }
 0x699   :  { %6612 = vmatprep.subr.bf16.mxu0 %v6611_v11  ;;  %v6629_v6 = vpack.c.bf16 %v3579_v2, %v3575_v1  ;;  %v3584_v11 = vld [vmem:[%s13922_s3 + $0x208] sm:$0xff]  ;;  %v3615_v5 = vld [vmem:[%s13922_s3 + $0x300] sm:$0xff]  ;;  %v3642_v48 = vld [vmem:[%s13922_s3 + $0x3d8] sm:$0xff] }
 0x69a   :  { %6674 = vmatpush1.bf16.msra.mxu1 %v6673_v10  ;;  %v6693_v10 = vpack.c.bf16 %v3581_v27, %v3577_v8  ;;  %v6631_v14 = vpack.c.bf16 %v3588_v12, %v3584_v11  ;;  %v3620_v1 = vld [vmem:[%s13922_s3 + $0x328] sm:$0xff]  ;;  %v3622_v27 = vld [vmem:[%s13922_s3 + $0x338] sm:$0xff]  ;;  %v3011_v57 = vld [vmem:[%s13925_s4] sm:$0xf] }
 0x69b   :  { %6676 = vmatprep.subr.bf16.mxu1 %v6675_v38  ;;  %v3585_v38 = vld [vmem:[%s13922_s3 + $0x210] sm:$0xff]  ;;  %v6711_v11 = vpack.c.bf16 %v3622_v27, %v3618_v7  ;;  %v3846_v60 = vld [vmem:[%s13921_s1 + $0x38] sm:$0xff]  ;;  %v3028_v27 = vrot.slane %v3011_v57, %v8333_v18 }
 0x69c   :  { %6614 = vmatpush1.bf16.msra.mxu0 %v6613_v22  ;;  %v3590_v22 = vld [vmem:[%s13922_s3 + $0x238] sm:$0xff]  ;;  %v6697_v25 = vpack.c.bf16 %v3589_v23, %v3585_v38 }
 0x69d   :  { %6616 = vmatprep.subr.bf16.mxu0 %v6615_v29  ;;  %v6695_v24 = vpack.c.bf16 %v3590_v22, %v3586_v21  ;;  %v3596_v29 = vld [vmem:[%s13922_s3 + $0x268] sm:$0xff]  ;;  %v3623_v21 = vld [vmem:[%s13922_s3 + $0x340] sm:$0xff]  ;;  %v3626_v22 = vld [vmem:[%s13922_s3 + $0x358] sm:$0xff] }
 0x69e   :  { %6678 = vmatpush1.bf16.msra.mxu1 %v6677_v28  ;;  %v3592_v28 = vld [vmem:[%s13922_s3 + $0x248] sm:$0xff]  ;;  %v3630_v23 = vld [vmem:[%s13922_s3 + $0x378] sm:$0xff] }
 0x69f   :  { %6680 = vmatprep.subr.bf16.mxu1 %v6679_v32  ;;  %v6635_v30 = vpack.c.bf16 %v3596_v29, %v3592_v28  ;;  %v3594_v32 = vld [vmem:[%s13922_s3 + $0x258] sm:$0xff]  ;;  %v6715_v28 = vpack.c.bf16 %v3630_v23, %v3626_v22 }
 0x6a0   :  { %6618 = vmatpush1.bf16.msra.mxu0 %v6617_v33  ;;  %v6637_v33 = vpack.c.bf16 %v3595_v47, %v3591_v31  ;;  %v6699_v37 = vpack.c.bf16 %v3598_v34, %v3594_v32  ;;  %v3636_v31 = vld [vmem:[%s13922_s3 + $0x3a8] sm:$0xff]  ;;  %v3631_v47 = vld [vmem:[%s13922_s3 + $0x380] sm:$0xff]  ;;  %v3634_v34 = vld [vmem:[%s13922_s3 + $0x398] sm:$0xff] }
 0x6a1   :  { %6620 = vmatprep.subr.bf16.mxu0 %v6619_v40  ;;  %v3600_v40 = vld [vmem:[%s13922_s3 + $0x288] sm:$0xff] }
 0x6a2   :  { %6682 = vmatpush1.bf16.msra.mxu1 %v6681_v36  ;;  %v3597_v36 = vld [vmem:[%s13922_s3 + $0x270] sm:$0xff]  ;;  %v6639_v42 = vpack.c.bf16 %v3604_v41, %v3600_v40  ;;  %v3640_v41 = vld [vmem:[%s13922_s3 + $0x3c8] sm:$0xff] }
 0x6a3   :  { %6684 = vmatprep.subr.bf16.mxu1 %v6683_v50  ;;  %v6701_v39 = vpack.c.bf16 %v3597_v36, %v3593_v35  ;;  %v3601_v50 = vld [vmem:[%s13922_s3 + $0x290] sm:$0xff]  ;;  %v3638_v35 = vld [vmem:[%s13922_s3 + $0x3b8] sm:$0xff] }
 0x6a4   :  { %6622 = vmatpush1.bf16.msra.mxu0 %v6621_v43  ;;  %v3603_v43 = vld [vmem:[%s13922_s3 + $0x2a0] sm:$0xff]  ;;  %v3637_v40 = vld [vmem:[%s13922_s3 + $0x3b0] sm:$0xff] }
 0x6a5   :  { %6624 = vmatprep.subr.bf16.mxu0 %v6623_v4  ;;  %v6641_v46 = vpack.c.bf16 %v3603_v43, %v3599_v58  ;;  %v3608_v4 = vld [vmem:[%s13922_s3 + $0x2c8] sm:$0xff]  ;;  %v3639_v43 = vld [vmem:[%s13922_s3 + $0x3c0] sm:$0xff] }
 0x6a6   :  { %6686 = vmatpush1.bf16.msra.mxu1 %v6685_v51  ;;  %v3605_v51 = vld [vmem:[%s13922_s3 + $0x2b0] sm:$0xff]  ;;  %v6643_v54 = vpack.c.bf16 %v3612_v53, %v3608_v4  ;;  %v3644_v58 = vld [vmem:[%s13922_s3 + $0x3e8] sm:$0xff] }
 0x6a7   :  { %6688 = vmatprep.subr.bf16.mxu1 %v6687_v61  ;;  %v6705_v3 = vpack.c.bf16 %v3605_v51, %v3601_v50  ;;  %v3609_v61 = vld [vmem:[%s13922_s3 + $0x2d0] sm:$0xff]  ;;  %v3646_v50 = vld [vmem:[%s13922_s3 + $0x3f8] sm:$0xff]  ;;  %v3840_v53 = vld [vmem:[%s13921_s1 + $0x8] sm:$0xff] }
 0x6a8   :  { %6626 = vmatpush1.bf16.msra.mxu0 %v6625_v56  ;;  %v3611_v56 = vld [vmem:[%s13922_s3 + $0x2e0] sm:$0xff]  ;;  %v3641_v51 = vld [vmem:[%s13922_s3 + $0x3d0] sm:$0xff] }
 0x6a9   :  { %6628 = vmatprep.subr.bf16.mxu0 %v6627_v0  ;;  %v6645_v59 = vpack.c.bf16 %v3611_v56, %v3607_v55  ;;  %v3616_v0 = vld [vmem:[%s13922_s3 + $0x308] sm:$0xff]  ;;  %v3645_v4 = vld [vmem:[%s13922_s3 + $0x3f0] sm:$0xff] }
 0x6aa   :  { %6690 = vmatpush1.bf16.msra.mxu1 %v6689_v62  ;;  %v3613_v62 = vld [vmem:[%s13922_s3 + $0x2f0] sm:$0xff]  ;;  %v6647_v2 = vpack.c.bf16 %v3620_v1, %v3616_v0  ;;  %v6725_v56 = vpack.c.bf16 %v3645_v4, %v3641_v51 }
 0x6ab   :  { %6692 = vmatprep.subr.bf16.mxu1 %v6691_v9  ;;  %v6709_v63 = vpack.c.bf16 %v3613_v62, %v3609_v61  ;;  %v3617_v9 = vld [vmem:[%s13922_s3 + $0x310] sm:$0xff]  ;;  %v3016_v62 = vrot.slane %v3011_v57, %v8324_v13 }
 0x6ac   :  { %6630 = vmatpush1.bf16.msra.mxu0 %v6629_v6  ;;  %v3619_v6 = vld [vmem:[%s13922_s3 + $0x320] sm:$0xff] }
 0x6ad   :  { %6632 = vmatprep.subr.bf16.mxu0 %v6631_v14  ;;  %v6649_v8 = vpack.c.bf16 %v3619_v6, %v3615_v5  ;;  %v3624_v14 = vld [vmem:[%s13922_s3 + $0x348] sm:$0xff] }
 0x6ae   :  { %6694 = vmatpush1.bf16.msra.mxu1 %v6693_v10  ;;  %v3621_v10 = vld [vmem:[%s13922_s3 + $0x330] sm:$0xff]  ;;  %v6651_v20 = vpack.c.bf16 %v3628_v17, %v3624_v14 }
 0x6af   :  { %6696 = vmatprep.subr.bf16.mxu1 %v6695_v24  ;;  %v6713_v12 = vpack.c.bf16 %v3621_v10, %v3617_v9  ;;  %v3625_v24 = vld [vmem:[%s13922_s3 + $0x350] sm:$0xff]  ;;  %v3024_v10 = vrot.slane %v3011_v57, %v8336_v26 }
 0x6b0   :  { %6634 = vmatpush1.bf16.msra.mxu0 %v6633_v44  ;;  %v3627_v44 = vld [vmem:[%s13922_s3 + $0x360] sm:$0xff] }
 0x6b1   :  { %6636 = vmatprep.subr.bf16.mxu0 %v6635_v30  ;;  %v6653_v38 = vpack.c.bf16 %v3627_v44, %v3623_v21  ;;  %v3632_v30 = vld [vmem:[%s13922_s3 + $0x388] sm:$0xff] }
 0x6b2   :  { %6698 = vmatpush1.bf16.msra.mxu1 %v6697_v25  ;;  %v3629_v25 = vld [vmem:[%s13922_s3 + $0x370] sm:$0xff]  ;;  %v6655_v32 = vpack.c.bf16 %v3636_v31, %v3632_v30 }
 0x6b3   :  { %6700 = vmatprep.subr.bf16.mxu1 %v6699_v37  ;;  %v6717_v29 = vpack.c.bf16 %v3629_v25, %v3625_v24  ;;  %v6719_v37 = vpack.c.bf16 %v3638_v35, %v3634_v34 }
 0x6b4   :  { %6638 = vmatpush1.bf16.msra.mxu0 %v6637_v33  ;;  %v3635_v33 = vld [vmem:[%s13922_s3 + $0x3a0] sm:$0xff] }
 0x6b5   :  { %6640 = vmatprep.subr.bf16.mxu0 %v6639_v42  ;;  %v6657_v36 = vpack.c.bf16 %v3635_v33, %v3631_v47 }
 0x6b6   :  { %6702 = vmatpush1.bf16.msra.mxu1 %v6701_v39  ;;  %v3633_v39 = vld [vmem:[%s13922_s3 + $0x390] sm:$0xff] }
 0x6b7   :  { %6704 = vmatprep.subr.bf16.mxu1 %v6703_v52  ;;  %v6721_v42 = vpack.c.bf16 %v3637_v40, %v3633_v39  ;;  %v6661_v52 = vpack.c.bf16 %v3643_v45, %v3639_v43 }
 0x6b8   :  { %6642 = vmatpush1.bf16.msra.mxu0 %v6641_v46  ;;  %v6659_v46 = vpack.c.bf16 %v3644_v58, %v3640_v41 }
 0x6b9   :  { %6644 = vmatprep.subr.bf16.mxu0 %v6643_v54  ;;  %v3844_v54 = vld [vmem:[%s13921_s1 + $0x28] sm:$0xff] }
 0x6ba   :  { %6706 = vmatpush1.bf16.msra.mxu1 %v6705_v3  ;;  %v6723_v3 = vpack.c.bf16 %v3646_v50, %v3642_v48  ;;  %v6727_v55 = vpack.c.bf16 %v3844_v54, %v3840_v53 }
 0x6bb   :  { %6708 = vmatprep.subr.bf16.mxu1 %v6707_v16  ;;  %v3020_v16 = vrot.slane %v3011_v57, %v8329_v15 }
 0x6bc   :  { %6646 = vmatpush1.bf16.msra.mxu0 %v6645_v59  ;;  %v3842_v59 = vld [vmem:[%s13921_s1 + $0x18] sm:$0xff] }
 0x6bd   :  { %6648 = vmatprep.subr.bf16.mxu0 %v6647_v2  ;;  %v6791_v61 = vpack.c.bf16 %v3846_v60, %v3842_v59 }
 0x6be   :  { %6710 = vmatpush1.bf16.msra.mxu1 %v6709_v63 }
 0x6bf   :  { %6712 = vmatprep.subr.bf16.mxu1 %v6711_v11 }
 0x6c0   :  { %6650 = vmatpush1.bf16.msra.mxu0 %v6649_v8 }
 0x6c1   :  { %6652 = vmatprep.subr.bf16.mxu0 %v6651_v20 }
 0x6c2   :  { %6714 = vmatpush1.bf16.msra.mxu1 %v6713_v12 }
 0x6c3   :  { %6716 = vmatprep.subr.bf16.mxu1 %v6715_v28 }
 0x6c4   :  { %6654 = vmatpush1.bf16.msra.mxu0 %v6653_v38 }
 0x6c5   :  { %6656 = vmatprep.subr.bf16.mxu0 %v6655_v32  ;;  %v3331_v32 = vld [vmem:[%s13924_s2] sm:$0xf] }
 0x6c6   :  { %6718 = vmatpush1.bf16.msra.mxu1 %v6717_v29  ;;  %v3340_v33 = vrot.slane %v3331_v32, %v8329_v15  ;;  %v3348_v41 = vrot.slane %v3331_v32, %v8333_v18  ;;  %v3344_v45 = vrot.slane %v3331_v32, %v8336_v26 }
 0x6c7   :  { %6720 = vmatprep.subr.bf16.mxu1 %v6719_v37 }
 0x6c8   :  { %6658 = vmatpush1.bf16.msra.mxu0 %v6657_v36 }
 0x6c9   :  { %6660 = vmatprep.subr.bf16.mxu0 %v6659_v46 }
 0x6ca   :  { %6722 = vmatpush1.bf16.msra.mxu1 %v6721_v42 }
 0x6cb   :  { %6724 = vmatprep.subr.bf16.mxu1 %v6723_v3 }
 0x6cc   :  { %6662 = vmatpush1.bf16.msra.mxu0 %v6661_v52 }
 0x6cd   :  { %6728 = vmatprep.subr.bf16.mxu0 %v6727_v55 }
 0x6ce   :  { %6726 = vmatpush1.bf16.msra.mxu1 %v6725_v56 }
 0x6cf   :  { %6792 = vmatprep.subr.bf16.mxu1 %v6791_v61  ;;  %v3839_v61 = vld [vmem:[%s13921_s1] sm:$0xff] }
 0x722   :  { %v3099_v63 = vpop.f32.mrb[18].mxu0  ;;  %v3170_v0 = vpop.f32.mrb[18].mxu1 }
 0x723   :  { %v3100_v1 = vadd.f32 %v3099_v63, %v3016_v62  ;;  %v3101_v2 = vpop.f32.mrb[19].mxu0  ;;  %v3172_v5 = vpop.f32.mrb[19].mxu1  ;;  %v3171_v12 = vadd.f32 %v3170_v0, %v3024_v10  ;;  %v3843_v62 = vld [vmem:[%s13921_s1 + $0x20] sm:$0xff]  ;;  %v3848_v63 = vld [vmem:[%s13921_s1 + $0x48] sm:$0xff]  ;;  %v3841_v0 = vld [vmem:[%s13921_s1 + $0x10] sm:$0xff] }
 0x724   :  { %v3102_v6 = vadd.f32 %v3101_v2, %v3020_v16  ;;  %v3173_v9 = vadd.f32 %v3172_v5, %v3028_v27  ;;  %v6729_v5 = vpack.c.bf16 %v3843_v62, %v3839_v61  ;;  %v3851_v10 = vld [vmem:[%s13921_s1 + $0x60] sm:$0xff]  ;;  %v3882_v61 = vld [vmem:[%s13921_s1 + $0x158] sm:$0xff] }
 0x725   :  { %v5161_v7 = vmul.f32 -1.442695, %v3100_v1  ;;  %v3845_v1 = vld [vmem:[%s13921_s1 + $0x30] sm:$0xff]  ;;  %v3886_v62 = vld [vmem:[%s13921_s1 + $0x178] sm:$0xff] }
 0x726   :  { %v5162_v8 = vmul.f32 -1.442695, %v3102_v6  ;;  %v5163_v11 = vmul.f32 -1.442695, %v3173_v9  ;;  %v3850_v6 = vld [vmem:[%s13921_s1 + $0x58] sm:$0xff]  ;;  %v3847_v9 = vld [vmem:[%s13921_s1 + $0x40] sm:$0xff] }
 0x727   :  { %7384 = vpow2.f32 %v5161_v7  ;;  %v3854_v7 = vld [vmem:[%s13921_s1 + $0x78] sm:$0xff] }
 0x728   :  { %7386 = vpow2.f32 %v5162_v8 }
 0x729   :  { %7388 = vpow2.f32 %v5163_v11  ;;  %v3856_v11 = vld [vmem:[%s13921_s1 + $0x88] sm:$0xff] }
 0x72a   :  { %7390 = vtanh.f32 %v3171_v12  ;;  %v3860_v12 = vld [vmem:[%s13921_s1 + $0xa8] sm:$0xff] }
 0x731   :  { %v7385_v14 = vpop.eup %7384 }
 0x732   :  { %v7387_v17 = vpop.eup %7386  ;;  %v3178_v20 = vadd.f32 1.0, %v7385_v14  ;;  %v6793_v14 = vpack.c.bf16 %v3845_v1, %v3841_v0  ;;  %v3888_v0 = vld [vmem:[%s13921_s1 + $0x188] sm:$0xff] }
 0x733   :  { %v3184_v21 = vadd.f32 1.0, %v7387_v17  ;;  %v7389_v44 = vpop.eup %7388  ;;  %v6795_v17 = vpack.c.bf16 %v3854_v7, %v3850_v6  ;;  %v3892_v1 = vld [vmem:[%s13921_s1 + $0x1a8] sm:$0xff]  ;;  %v3881_v6 = vld [vmem:[%s13921_s1 + $0x150] sm:$0xff] }
 0x734   :  { %7392 = vrcp.f32 %v3178_v20  ;;  %v7391_v22 = vpop.eup %7390  ;;  %v3191_v25 = vadd.f32 1.0, %v7389_v44  ;;  %v3849_v20 = vld [vmem:[%s13921_s1 + $0x50] sm:$0xff]  ;;  %v6733_v44 = vpack.c.bf16 %v3851_v10, %v3847_v9  ;;  %v3894_v9 = vld [vmem:[%s13921_s1 + $0x1b8] sm:$0xff]  ;;  %v6751_v10 = vpack.c.bf16 %v3892_v1, %v3888_v0  ;;  %v3919_v0 = vld [vmem:[%s13921_s1 + $0x280] sm:$0xff] }
 0x735   :  { %7394 = vrcp.f32 %v3184_v21  ;;  %v3853_v21 = vld [vmem:[%s13921_s1 + $0x70] sm:$0xff]  ;;  %v3923_v1 = vld [vmem:[%s13921_s1 + $0x2a0] sm:$0xff] }
 0x736   :  { %7396 = vrcp.f32 %v3191_v25  ;;  %v3859_v25 = vld [vmem:[%s13921_s1 + $0xa0] sm:$0xff]  ;;  %v3885_v7 = vld [vmem:[%s13921_s1 + $0x170] sm:$0xff] }
 0x73e   :  { %v7393_v38 = vpop.eup %7392 }
 0x73f   :  { %v7395_v23 = vpop.eup %7394  ;;  %v3195_v24 = vmul.f32 %v7393_v38, %v7391_v22  ;;  %v3858_v22 = vld [vmem:[%s13921_s1 + $0x98] sm:$0xff] }
 0x740   :  { %v3194_v28 = vmul.f32 %v7395_v23, %v11508_v49  ;;  %v7397_v30 = vpop.eup %7396  ;;  %v3336_v49 = vrot.slane %v3331_v32, %v8324_v13  ;;  %v3862_v38 = vld [vmem:[%s13921_s1 + $0xb8] sm:$0xff]  ;;  %v6735_v23 = vpack.c.bf16 %v3860_v12, %v3856_v11  ;;  %v3857_v32 = vld [vmem:[%s13921_s1 + $0x90] sm:$0xff]  ;;  %v3887_v11 = vld [vmem:[%s13921_s1 + $0x180] sm:$0xff] }
 0x741   :  { %v3891_v12 = vld [vmem:[%s13921_s1 + $0x1a0] sm:$0xff] }
 0x742   :  { %v12304_v29 = vadd.f32 %v3195_v24, %v3194_v28  ;;  %v3855_v24 = vld [vmem:[%s13921_s1 + $0x80] sm:$0xff]  ;;  %v3864_v28 = vld [vmem:[%s13921_s1 + $0xc8] sm:$0xff] }
 0x744   :  { %7398 = vtanh.f32 %v12304_v29 }
 0x74e   :  { %v7399_v31 = vpop.eup %7398 }
 0x74f   :  { %v3198_v47 = vmul.f32 %v7399_v31, %v7397_v30  ;;  %v3868_v30 = vld [vmem:[%s13921_s1 + $0xe8] sm:$0xff]  ;;  %v6797_v31 = vpack.c.bf16 %v3853_v21, %v3849_v20  ;;  %v6813_v20 = vpack.c.bf16 %v3885_v7, %v3881_v6 }
 0x751   :  { %5164 = vst [vmem:[%s13926_s5 + $0x20] sm:$0xff] %v3198_v47  ;;  %3733 = vmatprep.mubr.f32.mxu0 %v3198_v47  ;;  %3804 = vmatprep.mubr.f32.mxu1 %v3198_v47  ;;  %v6799_v47 = vpack.c.bf16 %v3862_v38, %v3858_v22  ;;  %v3893_v22 = vld [vmem:[%s13921_s1 + $0x1b0] sm:$0xff]  ;;  %v6753_v38 = vpack.c.bf16 %v3891_v12, %v3887_v11  ;;  %v3934_v11 = vld [vmem:[%s13921_s1 + $0x2f8] sm:$0xff] }
 0x762   :  { %v3419_v34 = vpop.f32.mrb[20].mxu0 }
 0x763   :  { %v3420_v35 = vadd.f32 %v3419_v34, %v3336_v49  ;;  %v3421_v36 = vpop.f32.mrb[21].mxu0  ;;  %v3861_v49 = vld [vmem:[%s13921_s1 + $0xb0] sm:$0xff]  ;;  %v3866_v34 = vld [vmem:[%s13921_s1 + $0xd8] sm:$0xff] }
 0x764   :  { %v3422_v37 = vadd.f32 %v3421_v36, %v3340_v33  ;;  %v3490_v39 = vpop.f32.mrb[20].mxu1  ;;  %v6737_v33 = vpack.c.bf16 %v3859_v25, %v3855_v24  ;;  %v6739_v36 = vpack.c.bf16 %v3868_v30, %v3864_v28  ;;  %v3902_v24 = vld [vmem:[%s13921_s1 + $0x1f8] sm:$0xff]  ;;  %v3895_v28 = vld [vmem:[%s13921_s1 + $0x1c0] sm:$0xff] }
 0x765   :  { %v5166_v40 = vmul.f32 -1.442695, %v3420_v35  ;;  %v3492_v42 = vpop.f32.mrb[21].mxu1  ;;  %v3491_v48 = vadd.f32 %v3490_v39, %v3344_v45  ;;  %v3870_v35 = vld [vmem:[%s13921_s1 + $0xf8] sm:$0xff]  ;;  %v3867_v39 = vld [vmem:[%s13921_s1 + $0xe0] sm:$0xff]  ;;  %v3869_v45 = vld [vmem:[%s13921_s1 + $0xf0] sm:$0xff] }
 0x766   :  { %v5167_v58 = vmul.f32 -1.442695, %v3422_v37  ;;  %v3493_v43 = vadd.f32 %v3492_v42, %v3348_v41  ;;  %v3863_v37 = vld [vmem:[%s13921_s1 + $0xc0] sm:$0xff]  ;;  %v3876_v41 = vld [vmem:[%s13921_s1 + $0x128] sm:$0xff]  ;;  %v6801_v42 = vpack.c.bf16 %v3861_v49, %v3857_v32 }
 0x767   :  { %7400 = vpow2.f32 %v5166_v40  ;;  %v3872_v40 = vld [vmem:[%s13921_s1 + $0x108] sm:$0xff]  ;;  %v3899_v30 = vld [vmem:[%s13921_s1 + $0x1e0] sm:$0xff] }
 0x768   :  { %7402 = vpow2.f32 %v5167_v58  ;;  %v5168_v46 = vmul.f32 -1.442695, %v3493_v43  ;;  %v6803_v58 = vpack.c.bf16 %v3870_v35, %v3866_v34  ;;  %v3865_v43 = vld [vmem:[%s13921_s1 + $0xd0] sm:$0xff]  ;;  %v6757_v35 = vpack.c.bf16 %v3899_v30, %v3895_v28  ;;  %v3942_v28 = vld [vmem:[%s13921_s1 + $0x338] sm:$0xff] }
 0x769   :  { %v3901_v34 = vld [vmem:[%s13921_s1 + $0x1f0] sm:$0xff] }
 0x76a   :  { %7404 = vpow2.f32 %v5168_v46  ;;  %v6741_v46 = vpack.c.bf16 %v3867_v39, %v3863_v37  ;;  %v3910_v37 = vld [vmem:[%s13921_s1 + $0x238] sm:$0xff] }
 0x76b   :  { %7406 = vtanh.f32 %v3491_v48  ;;  %v3874_v48 = vld [vmem:[%s13921_s1 + $0x118] sm:$0xff] }
 0x771   :  { %v7401_v50 = vpop.eup %7400 }
 0x772   :  { %v7403_v51 = vpop.eup %7402  ;;  %v3498_v52 = vadd.f32 1.0, %v7401_v50  ;;  %v3878_v50 = vld [vmem:[%s13921_s1 + $0x138] sm:$0xff] }
 0x773   :  { %v3504_v3 = vadd.f32 1.0, %v7403_v51  ;;  %v6743_v51 = vpack.c.bf16 %v3876_v41, %v3872_v40  ;;  %v3903_v40 = vld [vmem:[%s13921_s1 + $0x200] sm:$0xff] }
 0x774   :  { %7408 = vrcp.f32 %v3498_v52  ;;  %v7405_v4 = vpop.eup %7404  ;;  %v3871_v52 = vld [vmem:[%s13921_s1 + $0x100] sm:$0xff] }
 0x775   :  { %7410 = vrcp.f32 %v3504_v3  ;;  %v7407_v53 = vpop.eup %7406  ;;  %v3511_v55 = vadd.f32 1.0, %v7405_v4  ;;  %v3875_v3 = vld [vmem:[%s13921_s1 + $0x120] sm:$0xff]  ;;  %v3880_v4 = vld [vmem:[%s13921_s1 + $0x148] sm:$0xff] }
 0x776   :  { %v3907_v41 = vld [vmem:[%s13921_s1 + $0x220] sm:$0xff] }
 0x777   :  { %7412 = vrcp.f32 %v3511_v55  ;;  %v6807_v55 = vpack.c.bf16 %v3878_v50, %v3874_v48  ;;  %v3909_v48 = vld [vmem:[%s13921_s1 + $0x230] sm:$0xff]  ;;  %v6761_v50 = vpack.c.bf16 %v3907_v41, %v3903_v40  ;;  %v3950_v40 = vld [vmem:[%s13921_s1 + $0x378] sm:$0xff] }
 0x77e   :  { %v7409_v54 = vpop.eup %7408 }
 0x77f   :  { %v7411_v56 = vpop.eup %7410  ;;  %v3515_v57 = vmul.f32 %v7409_v54, %v7407_v53  ;;  %v3884_v53 = vld [vmem:[%s13921_s1 + $0x168] sm:$0xff]  ;;  %v6805_v54 = vpack.c.bf16 %v3869_v45, %v3865_v43 }
 0x780   :  { %v3514_v59 = vmul.f32 %v7411_v56, %v11522_v19  ;;  %v3852_v19 = vld [vmem:[%s13921_s1 + $0x68] sm:$0xff]  ;;  %v3873_v56 = vld [vmem:[%s13921_s1 + $0x110] sm:$0xff] }
 0x781   :  { %v7413_v16 = vpop.eup %7412  ;;  %v6731_v27 = vpack.c.bf16 %v3852_v19, %v3848_v63  ;;  %v3879_v63 = vld [vmem:[%s13921_s1 + $0x140] sm:$0xff] }
 0x782   :  { %v12318_v60 = vadd.f32 %v3515_v57, %v3514_v59  ;;  %v3877_v57 = vld [vmem:[%s13921_s1 + $0x130] sm:$0xff]  ;;  %v6745_v59 = vpack.c.bf16 %v3875_v3, %v3871_v52  ;;  %v3883_v19 = vld [vmem:[%s13921_s1 + $0x160] sm:$0xff]  ;;  %v3918_v52 = vld [vmem:[%s13921_s1 + $0x278] sm:$0xff] }
 0x784   :  { %7414 = vtanh.f32 %v12318_v60 }
 0x78e   :  { %v7415_v2 = vpop.eup %7414 }
 0x78f   :  { %v3518_v8 = vmul.f32 %v7415_v2, %v7413_v16  ;;  %v6747_v16 = vpack.c.bf16 %v3884_v53, %v3880_v4  ;;  %v6809_v2 = vpack.c.bf16 %v3877_v57, %v3873_v56  ;;  %v3911_v4 = vld [vmem:[%s13921_s1 + $0x240] sm:$0xff] }
 0x790   :  { %v3915_v53 = vld [vmem:[%s13921_s1 + $0x260] sm:$0xff] }
 0x791   :  { %3734 = vmatmul.mubr.f32.vlgmr.msra.gmra.mrb[22].mxu0 %v3518_v8  ;;  %3805 = vmatmul.mubr.f32.vlgmr.msra.gmra.mrb[22].mxu1 %v3518_v8 }
 0x792   :  { %6730 = vmatpush1.bf16.msra.mxu0 %v6729_v5  ;;  %4053 = vmatprep.mubr.f32.mxu0 %v3518_v8  ;;  %v6811_v5 = vpack.c.bf16 %v3886_v62, %v3882_v61  ;;  %v3917_v61 = vld [vmem:[%s13921_s1 + $0x270] sm:$0xff]  ;;  %v6765_v62 = vpack.c.bf16 %v3915_v53, %v3911_v4  ;;  %v3958_v4 = vld [vmem:[%s13921_s1 + $0x3b8] sm:$0xff] }
 0x793   :  { %4124 = vmatprep.mubr.f32.mxu1 %v3518_v8  ;;  %6732 = vmatprep.subr.bf16.mxu0 %v6731_v27  ;;  %v6749_v8 = vpack.c.bf16 %v3883_v19, %v3879_v63  ;;  %v3890_v27 = vld [vmem:[%s13921_s1 + $0x198] sm:$0xff] }
 0x794   :  { %6794 = vmatpush1.bf16.msra.mxu1 %v6793_v14  ;;  %v3896_v14 = vld [vmem:[%s13921_s1 + $0x1c8] sm:$0xff]  ;;  %v6815_v21 = vpack.c.bf16 %v3894_v9, %v3890_v27  ;;  %v3926_v63 = vld [vmem:[%s13921_s1 + $0x2b8] sm:$0xff]  ;;  %v3925_v27 = vld [vmem:[%s13921_s1 + $0x2b0] sm:$0xff]  ;;  %v6769_v9 = vpack.c.bf16 %v3923_v1, %v3919_v0 }
 0x795   :  { %6796 = vmatprep.subr.bf16.mxu1 %v6795_v17  ;;  %v3900_v17 = vld [vmem:[%s13921_s1 + $0x1e8] sm:$0xff]  ;;  %v3966_v0 = vld [vmem:[%s13921_s1 + $0x3f8] sm:$0xff] }
 0x796   :  { %6734 = vmatpush1.bf16.msra.mxu0 %v6733_v44  ;;  %v3889_v44 = vld [vmem:[%s13921_s1 + $0x190] sm:$0xff]  ;;  %v6755_v25 = vpack.c.bf16 %v3900_v17, %v3896_v14  ;;  %v3927_v14 = vld [vmem:[%s13921_s1 + $0x2c0] sm:$0xff] }
 0x797   :  { %6736 = vmatprep.subr.bf16.mxu0 %v6735_v23  ;;  %v3898_v23 = vld [vmem:[%s13921_s1 + $0x1d8] sm:$0xff]  ;;  %v6817_v32 = vpack.c.bf16 %v3893_v22, %v3889_v44  ;;  %v3931_v17 = vld [vmem:[%s13921_s1 + $0x2e0] sm:$0xff] }
 0x798   :  { %6798 = vmatpush1.bf16.msra.mxu1 %v6797_v31  ;;  %v3904_v31 = vld [vmem:[%s13921_s1 + $0x208] sm:$0xff]  ;;  %v6819_v49 = vpack.c.bf16 %v3902_v24, %v3898_v23  ;;  %v3933_v23 = vld [vmem:[%s13921_s1 + $0x2f0] sm:$0xff]  ;;  %v6773_v24 = vpack.c.bf16 %v3931_v17, %v3927_v14  ;;  %v4155_v17 = vld [vmem:[%s13922_s3] sm:$0xff] }
 0x799   :  { %6800 = vmatprep.subr.bf16.mxu1 %v6799_v47  ;;  %v3908_v47 = vld [vmem:[%s13921_s1 + $0x228] sm:$0xff] }
 0x79a   :  { %6738 = vmatpush1.bf16.msra.mxu0 %v6737_v33  ;;  %v3897_v33 = vld [vmem:[%s13921_s1 + $0x1d0] sm:$0xff]  ;;  %v6759_v39 = vpack.c.bf16 %v3908_v47, %v3904_v31  ;;  %v3935_v31 = vld [vmem:[%s13921_s1 + $0x300] sm:$0xff]  ;;  %v4160_v14 = vld [vmem:[%s13922_s3 + $0x28] sm:$0xff] }
 0x79b   :  { %6740 = vmatprep.subr.bf16.mxu0 %v6739_v36  ;;  %v3906_v36 = vld [vmem:[%s13921_s1 + $0x218] sm:$0xff]  ;;  %v6821_v43 = vpack.c.bf16 %v3901_v34, %v3897_v33  ;;  %v3939_v47 = vld [vmem:[%s13921_s1 + $0x320] sm:$0xff] }
 0x79c   :  { %6802 = vmatpush1.bf16.msra.mxu1 %v6801_v42  ;;  %v3912_v42 = vld [vmem:[%s13921_s1 + $0x248] sm:$0xff]  ;;  %v6823_v45 = vpack.c.bf16 %v3910_v37, %v3906_v36  ;;  %v3941_v36 = vld [vmem:[%s13921_s1 + $0x330] sm:$0xff]  ;;  %v6777_v37 = vpack.c.bf16 %v3939_v47, %v3935_v31  ;;  %v4163_v47 = vld [vmem:[%s13922_s3 + $0x40] sm:$0xff] }
 0x79d   :  { %6804 = vmatprep.subr.bf16.mxu1 %v6803_v58  ;;  %v3916_v58 = vld [vmem:[%s13921_s1 + $0x268] sm:$0xff] }
 0x79e   :  { %6742 = vmatpush1.bf16.msra.mxu0 %v6741_v46  ;;  %v3905_v46 = vld [vmem:[%s13921_s1 + $0x210] sm:$0xff]  ;;  %v6763_v3 = vpack.c.bf16 %v3916_v58, %v3912_v42  ;;  %v3943_v42 = vld [vmem:[%s13921_s1 + $0x340] sm:$0xff]  ;;  %v4168_v31 = vld [vmem:[%s13922_s3 + $0x68] sm:$0xff] }
 0x79f   :  { %6744 = vmatprep.subr.bf16.mxu0 %v6743_v51  ;;  %v3914_v51 = vld [vmem:[%s13921_s1 + $0x258] sm:$0xff]  ;;  %v6825_v56 = vpack.c.bf16 %v3909_v48, %v3905_v46  ;;  %v3947_v58 = vld [vmem:[%s13921_s1 + $0x360] sm:$0xff] }
 0x7a0   :  { %6806 = vmatpush1.bf16.msra.mxu1 %v6805_v54  ;;  %v3920_v54 = vld [vmem:[%s13921_s1 + $0x288] sm:$0xff]  ;;  %v6827_v57 = vpack.c.bf16 %v3918_v52, %v3914_v51  ;;  %v3949_v51 = vld [vmem:[%s13921_s1 + $0x370] sm:$0xff]  ;;  %v6781_v52 = vpack.c.bf16 %v3947_v58, %v3943_v42  ;;  %v4171_v58 = vld [vmem:[%s13922_s3 + $0x80] sm:$0xff] }
 0x7a1   :  { %6808 = vmatprep.subr.bf16.mxu1 %v6807_v55  ;;  %v3924_v55 = vld [vmem:[%s13921_s1 + $0x2a8] sm:$0xff] }
 0x7a2   :  { %6746 = vmatpush1.bf16.msra.mxu0 %v6745_v59  ;;  %v3913_v59 = vld [vmem:[%s13921_s1 + $0x250] sm:$0xff]  ;;  %v6767_v19 = vpack.c.bf16 %v3924_v55, %v3920_v54  ;;  %v3951_v54 = vld [vmem:[%s13921_s1 + $0x380] sm:$0xff]  ;;  %v4176_v42 = vld [vmem:[%s13922_s3 + $0xa8] sm:$0xff] }
 0x7a3   :  { %6748 = vmatprep.subr.bf16.mxu0 %v6747_v16  ;;  %v3922_v16 = vld [vmem:[%s13921_s1 + $0x298] sm:$0xff]  ;;  %v6829_v6 = vpack.c.bf16 %v3917_v61, %v3913_v59  ;;  %v3955_v55 = vld [vmem:[%s13921_s1 + $0x3a0] sm:$0xff] }
 0x7a4   :  { %6810 = vmatpush1.bf16.msra.mxu1 %v6809_v2  ;;  %v3928_v2 = vld [vmem:[%s13921_s1 + $0x2c8] sm:$0xff]  ;;  %v6831_v7 = vpack.c.bf16 %v3926_v63, %v3922_v16  ;;  %v3957_v16 = vld [vmem:[%s13921_s1 + $0x3b0] sm:$0xff]  ;;  %v6785_v63 = vpack.c.bf16 %v3955_v55, %v3951_v54 }
 0x7a5   :  { %6812 = vmatprep.subr.bf16.mxu1 %v6811_v5  ;;  %v3932_v5 = vld [vmem:[%s13921_s1 + $0x2e8] sm:$0xff] }
 0x7a6   :  { %6750 = vmatpush1.bf16.msra.mxu0 %v6749_v8  ;;  %v3921_v8 = vld [vmem:[%s13921_s1 + $0x290] sm:$0xff]  ;;  %v6771_v12 = vpack.c.bf16 %v3932_v5, %v3928_v2  ;;  %v3959_v2 = vld [vmem:[%s13921_s1 + $0x3c0] sm:$0xff] }
 0x7a7   :  { %6752 = vmatprep.subr.bf16.mxu0 %v6751_v10  ;;  %v3930_v10 = vld [vmem:[%s13921_s1 + $0x2d8] sm:$0xff]  ;;  %v6833_v44 = vpack.c.bf16 %v3925_v27, %v3921_v8  ;;  %v3963_v5 = vld [vmem:[%s13921_s1 + $0x3e0] sm:$0xff]  ;;  %v3961_v8 = vld [vmem:[%s13921_s1 + $0x3d0] sm:$0xff] }
 0x7a8   :  { %6814 = vmatpush1.bf16.msra.mxu1 %v6813_v20  ;;  %v3936_v20 = vld [vmem:[%s13921_s1 + $0x308] sm:$0xff]  ;;  %v6835_v22 = vpack.c.bf16 %v3934_v11, %v3930_v10  ;;  %v3965_v27 = vld [vmem:[%s13921_s1 + $0x3f0] sm:$0xff] }
 0x7a9   :  { %6816 = vmatprep.subr.bf16.mxu1 %v6815_v21  ;;  %v3940_v21 = vld [vmem:[%s13921_s1 + $0x328] sm:$0xff]  ;;  %v6853_v10 = vpack.c.bf16 %v3965_v27, %v3961_v8  ;;  %v5173_v11 = vld [vmem:[%s13923_s0 + $0x30] sm:$0xff]  ;;  %v4190_v8 = vld [vmem:[%s13922_s3 + $0x118] sm:$0xff] }
 0x7aa   :  { %6754 = vmatpush1.bf16.msra.mxu0 %v6753_v38  ;;  %v3929_v38 = vld [vmem:[%s13921_s1 + $0x2d0] sm:$0xff]  ;;  %v6775_v30 = vpack.c.bf16 %v3940_v21, %v3936_v20  ;;  %v4159_v21 = vld [vmem:[%s13922_s3 + $0x20] sm:$0xff]  ;;  %v4194_v27 = vld [vmem:[%s13922_s3 + $0x138] sm:$0xff] }
 0x7ab   :  { %6756 = vmatprep.subr.bf16.mxu0 %v6755_v25  ;;  %v3938_v25 = vld [vmem:[%s13921_s1 + $0x318] sm:$0xff]  ;;  %v6837_v33 = vpack.c.bf16 %v3933_v23, %v3929_v38  ;;  %v6857_v38 = vpack.c.bf16 %v4159_v21, %v4155_v17  ;;  %v4196_v17 = vld [vmem:[%s13922_s3 + $0x148] sm:$0xff] }
 0x7ac   :  { %6818 = vmatpush1.bf16.msra.mxu1 %v6817_v32  ;;  %v3944_v32 = vld [vmem:[%s13921_s1 + $0x348] sm:$0xff]  ;;  %v6839_v34 = vpack.c.bf16 %v3942_v28, %v3938_v25  ;;  %v4161_v25 = vld [vmem:[%s13922_s3 + $0x30] sm:$0xff] }
 0x7ad   :  { %6820 = vmatprep.subr.bf16.mxu1 %v6819_v49  ;;  %v3948_v49 = vld [vmem:[%s13921_s1 + $0x368] sm:$0xff] }
 0x7ae   :  { %6758 = vmatpush1.bf16.msra.mxu0 %v6757_v35  ;;  %v3937_v35 = vld [vmem:[%s13921_s1 + $0x310] sm:$0xff]  ;;  %v6779_v41 = vpack.c.bf16 %v3948_v49, %v3944_v32  ;;  %v4167_v49 = vld [vmem:[%s13922_s3 + $0x60] sm:$0xff] }
 0x7af   :  { %6760 = vmatprep.subr.bf16.mxu0 %v6759_v39  ;;  %v3946_v39 = vld [vmem:[%s13921_s1 + $0x358] sm:$0xff]  ;;  %v6841_v46 = vpack.c.bf16 %v3941_v36, %v3937_v35  ;;  %v6861_v35 = vpack.c.bf16 %v4167_v49, %v4163_v47  ;;  %v4204_v47 = vld [vmem:[%s13922_s3 + $0x188] sm:$0xff] }
 0x7b0   :  { %6822 = vmatpush1.bf16.msra.mxu1 %v6821_v43  ;;  %v3952_v43 = vld [vmem:[%s13921_s1 + $0x388] sm:$0xff]  ;;  %v6843_v48 = vpack.c.bf16 %v3950_v40, %v3946_v39  ;;  %v4169_v39 = vld [vmem:[%s13922_s3 + $0x70] sm:$0xff] }
 0x7b1   :  { %6824 = vmatprep.subr.bf16.mxu1 %v6823_v45  ;;  %v3956_v45 = vld [vmem:[%s13921_s1 + $0x3a8] sm:$0xff] }
 0x7b2   :  { %6762 = vmatpush1.bf16.msra.mxu0 %v6761_v50  ;;  %v3945_v50 = vld [vmem:[%s13921_s1 + $0x350] sm:$0xff]  ;;  %v6783_v53 = vpack.c.bf16 %v3956_v45, %v3952_v43  ;;  %v4172_v40 = vld [vmem:[%s13922_s3 + $0x88] sm:$0xff]  ;;  %v4175_v43 = vld [vmem:[%s13922_s3 + $0xa0] sm:$0xff] }
 0x7b3   :  { %6764 = vmatprep.subr.bf16.mxu0 %v6763_v3  ;;  %v3954_v3 = vld [vmem:[%s13921_s1 + $0x398] sm:$0xff]  ;;  %v6845_v59 = vpack.c.bf16 %v3949_v51, %v3945_v50  ;;  %v6863_v45 = vpack.c.bf16 %v4176_v42, %v4172_v40  ;;  %v4173_v51 = vld [vmem:[%s13922_s3 + $0x90] sm:$0xff] }
 0x7b4   :  { %6826 = vmatpush1.bf16.msra.mxu1 %v6825_v56  ;;  %v3960_v56 = vld [vmem:[%s13921_s1 + $0x3c8] sm:$0xff]  ;;  %v6847_v61 = vpack.c.bf16 %v3958_v4, %v3954_v3  ;;  %v4178_v50 = vld [vmem:[%s13922_s3 + $0xb8] sm:$0xff]  ;;  %v4177_v3 = vld [vmem:[%s13922_s3 + $0xb0] sm:$0xff] }
 0x7b5   :  { %6828 = vmatprep.subr.bf16.mxu1 %v6827_v57  ;;  %v3964_v57 = vld [vmem:[%s13921_s1 + $0x3e8] sm:$0xff]  ;;  %v6929_v54 = vpack.c.bf16 %v4177_v3, %v4173_v51  ;;  %v4209_v40 = vld [vmem:[%s13922_s3 + $0x1b0] sm:$0xff] }
 0x7b6   :  { %6766 = vmatpush1.bf16.msra.mxu0 %v6765_v62  ;;  %v3953_v62 = vld [vmem:[%s13921_s1 + $0x390] sm:$0xff]  ;;  %v6787_v1 = vpack.c.bf16 %v3964_v57, %v3960_v56  ;;  %v4180_v4 = vld [vmem:[%s13922_s3 + $0xc8] sm:$0xff]  ;;  %v4179_v56 = vld [vmem:[%s13922_s3 + $0xc0] sm:$0xff] }
 0x7b7   :  { %6768 = vmatprep.subr.bf16.mxu0 %v6767_v19  ;;  %v3962_v19 = vld [vmem:[%s13921_s1 + $0x3d8] sm:$0xff]  ;;  %v4183_v57 = vld [vmem:[%s13922_s3 + $0xe0] sm:$0xff]  ;;  %v4213_v3 = vld [vmem:[%s13922_s3 + $0x1d0] sm:$0xff] }
 0x7b8   :  { %6830 = vmatpush1.bf16.msra.mxu1 %v6829_v6  ;;  %v6849_v6 = vpack.c.bf16 %v3957_v16, %v3953_v62  ;;  %v4181_v62 = vld [vmem:[%s13922_s3 + $0xd0] sm:$0xff] }
 0x7b9   :  { %6832 = vmatprep.subr.bf16.mxu1 %v6831_v7  ;;  %v6851_v7 = vpack.c.bf16 %v3966_v0, %v3962_v19  ;;  %v4185_v16 = vld [vmem:[%s13922_s3 + $0xf0] sm:$0xff]  ;;  %v4188_v0 = vld [vmem:[%s13922_s3 + $0x108] sm:$0xff] }
 0x7ba   :  { %6770 = vmatpush1.bf16.msra.mxu0 %v6769_v9  ;;  %v6789_v9 = vpack.c.bf16 %v3963_v5, %v3959_v2  ;;  %v4187_v2 = vld [vmem:[%s13922_s3 + $0x100] sm:$0xff]  ;;  %v6933_v5 = vpack.c.bf16 %v4185_v16, %v4181_v62  ;;  %v4222_v62 = vld [vmem:[%s13922_s3 + $0x218] sm:$0xff] }
 0x7bb   :  { %6772 = vmatprep.subr.bf16.mxu0 %v6771_v12  ;;  %v4156_v12 = vld [vmem:[%s13922_s3 + $0x8] sm:$0xff] }
 0x7bc   :  { %6834 = vmatpush1.bf16.msra.mxu1 %v6833_v44  ;;  %v6855_v20 = vpack.c.bf16 %v4160_v14, %v4156_v12  ;;  %v4158_v44 = vld [vmem:[%s13922_s3 + $0x18] sm:$0xff]  ;;  %v4193_v12 = vld [vmem:[%s13922_s3 + $0x130] sm:$0xff] }
 0x7bd   :  { %6836 = vmatprep.subr.bf16.mxu1 %v6835_v22  ;;  %v4162_v22 = vld [vmem:[%s13922_s3 + $0x38] sm:$0xff] }
 0x7be   :  { %6774 = vmatpush1.bf16.msra.mxu0 %v6773_v24  ;;  %v6919_v23 = vpack.c.bf16 %v4162_v22, %v4158_v44  ;;  %v4157_v24 = vld [vmem:[%s13922_s3 + $0x10] sm:$0xff]  ;;  %v4195_v44 = vld [vmem:[%s13922_s3 + $0x140] sm:$0xff] }
 0x7bf   :  { %6776 = vmatprep.subr.bf16.mxu0 %v6775_v30  ;;  %v6921_v28 = vpack.c.bf16 %v4161_v25, %v4157_v24  ;;  %v4164_v30 = vld [vmem:[%s13922_s3 + $0x48] sm:$0xff]  ;;  %v4199_v22 = vld [vmem:[%s13922_s3 + $0x160] sm:$0xff]  ;;  %v4202_v24 = vld [vmem:[%s13922_s3 + $0x178] sm:$0xff] }
 0x7c0   :  { %6838 = vmatpush1.bf16.msra.mxu1 %v6837_v33  ;;  %v6859_v32 = vpack.c.bf16 %v4168_v31, %v4164_v30  ;;  %v4166_v33 = vld [vmem:[%s13922_s3 + $0x58] sm:$0xff]  ;;  %v4197_v25 = vld [vmem:[%s13922_s3 + $0x150] sm:$0xff] }
 0x7c1   :  { %6840 = vmatprep.subr.bf16.mxu1 %v6839_v34  ;;  %v4170_v34 = vld [vmem:[%s13922_s3 + $0x78] sm:$0xff] }
 0x7c2   :  { %6778 = vmatpush1.bf16.msra.mxu0 %v6777_v37  ;;  %v6923_v36 = vpack.c.bf16 %v4170_v34, %v4166_v33  ;;  %v4165_v37 = vld [vmem:[%s13922_s3 + $0x50] sm:$0xff]  ;;  %v4203_v33 = vld [vmem:[%s13922_s3 + $0x180] sm:$0xff] }
 0x7c3   :  { %6780 = vmatprep.subr.bf16.mxu0 %v6779_v41  ;;  %v6925_v41 = vpack.c.bf16 %v4169_v39, %v4165_v37  ;;  %v4207_v34 = vld [vmem:[%s13922_s3 + $0x1a0] sm:$0xff]  ;;  %v4210_v37 = vld [vmem:[%s13922_s3 + $0x1b8] sm:$0xff]  ;;  %v4205_v39 = vld [vmem:[%s13922_s3 + $0x190] sm:$0xff] }
 0x7c4   :  { %6842 = vmatpush1.bf16.msra.mxu1 %v6841_v46  ;;  %v6865_v46 = vpack.c.bf16 %v4175_v43, %v4171_v58  ;;  %v6945_v42 = vpack.c.bf16 %v4209_v40, %v4205_v39  ;;  %v4212_v58 = vld [vmem:[%s13922_s3 + $0x1c8] sm:$0xff]  ;;  %v4250_v40 = vld [vmem:[%s13922_s3 + $0x2f8] sm:$0xff] }
 0x7c5   :  { %6844 = vmatprep.subr.bf16.mxu1 %v6843_v48  ;;  %v4174_v48 = vld [vmem:[%s13922_s3 + $0x98] sm:$0xff]  ;;  %v4216_v43 = vld [vmem:[%s13922_s3 + $0x1e8] sm:$0xff] }
 0x7c6   :  { %6782 = vmatpush1.bf16.msra.mxu0 %v6781_v52  ;;  %v6927_v52 = vpack.c.bf16 %v4178_v50, %v4174_v48  ;;  %v4215_v48 = vld [vmem:[%s13922_s3 + $0x1e0] sm:$0xff]  ;;  %v4214_v50 = vld [vmem:[%s13922_s3 + $0x1d8] sm:$0xff] }
 0x7c7   :  { %6784 = vmatprep.subr.bf16.mxu0 %v6783_v53  ;;  %v4184_v53 = vld [vmem:[%s13922_s3 + $0xe8] sm:$0xff] }
 0x7c8   :  { %6846 = vmatpush1.bf16.msra.mxu1 %v6845_v59  ;;  %v6867_v55 = vpack.c.bf16 %v4184_v53, %v4180_v4  ;;  %v4182_v59 = vld [vmem:[%s13922_s3 + $0xd8] sm:$0xff]  ;;  %v4217_v4 = vld [vmem:[%s13922_s3 + $0x1f0] sm:$0xff] }
 0x7c9   :  { %6848 = vmatprep.subr.bf16.mxu1 %v6847_v61  ;;  %v4186_v61 = vld [vmem:[%s13922_s3 + $0xf8] sm:$0xff] }
 0x7ca   :  { %6786 = vmatpush1.bf16.msra.mxu0 %v6785_v63  ;;  %v6869_v63 = vpack.c.bf16 %v4183_v57, %v4179_v56  ;;  %v6931_v19 = vpack.c.bf16 %v4186_v61, %v4182_v59  ;;  %v4224_v56 = vld [vmem:[%s13922_s3 + $0x228] sm:$0xff]  ;;  %v4219_v59 = vld [vmem:[%s13922_s3 + $0x200] sm:$0xff] }
 0x7cb   :  { %6788 = vmatprep.subr.bf16.mxu0 %v6787_v1  ;;  %v4192_v1 = vld [vmem:[%s13922_s3 + $0x128] sm:$0xff]  ;;  %v4223_v61 = vld [vmem:[%s13922_s3 + $0x220] sm:$0xff] }
 0x7cc   :  { %6850 = vmatpush1.bf16.msra.mxu1 %v6849_v6  ;;  %v6871_v6 = vpack.c.bf16 %v4192_v1, %v4188_v0  ;;  %v6889_v16 = vpack.c.bf16 %v4223_v61, %v4219_v59  ;;  %v4225_v0 = vld [vmem:[%s13922_s3 + $0x230] sm:$0xff]  ;;  %v4264_v59 = vld [vmem:[%s13922_s3 + $0x368] sm:$0xff] }
 0x7cd   :  { %6852 = vmatprep.subr.bf16.mxu1 %v6851_v7  ;;  %v4191_v7 = vld [vmem:[%s13922_s3 + $0x120] sm:$0xff] }
 0x7ce   :  { %6790 = vmatpush1.bf16.msra.mxu0 %v6789_v9  ;;  %v6935_v9 = vpack.c.bf16 %v4194_v27, %v4190_v8  ;;  %v4227_v8 = vld [vmem:[%s13922_s3 + $0x240] sm:$0xff] }
 0x7cf   :  { %6856 = vmatprep.subr.bf16.mxu0 %v6855_v20  ;;  %v4200_v20 = vld [vmem:[%s13922_s3 + $0x168] sm:$0xff]  ;;  %v4231_v27 = vld [vmem:[%s13922_s3 + $0x260] sm:$0xff] }
 0x7d0   :  { %6854 = vmatpush1.bf16.msra.mxu1 %v6853_v10  ;;  %v6873_v10 = vpack.c.bf16 %v4191_v7, %v4187_v2  ;;  %v6875_v21 = vpack.c.bf16 %v4200_v20, %v4196_v17 }
 0x7d1   :  { %4054 = vmatmul.mubr.f32.vlgmr.msra.gmra.mrb[24].mxu0 %v5173_v11  ;;  %6920 = vmatprep.subr.bf16.mxu1 %v6919_v23  ;;  %v6877_v23 = vpack.c.bf16 %v4199_v22, %v4195_v44  ;;  %v4240_v44 = vld [vmem:[%s13922_s3 + $0x2a8] sm:$0xff] }
 0x7d2   :  { %6858 = vmatpush1.bf16.msra.mxu0 %v6857_v38  ;;  %v4198_v38 = vld [vmem:[%s13922_s3 + $0x158] sm:$0xff] }
 0x7d3   :  { %4125 = vmatmul.mubr.f32.vlgmr.msra.gmra.mrb[24].mxu1 %v5173_v11  ;;  %6860 = vmatprep.subr.bf16.mxu0 %v6859_v32  ;;  %v4189_v11 = vld [vmem:[%s13922_s3 + $0x110] sm:$0xff]  ;;  %v6939_v30 = vpack.c.bf16 %v4202_v24, %v4198_v38  ;;  %v4208_v32 = vld [vmem:[%s13922_s3 + $0x1a8] sm:$0xff]  ;;  %v4235_v38 = vld [vmem:[%s13922_s3 + $0x280] sm:$0xff] }
 0x7d4   :  { %6922 = vmatpush1.bf16.msra.mxu1 %v6921_v28  ;;  %v6937_v14 = vpack.c.bf16 %v4193_v12, %v4189_v11  ;;  %v4201_v28 = vld [vmem:[%s13922_s3 + $0x170] sm:$0xff]  ;;  %v6879_v49 = vpack.c.bf16 %v4208_v32, %v4204_v47  ;;  %v4234_v11 = vld [vmem:[%s13922_s3 + $0x278] sm:$0xff] }
 0x7d5   :  { %6924 = vmatprep.subr.bf16.mxu1 %v6923_v36  ;;  %v6941_v31 = vpack.c.bf16 %v4201_v28, %v4197_v25  ;;  %v6881_v36 = vpack.c.bf16 %v4207_v34, %v4203_v33  ;;  %v4229_v12 = vld [vmem:[%s13922_s3 + $0x250] sm:$0xff]  ;;  %v4238_v24 = vld [vmem:[%s13922_s3 + $0x298] sm:$0xff]  ;;  %v4248_v33 = vld [vmem:[%s13922_s3 + $0x2e8] sm:$0xff] }
 0x7d6   :  { %6862 = vmatpush1.bf16.msra.mxu0 %v6861_v35  ;;  %v4206_v35 = vld [vmem:[%s13922_s3 + $0x198] sm:$0xff] }
 0x7d7   :  { %6864 = vmatprep.subr.bf16.mxu0 %v6863_v45  ;;  %v6883_v45 = vpack.c.bf16 %v4216_v43, %v4212_v58  ;;  %v4242_v28 = vld [vmem:[%s13922_s3 + $0x2b8] sm:$0xff] }
 0x7d8   :  { %6926 = vmatpush1.bf16.msra.mxu1 %v6925_v41  ;;  %v6943_v41 = vpack.c.bf16 %v4210_v37, %v4206_v35  ;;  %v6959_v47 = vpack.c.bf16 %v4242_v28, %v4238_v24  ;;  %v4243_v35 = vld [vmem:[%s13922_s3 + $0x2c0] sm:$0xff]  ;;  %v4246_v37 = vld [vmem:[%s13922_s3 + $0x2d8] sm:$0xff] }
 0x7d9   :  { %6928 = vmatprep.subr.bf16.mxu1 %v6927_v52  ;;  %v4218_v52 = vld [vmem:[%s13922_s3 + $0x1f8] sm:$0xff]  ;;  %v6963_v58 = vpack.c.bf16 %v4250_v40, %v4246_v37  ;;  %v4279_v24 = vld [vmem:[%s13922_s3 + $0x3e0] sm:$0xff] }
 0x7da   :  { %6866 = vmatpush1.bf16.msra.mxu0 %v6865_v46  ;;  %v4211_v46 = vld [vmem:[%s13922_s3 + $0x1c0] sm:$0xff]  ;;  %v6947_v53 = vpack.c.bf16 %v4218_v52, %v4214_v50  ;;  %v4254_v52 = vld [vmem:[%s13922_s3 + $0x318] sm:$0xff] }
 0x7db   :  { %6868 = vmatprep.subr.bf16.mxu0 %v6867_v55  ;;  %v6885_v51 = vpack.c.bf16 %v4215_v48, %v4211_v46  ;;  %v4220_v55 = vld [vmem:[%s13922_s3 + $0x208] sm:$0xff]  ;;  %v4251_v50 = vld [vmem:[%s13922_s3 + $0x300] sm:$0xff]  ;;  %v4278_v28 = vld [vmem:[%s13922_s3 + $0x3d8] sm:$0xff] }
 0x7dc   :  { %6930 = vmatpush1.bf16.msra.mxu1 %v6929_v54  ;;  %v6949_v54 = vpack.c.bf16 %v4217_v4, %v4213_v3  ;;  %v6887_v57 = vpack.c.bf16 %v4224_v56, %v4220_v55  ;;  %v4256_v46 = vld [vmem:[%s13922_s3 + $0x328] sm:$0xff]  ;;  %v4258_v4 = vld [vmem:[%s13922_s3 + $0x338] sm:$0xff]  ;;  %v3647_v37 = vld [vmem:[%s13925_s4] sm:$0xf] }
 0x7dd   :  { %6932 = vmatprep.subr.bf16.mxu1 %v6931_v19  ;;  %v4221_v19 = vld [vmem:[%s13922_s3 + $0x210] sm:$0xff]  ;;  %v6967_v55 = vpack.c.bf16 %v4258_v4, %v4254_v52  ;;  %v4482_v40 = vld [vmem:[%s13921_s1 + $0x38] sm:$0xff]  ;;  %v3664_v4 = vrot.slane %v3647_v37, %v8333_v18 }
 0x7de   :  { %6870 = vmatpush1.bf16.msra.mxu0 %v6869_v63  ;;  %v4226_v63 = vld [vmem:[%s13922_s3 + $0x238] sm:$0xff]  ;;  %v6953_v2 = vpack.c.bf16 %v4225_v0, %v4221_v19 }
 0x7df   :  { %6872 = vmatprep.subr.bf16.mxu0 %v6871_v6  ;;  %v6951_v1 = vpack.c.bf16 %v4226_v63, %v4222_v62  ;;  %v4232_v6 = vld [vmem:[%s13922_s3 + $0x268] sm:$0xff]  ;;  %v4259_v62 = vld [vmem:[%s13922_s3 + $0x340] sm:$0xff]  ;;  %v4262_v63 = vld [vmem:[%s13922_s3 + $0x358] sm:$0xff] }
 0x7e0   :  { %6934 = vmatpush1.bf16.msra.mxu1 %v6933_v5  ;;  %v4228_v5 = vld [vmem:[%s13922_s3 + $0x248] sm:$0xff]  ;;  %v4266_v0 = vld [vmem:[%s13922_s3 + $0x378] sm:$0xff] }
 0x7e1   :  { %6936 = vmatprep.subr.bf16.mxu1 %v6935_v9  ;;  %v6891_v7 = vpack.c.bf16 %v4232_v6, %v4228_v5  ;;  %v4230_v9 = vld [vmem:[%s13922_s3 + $0x258] sm:$0xff]  ;;  %v6971_v5 = vpack.c.bf16 %v4266_v0, %v4262_v63 }
 0x7e2   :  { %6874 = vmatpush1.bf16.msra.mxu0 %v6873_v10  ;;  %v6893_v10 = vpack.c.bf16 %v4231_v27, %v4227_v8  ;;  %v6955_v17 = vpack.c.bf16 %v4234_v11, %v4230_v9  ;;  %v4272_v8 = vld [vmem:[%s13922_s3 + $0x3a8] sm:$0xff]  ;;  %v4267_v27 = vld [vmem:[%s13922_s3 + $0x380] sm:$0xff]  ;;  %v4270_v11 = vld [vmem:[%s13922_s3 + $0x398] sm:$0xff] }
 0x7e3   :  { %6876 = vmatprep.subr.bf16.mxu0 %v6875_v21  ;;  %v4236_v21 = vld [vmem:[%s13922_s3 + $0x288] sm:$0xff] }
 0x7e4   :  { %6938 = vmatpush1.bf16.msra.mxu1 %v6937_v14  ;;  %v4233_v14 = vld [vmem:[%s13922_s3 + $0x270] sm:$0xff]  ;;  %v6895_v22 = vpack.c.bf16 %v4240_v44, %v4236_v21  ;;  %v4276_v44 = vld [vmem:[%s13922_s3 + $0x3c8] sm:$0xff] }
 0x7e5   :  { %6940 = vmatprep.subr.bf16.mxu1 %v6939_v30  ;;  %v6957_v20 = vpack.c.bf16 %v4233_v14, %v4229_v12  ;;  %v4237_v30 = vld [vmem:[%s13922_s3 + $0x290] sm:$0xff]  ;;  %v4274_v12 = vld [vmem:[%s13922_s3 + $0x3b8] sm:$0xff] }
 0x7e6   :  { %6878 = vmatpush1.bf16.msra.mxu0 %v6877_v23  ;;  %v4239_v23 = vld [vmem:[%s13922_s3 + $0x2a0] sm:$0xff]  ;;  %v4273_v21 = vld [vmem:[%s13922_s3 + $0x3b0] sm:$0xff] }
 0x7e7   :  { %6880 = vmatprep.subr.bf16.mxu0 %v6879_v49  ;;  %v6897_v25 = vpack.c.bf16 %v4239_v23, %v4235_v38  ;;  %v4244_v49 = vld [vmem:[%s13922_s3 + $0x2c8] sm:$0xff]  ;;  %v4275_v23 = vld [vmem:[%s13922_s3 + $0x3c0] sm:$0xff] }
 0x7e8   :  { %6942 = vmatpush1.bf16.msra.mxu1 %v6941_v31  ;;  %v4241_v31 = vld [vmem:[%s13922_s3 + $0x2b0] sm:$0xff]  ;;  %v6899_v34 = vpack.c.bf16 %v4248_v33, %v4244_v49  ;;  %v4280_v38 = vld [vmem:[%s13922_s3 + $0x3e8] sm:$0xff] }
 0x7e9   :  { %6944 = vmatprep.subr.bf16.mxu1 %v6943_v41  ;;  %v6961_v32 = vpack.c.bf16 %v4241_v31, %v4237_v30  ;;  %v4245_v41 = vld [vmem:[%s13922_s3 + $0x2d0] sm:$0xff]  ;;  %v4282_v30 = vld [vmem:[%s13922_s3 + $0x3f8] sm:$0xff]  ;;  %v4476_v33 = vld [vmem:[%s13921_s1 + $0x8] sm:$0xff] }
 0x7ea   :  { %6882 = vmatpush1.bf16.msra.mxu0 %v6881_v36  ;;  %v4247_v36 = vld [vmem:[%s13922_s3 + $0x2e0] sm:$0xff]  ;;  %v4277_v31 = vld [vmem:[%s13922_s3 + $0x3d0] sm:$0xff] }
 0x7eb   :  { %6884 = vmatprep.subr.bf16.mxu0 %v6883_v45  ;;  %v6901_v39 = vpack.c.bf16 %v4247_v36, %v4243_v35  ;;  %v4252_v45 = vld [vmem:[%s13922_s3 + $0x308] sm:$0xff]  ;;  %v4281_v49 = vld [vmem:[%s13922_s3 + $0x3f0] sm:$0xff] }
 0x7ec   :  { %6946 = vmatpush1.bf16.msra.mxu1 %v6945_v42  ;;  %v4249_v42 = vld [vmem:[%s13922_s3 + $0x2f0] sm:$0xff]  ;;  %v6903_v48 = vpack.c.bf16 %v4256_v46, %v4252_v45  ;;  %v6981_v36 = vpack.c.bf16 %v4281_v49, %v4277_v31 }
 0x7ed   :  { %6948 = vmatprep.subr.bf16.mxu1 %v6947_v53  ;;  %v6965_v43 = vpack.c.bf16 %v4249_v42, %v4245_v41  ;;  %v4253_v53 = vld [vmem:[%s13922_s3 + $0x310] sm:$0xff]  ;;  %v3652_v42 = vrot.slane %v3647_v37, %v8324_v13 }
 0x7ee   :  { %6886 = vmatpush1.bf16.msra.mxu0 %v6885_v51  ;;  %v4255_v51 = vld [vmem:[%s13922_s3 + $0x320] sm:$0xff] }
 0x7ef   :  { %6888 = vmatprep.subr.bf16.mxu0 %v6887_v57  ;;  %v6905_v3 = vpack.c.bf16 %v4255_v51, %v4251_v50  ;;  %v4260_v57 = vld [vmem:[%s13922_s3 + $0x348] sm:$0xff] }
 0x7f0   :  { %6950 = vmatpush1.bf16.msra.mxu1 %v6949_v54  ;;  %v4257_v54 = vld [vmem:[%s13922_s3 + $0x330] sm:$0xff]  ;;  %v6907_v61 = vpack.c.bf16 %v4264_v59, %v4260_v57 }
 0x7f1   :  { %6952 = vmatprep.subr.bf16.mxu1 %v6951_v1  ;;  %v6969_v56 = vpack.c.bf16 %v4257_v54, %v4253_v53  ;;  %v4261_v1 = vld [vmem:[%s13922_s3 + $0x350] sm:$0xff]  ;;  %v3660_v54 = vrot.slane %v3647_v37, %v8336_v26 }
 0x7f2   :  { %6890 = vmatpush1.bf16.msra.mxu0 %v6889_v16  ;;  %v4263_v16 = vld [vmem:[%s13922_s3 + $0x360] sm:$0xff] }
 0x7f3   :  { %6892 = vmatprep.subr.bf16.mxu0 %v6891_v7  ;;  %v6909_v19 = vpack.c.bf16 %v4263_v16, %v4259_v62  ;;  %v4268_v7 = vld [vmem:[%s13922_s3 + $0x388] sm:$0xff] }
 0x7f4   :  { %6954 = vmatpush1.bf16.msra.mxu1 %v6953_v2  ;;  %v4265_v2 = vld [vmem:[%s13922_s3 + $0x370] sm:$0xff]  ;;  %v6911_v9 = vpack.c.bf16 %v4272_v8, %v4268_v7 }
 0x7f5   :  { %6956 = vmatprep.subr.bf16.mxu1 %v6955_v17  ;;  %v6973_v6 = vpack.c.bf16 %v4265_v2, %v4261_v1  ;;  %v6975_v17 = vpack.c.bf16 %v4274_v12, %v4270_v11 }
 0x7f6   :  { %6894 = vmatpush1.bf16.msra.mxu0 %v6893_v10  ;;  %v4271_v10 = vld [vmem:[%s13922_s3 + $0x3a0] sm:$0xff] }
 0x7f7   :  { %6896 = vmatprep.subr.bf16.mxu0 %v6895_v22  ;;  %v6913_v14 = vpack.c.bf16 %v4271_v10, %v4267_v27 }
 0x7f8   :  { %6958 = vmatpush1.bf16.msra.mxu1 %v6957_v20  ;;  %v4269_v20 = vld [vmem:[%s13922_s3 + $0x390] sm:$0xff] }
 0x7f9   :  { %6960 = vmatprep.subr.bf16.mxu1 %v6959_v47  ;;  %v6977_v22 = vpack.c.bf16 %v4273_v21, %v4269_v20  ;;  %v6917_v47 = vpack.c.bf16 %v4279_v24, %v4275_v23 }
 0x7fa   :  { %6898 = vmatpush1.bf16.msra.mxu0 %v6897_v25  ;;  %v6915_v25 = vpack.c.bf16 %v4280_v38, %v4276_v44 }
 0x7fb   :  { %6900 = vmatprep.subr.bf16.mxu0 %v6899_v34  ;;  %v4480_v34 = vld [vmem:[%s13921_s1 + $0x28] sm:$0xff] }
 0x7fc   :  { %6962 = vmatpush1.bf16.msra.mxu1 %v6961_v32  ;;  %v6979_v32 = vpack.c.bf16 %v4282_v30, %v4278_v28  ;;  %v6983_v35 = vpack.c.bf16 %v4480_v34, %v4476_v33 }
 0x7fd   :  { %6964 = vmatprep.subr.bf16.mxu1 %v6963_v58  ;;  %v3656_v58 = vrot.slane %v3647_v37, %v8329_v15 }
 0x7fe   :  { %6902 = vmatpush1.bf16.msra.mxu0 %v6901_v39  ;;  %v4478_v39 = vld [vmem:[%s13921_s1 + $0x18] sm:$0xff] }
 0x7ff   :  { %6904 = vmatprep.subr.bf16.mxu0 %v6903_v48  ;;  %v7047_v41 = vpack.c.bf16 %v4482_v40, %v4478_v39 }
 0x800   :  { %6966 = vmatpush1.bf16.msra.mxu1 %v6965_v43 }
 0x801   :  { %6968 = vmatprep.subr.bf16.mxu1 %v6967_v55 }
 0x802   :  { %6906 = vmatpush1.bf16.msra.mxu0 %v6905_v3 }
 0x803   :  { %6908 = vmatprep.subr.bf16.mxu0 %v6907_v61 }
 0x804   :  { %6970 = vmatpush1.bf16.msra.mxu1 %v6969_v56 }
 0x805   :  { %6972 = vmatprep.subr.bf16.mxu1 %v6971_v5 }
 0x806   :  { %6910 = vmatpush1.bf16.msra.mxu0 %v6909_v19 }
 0x807   :  { %6912 = vmatprep.subr.bf16.mxu0 %v6911_v9  ;;  %v3967_v9 = vld [vmem:[%s13924_s2] sm:$0xf] }
 0x808   :  { %6974 = vmatpush1.bf16.msra.mxu1 %v6973_v6  ;;  %v3976_v10 = vrot.slane %v3967_v9, %v8329_v15  ;;  %v3984_v44 = vrot.slane %v3967_v9, %v8333_v18  ;;  %v3980_v24 = vrot.slane %v3967_v9, %v8336_v26 }
 0x809   :  { %6976 = vmatprep.subr.bf16.mxu1 %v6975_v17 }
 0x80a   :  { %6914 = vmatpush1.bf16.msra.mxu0 %v6913_v14 }
 0x80b   :  { %6916 = vmatprep.subr.bf16.mxu0 %v6915_v25 }
 0x80c   :  { %6978 = vmatpush1.bf16.msra.mxu1 %v6977_v22 }
 0x80d   :  { %6980 = vmatprep.subr.bf16.mxu1 %v6979_v32 }
 0x80e   :  { %6918 = vmatpush1.bf16.msra.mxu0 %v6917_v47 }
 0x80f   :  { %6984 = vmatprep.subr.bf16.mxu0 %v6983_v35 }
 0x810   :  { %6982 = vmatpush1.bf16.msra.mxu1 %v6981_v36 }
 0x811   :  { %7048 = vmatprep.subr.bf16.mxu1 %v7047_v41  ;;  %v4475_v41 = vld [vmem:[%s13921_s1] sm:$0xff] }
 0x864   :  { %v3735_v43 = vpop.f32.mrb[22].mxu0  ;;  %v3806_v45 = vpop.f32.mrb[22].mxu1 }
 0x865   :  { %v3736_v46 = vadd.f32 %v3735_v43, %v3652_v42  ;;  %v3737_v48 = vpop.f32.mrb[23].mxu0  ;;  %v3808_v50 = vpop.f32.mrb[23].mxu1  ;;  %v3807_v56 = vadd.f32 %v3806_v45, %v3660_v54  ;;  %v4479_v42 = vld [vmem:[%s13921_s1 + $0x20] sm:$0xff]  ;;  %v4484_v43 = vld [vmem:[%s13921_s1 + $0x48] sm:$0xff]  ;;  %v4477_v45 = vld [vmem:[%s13921_s1 + $0x10] sm:$0xff] }
 0x866   :  { %v3738_v51 = vadd.f32 %v3737_v48, %v3656_v58  ;;  %v3809_v53 = vadd.f32 %v3808_v50, %v3664_v4  ;;  %v6985_v50 = vpack.c.bf16 %v4479_v42, %v4475_v41  ;;  %v4487_v54 = vld [vmem:[%s13921_s1 + $0x60] sm:$0xff]  ;;  %v4518_v41 = vld [vmem:[%s13921_s1 + $0x158] sm:$0xff] }
 0x867   :  { %v5169_v52 = vmul.f32 -1.442695, %v3736_v46  ;;  %v4481_v46 = vld [vmem:[%s13921_s1 + $0x30] sm:$0xff]  ;;  %v4522_v42 = vld [vmem:[%s13921_s1 + $0x178] sm:$0xff] }
 0x868   :  { %v5170_v3 = vmul.f32 -1.442695, %v3738_v51  ;;  %v5171_v55 = vmul.f32 -1.442695, %v3809_v53  ;;  %v4486_v51 = vld [vmem:[%s13921_s1 + $0x58] sm:$0xff]  ;;  %v4483_v53 = vld [vmem:[%s13921_s1 + $0x40] sm:$0xff] }
 0x869   :  { %7416 = vpow2.f32 %v5169_v52  ;;  %v4490_v52 = vld [vmem:[%s13921_s1 + $0x78] sm:$0xff] }
 0x86a   :  { %7418 = vpow2.f32 %v5170_v3 }
 0x86b   :  { %7420 = vpow2.f32 %v5171_v55  ;;  %v4492_v55 = vld [vmem:[%s13921_s1 + $0x88] sm:$0xff] }
 0x86c   :  { %7422 = vtanh.f32 %v3807_v56  ;;  %v4496_v56 = vld [vmem:[%s13921_s1 + $0xa8] sm:$0xff] }
 0x873   :  { %v7417_v57 = vpop.eup %7416 }
 0x874   :  { %v7419_v59 = vpop.eup %7418  ;;  %v3814_v61 = vadd.f32 1.0, %v7417_v57  ;;  %v7049_v57 = vpack.c.bf16 %v4481_v46, %v4477_v45  ;;  %v4524_v45 = vld [vmem:[%s13921_s1 + $0x188] sm:$0xff] }
 0x875   :  { %v3820_v62 = vadd.f32 1.0, %v7419_v59  ;;  %v7421_v16 = vpop.eup %7420  ;;  %v7051_v59 = vpack.c.bf16 %v4490_v52, %v4486_v51  ;;  %v4528_v46 = vld [vmem:[%s13921_s1 + $0x1a8] sm:$0xff]  ;;  %v4517_v51 = vld [vmem:[%s13921_s1 + $0x150] sm:$0xff] }
 0x876   :  { %7424 = vrcp.f32 %v3814_v61  ;;  %v7423_v63 = vpop.eup %7422  ;;  %v3827_v2 = vadd.f32 1.0, %v7421_v16  ;;  %v4485_v61 = vld [vmem:[%s13921_s1 + $0x50] sm:$0xff]  ;;  %v6989_v16 = vpack.c.bf16 %v4487_v54, %v4483_v53  ;;  %v4530_v53 = vld [vmem:[%s13921_s1 + $0x1b8] sm:$0xff]  ;;  %v7007_v54 = vpack.c.bf16 %v4528_v46, %v4524_v45  ;;  %v4555_v45 = vld [vmem:[%s13921_s1 + $0x280] sm:$0xff] }
 0x877   :  { %7426 = vrcp.f32 %v3820_v62  ;;  %v4489_v62 = vld [vmem:[%s13921_s1 + $0x70] sm:$0xff]  ;;  %v4559_v46 = vld [vmem:[%s13921_s1 + $0x2a0] sm:$0xff] }
 0x878   :  { %7428 = vrcp.f32 %v3827_v2  ;;  %v4495_v2 = vld [vmem:[%s13921_s1 + $0xa0] sm:$0xff]  ;;  %v4521_v52 = vld [vmem:[%s13921_s1 + $0x170] sm:$0xff] }
 0x880   :  { %v7425_v19 = vpop.eup %7424 }
 0x881   :  { %v7427_v0 = vpop.eup %7426  ;;  %v3831_v1 = vmul.f32 %v7425_v19, %v7423_v63  ;;  %v4494_v63 = vld [vmem:[%s13921_s1 + $0x98] sm:$0xff] }
 0x882   :  { %v3830_v5 = vmul.f32 %v7427_v0, %v12304_v29  ;;  %v7429_v7 = vpop.eup %7428  ;;  %v3972_v29 = vrot.slane %v3967_v9, %v8324_v13  ;;  %v4498_v19 = vld [vmem:[%s13921_s1 + $0xb8] sm:$0xff]  ;;  %v6991_v0 = vpack.c.bf16 %v4496_v56, %v4492_v55  ;;  %v4493_v9 = vld [vmem:[%s13921_s1 + $0x90] sm:$0xff]  ;;  %v4523_v55 = vld [vmem:[%s13921_s1 + $0x180] sm:$0xff] }
 0x883   :  { %v4527_v56 = vld [vmem:[%s13921_s1 + $0x1a0] sm:$0xff] }
 0x884   :  { %v13100_v6 = vadd.f32 %v3831_v1, %v3830_v5  ;;  %v4491_v1 = vld [vmem:[%s13921_s1 + $0x80] sm:$0xff]  ;;  %v4500_v5 = vld [vmem:[%s13921_s1 + $0xc8] sm:$0xff] }
 0x886   :  { %7430 = vtanh.f32 %v13100_v6 }
 0x890   :  { %v7431_v8 = vpop.eup %7430 }
 0x891   :  { %v3834_v27 = vmul.f32 %v7431_v8, %v7429_v7  ;;  %v4504_v7 = vld [vmem:[%s13921_s1 + $0xe8] sm:$0xff]  ;;  %v7053_v8 = vpack.c.bf16 %v4489_v62, %v4485_v61  ;;  %v7069_v61 = vpack.c.bf16 %v4521_v52, %v4517_v51 }
 0x893   :  { %5172 = vst [vmem:[%s13926_s5 + $0x28] sm:$0xff] %v3834_v27  ;;  %4369 = vmatprep.mubr.f32.mxu0 %v3834_v27  ;;  %4440 = vmatprep.mubr.f32.mxu1 %v3834_v27  ;;  %v7055_v27 = vpack.c.bf16 %v4498_v19, %v4494_v63  ;;  %v4529_v63 = vld [vmem:[%s13921_s1 + $0x1b0] sm:$0xff]  ;;  %v7009_v19 = vpack.c.bf16 %v4527_v56, %v4523_v55  ;;  %v4570_v55 = vld [vmem:[%s13921_s1 + $0x2f8] sm:$0xff] }
 0x8a4   :  { %v4055_v11 = vpop.f32.mrb[24].mxu0 }
 0x8a5   :  { %v4056_v12 = vadd.f32 %v4055_v11, %v3972_v29  ;;  %v4057_v14 = vpop.f32.mrb[25].mxu0  ;;  %v4497_v29 = vld [vmem:[%s13921_s1 + $0xb0] sm:$0xff]  ;;  %v4502_v11 = vld [vmem:[%s13921_s1 + $0xd8] sm:$0xff] }
 0x8a6   :  { %v4058_v17 = vadd.f32 %v4057_v14, %v3976_v10  ;;  %v4126_v20 = vpop.f32.mrb[24].mxu1  ;;  %v6993_v10 = vpack.c.bf16 %v4495_v2, %v4491_v1  ;;  %v6995_v14 = vpack.c.bf16 %v4504_v7, %v4500_v5  ;;  %v4538_v1 = vld [vmem:[%s13921_s1 + $0x1f8] sm:$0xff]  ;;  %v4531_v5 = vld [vmem:[%s13921_s1 + $0x1c0] sm:$0xff] }
 0x8a7   :  { %v5174_v21 = vmul.f32 -1.442695, %v4056_v12  ;;  %v4128_v22 = vpop.f32.mrb[25].mxu1  ;;  %v4127_v28 = vadd.f32 %v4126_v20, %v3980_v24  ;;  %v4506_v12 = vld [vmem:[%s13921_s1 + $0xf8] sm:$0xff]  ;;  %v4503_v20 = vld [vmem:[%s13921_s1 + $0xe0] sm:$0xff]  ;;  %v4505_v24 = vld [vmem:[%s13921_s1 + $0xf0] sm:$0xff] }
 0x8a8   :  { %v5175_v38 = vmul.f32 -1.442695, %v4058_v17  ;;  %v4129_v23 = vadd.f32 %v4128_v22, %v3984_v44  ;;  %v4499_v17 = vld [vmem:[%s13921_s1 + $0xc0] sm:$0xff]  ;;  %v4512_v44 = vld [vmem:[%s13921_s1 + $0x128] sm:$0xff]  ;;  %v7057_v22 = vpack.c.bf16 %v4497_v29, %v4493_v9 }
 0x8a9   :  { %7432 = vpow2.f32 %v5174_v21  ;;  %v4508_v21 = vld [vmem:[%s13921_s1 + $0x108] sm:$0xff]  ;;  %v4535_v7 = vld [vmem:[%s13921_s1 + $0x1e0] sm:$0xff] }
 0x8aa   :  { %7434 = vpow2.f32 %v5175_v38  ;;  %v5176_v25 = vmul.f32 -1.442695, %v4129_v23  ;;  %v7059_v38 = vpack.c.bf16 %v4506_v12, %v4502_v11  ;;  %v4501_v23 = vld [vmem:[%s13921_s1 + $0xd0] sm:$0xff]  ;;  %v7013_v12 = vpack.c.bf16 %v4535_v7, %v4531_v5  ;;  %v4578_v5 = vld [vmem:[%s13921_s1 + $0x338] sm:$0xff] }
 0x8ab   :  { %v4537_v11 = vld [vmem:[%s13921_s1 + $0x1f0] sm:$0xff] }
 0x8ac   :  { %7436 = vpow2.f32 %v5176_v25  ;;  %v6997_v25 = vpack.c.bf16 %v4503_v20, %v4499_v17  ;;  %v4546_v17 = vld [vmem:[%s13921_s1 + $0x238] sm:$0xff] }
 0x8ad   :  { %7438 = vtanh.f32 %v4127_v28  ;;  %v4510_v28 = vld [vmem:[%s13921_s1 + $0x118] sm:$0xff] }
 0x8b3   :  { %v7433_v30 = vpop.eup %7432 }
 0x8b4   :  { %v7435_v31 = vpop.eup %7434  ;;  %v4134_v47 = vadd.f32 1.0, %v7433_v30  ;;  %v4514_v30 = vld [vmem:[%s13921_s1 + $0x138] sm:$0xff] }
 0x8b5   :  { %v4140_v32 = vadd.f32 1.0, %v7435_v31  ;;  %v6999_v31 = vpack.c.bf16 %v4512_v44, %v4508_v21  ;;  %v4539_v21 = vld [vmem:[%s13921_s1 + $0x200] sm:$0xff] }
 0x8b6   :  { %7440 = vrcp.f32 %v4134_v47  ;;  %v7437_v49 = vpop.eup %7436  ;;  %v4507_v47 = vld [vmem:[%s13921_s1 + $0x100] sm:$0xff] }
 0x8b7   :  { %7442 = vrcp.f32 %v4140_v32  ;;  %v7439_v33 = vpop.eup %7438  ;;  %v4147_v35 = vadd.f32 1.0, %v7437_v49  ;;  %v4511_v32 = vld [vmem:[%s13921_s1 + $0x120] sm:$0xff]  ;;  %v4516_v49 = vld [vmem:[%s13921_s1 + $0x148] sm:$0xff] }
 0x8b8   :  { %v4543_v44 = vld [vmem:[%s13921_s1 + $0x220] sm:$0xff] }
 0x8b9   :  { %7444 = vrcp.f32 %v4147_v35  ;;  %v7063_v35 = vpack.c.bf16 %v4514_v30, %v4510_v28  ;;  %v4545_v28 = vld [vmem:[%s13921_s1 + $0x230] sm:$0xff]  ;;  %v7017_v30 = vpack.c.bf16 %v4543_v44, %v4539_v21  ;;  %v4586_v21 = vld [vmem:[%s13921_s1 + $0x378] sm:$0xff] }
 0x8c0   :  { %v7441_v34 = vpop.eup %7440 }
 0x8c1   :  { %v7443_v36 = vpop.eup %7442  ;;  %v4151_v37 = vmul.f32 %v7441_v34, %v7439_v33  ;;  %v4520_v33 = vld [vmem:[%s13921_s1 + $0x168] sm:$0xff]  ;;  %v7061_v34 = vpack.c.bf16 %v4505_v24, %v4501_v23 }
 0x8c2   :  { %v4150_v39 = vmul.f32 %v7443_v36, %v12318_v60  ;;  %v4488_v60 = vld [vmem:[%s13921_s1 + $0x68] sm:$0xff]  ;;  %v4509_v36 = vld [vmem:[%s13921_s1 + $0x110] sm:$0xff] }
 0x8c3   :  { %v7445_v58 = vpop.eup %7444  ;;  %v6987_v4 = vpack.c.bf16 %v4488_v60, %v4484_v43  ;;  %v4515_v43 = vld [vmem:[%s13921_s1 + $0x140] sm:$0xff] }
 0x8c4   :  { %v13114_v40 = vadd.f32 %v4151_v37, %v4150_v39  ;;  %v4513_v37 = vld [vmem:[%s13921_s1 + $0x130] sm:$0xff]  ;;  %v7001_v39 = vpack.c.bf16 %v4511_v32, %v4507_v47  ;;  %v4519_v60 = vld [vmem:[%s13921_s1 + $0x160] sm:$0xff]  ;;  %v4554_v47 = vld [vmem:[%s13921_s1 + $0x278] sm:$0xff] }
 0x8c6   :  { %7446 = vtanh.f32 %v13114_v40 }
 0x8d0   :  { %v7447_v48 = vpop.eup %7446 }
 0x8d1   :  { %v4154_v3 = vmul.f32 %v7447_v48, %v7445_v58  ;;  %v7003_v58 = vpack.c.bf16 %v4520_v33, %v4516_v49  ;;  %v7065_v48 = vpack.c.bf16 %v4513_v37, %v4509_v36  ;;  %v4547_v49 = vld [vmem:[%s13921_s1 + $0x240] sm:$0xff] }
 0x8d2   :  { %v4551_v33 = vld [vmem:[%s13921_s1 + $0x260] sm:$0xff] }
 0x8d3   :  { %4370 = vmatmul.mubr.f32.vlgmr.msra.gmra.mrb[26].mxu0 %v4154_v3  ;;  %4441 = vmatmul.mubr.f32.vlgmr.msra.gmra.mrb[26].mxu1 %v4154_v3 }
 0x8d4   :  { %6986 = vmatpush1.bf16.msra.mxu0 %v6985_v50  ;;  %4689 = vmatprep.mubr.f32.mxu0 %v4154_v3  ;;  %v7067_v50 = vpack.c.bf16 %v4522_v42, %v4518_v41  ;;  %v4553_v41 = vld [vmem:[%s13921_s1 + $0x270] sm:$0xff]  ;;  %v7021_v42 = vpack.c.bf16 %v4551_v33, %v4547_v49  ;;  %v4594_v49 = vld [vmem:[%s13921_s1 + $0x3b8] sm:$0xff] }
 0x8d5   :  { %4760 = vmatprep.mubr.f32.mxu1 %v4154_v3  ;;  %6988 = vmatprep.subr.bf16.mxu0 %v6987_v4  ;;  %v7005_v3 = vpack.c.bf16 %v4519_v60, %v4515_v43  ;;  %v4526_v4 = vld [vmem:[%s13921_s1 + $0x198] sm:$0xff] }
 0x8d6   :  { %7050 = vmatpush1.bf16.msra.mxu1 %v7049_v57  ;;  %v4532_v57 = vld [vmem:[%s13921_s1 + $0x1c8] sm:$0xff]  ;;  %v7071_v62 = vpack.c.bf16 %v4530_v53, %v4526_v4  ;;  %v4562_v43 = vld [vmem:[%s13921_s1 + $0x2b8] sm:$0xff]  ;;  %v4561_v4 = vld [vmem:[%s13921_s1 + $0x2b0] sm:$0xff]  ;;  %v7025_v53 = vpack.c.bf16 %v4559_v46, %v4555_v45 }
 0x8d7   :  { %7052 = vmatprep.subr.bf16.mxu1 %v7051_v59  ;;  %v4536_v59 = vld [vmem:[%s13921_s1 + $0x1e8] sm:$0xff]  ;;  %v4602_v45 = vld [vmem:[%s13921_s1 + $0x3f8] sm:$0xff] }
 0x8d8   :  { %6990 = vmatpush1.bf16.msra.mxu0 %v6989_v16  ;;  %v4525_v16 = vld [vmem:[%s13921_s1 + $0x190] sm:$0xff]  ;;  %v7011_v2 = vpack.c.bf16 %v4536_v59, %v4532_v57  ;;  %v4563_v57 = vld [vmem:[%s13921_s1 + $0x2c0] sm:$0xff] }
 0x8d9   :  { %6992 = vmatprep.subr.bf16.mxu0 %v6991_v0  ;;  %v4534_v0 = vld [vmem:[%s13921_s1 + $0x1d8] sm:$0xff]  ;;  %v7073_v9 = vpack.c.bf16 %v4529_v63, %v4525_v16  ;;  %v4567_v59 = vld [vmem:[%s13921_s1 + $0x2e0] sm:$0xff] }
 0x8da   :  { %7054 = vmatpush1.bf16.msra.mxu1 %v7053_v8  ;;  %v4540_v8 = vld [vmem:[%s13921_s1 + $0x208] sm:$0xff]  ;;  %v7075_v29 = vpack.c.bf16 %v4538_v1, %v4534_v0  ;;  %v4569_v0 = vld [vmem:[%s13921_s1 + $0x2f0] sm:$0xff]  ;;  %v7029_v1 = vpack.c.bf16 %v4567_v59, %v4563_v57  ;;  %v4794_v59 = vld [vmem:[%s13922_s3 + $0x18] sm:$0xff] }
 0x8db   :  { %7056 = vmatprep.subr.bf16.mxu1 %v7055_v27  ;;  %v4544_v27 = vld [vmem:[%s13921_s1 + $0x228] sm:$0xff] }
 0x8dc   :  { %6994 = vmatpush1.bf16.msra.mxu0 %v6993_v10  ;;  %v4533_v10 = vld [vmem:[%s13921_s1 + $0x1d0] sm:$0xff]  ;;  %v7015_v20 = vpack.c.bf16 %v4544_v27, %v4540_v8  ;;  %v4571_v8 = vld [vmem:[%s13921_s1 + $0x300] sm:$0xff]  ;;  %v4796_v57 = vld [vmem:[%s13922_s3 + $0x28] sm:$0xff] }
 0x8dd   :  { %6996 = vmatprep.subr.bf16.mxu0 %v6995_v14  ;;  %v4542_v14 = vld [vmem:[%s13921_s1 + $0x218] sm:$0xff]  ;;  %v7077_v23 = vpack.c.bf16 %v4537_v11, %v4533_v10  ;;  %v4575_v27 = vld [vmem:[%s13921_s1 + $0x320] sm:$0xff] }
 0x8de   :  { %7058 = vmatpush1.bf16.msra.mxu1 %v7057_v22  ;;  %v4548_v22 = vld [vmem:[%s13921_s1 + $0x248] sm:$0xff]  ;;  %v7079_v24 = vpack.c.bf16 %v4546_v17, %v4542_v14  ;;  %v4577_v14 = vld [vmem:[%s13921_s1 + $0x330] sm:$0xff]  ;;  %v7033_v17 = vpack.c.bf16 %v4575_v27, %v4571_v8  ;;  %v4802_v27 = vld [vmem:[%s13922_s3 + $0x58] sm:$0xff] }
 0x8df   :  { %7060 = vmatprep.subr.bf16.mxu1 %v7059_v38  ;;  %v4552_v38 = vld [vmem:[%s13921_s1 + $0x268] sm:$0xff] }
 0x8e0   :  { %6998 = vmatpush1.bf16.msra.mxu0 %v6997_v25  ;;  %v4541_v25 = vld [vmem:[%s13921_s1 + $0x210] sm:$0xff]  ;;  %v7019_v32 = vpack.c.bf16 %v4552_v38, %v4548_v22  ;;  %v4579_v22 = vld [vmem:[%s13921_s1 + $0x340] sm:$0xff]  ;;  %v4804_v8 = vld [vmem:[%s13922_s3 + $0x68] sm:$0xff] }
 0x8e1   :  { %7000 = vmatprep.subr.bf16.mxu0 %v6999_v31  ;;  %v4550_v31 = vld [vmem:[%s13921_s1 + $0x258] sm:$0xff]  ;;  %v7081_v36 = vpack.c.bf16 %v4545_v28, %v4541_v25  ;;  %v4583_v38 = vld [vmem:[%s13921_s1 + $0x360] sm:$0xff] }
 0x8e2   :  { %7062 = vmatpush1.bf16.msra.mxu1 %v7061_v34  ;;  %v4556_v34 = vld [vmem:[%s13921_s1 + $0x288] sm:$0xff]  ;;  %v7083_v37 = vpack.c.bf16 %v4554_v47, %v4550_v31  ;;  %v4585_v31 = vld [vmem:[%s13921_s1 + $0x370] sm:$0xff]  ;;  %v7037_v47 = vpack.c.bf16 %v4583_v38, %v4579_v22  ;;  %v4810_v38 = vld [vmem:[%s13922_s3 + $0x98] sm:$0xff] }
 0x8e3   :  { %7064 = vmatprep.subr.bf16.mxu1 %v7063_v35  ;;  %v4560_v35 = vld [vmem:[%s13921_s1 + $0x2a8] sm:$0xff] }
 0x8e4   :  { %7002 = vmatpush1.bf16.msra.mxu0 %v7001_v39  ;;  %v4549_v39 = vld [vmem:[%s13921_s1 + $0x250] sm:$0xff]  ;;  %v7023_v60 = vpack.c.bf16 %v4560_v35, %v4556_v34  ;;  %v4587_v34 = vld [vmem:[%s13921_s1 + $0x380] sm:$0xff]  ;;  %v4812_v22 = vld [vmem:[%s13922_s3 + $0xa8] sm:$0xff] }
 0x8e5   :  { %7004 = vmatprep.subr.bf16.mxu0 %v7003_v58  ;;  %v4558_v58 = vld [vmem:[%s13921_s1 + $0x298] sm:$0xff]  ;;  %v7085_v51 = vpack.c.bf16 %v4553_v41, %v4549_v39  ;;  %v4591_v35 = vld [vmem:[%s13921_s1 + $0x3a0] sm:$0xff] }
 0x8e6   :  { %7066 = vmatpush1.bf16.msra.mxu1 %v7065_v48  ;;  %v4564_v48 = vld [vmem:[%s13921_s1 + $0x2c8] sm:$0xff]  ;;  %v7087_v52 = vpack.c.bf16 %v4562_v43, %v4558_v58  ;;  %v4593_v58 = vld [vmem:[%s13921_s1 + $0x3b0] sm:$0xff]  ;;  %v7041_v43 = vpack.c.bf16 %v4591_v35, %v4587_v34 }
 0x8e7   :  { %7068 = vmatprep.subr.bf16.mxu1 %v7067_v50  ;;  %v4568_v50 = vld [vmem:[%s13921_s1 + $0x2e8] sm:$0xff] }
 0x8e8   :  { %7006 = vmatpush1.bf16.msra.mxu0 %v7005_v3  ;;  %v4557_v3 = vld [vmem:[%s13921_s1 + $0x290] sm:$0xff]  ;;  %v7027_v56 = vpack.c.bf16 %v4568_v50, %v4564_v48  ;;  %v4595_v48 = vld [vmem:[%s13921_s1 + $0x3c0] sm:$0xff] }
 0x8e9   :  { %7008 = vmatprep.subr.bf16.mxu0 %v7007_v54  ;;  %v4566_v54 = vld [vmem:[%s13921_s1 + $0x2d8] sm:$0xff]  ;;  %v7089_v16 = vpack.c.bf16 %v4561_v4, %v4557_v3  ;;  %v4599_v50 = vld [vmem:[%s13921_s1 + $0x3e0] sm:$0xff]  ;;  %v4597_v3 = vld [vmem:[%s13921_s1 + $0x3d0] sm:$0xff] }
 0x8ea   :  { %7070 = vmatpush1.bf16.msra.mxu1 %v7069_v61  ;;  %v4572_v61 = vld [vmem:[%s13921_s1 + $0x308] sm:$0xff]  ;;  %v7091_v63 = vpack.c.bf16 %v4570_v55, %v4566_v54  ;;  %v4601_v4 = vld [vmem:[%s13921_s1 + $0x3f0] sm:$0xff]  ;;  %v5181_v55 = vld [vmem:[%s13923_s0 + $0x38] sm:$0xff] }
 0x8eb   :  { %7072 = vmatprep.subr.bf16.mxu1 %v7071_v62  ;;  %v4576_v62 = vld [vmem:[%s13921_s1 + $0x328] sm:$0xff]  ;;  %v7109_v54 = vpack.c.bf16 %v4601_v4, %v4597_v3  ;;  %v4823_v4 = vld [vmem:[%s13922_s3 + $0x100] sm:$0xff] }
 0x8ec   :  { %7010 = vmatpush1.bf16.msra.mxu0 %v7009_v19  ;;  %v4565_v19 = vld [vmem:[%s13921_s1 + $0x2d0] sm:$0xff]  ;;  %v7031_v7 = vpack.c.bf16 %v4576_v62, %v4572_v61  ;;  %v4798_v62 = vld [vmem:[%s13922_s3 + $0x38] sm:$0xff] }
 0x8ed   :  { %7012 = vmatprep.subr.bf16.mxu0 %v7011_v2  ;;  %v4574_v2 = vld [vmem:[%s13921_s1 + $0x318] sm:$0xff]  ;;  %v7093_v10 = vpack.c.bf16 %v4569_v0, %v4565_v19  ;;  %v7175_v19 = vpack.c.bf16 %v4798_v62, %v4794_v59  ;;  %v4832_v59 = vld [vmem:[%s13922_s3 + $0x148] sm:$0xff] }
 0x8ee   :  { %7074 = vmatpush1.bf16.msra.mxu1 %v7073_v9  ;;  %v4580_v9 = vld [vmem:[%s13921_s1 + $0x348] sm:$0xff]  ;;  %v7095_v11 = vpack.c.bf16 %v4578_v5, %v4574_v2  ;;  %v4797_v2 = vld [vmem:[%s13922_s3 + $0x30] sm:$0xff]  ;;  %v4834_v62 = vld [vmem:[%s13922_s3 + $0x158] sm:$0xff] }
 0x8ef   :  { %7076 = vmatprep.subr.bf16.mxu1 %v7075_v29  ;;  %v4584_v29 = vld [vmem:[%s13921_s1 + $0x368] sm:$0xff] }
 0x8f0   :  { %7014 = vmatpush1.bf16.msra.mxu0 %v7013_v12  ;;  %v4573_v12 = vld [vmem:[%s13921_s1 + $0x310] sm:$0xff]  ;;  %v7035_v44 = vpack.c.bf16 %v4584_v29, %v4580_v9  ;;  %v4806_v29 = vld [vmem:[%s13922_s3 + $0x78] sm:$0xff] }
 0x8f1   :  { %7016 = vmatprep.subr.bf16.mxu0 %v7015_v20  ;;  %v4582_v20 = vld [vmem:[%s13921_s1 + $0x358] sm:$0xff]  ;;  %v7097_v25 = vpack.c.bf16 %v4577_v14, %v4573_v12  ;;  %v7179_v12 = vpack.c.bf16 %v4806_v29, %v4802_v27  ;;  %v4840_v27 = vld [vmem:[%s13922_s3 + $0x188] sm:$0xff] }
 0x8f2   :  { %7078 = vmatpush1.bf16.msra.mxu1 %v7077_v23  ;;  %v4588_v23 = vld [vmem:[%s13921_s1 + $0x388] sm:$0xff]  ;;  %v7099_v28 = vpack.c.bf16 %v4586_v21, %v4582_v20  ;;  %v4805_v20 = vld [vmem:[%s13922_s3 + $0x70] sm:$0xff]  ;;  %v4842_v29 = vld [vmem:[%s13922_s3 + $0x198] sm:$0xff] }
 0x8f3   :  { %7080 = vmatprep.subr.bf16.mxu1 %v7079_v24  ;;  %v4592_v24 = vld [vmem:[%s13921_s1 + $0x3a8] sm:$0xff] }
 0x8f4   :  { %7018 = vmatpush1.bf16.msra.mxu0 %v7017_v30  ;;  %v4581_v30 = vld [vmem:[%s13921_s1 + $0x350] sm:$0xff]  ;;  %v7039_v33 = vpack.c.bf16 %v4592_v24, %v4588_v23  ;;  %v4808_v21 = vld [vmem:[%s13922_s3 + $0x88] sm:$0xff]  ;;  %v4814_v23 = vld [vmem:[%s13922_s3 + $0xb8] sm:$0xff] }
 0x8f5   :  { %7020 = vmatprep.subr.bf16.mxu0 %v7019_v32  ;;  %v4590_v32 = vld [vmem:[%s13921_s1 + $0x398] sm:$0xff]  ;;  %v7101_v39 = vpack.c.bf16 %v4585_v31, %v4581_v30  ;;  %v7119_v24 = vpack.c.bf16 %v4812_v22, %v4808_v21  ;;  %v4811_v30 = vld [vmem:[%s13922_s3 + $0xa0] sm:$0xff]  ;;  %v4809_v31 = vld [vmem:[%s13922_s3 + $0x90] sm:$0xff] }
 0x8f6   :  { %7082 = vmatpush1.bf16.msra.mxu1 %v7081_v36  ;;  %v4596_v36 = vld [vmem:[%s13921_s1 + $0x3c8] sm:$0xff]  ;;  %v7103_v41 = vpack.c.bf16 %v4594_v49, %v4590_v32  ;;  %v4813_v32 = vld [vmem:[%s13922_s3 + $0xb0] sm:$0xff] }
 0x8f7   :  { %7084 = vmatprep.subr.bf16.mxu1 %v7083_v37  ;;  %v4600_v37 = vld [vmem:[%s13921_s1 + $0x3e8] sm:$0xff]  ;;  %v7185_v34 = vpack.c.bf16 %v4813_v32, %v4809_v31  ;;  %v4841_v21 = vld [vmem:[%s13922_s3 + $0x190] sm:$0xff]  ;;  %v4851_v31 = vld [vmem:[%s13922_s3 + $0x1e0] sm:$0xff] }
 0x8f8   :  { %7022 = vmatpush1.bf16.msra.mxu0 %v7021_v42  ;;  %v4589_v42 = vld [vmem:[%s13921_s1 + $0x390] sm:$0xff]  ;;  %v7043_v46 = vpack.c.bf16 %v4600_v37, %v4596_v36  ;;  %v4816_v49 = vld [vmem:[%s13922_s3 + $0xc8] sm:$0xff]  ;;  %v4818_v36 = vld [vmem:[%s13922_s3 + $0xd8] sm:$0xff] }
 0x8f9   :  { %7024 = vmatprep.subr.bf16.mxu0 %v7023_v60  ;;  %v4598_v60 = vld [vmem:[%s13921_s1 + $0x3d8] sm:$0xff] }
 0x8fa   :  { %7086 = vmatpush1.bf16.msra.mxu1 %v7085_v51  ;;  %v7105_v51 = vpack.c.bf16 %v4593_v58, %v4589_v42  ;;  %v4822_v37 = vld [vmem:[%s13922_s3 + $0xf8] sm:$0xff]  ;;  %v4819_v42 = vld [vmem:[%s13922_s3 + $0xe0] sm:$0xff]  ;;  %v4817_v58 = vld [vmem:[%s13922_s3 + $0xd0] sm:$0xff] }
 0x8fb   :  { %7088 = vmatprep.subr.bf16.mxu1 %v7087_v52  ;;  %v7107_v52 = vpack.c.bf16 %v4602_v45, %v4598_v60  ;;  %v4824_v45 = vld [vmem:[%s13922_s3 + $0x108] sm:$0xff] }
 0x8fc   :  { %7026 = vmatpush1.bf16.msra.mxu0 %v7025_v53  ;;  %v7045_v53 = vpack.c.bf16 %v4599_v50, %v4595_v48  ;;  %v4826_v48 = vld [vmem:[%s13922_s3 + $0x118] sm:$0xff] }
 0x8fd   :  { %7028 = vmatprep.subr.bf16.mxu0 %v7027_v56  ;;  %v4792_v56 = vld [vmem:[%s13922_s3 + $0x8] sm:$0xff] }
 0x8fe   :  { %7090 = vmatpush1.bf16.msra.mxu1 %v7089_v16  ;;  %v7111_v61 = vpack.c.bf16 %v4796_v57, %v4792_v56  ;;  %v4791_v16 = vld [vmem:[%s13922_s3] sm:$0xff]  ;;  %v4829_v56 = vld [vmem:[%s13922_s3 + $0x130] sm:$0xff] }
 0x8ff   :  { %7092 = vmatprep.subr.bf16.mxu1 %v7091_v63  ;;  %v4795_v63 = vld [vmem:[%s13922_s3 + $0x20] sm:$0xff] }
 0x900   :  { %7030 = vmatpush1.bf16.msra.mxu0 %v7029_v1  ;;  %v7113_v0 = vpack.c.bf16 %v4795_v63, %v4791_v16  ;;  %v4793_v1 = vld [vmem:[%s13922_s3 + $0x10] sm:$0xff]  ;;  %v4838_v63 = vld [vmem:[%s13922_s3 + $0x178] sm:$0xff] }
 0x901   :  { %7032 = vmatprep.subr.bf16.mxu0 %v7031_v7  ;;  %v7177_v5 = vpack.c.bf16 %v4797_v2, %v4793_v1  ;;  %v4800_v7 = vld [vmem:[%s13922_s3 + $0x48] sm:$0xff]  ;;  %v7195_v1 = vpack.c.bf16 %v4838_v63, %v4834_v62  ;;  %v4874_v63 = vld [vmem:[%s13922_s3 + $0x298] sm:$0xff] }
 0x902   :  { %7094 = vmatpush1.bf16.msra.mxu1 %v7093_v10  ;;  %v7115_v9 = vpack.c.bf16 %v4804_v8, %v4800_v7  ;;  %v4799_v10 = vld [vmem:[%s13922_s3 + $0x40] sm:$0xff]  ;;  %v4837_v7 = vld [vmem:[%s13922_s3 + $0x170] sm:$0xff]  ;;  %v4872_v62 = vld [vmem:[%s13922_s3 + $0x288] sm:$0xff] }
 0x903   :  { %7096 = vmatprep.subr.bf16.mxu1 %v7095_v11  ;;  %v4803_v11 = vld [vmem:[%s13922_s3 + $0x60] sm:$0xff] }
 0x904   :  { %7034 = vmatpush1.bf16.msra.mxu0 %v7033_v17  ;;  %v7117_v14 = vpack.c.bf16 %v4803_v11, %v4799_v10  ;;  %v4801_v17 = vld [vmem:[%s13922_s3 + $0x50] sm:$0xff]  ;;  %v4846_v11 = vld [vmem:[%s13922_s3 + $0x1b8] sm:$0xff] }
 0x905   :  { %7036 = vmatprep.subr.bf16.mxu0 %v7035_v44  ;;  %v7181_v44 = vpack.c.bf16 %v4805_v20, %v4801_v17  ;;  %v7199_v17 = vpack.c.bf16 %v4846_v11, %v4842_v29  ;;  %v4880_v29 = vld [vmem:[%s13922_s3 + $0x2c8] sm:$0xff]  ;;  %v4882_v11 = vld [vmem:[%s13922_s3 + $0x2d8] sm:$0xff] }
 0x906   :  { %7098 = vmatpush1.bf16.msra.mxu1 %v7097_v25  ;;  %v7183_v25 = vpack.c.bf16 %v4814_v23, %v4810_v38  ;;  %v4848_v38 = vld [vmem:[%s13922_s3 + $0x1c8] sm:$0xff] }
 0x907   :  { %7100 = vmatprep.subr.bf16.mxu1 %v7099_v28  ;;  %v4807_v28 = vld [vmem:[%s13922_s3 + $0x80] sm:$0xff]  ;;  %v4852_v23 = vld [vmem:[%s13922_s3 + $0x1e8] sm:$0xff] }
 0x908   :  { %7038 = vmatpush1.bf16.msra.mxu0 %v7037_v47  ;;  %v7121_v47 = vpack.c.bf16 %v4811_v30, %v4807_v28  ;;  %v4854_v28 = vld [vmem:[%s13922_s3 + $0x1f8] sm:$0xff]  ;;  %v4847_v30 = vld [vmem:[%s13922_s3 + $0x1c0] sm:$0xff] }
 0x909   :  { %7040 = vmatprep.subr.bf16.mxu0 %v7039_v33  ;;  %v4820_v33 = vld [vmem:[%s13922_s3 + $0xe8] sm:$0xff]  ;;  %v7141_v32 = vpack.c.bf16 %v4851_v31, %v4847_v30  ;;  %v4894_v31 = vld [vmem:[%s13922_s3 + $0x338] sm:$0xff] }
 0x90a   :  { %7102 = vmatpush1.bf16.msra.mxu1 %v7101_v39  ;;  %v7123_v35 = vpack.c.bf16 %v4820_v33, %v4816_v49  ;;  %v4815_v39 = vld [vmem:[%s13922_s3 + $0xc0] sm:$0xff]  ;;  %v4849_v49 = vld [vmem:[%s13922_s3 + $0x1d0] sm:$0xff] }
 0x90b   :  { %7104 = vmatprep.subr.bf16.mxu1 %v7103_v41  ;;  %v7187_v41 = vpack.c.bf16 %v4822_v37, %v4818_v36  ;;  %v7125_v60 = vpack.c.bf16 %v4819_v42, %v4815_v39  ;;  %v4853_v33 = vld [vmem:[%s13922_s3 + $0x1f0] sm:$0xff]  ;;  %v4860_v36 = vld [vmem:[%s13922_s3 + $0x228] sm:$0xff]  ;;  %v4858_v37 = vld [vmem:[%s13922_s3 + $0x218] sm:$0xff] }
 0x90c   :  { %7042 = vmatpush1.bf16.msra.mxu0 %v7041_v43  ;;  %v4821_v43 = vld [vmem:[%s13922_s3 + $0xf0] sm:$0xff]  ;;  %v4855_v42 = vld [vmem:[%s13922_s3 + $0x200] sm:$0xff] }
 0x90d   :  { %7044 = vmatprep.subr.bf16.mxu0 %v7043_v46  ;;  %v4828_v46 = vld [vmem:[%s13922_s3 + $0x128] sm:$0xff]  ;;  %v7189_v50 = vpack.c.bf16 %v4821_v43, %v4817_v58  ;;  %v4859_v58 = vld [vmem:[%s13922_s3 + $0x220] sm:$0xff] }
 0x90e   :  { %7106 = vmatpush1.bf16.msra.mxu1 %v7105_v51  ;;  %v7127_v51 = vpack.c.bf16 %v4828_v46, %v4824_v45  ;;  %v4857_v45 = vld [vmem:[%s13922_s3 + $0x210] sm:$0xff] }
 0x90f   :  { %7108 = vmatprep.subr.bf16.mxu1 %v7107_v52  ;;  %v4830_v52 = vld [vmem:[%s13922_s3 + $0x138] sm:$0xff]  ;;  %v4861_v46 = vld [vmem:[%s13922_s3 + $0x230] sm:$0xff] }
 0x910   :  { %7046 = vmatpush1.bf16.msra.mxu0 %v7045_v53  ;;  %v7191_v3 = vpack.c.bf16 %v4830_v52, %v4826_v48  ;;  %v4827_v53 = vld [vmem:[%s13922_s3 + $0x120] sm:$0xff]  ;;  %v7209_v48 = vpack.c.bf16 %v4861_v46, %v4857_v45  ;;  %v4866_v52 = vld [vmem:[%s13922_s3 + $0x258] sm:$0xff] }
 0x911   :  { %7112 = vmatprep.subr.bf16.mxu0 %v7111_v61  ;;  %v4836_v61 = vld [vmem:[%s13922_s3 + $0x168] sm:$0xff] }
 0x912   :  { %7110 = vmatpush1.bf16.msra.mxu1 %v7109_v54  ;;  %v4825_v54 = vld [vmem:[%s13922_s3 + $0x110] sm:$0xff]  ;;  %v7131_v16 = vpack.c.bf16 %v4836_v61, %v4832_v59 }
 0x913   :  { %4690 = vmatmul.mubr.f32.vlgmr.msra.gmra.mrb[28].mxu0 %v5181_v55  ;;  %7176 = vmatprep.subr.bf16.mxu1 %v7175_v19  ;;  %v7193_v57 = vpack.c.bf16 %v4829_v56, %v4825_v54  ;;  %v4831_v19 = vld [vmem:[%s13922_s3 + $0x140] sm:$0xff]  ;;  %v4869_v59 = vld [vmem:[%s13922_s3 + $0x270] sm:$0xff] }
 0x914   :  { %7114 = vmatpush1.bf16.msra.mxu0 %v7113_v0  ;;  %v4835_v0 = vld [vmem:[%s13922_s3 + $0x160] sm:$0xff] }
 0x915   :  { %4761 = vmatmul.mubr.f32.vlgmr.msra.gmra.mrb[28].mxu1 %v5181_v55  ;;  %7116 = vmatprep.subr.bf16.mxu0 %v7115_v9  ;;  %v7129_v55 = vpack.c.bf16 %v4827_v53, %v4823_v4  ;;  %v7133_v2 = vpack.c.bf16 %v4835_v0, %v4831_v19  ;;  %v4844_v9 = vld [vmem:[%s13922_s3 + $0x1a8] sm:$0xff]  ;;  %v4870_v4 = vld [vmem:[%s13922_s3 + $0x278] sm:$0xff]  ;;  %v4863_v53 = vld [vmem:[%s13922_s3 + $0x240] sm:$0xff] }
 0x916   :  { %7178 = vmatpush1.bf16.msra.mxu1 %v7177_v5  ;;  %v4833_v5 = vld [vmem:[%s13922_s3 + $0x150] sm:$0xff]  ;;  %v7135_v10 = vpack.c.bf16 %v4844_v9, %v4840_v27  ;;  %v4867_v54 = vld [vmem:[%s13922_s3 + $0x260] sm:$0xff]  ;;  %v4878_v0 = vld [vmem:[%s13922_s3 + $0x2b8] sm:$0xff] }
 0x917   :  { %7180 = vmatprep.subr.bf16.mxu1 %v7179_v12  ;;  %v7197_v8 = vpack.c.bf16 %v4837_v7, %v4833_v5  ;;  %v4839_v12 = vld [vmem:[%s13922_s3 + $0x180] sm:$0xff]  ;;  %v7149_v56 = vpack.c.bf16 %v4867_v54, %v4863_v53  ;;  %v7215_v5 = vpack.c.bf16 %v4878_v0, %v4874_v63  ;;  %v4877_v27 = vld [vmem:[%s13922_s3 + $0x2b0] sm:$0xff]  ;;  %v4910_v53 = vld [vmem:[%s13922_s3 + $0x3b8] sm:$0xff] }
 0x918   :  { %7118 = vmatpush1.bf16.msra.mxu0 %v7117_v14  ;;  %v4843_v14 = vld [vmem:[%s13922_s3 + $0x1a0] sm:$0xff]  ;;  %v4916_v63 = vld [vmem:[%s13922_s3 + $0x3e8] sm:$0xff] }
 0x919   :  { %7120 = vmatprep.subr.bf16.mxu0 %v7119_v24  ;;  %v7137_v20 = vpack.c.bf16 %v4843_v14, %v4839_v12  ;;  %v4850_v24 = vld [vmem:[%s13922_s3 + $0x1d8] sm:$0xff] }
 0x91a   :  { %7182 = vmatpush1.bf16.msra.mxu1 %v7181_v44  ;;  %v4845_v44 = vld [vmem:[%s13922_s3 + $0x1b0] sm:$0xff]  ;;  %v4886_v14 = vld [vmem:[%s13922_s3 + $0x2f8] sm:$0xff] }
 0x91b   :  { %7184 = vmatprep.subr.bf16.mxu1 %v7183_v25  ;;  %v7201_v22 = vpack.c.bf16 %v4845_v44, %v4841_v21  ;;  %v7139_v25 = vpack.c.bf16 %v4852_v23, %v4848_v38  ;;  %v7219_v21 = vpack.c.bf16 %v4886_v14, %v4882_v11  ;;  %v4885_v38 = vld [vmem:[%s13922_s3 + $0x2f0] sm:$0xff]  ;;  %v4283_v11 = vld [vmem:[%s13925_s4] sm:$0xf] }
 0x91c   :  { %7122 = vmatpush1.bf16.msra.mxu0 %v7121_v47  ;;  %v7203_v47 = vpack.c.bf16 %v4854_v28, %v4850_v24  ;;  %v4888_v24 = vld [vmem:[%s13922_s3 + $0x308] sm:$0xff]  ;;  %v4890_v28 = vld [vmem:[%s13922_s3 + $0x318] sm:$0xff]  ;;  %v4292_v14 = vrot.slane %v4283_v11, %v8329_v15 }
 0x91d   :  { %7124 = vmatprep.subr.bf16.mxu0 %v7123_v35  ;;  %v4856_v35 = vld [vmem:[%s13922_s3 + $0x208] sm:$0xff] }
 0x91e   :  { %7186 = vmatpush1.bf16.msra.mxu1 %v7185_v34  ;;  %v7205_v34 = vpack.c.bf16 %v4853_v33, %v4849_v49  ;;  %v7143_v39 = vpack.c.bf16 %v4860_v36, %v4856_v35  ;;  %v7223_v49 = vpack.c.bf16 %v4894_v31, %v4890_v28  ;;  %v4893_v35 = vld [vmem:[%s13922_s3 + $0x330] sm:$0xff] }
 0x91f   :  { %7188 = vmatprep.subr.bf16.mxu1 %v7187_v41  ;;  %v4862_v41 = vld [vmem:[%s13922_s3 + $0x238] sm:$0xff] }
 0x920   :  { %7126 = vmatpush1.bf16.msra.mxu0 %v7125_v60  ;;  %v7207_v43 = vpack.c.bf16 %v4862_v41, %v4858_v37  ;;  %v7145_v60 = vpack.c.bf16 %v4859_v58, %v4855_v42  ;;  %v4896_v37 = vld [vmem:[%s13922_s3 + $0x348] sm:$0xff]  ;;  %v4898_v41 = vld [vmem:[%s13922_s3 + $0x358] sm:$0xff] }
 0x921   :  { %7128 = vmatprep.subr.bf16.mxu0 %v7127_v51  ;;  %v4868_v51 = vld [vmem:[%s13922_s3 + $0x268] sm:$0xff]  ;;  %v4902_v58 = vld [vmem:[%s13922_s3 + $0x378] sm:$0xff] }
 0x922   :  { %7190 = vmatpush1.bf16.msra.mxu1 %v7189_v50  ;;  %v4864_v50 = vld [vmem:[%s13922_s3 + $0x248] sm:$0xff]  ;;  %v7227_v45 = vpack.c.bf16 %v4902_v58, %v4898_v41 }
 0x923   :  { %7192 = vmatprep.subr.bf16.mxu1 %v7191_v3  ;;  %v7147_v3 = vpack.c.bf16 %v4868_v51, %v4864_v50  ;;  %v4901_v50 = vld [vmem:[%s13922_s3 + $0x370] sm:$0xff]  ;;  %v4904_v51 = vld [vmem:[%s13922_s3 + $0x388] sm:$0xff] }
 0x924   :  { %7130 = vmatpush1.bf16.msra.mxu0 %v7129_v55  ;;  %v7211_v55 = vpack.c.bf16 %v4870_v4, %v4866_v52  ;;  %v4906_v4 = vld [vmem:[%s13922_s3 + $0x398] sm:$0xff] }
 0x925   :  { %7132 = vmatprep.subr.bf16.mxu0 %v7131_v16  ;;  %v4876_v16 = vld [vmem:[%s13922_s3 + $0x2a8] sm:$0xff] }
 0x926   :  { %7194 = vmatpush1.bf16.msra.mxu1 %v7193_v57  ;;  %v4865_v57 = vld [vmem:[%s13922_s3 + $0x250] sm:$0xff]  ;;  %v7151_v19 = vpack.c.bf16 %v4876_v16, %v4872_v62  ;;  %v4912_v16 = vld [vmem:[%s13922_s3 + $0x3c8] sm:$0xff] }
 0x927   :  { %7196 = vmatprep.subr.bf16.mxu1 %v7195_v1  ;;  %v7213_v61 = vpack.c.bf16 %v4869_v59, %v4865_v57  ;;  %v4871_v1 = vld [vmem:[%s13922_s3 + $0x280] sm:$0xff]  ;;  %v4905_v59 = vld [vmem:[%s13922_s3 + $0x390] sm:$0xff]  ;;  %v7171_v0 = vpack.c.bf16 %v4916_v63, %v4912_v16 }
 0x928   :  { %7134 = vmatpush1.bf16.msra.mxu0 %v7133_v2  ;;  %v4875_v2 = vld [vmem:[%s13922_s3 + $0x2a0] sm:$0xff]  ;;  %v4909_v62 = vld [vmem:[%s13922_s3 + $0x3b0] sm:$0xff] }
 0x929   :  { %7136 = vmatprep.subr.bf16.mxu0 %v7135_v10  ;;  %v7153_v7 = vpack.c.bf16 %v4875_v2, %v4871_v1  ;;  %v4884_v10 = vld [vmem:[%s13922_s3 + $0x2e8] sm:$0xff]  ;;  %v4907_v57 = vld [vmem:[%s13922_s3 + $0x3a0] sm:$0xff]  ;;  %v4914_v1 = vld [vmem:[%s13922_s3 + $0x3d8] sm:$0xff] }
 0x92a   :  { %7198 = vmatpush1.bf16.msra.mxu1 %v7197_v8  ;;  %v4873_v8 = vld [vmem:[%s13922_s3 + $0x290] sm:$0xff]  ;;  %v7155_v12 = vpack.c.bf16 %v4884_v10, %v4880_v29  ;;  %v4918_v2 = vld [vmem:[%s13922_s3 + $0x3f8] sm:$0xff] }
 0x92b   :  { %7200 = vmatprep.subr.bf16.mxu1 %v7199_v17  ;;  %v7217_v9 = vpack.c.bf16 %v4877_v27, %v4873_v8  ;;  %v4879_v17 = vld [vmem:[%s13922_s3 + $0x2c0] sm:$0xff]  ;;  %v4913_v27 = vld [vmem:[%s13922_s3 + $0x3d0] sm:$0xff] }
 0x92c   :  { %7138 = vmatpush1.bf16.msra.mxu0 %v7137_v20  ;;  %v4883_v20 = vld [vmem:[%s13922_s3 + $0x2e0] sm:$0xff] }
 0x92d   :  { %7140 = vmatprep.subr.bf16.mxu0 %v7139_v25  ;;  %v7157_v44 = vpack.c.bf16 %v4883_v20, %v4879_v17  ;;  %v4892_v25 = vld [vmem:[%s13922_s3 + $0x328] sm:$0xff]  ;;  %v4915_v8 = vld [vmem:[%s13922_s3 + $0x3e0] sm:$0xff] }
 0x92e   :  { %7202 = vmatpush1.bf16.msra.mxu1 %v7201_v22  ;;  %v4881_v22 = vld [vmem:[%s13922_s3 + $0x2d0] sm:$0xff]  ;;  %v7159_v30 = vpack.c.bf16 %v4892_v25, %v4888_v24  ;;  %v4300_v25 = vrot.slane %v4283_v11, %v8333_v18 }
 0x92f   :  { %7204 = vmatprep.subr.bf16.mxu1 %v7203_v47  ;;  %v7221_v23 = vpack.c.bf16 %v4885_v38, %v4881_v22  ;;  %v4887_v47 = vld [vmem:[%s13922_s3 + $0x300] sm:$0xff] }
 0x930   :  { %7142 = vmatpush1.bf16.msra.mxu0 %v7141_v32  ;;  %v4891_v32 = vld [vmem:[%s13922_s3 + $0x320] sm:$0xff] }
 0x931   :  { %7144 = vmatprep.subr.bf16.mxu0 %v7143_v39  ;;  %v7161_v33 = vpack.c.bf16 %v4891_v32, %v4887_v47  ;;  %v4900_v39 = vld [vmem:[%s13922_s3 + $0x368] sm:$0xff] }
 0x932   :  { %7206 = vmatpush1.bf16.msra.mxu1 %v7205_v34  ;;  %v4889_v34 = vld [vmem:[%s13922_s3 + $0x310] sm:$0xff]  ;;  %v7163_v42 = vpack.c.bf16 %v4900_v39, %v4896_v37 }
 0x933   :  { %7208 = vmatprep.subr.bf16.mxu1 %v7207_v43  ;;  %v7225_v36 = vpack.c.bf16 %v4893_v35, %v4889_v34  ;;  %v4895_v43 = vld [vmem:[%s13922_s3 + $0x340] sm:$0xff] }
 0x934   :  { %7146 = vmatpush1.bf16.msra.mxu0 %v7145_v60  ;;  %v4899_v60 = vld [vmem:[%s13922_s3 + $0x360] sm:$0xff] }
 0x935   :  { %7148 = vmatprep.subr.bf16.mxu0 %v7147_v3  ;;  %v7165_v46 = vpack.c.bf16 %v4899_v60, %v4895_v43  ;;  %v4908_v3 = vld [vmem:[%s13922_s3 + $0x3a8] sm:$0xff] }
 0x936   :  { %7210 = vmatpush1.bf16.msra.mxu1 %v7209_v48  ;;  %v4897_v48 = vld [vmem:[%s13922_s3 + $0x350] sm:$0xff]  ;;  %v7167_v54 = vpack.c.bf16 %v4908_v3, %v4904_v51 }
 0x937   :  { %7212 = vmatprep.subr.bf16.mxu1 %v7211_v55  ;;  %v7229_v52 = vpack.c.bf16 %v4901_v50, %v4897_v48  ;;  %v7231_v55 = vpack.c.bf16 %v4910_v53, %v4906_v4  ;;  %v4603_v48 = vld [vmem:[%s13924_s2] sm:$0xf] }
 0x938   :  { %7150 = vmatpush1.bf16.msra.mxu0 %v7149_v56  ;;  %v4903_v56 = vld [vmem:[%s13922_s3 + $0x380] sm:$0xff]  ;;  %v4612_v50 = vrot.slane %v4603_v48, %v8329_v15 }
 0x939   :  { %7152 = vmatprep.subr.bf16.mxu0 %v7151_v19  ;;  %v7233_v19 = vpack.c.bf16 %v4909_v62, %v4905_v59 }
 0x93a   :  { %7214 = vmatpush1.bf16.msra.mxu1 %v7213_v61  ;;  %v7169_v61 = vpack.c.bf16 %v4907_v57, %v4903_v56 }
 0x93b   :  { %7216 = vmatprep.subr.bf16.mxu1 %v7215_v5  ;;  %v4911_v5 = vld [vmem:[%s13922_s3 + $0x3c0] sm:$0xff] }
 0x93c   :  { %7154 = vmatpush1.bf16.msra.mxu0 %v7153_v7  ;;  %v7235_v7 = vpack.c.bf16 %v4918_v2, %v4914_v1  ;;  %v7173_v29 = vpack.c.bf16 %v4915_v8, %v4911_v5 }
 0x93d   :  { %7156 = vmatprep.subr.bf16.mxu0 %v7155_v12  ;;  %v4288_v12 = vrot.slane %v4283_v11, %v8324_v13 }
 0x93e   :  { %7218 = vmatpush1.bf16.msra.mxu1 %v7217_v9  ;;  %v4917_v9 = vld [vmem:[%s13922_s3 + $0x3f0] sm:$0xff] }
 0x93f   :  { %7220 = vmatprep.subr.bf16.mxu1 %v7219_v21  ;;  %v7237_v10 = vpack.c.bf16 %v4917_v9, %v4913_v27 }
 0x940   :  { %7158 = vmatpush1.bf16.msra.mxu0 %v7157_v44 }
 0x941   :  { %7160 = vmatprep.subr.bf16.mxu0 %v7159_v30  ;;  %v4296_v30 = vrot.slane %v4283_v11, %v8336_v26 }
 0x942   :  { %7222 = vmatpush1.bf16.msra.mxu1 %v7221_v23 }
 0x943   :  { %7224 = vmatprep.subr.bf16.mxu1 %v7223_v49 }
 0x944   :  { %7162 = vmatpush1.bf16.msra.mxu0 %v7161_v33 }
 0x945   :  { %7164 = vmatprep.subr.bf16.mxu0 %v7163_v42 }
 0x946   :  { %7226 = vmatpush1.bf16.msra.mxu1 %v7225_v36 }
 0x947   :  { %7228 = vmatprep.subr.bf16.mxu1 %v7227_v45 }
 0x948   :  { %7166 = vmatpush1.bf16.msra.mxu0 %v7165_v46 }
 0x949   :  { %7168 = vmatprep.subr.bf16.mxu0 %v7167_v54 }
 0x94a   :  { %7230 = vmatpush1.bf16.msra.mxu1 %v7229_v52 }
 0x94b   :  { %7232 = vmatprep.subr.bf16.mxu1 %v7231_v55  ;;  %v4620_v55 = vrot.slane %v4603_v48, %v8333_v18 }
 0x94c   :  { %7170 = vmatpush1.bf16.msra.mxu0 %v7169_v61  ;;  %v4616_v61 = vrot.slane %v4603_v48, %v8336_v26 }
 0x94d   :  { %7172 = vmatprep.subr.bf16.mxu0 %v7171_v0 }
 0x94e   :  { %7234 = vmatpush1.bf16.msra.mxu1 %v7233_v19 }
 0x94f   :  { %7236 = vmatprep.subr.bf16.mxu1 %v7235_v7 }
 0x950   :  { %7174 = vmatpush1.bf16.msra.mxu0 %v7173_v29 }
 0x952   :  { %7238 = vmatpush1.bf16.msra.mxu1 %v7237_v10 }
 0x9a6   :  { %v4371_v17 = vpop.f32.mrb[26].mxu0  ;;  %v4442_v20 = vpop.f32.mrb[26].mxu1 }
 0x9a7   :  { %v4372_v21 = vadd.f32 %v4371_v17, %v4288_v12  ;;  %v4373_v44 = vpop.f32.mrb[27].mxu0  ;;  %v4444_v22 = vpop.f32.mrb[27].mxu1  ;;  %v4443_v47 = vadd.f32 %v4442_v20, %v4296_v30 }
 0x9a8   :  { %v4374_v38 = vadd.f32 %v4373_v44, %v4292_v14  ;;  %v4445_v28 = vadd.f32 %v4444_v22, %v4300_v25 }
 0x9a9   :  { %v5177_v23 = vmul.f32 -1.442695, %v4372_v21 }
 0x9aa   :  { %v5178_v24 = vmul.f32 -1.442695, %v4374_v38  ;;  %v5179_v31 = vmul.f32 -1.442695, %v4445_v28 }
 0x9ab   :  { %7448 = vpow2.f32 %v5177_v23 }
 0x9ac   :  { %7450 = vpow2.f32 %v5178_v24 }
 0x9ad   :  { %7452 = vpow2.f32 %v5179_v31 }
 0x9ae   :  { %7454 = vtanh.f32 %v4443_v47 }
 0x9b5   :  { %v7449_v32 = vpop.eup %7448 }
 0x9b6   :  { %v7451_v49 = vpop.eup %7450  ;;  %v4450_v33 = vadd.f32 1.0, %v7449_v32 }
 0x9b7   :  { %v4456_v34 = vadd.f32 1.0, %v7451_v49  ;;  %v7453_v35 = vpop.eup %7452 }
 0x9b8   :  { %7456 = vrcp.f32 %v4450_v33  ;;  %v7455_v36 = vpop.eup %7454  ;;  %v4463_v42 = vadd.f32 1.0, %v7453_v35 }
 0x9b9   :  { %7458 = vrcp.f32 %v4456_v34 }
 0x9ba   :  { %7460 = vrcp.f32 %v4463_v42 }
 0x9c2   :  { %v7457_v37 = vpop.eup %7456 }
 0x9c3   :  { %v7459_v39 = vpop.eup %7458  ;;  %v4467_v41 = vmul.f32 %v7457_v37, %v7455_v36 }
 0x9c4   :  { %v4466_v58 = vmul.f32 %v7459_v39, %v13100_v6  ;;  %v7461_v60 = vpop.eup %7460  ;;  %v4608_v6 = vrot.slane %v4603_v48, %v8324_v13 }
 0x9c6   :  { %v13884_v43 = vadd.f32 %v4467_v41, %v4466_v58 }
 0x9c8   :  { %7462 = vtanh.f32 %v13884_v43 }
 0x9d2   :  { %v7463_v45 = vpop.eup %7462 }
 0x9d3   :  { %v4470_v46 = vmul.f32 %v7463_v45, %v7461_v60 }
 0x9d5   :  { %5180 = vst [vmem:[%s13926_s5 + $0x30] sm:$0xff] %v4470_v46  ;;  %5005 = vmatprep.mubr.f32.mxu0 %v4470_v46  ;;  %5076 = vmatprep.mubr.f32.mxu1 %v4470_v46 }
 0x9e6   :  { %v4691_v51 = vpop.f32.mrb[28].mxu0 }
 0x9e7   :  { %v4692_v52 = vadd.f32 %v4691_v51, %v4608_v6  ;;  %v4693_v3 = vpop.f32.mrb[29].mxu0 }
 0x9e8   :  { %v4694_v4 = vadd.f32 %v4693_v3, %v4612_v50  ;;  %v4762_v53 = vpop.f32.mrb[28].mxu1 }
 0x9e9   :  { %v5182_v54 = vmul.f32 -1.442695, %v4692_v52  ;;  %v4764_v56 = vpop.f32.mrb[29].mxu1  ;;  %v4763_v16 = vadd.f32 %v4762_v53, %v4616_v61 }
 0x9ea   :  { %v5183_v57 = vmul.f32 -1.442695, %v4694_v4  ;;  %v4765_v59 = vadd.f32 %v4764_v56, %v4620_v55 }
 0x9eb   :  { %7464 = vpow2.f32 %v5182_v54 }
 0x9ec   :  { %7466 = vpow2.f32 %v5183_v57  ;;  %v5184_v62 = vmul.f32 -1.442695, %v4765_v59 }
 0x9ee   :  { %7468 = vpow2.f32 %v5184_v62 }
 0x9ef   :  { %7470 = vtanh.f32 %v4763_v16 }
 0x9f5   :  { %v7465_v63 = vpop.eup %7464 }
 0x9f6   :  { %v7467_v19 = vpop.eup %7466  ;;  %v4770_v0 = vadd.f32 1.0, %v7465_v63 }
 0x9f7   :  { %v4776_v1 = vadd.f32 1.0, %v7467_v19 }
 0x9f8   :  { %7472 = vrcp.f32 %v4770_v0  ;;  %v7469_v2 = vpop.eup %7468 }
 0x9f9   :  { %7474 = vrcp.f32 %v4776_v1  ;;  %v7471_v5 = vpop.eup %7470  ;;  %v4783_v8 = vadd.f32 1.0, %v7469_v2 }
 0x9fb   :  { %7476 = vrcp.f32 %v4783_v8 }
 0xa02   :  { %v7473_v7 = vpop.eup %7472 }
 0xa03   :  { %v7475_v27 = vpop.eup %7474  ;;  %v4787_v9 = vmul.f32 %v7473_v7, %v7471_v5 }
 0xa04   :  { %v4786_v29 = vmul.f32 %v7475_v27, %v13114_v40  ;;  %v4919_v40 = vld [vmem:[%s13925_s4] sm:$0xf] }
 0xa05   :  { %v7477_v11 = vpop.eup %7476  ;;  %v4924_v17 = vrot.slane %v4919_v40, %v8324_v13  ;;  %v4928_v20 = vrot.slane %v4919_v40, %v8329_v15  ;;  %v4936_v30 = vrot.slane %v4919_v40, %v8333_v18  ;;  %v4932_v47 = vrot.slane %v4919_v40, %v8336_v26 }
 0xa06   :  { %v4788_v10 = vadd.f32 %v4787_v9, %v4786_v29 }
 0xa08   :  { %7478 = vtanh.f32 %v4788_v10  ;;  %5112 = vst [vmem:[%s13927_s7] sm:$0xff] %v4788_v10 }
 0xa12   :  { %v7479_v12 = vpop.eup %7478 }
 0xa13   :  { %v4790_v14 = vmul.f32 %v7479_v12, %v7477_v11 }
 0xa15   :  { %5006 = vmatmul.mubr.f32.vlgmr.msra.gmra.mrb[30].mxu0 %v4790_v14  ;;  %5109 = vst [vmem:[%s13928_s6] sm:$0xff] %v4790_v14  ;;  %5077 = vmatmul.mubr.f32.vlgmr.msra.gmra.mrb[30].mxu1 %v4790_v14 }
 0xae8   :  { %v5007_v21 = vpop.f32.mrb[30].mxu0  ;;  %v5078_v44 = vpop.f32.mrb[30].mxu1 }
 0xae9   :  { %v5008_v22 = vadd.f32 %v5007_v21, %v4924_v17  ;;  %v5009_v38 = vpop.f32.mrb[31].mxu0  ;;  %v5080_v23 = vpop.f32.mrb[31].mxu1  ;;  %v5079_v49 = vadd.f32 %v5078_v44, %v4932_v47 }
 0xaea   :  { %v5010_v24 = vadd.f32 %v5009_v38, %v4928_v20  ;;  %v5081_v31 = vadd.f32 %v5080_v23, %v4936_v30 }
 0xaeb   :  { %v5185_v25 = vmul.f32 -1.442695, %v5008_v22 }
 0xaec   :  { %v5186_v28 = vmul.f32 -1.442695, %v5010_v24  ;;  %v5187_v32 = vmul.f32 -1.442695, %v5081_v31 }
 0xaed   :  { %7480 = vpow2.f32 %v5185_v25 }
 0xaee   :  { %7482 = vpow2.f32 %v5186_v28 }
 0xaef   :  { %7484 = vpow2.f32 %v5187_v32 }
 0xaf0   :  { %7486 = vtanh.f32 %v5079_v49 }
 0xaf7   :  { %v7481_v13 = vpop.eup %7480 }
 0xaf8   :  { %v7483_v33 = vpop.eup %7482  ;;  %v5086_v15 = vadd.f32 1.0, %v7481_v13 }
 0xaf9   :  { %v5092_v34 = vadd.f32 1.0, %v7483_v33  ;;  %v7485_v35 = vpop.eup %7484 }
 0xafa   :  { %7488 = vrcp.f32 %v5086_v15  ;;  %v7487_v36 = vpop.eup %7486  ;;  %v5099_v41 = vadd.f32 1.0, %v7485_v35 }
 0xafb   :  { %7490 = vrcp.f32 %v5092_v34 }
 0xafc   :  { %7492 = vrcp.f32 %v5099_v41 }
 0xb04   :  { %v7489_v37 = vpop.eup %7488 }
 0xb05   :  { %v7491_v39 = vpop.eup %7490  ;;  %v5103_v18 = vmul.f32 %v7489_v37, %v7487_v36 }
 0xb06   :  { %v5102_v42 = vmul.f32 %v7491_v39, %v13884_v43  ;;  %v7493_v26 = vpop.eup %7492 }
 0xb08   :  { %v5104_v58 = vadd.f32 %v5103_v18, %v5102_v42 }
 0xb0a   :  { %7494 = vtanh.f32 %v5104_v58  ;;  %5190 = vst [vmem:[%s13927_s7 + $0x8] sm:$0xff] %v5104_v58 }
 0xb14   :  { %v7495_v60 = vpop.eup %7494 }
 0xb15   :  { %v5106_v45 = vmul.f32 %v7495_v60, %v7493_v26 }
 0xb17   :  { %5188 = vst [vmem:[%s13926_s5 + $0x38] sm:$0xff] %v5106_v45  ;;  %5189 = vst [vmem:[%s13928_s6 + $0x8] sm:$0xff] %v5106_v45 }

</bundles_post_ra>
